<compile_context>
chip_gen: v6e
topology: v6e:2x2x1
jax: 0.10.0
libtpu: 0.0.40
codegen_flags: <defaults>
</compile_context>

<pallas_src>
import functools
import math

import jax
import jax.numpy as jnp
from jax.experimental import pallas as pl
from jax.experimental.pallas import tpu as pltpu

DTYPE = jnp.bfloat16      # transformer.dtype (mixed_precision -> bf16 compute)
INNER = 64                # transformer inner dim
NHEADS = 2
HDIM = INNER // NHEADS
FF = 4 * INNER
TEMB = 64                 # sinusoidal timestep frequency dim
NUM_LAYERS = 2
EPS = 1e-6


# ---------------------------------------------------------------------------
# BlockSpec helpers
# ---------------------------------------------------------------------------
def full_spec(shape):
    n = len(shape)
    return pl.BlockSpec(tuple(shape), lambda i, _n=n: (0,) * _n)


def batch_spec(shape):
    n = len(shape)
    return pl.BlockSpec((1,) + tuple(shape[1:]),
                        lambda b, _n=n: (b,) + (0,) * (_n - 1))


# ---------------------------------------------------------------------------
# Small dense kernel (proj_in fused with positional linear; caption projection)
# ---------------------------------------------------------------------------
def _dense_kernel(x_ref, w_ref, b_ref, o_ref):
    acc = jnp.dot(x_ref[...], w_ref[...], preferred_element_type=jnp.float32)
    acc = acc + b_ref[...].astype(jnp.float32)
    o_ref[...] = acc.astype(o_ref.dtype)


def pallas_dense(x, w, b):
    M, K = x.shape
    N = w.shape[1]
    return pl.pallas_call(
        _dense_kernel,
        out_shape=jax.ShapeDtypeStruct((M, N), x.dtype),
        grid=(1,),
        in_specs=[full_spec((M, K)), full_spec((K, N)), full_spec((1, N))],
        out_specs=full_spec((M, N)),
        compiler_params=pltpu.CompilerParams(dimension_semantics=("arbitrary",)),
    )(x, w, b)


# ---------------------------------------------------------------------------
# Timestep-conditioning kernel: sinusoid -> MLP(SiLU) -> SiLU -> adaLN / final mods
# (one launch for the whole conditioning path)
# ---------------------------------------------------------------------------
def _timestep_kernel(tf_ref, t1w, t1b, t2w, t2b, adaw, adab, finw, finb,
                     ada_ref, fin_ref):
    f32 = jnp.float32
    tf = tf_ref[...]                                                    # bf16 [B, TEMB]
    h = jnp.dot(tf, t1w[...], preferred_element_type=f32) + t1b[...].astype(f32)
    h = (h * jax.nn.sigmoid(h)).astype(DTYPE)                           # SiLU
    emb = jnp.dot(h, t2w[...], preferred_element_type=f32) + t2b[...].astype(f32)
    ts = (emb * jax.nn.sigmoid(emb)).astype(DTYPE)                      # SiLU(emb)
    ada = jnp.dot(ts, adaw[...], preferred_element_type=f32) + adab[...].astype(f32)
    fin = jnp.dot(ts, finw[...], preferred_element_type=f32) + finb[...].astype(f32)
    ada_ref[...] = ada.astype(ada_ref.dtype)
    fin_ref[...] = fin.astype(fin_ref.dtype)


def pallas_timestep(t_freq, p):
    B = t_freq.shape[0]
    return pl.pallas_call(
        _timestep_kernel,
        out_shape=(jax.ShapeDtypeStruct((B, 6 * INNER), DTYPE),
                   jax.ShapeDtypeStruct((B, 2 * INNER), DTYPE)),
        grid=(1,),
        in_specs=[full_spec(t_freq.shape),
                  full_spec(p["t1_w"].shape), full_spec(p["t1_b"].shape),
                  full_spec(p["t2_w"].shape), full_spec(p["t2_b"].shape),
                  full_spec(p["ada_w"].shape), full_spec(p["ada_b"].shape),
                  full_spec(p["fin_w"].shape), full_spec(p["fin_b"].shape)],
        out_specs=(full_spec((B, 6 * INNER)), full_spec((B, 2 * INNER))),
        compiler_params=pltpu.CompilerParams(dimension_semantics=("arbitrary",)),
    )(t_freq, p["t1_w"], p["t1_b"], p["t2_w"], p["t2_b"],
      p["ada_w"], p["ada_b"], p["fin_w"], p["fin_b"])


# ---------------------------------------------------------------------------
# Fused transformer block kernel (one pallas_call per block, grid over batch)
# ---------------------------------------------------------------------------
def _block_kernel(x_ref, ctx_ref, mod_ref, bias_ref, sst_ref,
                  qkv_w, qkv_b, o_w, o_b,
                  cq_w, cq_b, ckv_w, ckv_b, co_w, co_b,
                  ff1_w, ff1_b, ff2_w, ff2_b,
                  o_out_ref, *, scale):
    f32 = jnp.float32
    x = x_ref[0].astype(f32)                                            # [N, D]
    mod = mod_ref[0].astype(f32) + sst_ref[...].astype(f32)             # [6, D]
    shift_msa, scale_msa, gate_msa = mod[0:1], mod[1:2], mod[2:3]
    shift_mlp, scale_mlp, gate_mlp = mod[3:4], mod[4:5], mod[5:6]

    def ln_mod(z, scl, shf):
        mu = jnp.mean(z, axis=-1, keepdims=True)
        zc = z - mu
        var = jnp.mean(zc * zc, axis=-1, keepdims=True)
        return (zc * jax.lax.rsqrt(var + EPS)) * (1.0 + scl) + shf

    def attend(q, k, v, bias=None):
        # bf16 operands on the MXU, f32 accumulation
        s = jax.lax.dot_general(q, k, (((1,), (1,)), ((), ())),
                                preferred_element_type=f32) * scale
        if bias is not None:
            s = s + bias
        m = jnp.max(s, axis=-1, keepdims=True)
        p = jnp.exp(s - m)
        denom = jnp.sum(p, axis=-1, keepdims=True)
        out = jnp.dot(p.astype(q.dtype), v, preferred_element_type=f32)
        return out * pl.reciprocal(denom, approx=True)

    # ------------------ self-attention (adaLN-modulated) -------------------
    h = ln_mod(x, scale_msa, shift_msa).astype(DTYPE)
    qkv = (jnp.dot(h, qkv_w[...], preferred_element_type=f32)
           + qkv_b[...].astype(f32)).astype(DTYPE)                      # [N, 3D]
    heads = []
    for hh in range(NHEADS):
        q = qkv[:, hh * HDIM:(hh + 1) * HDIM]
        k = qkv[:, INNER + hh * HDIM:INNER + (hh + 1) * HDIM]
        v = qkv[:, 2 * INNER + hh * HDIM:2 * INNER + (hh + 1) * HDIM]
        heads.append(attend(q, k, v))
    attn = jnp.concatenate(heads, axis=-1).astype(DTYPE)                # [N, D]
    attn = (jnp.dot(attn, o_w[...], preferred_element_type=f32)
            + o_b[...].astype(f32))
    x = x + gate_msa * attn

    # ------------- cross-attention with encoder_attention_mask --------------
    h2 = ln_mod(x, 0.0, 0.0).astype(DTYPE)                              # plain LayerNorm
    ctx = ctx_ref[0]                                                    # bf16 [S, D]
    q2 = (jnp.dot(h2, cq_w[...], preferred_element_type=f32)
          + cq_b[...].astype(f32)).astype(DTYPE)
    kv2 = (jnp.dot(ctx, ckv_w[...], preferred_element_type=f32)
           + ckv_b[...].astype(f32)).astype(DTYPE)                      # [S, 2D]
    bias = bias_ref[0].astype(f32)                                      # [1, S]
    cheads = []
    for hh in range(NHEADS):
        q = q2[:, hh * HDIM:(hh + 1) * HDIM]
        k = kv2[:, hh * HDIM:(hh + 1) * HDIM]
        v = kv2[:, INNER + hh * HDIM:INNER + (hh + 1) * HDIM]
        cheads.append(attend(q, k, v, bias))
    catt = jnp.concatenate(cheads, axis=-1).astype(DTYPE)
    catt = (jnp.dot(catt, co_w[...], preferred_element_type=f32)
            + co_b[...].astype(f32))
    # TODO(synk): cross-attention residual is ungated; reference gating scheme unknown.
    x = x + catt

    # ------------------------------ feed-forward -----------------------------
    h3 = ln_mod(x, scale_mlp, shift_mlp).astype(DTYPE)
    ff = jnp.dot(h3, ff1_w[...], preferred_element_type=f32) + ff1_b[...].astype(f32)
    ff = jax.nn.gelu(ff, approximate=True).astype(DTYPE)
    ff = (jnp.dot(ff, ff2_w[...], preferred_element_type=f32)
          + ff2_b[...].astype(f32))
    x = x + gate_mlp * ff

    o_out_ref[0] = x.astype(o_out_ref.dtype)


def pallas_block(x, ctx_tok, adaln, bias, p):
    B, N, D = x.shape
    S = ctx_tok.shape[1]
    kern = functools.partial(_block_kernel, scale=1.0 / math.sqrt(HDIM))
    return pl.pallas_call(
        kern,
        out_shape=jax.ShapeDtypeStruct((B, N, D), x.dtype),
        grid=(B,),
        in_specs=[
            batch_spec((B, N, D)),          # x
            batch_spec((B, S, D)),          # projected context tokens
            batch_spec((B, 6, D)),          # adaLN modulation
            batch_spec((B, 1, S)),          # additive mask bias (f32)
            full_spec(p["sst"].shape),
            full_spec(p["qkv_w"].shape), full_spec(p["qkv_b"].shape),
            full_spec(p["o_w"].shape), full_spec(p["o_b"].shape),
            full_spec(p["cq_w"].shape), full_spec(p["cq_b"].shape),
            full_spec(p["ckv_w"].shape), full_spec(p["ckv_b"].shape),
            full_spec(p["co_w"].shape), full_spec(p["co_b"].shape),
            full_spec(p["ff1_w"].shape), full_spec(p["ff1_b"].shape),
            full_spec(p["ff2_w"].shape), full_spec(p["ff2_b"].shape),
        ],
        out_specs=batch_spec((B, N, D)),
        compiler_params=pltpu.CompilerParams(dimension_semantics=("parallel",)),
    )(x, ctx_tok, adaln, bias, p["sst"],
      p["qkv_w"], p["qkv_b"], p["o_w"], p["o_b"],
      p["cq_w"], p["cq_b"], p["ckv_w"], p["ckv_b"], p["co_w"], p["co_b"],
      p["ff1_w"], p["ff1_b"], p["ff2_w"], p["ff2_b"])


# ---------------------------------------------------------------------------
# Final modulated LayerNorm + proj_out (fused, grid over batch)
# ---------------------------------------------------------------------------
def _final_kernel(x_ref, fin_ref, w_ref, b_ref, o_ref):
    f32 = jnp.float32
    x = x_ref[0].astype(f32)                                            # [N, D]
    fin = fin_ref[0].astype(f32)                                        # [2, D]
    shift_f, scale_f = fin[0:1], fin[1:2]
    mu = jnp.mean(x, axis=-1, keepdims=True)
    xc = x - mu
    var = jnp.mean(xc * xc, axis=-1, keepdims=True)
    h = ((xc * jax.lax.rsqrt(var + EPS)) * (1.0 + scale_f) + shift_f).astype(DTYPE)
    out = jnp.dot(h, w_ref[...], preferred_element_type=f32) + b_ref[...].astype(f32)
    o_ref[0] = out.astype(o_ref.dtype)


def pallas_final(x, fin, w, b):
    B, N, D = x.shape
    C = w.shape[1]
    return pl.pallas_call(
        _final_kernel,
        out_shape=jax.ShapeDtypeStruct((B, N, C), x.dtype),
        grid=(B,),
        in_specs=[batch_spec((B, N, D)), batch_spec((B, 2, D)),
                  full_spec((D, C)), full_spec((1, C))],
        out_specs=batch_spec((B, N, C)),
        compiler_params=pltpu.CompilerParams(dimension_semantics=("parallel",)),
    )(x, fin, w, b)


# ---------------------------------------------------------------------------
# Plain-JAX glue
# ---------------------------------------------------------------------------
def sinusoidal_embedding(t, dim):
    half = dim // 2
    freqs = jnp.exp(-math.log(10000.0) * jnp.arange(half, dtype=jnp.float32) / half)
    args = t[:, None] * freqs[None, :]
    return jnp.concatenate([jnp.cos(args), jnp.sin(args)], axis=-1)


def ltxv_forward(params, latent, timesteps, context, indices_grid):
    B, C, F, H, W = latent.shape
    N = F * H * W
    S_ctx, D_ctx = context.shape[1], context.shape[2]

    # latent.to(dtype); patchify (SymmetricPatchifier, patch_size=(1,1,1)):
    #   b c f h w -> b (f h w) c
    tokens = jnp.transpose(latent.astype(DTYPE), (0, 2, 3, 4, 1)).reshape(B, N, C)
    # TODO(synk): original LTX transformer applies fractional RoPE built from
    # indices_grid; approximated with a learned linear positional embedding that
    # is folded into proj_in via feature concatenation.
    pos = jnp.transpose(indices_grid, (0, 2, 1)).astype(DTYPE)          # [B, N, 3]
    x_in = jnp.concatenate([tokens, pos], axis=-1).reshape(B * N, C + 3)

    # context_mask = (context != 0).any(dim=2), computed on the original f32 context
    mask = jnp.any(context != 0, axis=2)                                # [B, S_ctx] bool
    bias = jnp.where(mask, 0.0, -1e9).astype(jnp.float32).reshape(B, 1, S_ctx)

    # proj_in fused with the positional linear
    x = pallas_dense(x_in, params["in_w"], params["in_b"]).reshape(B, N, INNER)

    # timestep embedding -> adaLN-single + final modulation (one fused launch)
    t_freq = sinusoidal_embedding(timesteps.astype(jnp.float32), TEMB).astype(DTYPE)
    adaln, fin = pallas_timestep(t_freq, params)
    adaln = adaln.reshape(B, 6, INNER)
    fin = fin.reshape(B, 2, INNER)

    # caption projection
    ctx_tok = pallas_dense(context.astype(DTYPE).reshape(B * S_ctx, D_ctx),
                           params["cap_w"], params["cap_b"]).reshape(B, S_ctx, INNER)

    for blk in params["blocks"]:
        x = pallas_block(x, ctx_tok, adaln, bias, blk)

    # final modulated norm + proj_out (fused)
    noise = pallas_final(x, fin, params["proj_out_w"], params["proj_out_b"])  # [B, N, C]

    # unpatchify: b (f h w) c -> b c f h w   (out_channels = C // prod(patch) = C)
    return noise.reshape(B, F, H, W, C).transpose(0, 4, 1, 2, 3)


# ---------------------------------------------------------------------------
# Deterministic parameter init
# ---------------------------------------------------------------------------
def init_params(key, in_ch, caption_dim):
    keys = iter(jax.random.split(key, 64))

    def lin(k_in, k_out, scale=None):
        s = scale if scale is not None else 1.0 / math.sqrt(k_in)
        w = (jax.random.normal(next(keys), (k_in, k_out), jnp.float32) * s).astype(DTYPE)
        b = jnp.zeros((1, k_out), DTYPE)
        return w, b

    p = {}
    p["in_w"], p["in_b"] = lin(in_ch + 3, INNER)          # proj_in + positional (fused)
    p["t1_w"], p["t1_b"] = lin(TEMB, INNER)
    p["t2_w"], p["t2_b"] = lin(INNER, INNER)
    p["ada_w"], p["ada_b"] = lin(INNER, 6 * INNER, scale=0.02)
    p["fin_w"], p["fin_b"] = lin(INNER, 2 * INNER, scale=0.02)
    p["cap_w"], p["cap_b"] = lin(caption_dim, INNER)
    p["proj_out_w"], p["proj_out_b"] = lin(INNER, in_ch)

    blocks = []
    for _ in range(NUM_LAYERS):
        blk = {}
        blk["qkv_w"], blk["qkv_b"] = lin(INNER, 3 * INNER)     # fused Q/K/V
        blk["o_w"], blk["o_b"] = lin(INNER, INNER)
        blk["cq_w"], blk["cq_b"] = lin(INNER, INNER)
        blk["ckv_w"], blk["ckv_b"] = lin(INNER, 2 * INNER)     # fused cross K/V
        blk["co_w"], blk["co_b"] = lin(INNER, INNER)
        blk["ff1_w"], blk["ff1_b"] = lin(INNER, FF)
        blk["ff2_w"], blk["ff2_b"] = lin(FF, INNER)
        blk["sst"] = (jax.random.normal(next(keys), (6, INNER), jnp.float32) * 0.02
                      ).astype(DTYPE)
        blocks.append(blk)
    p["blocks"] = blocks
    return p


if __name__ == "__main__":
    B, C, F, H, W = 2, 16, 2, 8, 8
    S_ctx, D_ctx = 8, 32
    N = F * H * W

    key = jax.random.PRNGKey(0)
    k_lat, k_ctx, k_par = jax.random.split(key, 3)

    latent = jax.random.normal(k_lat, (B, C, F, H, W), jnp.float32)
    context = jax.random.normal(k_ctx, (B, S_ctx, D_ctx), jnp.float32)
    timesteps = jnp.array([100.0, 500.0], jnp.float32)

    # indices_grid: fractional (f, h, w) coordinates per token, shape [B, 3, N]
    f_idx, h_idx, w_idx = jnp.meshgrid(jnp.arange(F), jnp.arange(H), jnp.arange(W),
                                       indexing="ij")
    grid = jnp.stack([f_idx / F, h_idx / H, w_idx / W]).reshape(3, N).astype(jnp.float32)
    indices_grid = jnp.broadcast_to(grid[None], (B, 3, N))

    params = init_params(k_par, C, D_ctx)

    out = jax.jit(ltxv_forward)(params, latent, timesteps, context, indices_grid)
    out = jax.block_until_ready(out)

    assert out.shape == (B, C, F, H, W), out.shape
    assert bool(jnp.all(jnp.isfinite(out.astype(jnp.float32))))
    print("KERNEL_OK")
</pallas_src>

<mosaic_0001>
module attributes {stable_mosaic.version = 11 : i64} {
  func.func @_timestep_kernel(%arg0: i32, %arg1: memref<2x64xbf16, #tpu.memory_space<vmem>>, %arg2: memref<64x64xbf16, #tpu.memory_space<vmem>>, %arg3: memref<1x64xbf16, #tpu.memory_space<vmem>>, %arg4: memref<64x64xbf16, #tpu.memory_space<vmem>>, %arg5: memref<1x64xbf16, #tpu.memory_space<vmem>>, %arg6: memref<64x384xbf16, #tpu.memory_space<vmem>>, %arg7: memref<1x384xbf16, #tpu.memory_space<vmem>>, %arg8: memref<64x128xbf16, #tpu.memory_space<vmem>>, %arg9: memref<1x128xbf16, #tpu.memory_space<vmem>>, %arg10: memref<2x384xbf16, #tpu.memory_space<vmem>>, %arg11: memref<2x128xbf16, #tpu.memory_space<vmem>>) attributes {dimension_semantics = [#tpu.dimension_semantics<arbitrary>], iteration_bounds = array<i64: 1>, scalar_prefetch = 0 : i64, scratch_operands = 0 : i64, tpu.core_type = #tpu.core_type<tc>, window_params = [{pipeline_mode = #tpu.pipeline_mode<synchronous>, transform_indices = @transform_0, window_bounds = array<i64: 2, 64>}, {pipeline_mode = #tpu.pipeline_mode<synchronous>, transform_indices = @transform_1, window_bounds = array<i64: 64, 64>}, {pipeline_mode = #tpu.pipeline_mode<synchronous>, transform_indices = @transform_2, window_bounds = array<i64: 1, 64>}, {pipeline_mode = #tpu.pipeline_mode<synchronous>, transform_indices = @transform_3, window_bounds = array<i64: 64, 64>}, {pipeline_mode = #tpu.pipeline_mode<synchronous>, transform_indices = @transform_4, window_bounds = array<i64: 1, 64>}, {pipeline_mode = #tpu.pipeline_mode<synchronous>, transform_indices = @transform_5, window_bounds = array<i64: 64, 384>}, {pipeline_mode = #tpu.pipeline_mode<synchronous>, transform_indices = @transform_6, window_bounds = array<i64: 1, 384>}, {pipeline_mode = #tpu.pipeline_mode<synchronous>, transform_indices = @transform_7, window_bounds = array<i64: 64, 128>}, {pipeline_mode = #tpu.pipeline_mode<synchronous>, transform_indices = @transform_8, window_bounds = array<i64: 1, 128>}, {pipeline_mode = #tpu.pipeline_mode<synchronous>, transform_indices = @transform_9, window_bounds = array<i64: 2, 384>}, {pipeline_mode = #tpu.pipeline_mode<synchronous>, transform_indices = @transform_10, window_bounds = array<i64: 2, 128>}]} {
    %c0 = arith.constant 0 : index
    %c0_0 = arith.constant 0 : index
    %0 = vector.load %arg1[%c0, %c0_0] : memref<2x64xbf16, #tpu.memory_space<vmem>>, vector<2x64xbf16>
    %c0_1 = arith.constant 0 : index
    %c0_2 = arith.constant 0 : index
    %1 = vector.load %arg2[%c0_1, %c0_2] : memref<64x64xbf16, #tpu.memory_space<vmem>>, vector<64x64xbf16>
    %cst = arith.constant dense<0.000000e+00> : vector<2x64xf32>
    %2 = tpu.matmul %0, %1, %cst {dimension_numbers = #tpu.dot_dimension_numbers<[1], [0], [0], [1], [0, 0, 1, 1], [], []>} : vector<2x64xbf16>, vector<64x64xbf16>, vector<2x64xf32> -> vector<2x64xf32>
    %c0_3 = arith.constant 0 : index
    %c0_4 = arith.constant 0 : index
    %3 = vector.load %arg3[%c0_3, %c0_4] : memref<1x64xbf16, #tpu.memory_space<vmem>>, vector<1x64xbf16>
    %4 = arith.extf %3 : vector<1x64xbf16> to vector<1x64xf32>
    %5 = vector.broadcast %4 : vector<1x64xf32> to vector<2x64xf32>
    %6 = arith.addf %2, %5 : vector<2x64xf32>
    %7 = arith.negf %6 : vector<2x64xf32>
    %8 = math.exp %7 : vector<2x64xf32>
    %cst_5 = arith.constant 1.000000e+00 : f32
    %9 = vector.broadcast %cst_5 : f32 to vector<2x64xf32>
    %10 = arith.addf %9, %8 : vector<2x64xf32>
    %11 = arith.divf %9, %10 : vector<2x64xf32>
    %12 = arith.mulf %6, %11 : vector<2x64xf32>
    %13 = arith.truncf %12 : vector<2x64xf32> to vector<2x64xbf16>
    %c0_6 = arith.constant 0 : index
    %c0_7 = arith.constant 0 : index
    %14 = vector.load %arg4[%c0_6, %c0_7] : memref<64x64xbf16, #tpu.memory_space<vmem>>, vector<64x64xbf16>
    %cst_8 = arith.constant dense<0.000000e+00> : vector<2x64xf32>
    %15 = tpu.matmul %13, %14, %cst_8 {dimension_numbers = #tpu.dot_dimension_numbers<[1], [0], [0], [1], [0, 0, 1, 1], [], []>} : vector<2x64xbf16>, vector<64x64xbf16>, vector<2x64xf32> -> vector<2x64xf32>
    %c0_9 = arith.constant 0 : index
    %c0_10 = arith.constant 0 : index
    %16 = vector.load %arg5[%c0_9, %c0_10] : memref<1x64xbf16, #tpu.memory_space<vmem>>, vector<1x64xbf16>
    %17 = arith.extf %16 : vector<1x64xbf16> to vector<1x64xf32>
    %18 = vector.broadcast %17 : vector<1x64xf32> to vector<2x64xf32>
    %19 = arith.addf %15, %18 : vector<2x64xf32>
    %20 = arith.negf %19 : vector<2x64xf32>
    %21 = math.exp %20 : vector<2x64xf32>
    %cst_11 = arith.constant 1.000000e+00 : f32
    %22 = vector.broadcast %cst_11 : f32 to vector<2x64xf32>
    %23 = arith.addf %22, %21 : vector<2x64xf32>
    %24 = arith.divf %22, %23 : vector<2x64xf32>
    %25 = arith.mulf %19, %24 : vector<2x64xf32>
    %26 = arith.truncf %25 : vector<2x64xf32> to vector<2x64xbf16>
    %c0_12 = arith.constant 0 : index
    %c0_13 = arith.constant 0 : index
    %27 = vector.load %arg6[%c0_12, %c0_13] : memref<64x384xbf16, #tpu.memory_space<vmem>>, vector<64x384xbf16>
    %cst_14 = arith.constant dense<0.000000e+00> : vector<2x384xf32>
    %28 = tpu.matmul %26, %27, %cst_14 {dimension_numbers = #tpu.dot_dimension_numbers<[1], [0], [0], [1], [0, 0, 1, 1], [], []>} : vector<2x64xbf16>, vector<64x384xbf16>, vector<2x384xf32> -> vector<2x384xf32>
    %c0_15 = arith.constant 0 : index
    %c0_16 = arith.constant 0 : index
    %29 = vector.load %arg7[%c0_15, %c0_16] : memref<1x384xbf16, #tpu.memory_space<vmem>>, vector<1x384xbf16>
    %30 = arith.extf %29 : vector<1x384xbf16> to vector<1x384xf32>
    %31 = vector.broadcast %30 : vector<1x384xf32> to vector<2x384xf32>
    %32 = arith.addf %28, %31 : vector<2x384xf32>
    %c0_17 = arith.constant 0 : index
    %c0_18 = arith.constant 0 : index
    %33 = vector.load %arg8[%c0_17, %c0_18] : memref<64x128xbf16, #tpu.memory_space<vmem>>, vector<64x128xbf16>
    %cst_19 = arith.constant dense<0.000000e+00> : vector<2x128xf32>
    %34 = tpu.matmul %26, %33, %cst_19 {dimension_numbers = #tpu.dot_dimension_numbers<[1], [0], [0], [1], [0, 0, 1, 1], [], []>} : vector<2x64xbf16>, vector<64x128xbf16>, vector<2x128xf32> -> vector<2x128xf32>
    %c0_20 = arith.constant 0 : index
    %c0_21 = arith.constant 0 : index
    %35 = vector.load %arg9[%c0_20, %c0_21] : memref<1x128xbf16, #tpu.memory_space<vmem>>, vector<1x128xbf16>
    %36 = arith.extf %35 : vector<1x128xbf16> to vector<1x128xf32>
    %37 = vector.broadcast %36 : vector<1x128xf32> to vector<2x128xf32>
    %38 = arith.addf %34, %37 : vector<2x128xf32>
    %39 = arith.truncf %32 : vector<2x384xf32> to vector<2x384xbf16>
    %c0_22 = arith.constant 0 : index
    %c0_23 = arith.constant 0 : index
    %40 = vector.load %arg10[%c0_22, %c0_23] : memref<2x384xbf16, #tpu.memory_space<vmem>>, vector<2x384xbf16>
    tpu.vector_store %arg10[%c0_22, %c0_23], %39 {strides = array<i32>} : memref<2x384xbf16, #tpu.memory_space<vmem>>, vector<2x384xbf16>,
    %41 = arith.truncf %38 : vector<2x128xf32> to vector<2x128xbf16>
    %c0_24 = arith.constant 0 : index
    %c0_25 = arith.constant 0 : index
    %42 = vector.load %arg11[%c0_24, %c0_25] : memref<2x128xbf16, #tpu.memory_space<vmem>>, vector<2x128xbf16>
    tpu.vector_store %arg11[%c0_24, %c0_25], %41 {strides = array<i32>} : memref<2x128xbf16, #tpu.memory_space<vmem>>, vector<2x128xbf16>,
    return
  }
  func.func @transform_0(%arg0: i32) -> (i32, i32) {
    %c0_i32 = arith.constant 0 : i32
    %c0_i32_0 = arith.constant 0 : i32
    %c0_i32_1 = arith.constant 0 : i32
    return %c0_i32, %c0_i32_0 : i32, i32
  }
  func.func @transform_1(%arg0: i32) -> (i32, i32) {
    %c0_i32 = arith.constant 0 : i32
    %c0_i32_0 = arith.constant 0 : i32
    %c0_i32_1 = arith.constant 0 : i32
    return %c0_i32, %c0_i32_0 : i32, i32
  }
  func.func @transform_2(%arg0: i32) -> (i32, i32) {
    %c0_i32 = arith.constant 0 : i32
    %c0_i32_0 = arith.constant 0 : i32
    %c0_i32_1 = arith.constant 0 : i32
    return %c0_i32, %c0_i32_0 : i32, i32
  }
  func.func @transform_3(%arg0: i32) -> (i32, i32) {
    %c0_i32 = arith.constant 0 : i32
    %c0_i32_0 = arith.constant 0 : i32
    %c0_i32_1 = arith.constant 0 : i32
    return %c0_i32, %c0_i32_0 : i32, i32
  }
  func.func @transform_4(%arg0: i32) -> (i32, i32) {
    %c0_i32 = arith.constant 0 : i32
    %c0_i32_0 = arith.constant 0 : i32
    %c0_i32_1 = arith.constant 0 : i32
    return %c0_i32, %c0_i32_0 : i32, i32
  }
  func.func @transform_5(%arg0: i32) -> (i32, i32) {
    %c0_i32 = arith.constant 0 : i32
    %c0_i32_0 = arith.constant 0 : i32
    %c0_i32_1 = arith.constant 0 : i32
    return %c0_i32, %c0_i32_0 : i32, i32
  }
  func.func @transform_6(%arg0: i32) -> (i32, i32) {
    %c0_i32 = arith.constant 0 : i32
    %c0_i32_0 = arith.constant 0 : i32
    %c0_i32_1 = arith.constant 0 : i32
    return %c0_i32, %c0_i32_0 : i32, i32
  }
  func.func @transform_7(%arg0: i32) -> (i32, i32) {
    %c0_i32 = arith.constant 0 : i32
    %c0_i32_0 = arith.constant 0 : i32
    %c0_i32_1 = arith.constant 0 : i32
    return %c0_i32, %c0_i32_0 : i32, i32
  }
  func.func @transform_8(%arg0: i32) -> (i32, i32) {
    %c0_i32 = arith.constant 0 : i32
    %c0_i32_0 = arith.constant 0 : i32
    %c0_i32_1 = arith.constant 0 : i32
    return %c0_i32, %c0_i32_0 : i32, i32
  }
  func.func @transform_9(%arg0: i32) -> (i32, i32) {
    %c0_i32 = arith.constant 0 : i32
    %c0_i32_0 = arith.constant 0 : i32
    %c0_i32_1 = arith.constant 0 : i32
    return %c0_i32, %c0_i32_0 : i32, i32
  }
  func.func @transform_10(%arg0: i32) -> (i32, i32) {
    %c0_i32 = arith.constant 0 : i32
    %c0_i32_0 = arith.constant 0 : i32
    %c0_i32_1 = arith.constant 0 : i32
    return %c0_i32, %c0_i32_0 : i32, i32
  }
}

module attributes {stable_mosaic.version = 11 : i64} {
  func.func @_dense_kernel(%arg0: i32, %arg1: memref<16x32xbf16, #tpu.memory_space<vmem>>, %arg2: memref<32x64xbf16, #tpu.memory_space<vmem>>, %arg3: memref<1x64xbf16, #tpu.memory_space<vmem>>, %arg4: memref<16x64xbf16, #tpu.memory_space<vmem>>) attributes {dimension_semantics = [#tpu.dimension_semantics<arbitrary>], iteration_bounds = array<i64: 1>, scalar_prefetch = 0 : i64, scratch_operands = 0 : i64, tpu.core_type = #tpu.core_type<tc>, window_params = [{pipeline_mode = #tpu.pipeline_mode<synchronous>, transform_indices = @transform_0, window_bounds = array<i64: 16, 32>}, {pipeline_mode = #tpu.pipeline_mode<synchronous>, transform_indices = @transform_1, window_bounds = array<i64: 32, 64>}, {pipeline_mode = #tpu.pipeline_mode<synchronous>, transform_indices = @transform_2, window_bounds = array<i64: 1, 64>}, {pipeline_mode = #tpu.pipeline_mode<synchronous>, transform_indices = @transform_3, window_bounds = array<i64: 16, 64>}]} {
    %c0 = arith.constant 0 : index
    %c0_0 = arith.constant 0 : index
    %0 = vector.load %arg1[%c0, %c0_0] : memref<16x32xbf16, #tpu.memory_space<vmem>>, vector<16x32xbf16>
    %c0_1 = arith.constant 0 : index
    %c0_2 = arith.constant 0 : index
    %1 = vector.load %arg2[%c0_1, %c0_2] : memref<32x64xbf16, #tpu.memory_space<vmem>>, vector<32x64xbf16>
    %cst = arith.constant dense<0.000000e+00> : vector<16x64xf32>
    %2 = tpu.matmul %0, %1, %cst {dimension_numbers = #tpu.dot_dimension_numbers<[1], [0], [0], [1], [0, 0, 1, 1], [], []>} : vector<16x32xbf16>, vector<32x64xbf16>, vector<16x64xf32> -> vector<16x64xf32>
    %c0_3 = arith.constant 0 : index
    %c0_4 = arith.constant 0 : index
    %3 = vector.load %arg3[%c0_3, %c0_4] : memref<1x64xbf16, #tpu.memory_space<vmem>>, vector<1x64xbf16>
    %4 = arith.extf %3 : vector<1x64xbf16> to vector<1x64xf32>
    %5 = vector.broadcast %4 : vector<1x64xf32> to vector<16x64xf32>
    %6 = arith.addf %2, %5 : vector<16x64xf32>
    %7 = arith.truncf %6 : vector<16x64xf32> to vector<16x64xbf16>
    %c0_5 = arith.constant 0 : index
    %c0_6 = arith.constant 0 : index
    %8 = vector.load %arg4[%c0_5, %c0_6] : memref<16x64xbf16, #tpu.memory_space<vmem>>, vector<16x64xbf16>
    tpu.vector_store %arg4[%c0_5, %c0_6], %7 {strides = array<i32>} : memref<16x64xbf16, #tpu.memory_space<vmem>>, vector<16x64xbf16>,
    return
  }
  func.func @transform_0(%arg0: i32) -> (i32, i32) {
    %c0_i32 = arith.constant 0 : i32
    %c0_i32_0 = arith.constant 0 : i32
    %c0_i32_1 = arith.constant 0 : i32
    return %c0_i32, %c0_i32_0 : i32, i32
  }
  func.func @transform_1(%arg0: i32) -> (i32, i32) {
    %c0_i32 = arith.constant 0 : i32
    %c0_i32_0 = arith.constant 0 : i32
    %c0_i32_1 = arith.constant 0 : i32
    return %c0_i32, %c0_i32_0 : i32, i32
  }
  func.func @transform_2(%arg0: i32) -> (i32, i32) {
    %c0_i32 = arith.constant 0 : i32
    %c0_i32_0 = arith.constant 0 : i32
    %c0_i32_1 = arith.constant 0 : i32
    return %c0_i32, %c0_i32_0 : i32, i32
  }
  func.func @transform_3(%arg0: i32) -> (i32, i32) {
    %c0_i32 = arith.constant 0 : i32
    %c0_i32_0 = arith.constant 0 : i32
    %c0_i32_1 = arith.constant 0 : i32
    return %c0_i32, %c0_i32_0 : i32, i32
  }
}

module attributes {stable_mosaic.version = 11 : i64} {
  func.func @_dense_kernel(%arg0: i32, %arg1: memref<256x19xbf16, #tpu.memory_space<vmem>>, %arg2: memref<19x64xbf16, #tpu.memory_space<vmem>>, %arg3: memref<1x64xbf16, #tpu.memory_space<vmem>>, %arg4: memref<256x64xbf16, #tpu.memory_space<vmem>>) attributes {dimension_semantics = [#tpu.dimension_semantics<arbitrary>], iteration_bounds = array<i64: 1>, scalar_prefetch = 0 : i64, scratch_operands = 0 : i64, tpu.core_type = #tpu.core_type<tc>, window_params = [{pipeline_mode = #tpu.pipeline_mode<synchronous>, transform_indices = @transform_0, window_bounds = array<i64: 256, 19>}, {pipeline_mode = #tpu.pipeline_mode<synchronous>, transform_indices = @transform_1, window_bounds = array<i64: 19, 64>}, {pipeline_mode = #tpu.pipeline_mode<synchronous>, transform_indices = @transform_2, window_bounds = array<i64: 1, 64>}, {pipeline_mode = #tpu.pipeline_mode<synchronous>, transform_indices = @transform_3, window_bounds = array<i64: 256, 64>}]} {
    %c0 = arith.constant 0 : index
    %c0_0 = arith.constant 0 : index
    %0 = vector.load %arg1[%c0, %c0_0] : memref<256x19xbf16, #tpu.memory_space<vmem>>, vector<256x19xbf16>
    %c0_1 = arith.constant 0 : index
    %c0_2 = arith.constant 0 : index
    %1 = vector.load %arg2[%c0_1, %c0_2] : memref<19x64xbf16, #tpu.memory_space<vmem>>, vector<19x64xbf16>
    %cst = arith.constant dense<0.000000e+00> : vector<256x64xf32>
    %2 = tpu.matmul %0, %1, %cst {dimension_numbers = #tpu.dot_dimension_numbers<[1], [0], [0], [1], [0, 0, 1, 1], [], []>} : vector<256x19xbf16>, vector<19x64xbf16>, vector<256x64xf32> -> vector<256x64xf32>
    %c0_3 = arith.constant 0 : index
    %c0_4 = arith.constant 0 : index
    %3 = vector.load %arg3[%c0_3, %c0_4] : memref<1x64xbf16, #tpu.memory_space<vmem>>, vector<1x64xbf16>
    %4 = arith.extf %3 : vector<1x64xbf16> to vector<1x64xf32>
    %5 = vector.broadcast %4 : vector<1x64xf32> to vector<256x64xf32>
    %6 = arith.addf %2, %5 : vector<256x64xf32>
    %7 = arith.truncf %6 : vector<256x64xf32> to vector<256x64xbf16>
    %c0_5 = arith.constant 0 : index
    %c0_6 = arith.constant 0 : index
    %8 = vector.load %arg4[%c0_5, %c0_6] : memref<256x64xbf16, #tpu.memory_space<vmem>>, vector<256x64xbf16>
    tpu.vector_store %arg4[%c0_5, %c0_6], %7 {strides = array<i32>} : memref<256x64xbf16, #tpu.memory_space<vmem>>, vector<256x64xbf16>,
    return
  }
  func.func @transform_0(%arg0: i32) -> (i32, i32) {
    %c0_i32 = arith.constant 0 : i32
    %c0_i32_0 = arith.constant 0 : i32
    %c0_i32_1 = arith.constant 0 : i32
    return %c0_i32, %c0_i32_0 : i32, i32
  }
  func.func @transform_1(%arg0: i32) -> (i32, i32) {
    %c0_i32 = arith.constant 0 : i32
    %c0_i32_0 = arith.constant 0 : i32
    %c0_i32_1 = arith.constant 0 : i32
    return %c0_i32, %c0_i32_0 : i32, i32
  }
  func.func @transform_2(%arg0: i32) -> (i32, i32) {
    %c0_i32 = arith.constant 0 : i32
    %c0_i32_0 = arith.constant 0 : i32
    %c0_i32_1 = arith.constant 0 : i32
    return %c0_i32, %c0_i32_0 : i32, i32
  }
  func.func @transform_3(%arg0: i32) -> (i32, i32) {
    %c0_i32 = arith.constant 0 : i32
    %c0_i32_0 = arith.constant 0 : i32
    %c0_i32_1 = arith.constant 0 : i32
    return %c0_i32, %c0_i32_0 : i32, i32
  }
}

module attributes {stable_mosaic.version = 11 : i64} {
  func.func @_final_kernel(%arg0: i32, %arg1: memref<1x128x64xbf16, #tpu.memory_space<vmem>>, %arg2: memref<1x2x64xbf16, #tpu.memory_space<vmem>>, %arg3: memref<64x16xbf16, #tpu.memory_space<vmem>>, %arg4: memref<1x16xbf16, #tpu.memory_space<vmem>>, %arg5: memref<1x128x16xbf16, #tpu.memory_space<vmem>>) attributes {dimension_semantics = [#tpu.dimension_semantics<parallel>], iteration_bounds = array<i64: 2>, scalar_prefetch = 0 : i64, scratch_operands = 0 : i64, tpu.core_type = #tpu.core_type<tc>, window_params = [{transform_indices = @transform_0, window_bounds = array<i64: 1, 128, 64>}, {transform_indices = @transform_1, window_bounds = array<i64: 1, 2, 64>}, {pipeline_mode = #tpu.pipeline_mode<synchronous>, transform_indices = @transform_2, window_bounds = array<i64: 64, 16>}, {pipeline_mode = #tpu.pipeline_mode<synchronous>, transform_indices = @transform_3, window_bounds = array<i64: 1, 16>}, {transform_indices = @transform_4, window_bounds = array<i64: 1, 128, 16>}]} {
    %c0 = arith.constant 0 : index
    %c0_0 = arith.constant 0 : index
    %c0_1 = arith.constant 0 : index
    %0 = vector.load %arg1[%c0, %c0_0, %c0_1] : memref<1x128x64xbf16, #tpu.memory_space<vmem>>, vector<1x128x64xbf16>
    %1 = vector.shape_cast %0 : vector<1x128x64xbf16> to vector<128x64xbf16>
    %2 = arith.extf %1 : vector<128x64xbf16> to vector<128x64xf32>
    %c0_2 = arith.constant 0 : index
    %c0_3 = arith.constant 0 : index
    %c0_4 = arith.constant 0 : index
    %3 = vector.load %arg2[%c0_2, %c0_3, %c0_4] : memref<1x2x64xbf16, #tpu.memory_space<vmem>>, vector<1x2x64xbf16>
    %4 = vector.shape_cast %3 : vector<1x2x64xbf16> to vector<2x64xbf16>
    %5 = arith.extf %4 : vector<2x64xbf16> to vector<2x64xf32>
    %6 = vector.extract_strided_slice %5 {offsets = [0, 0], sizes = [1, 64], strides = [1, 1]} : vector<2x64xf32> to vector<1x64xf32>
    %7 = vector.extract_strided_slice %5 {offsets = [1, 0], sizes = [1, 64], strides = [1, 1]} : vector<2x64xf32> to vector<1x64xf32>
    %cst = arith.constant dense<0.000000e+00> : vector<128xf32>
    %8 = vector.multi_reduction <add>, %2, %cst [1] : vector<128x64xf32> to vector<128xf32>
    %9 = vector.shape_cast %8 : vector<128xf32> to vector<128x1xf32>
    %cst_5 = arith.constant 6.400000e+01 : f32
    %10 = vector.broadcast %cst_5 : f32 to vector<128x1xf32>
    %11 = arith.divf %9, %10 : vector<128x1xf32>
    %12 = vector.broadcast %11 : vector<128x1xf32> to vector<128x64xf32>
    %13 = arith.subf %2, %12 : vector<128x64xf32>
    %14 = arith.mulf %13, %13 : vector<128x64xf32>
    %cst_6 = arith.constant dense<0.000000e+00> : vector<128xf32>
    %15 = vector.multi_reduction <add>, %14, %cst_6 [1] : vector<128x64xf32> to vector<128xf32>
    %16 = vector.shape_cast %15 : vector<128xf32> to vector<128x1xf32>
    %cst_7 = arith.constant 6.400000e+01 : f32
    %17 = vector.broadcast %cst_7 : f32 to vector<128x1xf32>
    %18 = arith.divf %16, %17 : vector<128x1xf32>
    %cst_8 = arith.constant 9.99999997E-7 : f32
    %19 = vector.broadcast %cst_8 : f32 to vector<128x1xf32>
    %20 = arith.addf %18, %19 : vector<128x1xf32>
    %21 = math.rsqrt %20 : vector<128x1xf32>
    %22 = vector.broadcast %21 : vector<128x1xf32> to vector<128x64xf32>
    %23 = arith.mulf %13, %22 : vector<128x64xf32>
    %cst_9 = arith.constant 1.000000e+00 : f32
    %24 = vector.broadcast %cst_9 : f32 to vector<1x64xf32>
    %25 = arith.addf %24, %7 : vector<1x64xf32>
    %26 = vector.broadcast %25 : vector<1x64xf32> to vector<128x64xf32>
    %27 = arith.mulf %23, %26 : vector<128x64xf32>
    %28 = vector.broadcast %6 : vector<1x64xf32> to vector<128x64xf32>
    %29 = arith.addf %27, %28 : vector<128x64xf32>
    %30 = arith.truncf %29 : vector<128x64xf32> to vector<128x64xbf16>
    %c0_10 = arith.constant 0 : index
    %c0_11 = arith.constant 0 : index
    %31 = vector.load %arg3[%c0_10, %c0_11] : memref<64x16xbf16, #tpu.memory_space<vmem>>, vector<64x16xbf16>
    %cst_12 = arith.constant dense<0.000000e+00> : vector<128x16xf32>
    %32 = tpu.matmul %30, %31, %cst_12 {dimension_numbers = #tpu.dot_dimension_numbers<[1], [0], [0], [1], [0, 0, 1, 1], [], []>} : vector<128x64xbf16>, vector<64x16xbf16>, vector<128x16xf32> -> vector<128x16xf32>
    %c0_13 = arith.constant 0 : index
    %c0_14 = arith.constant 0 : index
    %33 = vector.load %arg4[%c0_13, %c0_14] : memref<1x16xbf16, #tpu.memory_space<vmem>>, vector<1x16xbf16>
    %34 = arith.extf %33 : vector<1x16xbf16> to vector<1x16xf32>
    %35 = vector.broadcast %34 : vector<1x16xf32> to vector<128x16xf32>
    %36 = arith.addf %32, %35 : vector<128x16xf32>
    %37 = arith.truncf %36 : vector<128x16xf32> to vector<128x16xbf16>
    %c0_15 = arith.constant 0 : index
    %c0_16 = arith.constant 0 : index
    %c0_17 = arith.constant 0 : index
    %38 = vector.load %arg5[%c0_15, %c0_16, %c0_17] : memref<1x128x16xbf16, #tpu.memory_space<vmem>>, vector<1x128x16xbf16>
    %39 = vector.shape_cast %38 : vector<1x128x16xbf16> to vector<128x16xbf16>
    %40 = vector.shape_cast %37 : vector<128x16xbf16> to vector<1x128x16xbf16>
    tpu.vector_store %arg5[%c0_15, %c0_16, %c0_17], %40 {strides = array<i32>} : memref<1x128x16xbf16, #tpu.memory_space<vmem>>, vector<1x128x16xbf16>,
    return
  }
  func.func @transform_0(%arg0: i32) -> (i32, i32, i32) {
    %c0_i32 = arith.constant 0 : i32
    %c0_i32_0 = arith.constant 0 : i32
    %c0_i32_1 = arith.constant 0 : i32
    return %arg0, %c0_i32, %c0_i32_0 : i32, i32, i32
  }
  func.func @transform_1(%arg0: i32) -> (i32, i32, i32) {
    %c0_i32 = arith.constant 0 : i32
    %c0_i32_0 = arith.constant 0 : i32
    %c0_i32_1 = arith.constant 0 : i32
    return %arg0, %c0_i32, %c0_i32_0 : i32, i32, i32
  }
  func.func @transform_2(%arg0: i32) -> (i32, i32) {
    %c0_i32 = arith.constant 0 : i32
    %c0_i32_0 = arith.constant 0 : i32
    %c0_i32_1 = arith.constant 0 : i32
    return %c0_i32, %c0_i32_0 : i32, i32
  }
  func.func @transform_3(%arg0: i32) -> (i32, i32) {
    %c0_i32 = arith.constant 0 : i32
    %c0_i32_0 = arith.constant 0 : i32
    %c0_i32_1 = arith.constant 0 : i32
    return %c0_i32, %c0_i32_0 : i32, i32
  }
  func.func @transform_4(%arg0: i32) -> (i32, i32, i32) {
    %c0_i32 = arith.constant 0 : i32
    %c0_i32_0 = arith.constant 0 : i32
    %c0_i32_1 = arith.constant 0 : i32
    return %arg0, %c0_i32, %c0_i32_0 : i32, i32, i32
  }
}

module attributes {stable_mosaic.version = 11 : i64} {
  func.func @_block_kernel(%arg0: i32, %arg1: memref<1x128x64xbf16, #tpu.memory_space<vmem>>, %arg2: memref<1x8x64xbf16, #tpu.memory_space<vmem>>, %arg3: memref<1x6x64xbf16, #tpu.memory_space<vmem>>, %arg4: memref<1x1x8xf32, #tpu.memory_space<vmem>>, %arg5: memref<6x64xbf16, #tpu.memory_space<vmem>>, %arg6: memref<64x192xbf16, #tpu.memory_space<vmem>>, %arg7: memref<1x192xbf16, #tpu.memory_space<vmem>>, %arg8: memref<64x64xbf16, #tpu.memory_space<vmem>>, %arg9: memref<1x64xbf16, #tpu.memory_space<vmem>>, %arg10: memref<64x64xbf16, #tpu.memory_space<vmem>>, %arg11: memref<1x64xbf16, #tpu.memory_space<vmem>>, %arg12: memref<64x128xbf16, #tpu.memory_space<vmem>>, %arg13: memref<1x128xbf16, #tpu.memory_space<vmem>>, %arg14: memref<64x64xbf16, #tpu.memory_space<vmem>>, %arg15: memref<1x64xbf16, #tpu.memory_space<vmem>>, %arg16: memref<64x256xbf16, #tpu.memory_space<vmem>>, %arg17: memref<1x256xbf16, #tpu.memory_space<vmem>>, %arg18: memref<256x64xbf16, #tpu.memory_space<vmem>>, %arg19: memref<1x64xbf16, #tpu.memory_space<vmem>>, %arg20: memref<1x128x64xbf16, #tpu.memory_space<vmem>>) attributes {dimension_semantics = [#tpu.dimension_semantics<parallel>], iteration_bounds = array<i64: 2>, scalar_prefetch = 0 : i64, scratch_operands = 0 : i64, tpu.core_type = #tpu.core_type<tc>, window_params = [{transform_indices = @transform_0, window_bounds = array<i64: 1, 128, 64>}, {transform_indices = @transform_1, window_bounds = array<i64: 1, 8, 64>}, {transform_indices = @transform_2, window_bounds = array<i64: 1, 6, 64>}, {transform_indices = @transform_3, window_bounds = array<i64: 1, 1, 8>}, {pipeline_mode = #tpu.pipeline_mode<synchronous>, transform_indices = @transform_4, window_bounds = array<i64: 6, 64>}, {pipeline_mode = #tpu.pipeline_mode<synchronous>, transform_indices = @transform_5, window_bounds = array<i64: 64, 192>}, {pipeline_mode = #tpu.pipeline_mode<synchronous>, transform_indices = @transform_6, window_bounds = array<i64: 1, 192>}, {pipeline_mode = #tpu.pipeline_mode<synchronous>, transform_indices = @transform_7, window_bounds = array<i64: 64, 64>}, {pipeline_mode = #tpu.pipeline_mode<synchronous>, transform_indices = @transform_8, window_bounds = array<i64: 1, 64>}, {pipeline_mode = #tpu.pipeline_mode<synchronous>, transform_indices = @transform_9, window_bounds = array<i64: 64, 64>}, {pipeline_mode = #tpu.pipeline_mode<synchronous>, transform_indices = @transform_10, window_bounds = array<i64: 1, 64>}, {pipeline_mode = #tpu.pipeline_mode<synchronous>, transform_indices = @transform_11, window_bounds = array<i64: 64, 128>}, {pipeline_mode = #tpu.pipeline_mode<synchronous>, transform_indices = @transform_12, window_bounds = array<i64: 1, 128>}, {pipeline_mode = #tpu.pipeline_mode<synchronous>, transform_indices = @transform_13, window_bounds = array<i64: 64, 64>}, {pipeline_mode = #tpu.pipeline_mode<synchronous>, transform_indices = @transform_14, window_bounds = array<i64: 1, 64>}, {pipeline_mode = #tpu.pipeline_mode<synchronous>, transform_indices = @transform_15, window_bounds = array<i64: 64, 256>}, {pipeline_mode = #tpu.pipeline_mode<synchronous>, transform_indices = @transform_16, window_bounds = array<i64: 1, 256>}, {pipeline_mode = #tpu.pipeline_mode<synchronous>, transform_indices = @transform_17, window_bounds = array<i64: 256, 64>}, {pipeline_mode = #tpu.pipeline_mode<synchronous>, transform_indices = @transform_18, window_bounds = array<i64: 1, 64>}, {transform_indices = @transform_19, window_bounds = array<i64: 1, 128, 64>}]} {
    %c0 = arith.constant 0 : index
    %c0_0 = arith.constant 0 : index
    %c0_1 = arith.constant 0 : index
    %0 = vector.load %arg1[%c0, %c0_0, %c0_1] : memref<1x128x64xbf16, #tpu.memory_space<vmem>>, vector<1x128x64xbf16>
    %1 = vector.shape_cast %0 : vector<1x128x64xbf16> to vector<128x64xbf16>
    %2 = arith.extf %1 : vector<128x64xbf16> to vector<128x64xf32>
    %c0_2 = arith.constant 0 : index
    %c0_3 = arith.constant 0 : index
    %c0_4 = arith.constant 0 : index
    %3 = vector.load %arg3[%c0_2, %c0_3, %c0_4] : memref<1x6x64xbf16, #tpu.memory_space<vmem>>, vector<1x6x64xbf16>
    %4 = vector.shape_cast %3 : vector<1x6x64xbf16> to vector<6x64xbf16>
    %5 = arith.extf %4 : vector<6x64xbf16> to vector<6x64xf32>
    %c0_5 = arith.constant 0 : index
    %c0_6 = arith.constant 0 : index
    %6 = vector.load %arg5[%c0_5, %c0_6] : memref<6x64xbf16, #tpu.memory_space<vmem>>, vector<6x64xbf16>
    %7 = arith.extf %6 : vector<6x64xbf16> to vector<6x64xf32>
    %8 = arith.addf %5, %7 : vector<6x64xf32>
    %9 = vector.extract_strided_slice %8 {offsets = [0, 0], sizes = [1, 64], strides = [1, 1]} : vector<6x64xf32> to vector<1x64xf32>
    %10 = vector.extract_strided_slice %8 {offsets = [1, 0], sizes = [1, 64], strides = [1, 1]} : vector<6x64xf32> to vector<1x64xf32>
    %11 = vector.extract_strided_slice %8 {offsets = [2, 0], sizes = [1, 64], strides = [1, 1]} : vector<6x64xf32> to vector<1x64xf32>
    %12 = vector.extract_strided_slice %8 {offsets = [3, 0], sizes = [1, 64], strides = [1, 1]} : vector<6x64xf32> to vector<1x64xf32>
    %13 = vector.extract_strided_slice %8 {offsets = [4, 0], sizes = [1, 64], strides = [1, 1]} : vector<6x64xf32> to vector<1x64xf32>
    %14 = vector.extract_strided_slice %8 {offsets = [5, 0], sizes = [1, 64], strides = [1, 1]} : vector<6x64xf32> to vector<1x64xf32>
    %cst = arith.constant dense<0.000000e+00> : vector<128xf32>
    %15 = vector.multi_reduction <add>, %2, %cst [1] : vector<128x64xf32> to vector<128xf32>
    %16 = vector.shape_cast %15 : vector<128xf32> to vector<128x1xf32>
    %cst_7 = arith.constant 6.400000e+01 : f32
    %17 = vector.broadcast %cst_7 : f32 to vector<128x1xf32>
    %18 = arith.divf %16, %17 : vector<128x1xf32>
    %19 = vector.broadcast %18 : vector<128x1xf32> to vector<128x64xf32>
    %20 = arith.subf %2, %19 : vector<128x64xf32>
    %21 = arith.mulf %20, %20 : vector<128x64xf32>
    %cst_8 = arith.constant dense<0.000000e+00> : vector<128xf32>
    %22 = vector.multi_reduction <add>, %21, %cst_8 [1] : vector<128x64xf32> to vector<128xf32>
    %23 = vector.shape_cast %22 : vector<128xf32> to vector<128x1xf32>
    %cst_9 = arith.constant 6.400000e+01 : f32
    %24 = vector.broadcast %cst_9 : f32 to vector<128x1xf32>
    %25 = arith.divf %23, %24 : vector<128x1xf32>
    %cst_10 = arith.constant 9.99999997E-7 : f32
    %26 = vector.broadcast %cst_10 : f32 to vector<128x1xf32>
    %27 = arith.addf %25, %26 : vector<128x1xf32>
    %28 = math.rsqrt %27 : vector<128x1xf32>
    %29 = vector.broadcast %28 : vector<128x1xf32> to vector<128x64xf32>
    %30 = arith.mulf %20, %29 : vector<128x64xf32>
    %cst_11 = arith.constant 1.000000e+00 : f32
    %31 = vector.broadcast %cst_11 : f32 to vector<1x64xf32>
    %32 = arith.addf %31, %10 : vector<1x64xf32>
    %33 = vector.broadcast %32 : vector<1x64xf32> to vector<128x64xf32>
    %34 = arith.mulf %30, %33 : vector<128x64xf32>
    %35 = vector.broadcast %9 : vector<1x64xf32> to vector<128x64xf32>
    %36 = arith.addf %34, %35 : vector<128x64xf32>
    %37 = arith.truncf %36 : vector<128x64xf32> to vector<128x64xbf16>
    %c0_12 = arith.constant 0 : index
    %c0_13 = arith.constant 0 : index
    %38 = vector.load %arg6[%c0_12, %c0_13] : memref<64x192xbf16, #tpu.memory_space<vmem>>, vector<64x192xbf16>
    %cst_14 = arith.constant dense<0.000000e+00> : vector<128x192xf32>
    %39 = tpu.matmul %37, %38, %cst_14 {dimension_numbers = #tpu.dot_dimension_numbers<[1], [0], [0], [1], [0, 0, 1, 1], [], []>} : vector<128x64xbf16>, vector<64x192xbf16>, vector<128x192xf32> -> vector<128x192xf32>
    %c0_15 = arith.constant 0 : index
    %c0_16 = arith.constant 0 : index
    %40 = vector.load %arg7[%c0_15, %c0_16] : memref<1x192xbf16, #tpu.memory_space<vmem>>, vector<1x192xbf16>
    %41 = arith.extf %40 : vector<1x192xbf16> to vector<1x192xf32>
    %42 = vector.broadcast %41 : vector<1x192xf32> to vector<128x192xf32>
    %43 = arith.addf %39, %42 : vector<128x192xf32>
    %44 = arith.truncf %43 : vector<128x192xf32> to vector<128x192xbf16>
    %45 = vector.extract_strided_slice %44 {offsets = [0, 0], sizes = [128, 32], strides = [1, 1]} : vector<128x192xbf16> to vector<128x32xbf16>
    %46 = vector.extract_strided_slice %44 {offsets = [0, 64], sizes = [128, 32], strides = [1, 1]} : vector<128x192xbf16> to vector<128x32xbf16>
    %47 = vector.extract_strided_slice %44 {offsets = [0, 128], sizes = [128, 32], strides = [1, 1]} : vector<128x192xbf16> to vector<128x32xbf16>
    %cst_17 = arith.constant dense<0.000000e+00> : vector<128x128xf32>
    %48 = tpu.matmul %45, %46, %cst_17 {dimension_numbers = #tpu.dot_dimension_numbers<[1], [1], [0], [0], [0, 0, 1, 0], [], []>} : vector<128x32xbf16>, vector<128x32xbf16>, vector<128x128xf32> -> vector<128x128xf32>
    %cst_18 = arith.constant 0.176776692 : f32
    %49 = vector.broadcast %cst_18 : f32 to vector<128x128xf32>
    %50 = arith.mulf %48, %49 : vector<128x128xf32>
    %cst_19 = arith.constant dense<0xFF800000> : vector<128xf32>
    %51 = vector.multi_reduction <maximumf>, %50, %cst_19 [1] : vector<128x128xf32> to vector<128xf32>
    %52 = vector.shape_cast %51 : vector<128xf32> to vector<128x1xf32>
    %53 = vector.broadcast %52 : vector<128x1xf32> to vector<128x128xf32>
    %54 = arith.subf %50, %53 : vector<128x128xf32>
    %55 = math.exp %54 : vector<128x128xf32>
    %cst_20 = arith.constant dense<0.000000e+00> : vector<128xf32>
    %56 = vector.multi_reduction <add>, %55, %cst_20 [1] : vector<128x128xf32> to vector<128xf32>
    %57 = vector.shape_cast %56 : vector<128xf32> to vector<128x1xf32>
    %58 = arith.truncf %55 : vector<128x128xf32> to vector<128x128xbf16>
    %cst_21 = arith.constant dense<0.000000e+00> : vector<128x32xf32>
    %59 = tpu.matmul %58, %47, %cst_21 {dimension_numbers = #tpu.dot_dimension_numbers<[1], [0], [0], [1], [0, 0, 1, 1], [], []>} : vector<128x128xbf16>, vector<128x32xbf16>, vector<128x32xf32> -> vector<128x32xf32>
    %60 = tpu.reciprocal %57 {approx = true} : vector<128x1xf32> -> vector<128x1xf32>
    %61 = vector.broadcast %60 : vector<128x1xf32> to vector<128x32xf32>
    %62 = arith.mulf %59, %61 : vector<128x32xf32>
    %63 = vector.extract_strided_slice %44 {offsets = [0, 32], sizes = [128, 32], strides = [1, 1]} : vector<128x192xbf16> to vector<128x32xbf16>
    %64 = vector.extract_strided_slice %44 {offsets = [0, 96], sizes = [128, 32], strides = [1, 1]} : vector<128x192xbf16> to vector<128x32xbf16>
    %65 = vector.extract_strided_slice %44 {offsets = [0, 160], sizes = [128, 32], strides = [1, 1]} : vector<128x192xbf16> to vector<128x32xbf16>
    %cst_22 = arith.constant dense<0.000000e+00> : vector<128x128xf32>
    %66 = tpu.matmul %63, %64, %cst_22 {dimension_numbers = #tpu.dot_dimension_numbers<[1], [1], [0], [0], [0, 0, 1, 0], [], []>} : vector<128x32xbf16>, vector<128x32xbf16>, vector<128x128xf32> -> vector<128x128xf32>
    %cst_23 = arith.constant 0.176776692 : f32
    %67 = vector.broadcast %cst_23 : f32 to vector<128x128xf32>
    %68 = arith.mulf %66, %67 : vector<128x128xf32>
    %cst_24 = arith.constant dense<0xFF800000> : vector<128xf32>
    %69 = vector.multi_reduction <maximumf>, %68, %cst_24 [1] : vector<128x128xf32> to vector<128xf32>
    %70 = vector.shape_cast %69 : vector<128xf32> to vector<128x1xf32>
    %71 = vector.broadcast %70 : vector<128x1xf32> to vector<128x128xf32>
    %72 = arith.subf %68, %71 : vector<128x128xf32>
    %73 = math.exp %72 : vector<128x128xf32>
    %cst_25 = arith.constant dense<0.000000e+00> : vector<128xf32>
    %74 = vector.multi_reduction <add>, %73, %cst_25 [1] : vector<128x128xf32> to vector<128xf32>
    %75 = vector.shape_cast %74 : vector<128xf32> to vector<128x1xf32>
    %76 = arith.truncf %73 : vector<128x128xf32> to vector<128x128xbf16>
    %cst_26 = arith.constant dense<0.000000e+00> : vector<128x32xf32>
    %77 = tpu.matmul %76, %65, %cst_26 {dimension_numbers = #tpu.dot_dimension_numbers<[1], [0], [0], [1], [0, 0, 1, 1], [], []>} : vector<128x128xbf16>, vector<128x32xbf16>, vector<128x32xf32> -> vector<128x32xf32>
    %78 = tpu.reciprocal %75 {approx = true} : vector<128x1xf32> -> vector<128x1xf32>
    %79 = vector.broadcast %78 : vector<128x1xf32> to vector<128x32xf32>
    %80 = arith.mulf %77, %79 : vector<128x32xf32>
    %81 = tpu.concatenate %62, %80 in 1 : vector<128x32xf32>, vector<128x32xf32> -> vector<128x64xf32>
    %82 = arith.truncf %81 : vector<128x64xf32> to vector<128x64xbf16>
    %c0_27 = arith.constant 0 : index
    %c0_28 = arith.constant 0 : index
    %83 = vector.load %arg8[%c0_27, %c0_28] : memref<64x64xbf16, #tpu.memory_space<vmem>>, vector<64x64xbf16>
    %cst_29 = arith.constant dense<0.000000e+00> : vector<128x64xf32>
    %84 = tpu.matmul %82, %83, %cst_29 {dimension_numbers = #tpu.dot_dimension_numbers<[1], [0], [0], [1], [0, 0, 1, 1], [], []>} : vector<128x64xbf16>, vector<64x64xbf16>, vector<128x64xf32> -> vector<128x64xf32>
    %c0_30 = arith.constant 0 : index
    %c0_31 = arith.constant 0 : index
    %85 = vector.load %arg9[%c0_30, %c0_31] : memref<1x64xbf16, #tpu.memory_space<vmem>>, vector<1x64xbf16>
    %86 = arith.extf %85 : vector<1x64xbf16> to vector<1x64xf32>
    %87 = vector.broadcast %86 : vector<1x64xf32> to vector<128x64xf32>
    %88 = arith.addf %84, %87 : vector<128x64xf32>
    %89 = vector.broadcast %11 : vector<1x64xf32> to vector<128x64xf32>
    %90 = arith.mulf %89, %88 : vector<128x64xf32>
    %91 = arith.addf %2, %90 : vector<128x64xf32>
    %cst_32 = arith.constant dense<0.000000e+00> : vector<128xf32>
    %92 = vector.multi_reduction <add>, %91, %cst_32 [1] : vector<128x64xf32> to vector<128xf32>
    %93 = vector.shape_cast %92 : vector<128xf32> to vector<128x1xf32>
    %cst_33 = arith.constant 6.400000e+01 : f32
    %94 = vector.broadcast %cst_33 : f32 to vector<128x1xf32>
    %95 = arith.divf %93, %94 : vector<128x1xf32>
    %96 = vector.broadcast %95 : vector<128x1xf32> to vector<128x64xf32>
    %97 = arith.subf %91, %96 : vector<128x64xf32>
    %98 = arith.mulf %97, %97 : vector<128x64xf32>
    %cst_34 = arith.constant dense<0.000000e+00> : vector<128xf32>
    %99 = vector.multi_reduction <add>, %98, %cst_34 [1] : vector<128x64xf32> to vector<128xf32>
    %100 = vector.shape_cast %99 : vector<128xf32> to vector<128x1xf32>
    %cst_35 = arith.constant 6.400000e+01 : f32
    %101 = vector.broadcast %cst_35 : f32 to vector<128x1xf32>
    %102 = arith.divf %100, %101 : vector<128x1xf32>
    %cst_36 = arith.constant 9.99999997E-7 : f32
    %103 = vector.broadcast %cst_36 : f32 to vector<128x1xf32>
    %104 = arith.addf %102, %103 : vector<128x1xf32>
    %105 = math.rsqrt %104 : vector<128x1xf32>
    %106 = vector.broadcast %105 : vector<128x1xf32> to vector<128x64xf32>
    %107 = arith.mulf %97, %106 : vector<128x64xf32>
    %cst_37 = arith.constant 1.000000e+00 : f32
    %108 = vector.broadcast %cst_37 : f32 to vector<128x64xf32>
    %109 = arith.mulf %107, %108 : vector<128x64xf32>
    %cst_38 = arith.constant 0.000000e+00 : f32
    %110 = vector.broadcast %cst_38 : f32 to vector<128x64xf32>
    %111 = arith.addf %109, %110 : vector<128x64xf32>
    %112 = arith.truncf %111 : vector<128x64xf32> to vector<128x64xbf16>
    %c0_39 = arith.constant 0 : index
    %c0_40 = arith.constant 0 : index
    %c0_41 = arith.constant 0 : index
    %113 = vector.load %arg2[%c0_39, %c0_40, %c0_41] : memref<1x8x64xbf16, #tpu.memory_space<vmem>>, vector<1x8x64xbf16>
    %114 = vector.shape_cast %113 : vector<1x8x64xbf16> to vector<8x64xbf16>
    %c0_42 = arith.constant 0 : index
    %c0_43 = arith.constant 0 : index
    %115 = vector.load %arg10[%c0_42, %c0_43] : memref<64x64xbf16, #tpu.memory_space<vmem>>, vector<64x64xbf16>
    %cst_44 = arith.constant dense<0.000000e+00> : vector<128x64xf32>
    %116 = tpu.matmul %112, %115, %cst_44 {dimension_numbers = #tpu.dot_dimension_numbers<[1], [0], [0], [1], [0, 0, 1, 1], [], []>} : vector<128x64xbf16>, vector<64x64xbf16>, vector<128x64xf32> -> vector<128x64xf32>
    %c0_45 = arith.constant 0 : index
    %c0_46 = arith.constant 0 : index
    %117 = vector.load %arg11[%c0_45, %c0_46] : memref<1x64xbf16, #tpu.memory_space<vmem>>, vector<1x64xbf16>
    %118 = arith.extf %117 : vector<1x64xbf16> to vector<1x64xf32>
    %119 = vector.broadcast %118 : vector<1x64xf32> to vector<128x64xf32>
    %120 = arith.addf %116, %119 : vector<128x64xf32>
    %121 = arith.truncf %120 : vector<128x64xf32> to vector<128x64xbf16>
    %c0_47 = arith.constant 0 : index
    %c0_48 = arith.constant 0 : index
    %122 = vector.load %arg12[%c0_47, %c0_48] : memref<64x128xbf16, #tpu.memory_space<vmem>>, vector<64x128xbf16>
    %cst_49 = arith.constant dense<0.000000e+00> : vector<8x128xf32>
    %123 = tpu.matmul %114, %122, %cst_49 {dimension_numbers = #tpu.dot_dimension_numbers<[1], [0], [0], [1], [0, 0, 1, 1], [], []>} : vector<8x64xbf16>, vector<64x128xbf16>, vector<8x128xf32> -> vector<8x128xf32>
    %c0_50 = arith.constant 0 : index
    %c0_51 = arith.constant 0 : index
    %124 = vector.load %arg13[%c0_50, %c0_51] : memref<1x128xbf16, #tpu.memory_space<vmem>>, vector<1x128xbf16>
    %125 = arith.extf %124 : vector<1x128xbf16> to vector<1x128xf32>
    %126 = vector.broadcast %125 : vector<1x128xf32> to vector<8x128xf32>
    %127 = arith.addf %123, %126 : vector<8x128xf32>
    %128 = arith.truncf %127 : vector<8x128xf32> to vector<8x128xbf16>
    %c0_52 = arith.constant 0 : index
    %c0_53 = arith.constant 0 : index
    %c0_54 = arith.constant 0 : index
    %129 = vector.load %arg4[%c0_52, %c0_53, %c0_54] : memref<1x1x8xf32, #tpu.memory_space<vmem>>, vector<1x1x8xf32>
    %130 = vector.shape_cast %129 : vector<1x1x8xf32> to vector<1x8xf32>
    %131 = vector.extract_strided_slice %121 {offsets = [0, 0], sizes = [128, 32], strides = [1, 1]} : vector<128x64xbf16> to vector<128x32xbf16>
    %132 = vector.extract_strided_slice %128 {offsets = [0, 0], sizes = [8, 32], strides = [1, 1]} : vector<8x128xbf16> to vector<8x32xbf16>
    %133 = vector.extract_strided_slice %128 {offsets = [0, 64], sizes = [8, 32], strides = [1, 1]} : vector<8x128xbf16> to vector<8x32xbf16>
    %cst_55 = arith.constant dense<0.000000e+00> : vector<128x8xf32>
    %134 = tpu.matmul %131, %132, %cst_55 {dimension_numbers = #tpu.dot_dimension_numbers<[1], [1], [0], [0], [0, 0, 1, 0], [], []>} : vector<128x32xbf16>, vector<8x32xbf16>, vector<128x8xf32> -> vector<128x8xf32>
    %cst_56 = arith.constant 0.176776692 : f32
    %135 = vector.broadcast %cst_56 : f32 to vector<128x8xf32>
    %136 = arith.mulf %134, %135 : vector<128x8xf32>
    %137 = vector.broadcast %130 : vector<1x8xf32> to vector<128x8xf32>
    %138 = arith.addf %136, %137 : vector<128x8xf32>
    %cst_57 = arith.constant dense<0xFF800000> : vector<128xf32>
    %139 = vector.multi_reduction <maximumf>, %138, %cst_57 [1] : vector<128x8xf32> to vector<128xf32>
    %140 = vector.shape_cast %139 : vector<128xf32> to vector<128x1xf32>
    %141 = vector.broadcast %140 : vector<128x1xf32> to vector<128x8xf32>
    %142 = arith.subf %138, %141 : vector<128x8xf32>
    %143 = math.exp %142 : vector<128x8xf32>
    %cst_58 = arith.constant dense<0.000000e+00> : vector<128xf32>
    %144 = vector.multi_reduction <add>, %143, %cst_58 [1] : vector<128x8xf32> to vector<128xf32>
    %145 = vector.shape_cast %144 : vector<128xf32> to vector<128x1xf32>
    %146 = arith.truncf %143 : vector<128x8xf32> to vector<128x8xbf16>
    %cst_59 = arith.constant dense<0.000000e+00> : vector<128x32xf32>
    %147 = tpu.matmul %146, %133, %cst_59 {dimension_numbers = #tpu.dot_dimension_numbers<[1], [0], [0], [1], [0, 0, 1, 1], [], []>} : vector<128x8xbf16>, vector<8x32xbf16>, vector<128x32xf32> -> vector<128x32xf32>
    %148 = tpu.reciprocal %145 {approx = true} : vector<128x1xf32> -> vector<128x1xf32>
    %149 = vector.broadcast %148 : vector<128x1xf32> to vector<128x32xf32>
    %150 = arith.mulf %147, %149 : vector<128x32xf32>
    %151 = vector.extract_strided_slice %121 {offsets = [0, 32], sizes = [128, 32], strides = [1, 1]} : vector<128x64xbf16> to vector<128x32xbf16>
    %152 = vector.extract_strided_slice %128 {offsets = [0, 32], sizes = [8, 32], strides = [1, 1]} : vector<8x128xbf16> to vector<8x32xbf16>
    %153 = vector.extract_strided_slice %128 {offsets = [0, 96], sizes = [8, 32], strides = [1, 1]} : vector<8x128xbf16> to vector<8x32xbf16>
    %cst_60 = arith.constant dense<0.000000e+00> : vector<128x8xf32>
    %154 = tpu.matmul %151, %152, %cst_60 {dimension_numbers = #tpu.dot_dimension_numbers<[1], [1], [0], [0], [0, 0, 1, 0], [], []>} : vector<128x32xbf16>, vector<8x32xbf16>, vector<128x8xf32> -> vector<128x8xf32>
    %cst_61 = arith.constant 0.176776692 : f32
    %155 = vector.broadcast %cst_61 : f32 to vector<128x8xf32>
    %156 = arith.mulf %154, %155 : vector<128x8xf32>
    %157 = vector.broadcast %130 : vector<1x8xf32> to vector<128x8xf32>
    %158 = arith.addf %156, %157 : vector<128x8xf32>
    %cst_62 = arith.constant dense<0xFF800000> : vector<128xf32>
    %159 = vector.multi_reduction <maximumf>, %158, %cst_62 [1] : vector<128x8xf32> to vector<128xf32>
    %160 = vector.shape_cast %159 : vector<128xf32> to vector<128x1xf32>
    %161 = vector.broadcast %160 : vector<128x1xf32> to vector<128x8xf32>
    %162 = arith.subf %158, %161 : vector<128x8xf32>
    %163 = math.exp %162 : vector<128x8xf32>
    %cst_63 = arith.constant dense<0.000000e+00> : vector<128xf32>
    %164 = vector.multi_reduction <add>, %163, %cst_63 [1] : vector<128x8xf32> to vector<128xf32>
    %165 = vector.shape_cast %164 : vector<128xf32> to vector<128x1xf32>
    %166 = arith.truncf %163 : vector<128x8xf32> to vector<128x8xbf16>
    %cst_64 = arith.constant dense<0.000000e+00> : vector<128x32xf32>
    %167 = tpu.matmul %166, %153, %cst_64 {dimension_numbers = #tpu.dot_dimension_numbers<[1], [0], [0], [1], [0, 0, 1, 1], [], []>} : vector<128x8xbf16>, vector<8x32xbf16>, vector<128x32xf32> -> vector<128x32xf32>
    %168 = tpu.reciprocal %165 {approx = true} : vector<128x1xf32> -> vector<128x1xf32>
    %169 = vector.broadcast %168 : vector<128x1xf32> to vector<128x32xf32>
    %170 = arith.mulf %167, %169 : vector<128x32xf32>
    %171 = tpu.concatenate %150, %170 in 1 : vector<128x32xf32>, vector<128x32xf32> -> vector<128x64xf32>
    %172 = arith.truncf %171 : vector<128x64xf32> to vector<128x64xbf16>
    %c0_65 = arith.constant 0 : index
    %c0_66 = arith.constant 0 : index
    %173 = vector.load %arg14[%c0_65, %c0_66] : memref<64x64xbf16, #tpu.memory_space<vmem>>, vector<64x64xbf16>
    %cst_67 = arith.constant dense<0.000000e+00> : vector<128x64xf32>
    %174 = tpu.matmul %172, %173, %cst_67 {dimension_numbers = #tpu.dot_dimension_numbers<[1], [0], [0], [1], [0, 0, 1, 1], [], []>} : vector<128x64xbf16>, vector<64x64xbf16>, vector<128x64xf32> -> vector<128x64xf32>
    %c0_68 = arith.constant 0 : index
    %c0_69 = arith.constant 0 : index
    %175 = vector.load %arg15[%c0_68, %c0_69] : memref<1x64xbf16, #tpu.memory_space<vmem>>, vector<1x64xbf16>
    %176 = arith.extf %175 : vector<1x64xbf16> to vector<1x64xf32>
    %177 = vector.broadcast %176 : vector<1x64xf32> to vector<128x64xf32>
    %178 = arith.addf %174, %177 : vector<128x64xf32>
    %179 = arith.addf %91, %178 : vector<128x64xf32>
    %cst_70 = arith.constant dense<0.000000e+00> : vector<128xf32>
    %180 = vector.multi_reduction <add>, %179, %cst_70 [1] : vector<128x64xf32> to vector<128xf32>
    %181 = vector.shape_cast %180 : vector<128xf32> to vector<128x1xf32>
    %cst_71 = arith.constant 6.400000e+01 : f32
    %182 = vector.broadcast %cst_71 : f32 to vector<128x1xf32>
    %183 = arith.divf %181, %182 : vector<128x1xf32>
    %184 = vector.broadcast %183 : vector<128x1xf32> to vector<128x64xf32>
    %185 = arith.subf %179, %184 : vector<128x64xf32>
    %186 = arith.mulf %185, %185 : vector<128x64xf32>
    %cst_72 = arith.constant dense<0.000000e+00> : vector<128xf32>
    %187 = vector.multi_reduction <add>, %186, %cst_72 [1] : vector<128x64xf32> to vector<128xf32>
    %188 = vector.shape_cast %187 : vector<128xf32> to vector<128x1xf32>
    %cst_73 = arith.constant 6.400000e+01 : f32
    %189 = vector.broadcast %cst_73 : f32 to vector<128x1xf32>
    %190 = arith.divf %188, %189 : vector<128x1xf32>
    %cst_74 = arith.constant 9.99999997E-7 : f32
    %191 = vector.broadcast %cst_74 : f32 to vector<128x1xf32>
    %192 = arith.addf %190, %191 : vector<128x1xf32>
    %193 = math.rsqrt %192 : vector<128x1xf32>
    %194 = vector.broadcast %193 : vector<128x1xf32> to vector<128x64xf32>
    %195 = arith.mulf %185, %194 : vector<128x64xf32>
    %cst_75 = arith.constant 1.000000e+00 : f32
    %196 = vector.broadcast %cst_75 : f32 to vector<1x64xf32>
    %197 = arith.addf %196, %13 : vector<1x64xf32>
    %198 = vector.broadcast %197 : vector<1x64xf32> to vector<128x64xf32>
    %199 = arith.mulf %195, %198 : vector<128x64xf32>
    %200 = vector.broadcast %12 : vector<1x64xf32> to vector<128x64xf32>
    %201 = arith.addf %199, %200 : vector<128x64xf32>
    %202 = arith.truncf %201 : vector<128x64xf32> to vector<128x64xbf16>
    %c0_76 = arith.constant 0 : index
    %c0_77 = arith.constant 0 : index
    %203 = vector.load %arg16[%c0_76, %c0_77] : memref<64x256xbf16, #tpu.memory_space<vmem>>, vector<64x256xbf16>
    %cst_78 = arith.constant dense<0.000000e+00> : vector<128x256xf32>
    %204 = tpu.matmul %202, %203, %cst_78 {dimension_numbers = #tpu.dot_dimension_numbers<[1], [0], [0], [1], [0, 0, 1, 1], [], []>} : vector<128x64xbf16>, vector<64x256xbf16>, vector<128x256xf32> -> vector<128x256xf32>
    %c0_79 = arith.constant 0 : index
    %c0_80 = arith.constant 0 : index
    %205 = vector.load %arg17[%c0_79, %c0_80] : memref<1x256xbf16, #tpu.memory_space<vmem>>, vector<1x256xbf16>
    %206 = arith.extf %205 : vector<1x256xbf16> to vector<1x256xf32>
    %207 = vector.broadcast %206 : vector<1x256xf32> to vector<128x256xf32>
    %208 = arith.addf %204, %207 : vector<128x256xf32>
    %209 = arith.mulf %208, %208 : vector<128x256xf32>
    %210 = arith.mulf %208, %209 : vector<128x256xf32>
    %cst_81 = arith.constant 4.471500e-02 : f32
    %211 = vector.broadcast %cst_81 : f32 to vector<128x256xf32>
    %212 = arith.mulf %211, %210 : vector<128x256xf32>
    %213 = arith.addf %208, %212 : vector<128x256xf32>
    %cst_82 = arith.constant 0.797884583 : f32
    %214 = vector.broadcast %cst_82 : f32 to vector<128x256xf32>
    %215 = arith.mulf %214, %213 : vector<128x256xf32>
    %216 = math.tanh %215 : vector<128x256xf32>
    %cst_83 = arith.constant 1.000000e+00 : f32
    %217 = vector.broadcast %cst_83 : f32 to vector<128x256xf32>
    %218 = arith.addf %217, %216 : vector<128x256xf32>
    %cst_84 = arith.constant 5.000000e-01 : f32
    %219 = vector.broadcast %cst_84 : f32 to vector<128x256xf32>
    %220 = arith.mulf %219, %218 : vector<128x256xf32>
    %221 = arith.mulf %208, %220 : vector<128x256xf32>
    %222 = arith.truncf %221 : vector<128x256xf32> to vector<128x256xbf16>
    %c0_85 = arith.constant 0 : index
    %c0_86 = arith.constant 0 : index
    %223 = vector.load %arg18[%c0_85, %c0_86] : memref<256x64xbf16, #tpu.memory_space<vmem>>, vector<256x64xbf16>
    %cst_87 = arith.constant dense<0.000000e+00> : vector<128x64xf32>
    %224 = tpu.matmul %222, %223, %cst_87 {dimension_numbers = #tpu.dot_dimension_numbers<[1], [0], [0], [1], [0, 0, 1, 1], [], []>} : vector<128x256xbf16>, vector<256x64xbf16>, vector<128x64xf32> -> vector<128x64xf32>
    %c0_88 = arith.constant 0 : index
    %c0_89 = arith.constant 0 : index
    %225 = vector.load %arg19[%c0_88, %c0_89] : memref<1x64xbf16, #tpu.memory_space<vmem>>, vector<1x64xbf16>
    %226 = arith.extf %225 : vector<1x64xbf16> to vector<1x64xf32>
    %227 = vector.broadcast %226 : vector<1x64xf32> to vector<128x64xf32>
    %228 = arith.addf %224, %227 : vector<128x64xf32>
    %229 = vector.broadcast %14 : vector<1x64xf32> to vector<128x64xf32>
    %230 = arith.mulf %229, %228 : vector<128x64xf32>
    %231 = arith.addf %179, %230 : vector<128x64xf32>
    %232 = arith.truncf %231 : vector<128x64xf32> to vector<128x64xbf16>
    %c0_90 = arith.constant 0 : index
    %c0_91 = arith.constant 0 : index
    %c0_92 = arith.constant 0 : index
    %233 = vector.load %arg20[%c0_90, %c0_91, %c0_92] : memref<1x128x64xbf16, #tpu.memory_space<vmem>>, vector<1x128x64xbf16>
    %234 = vector.shape_cast %233 : vector<1x128x64xbf16> to vector<128x64xbf16>
    %235 = vector.shape_cast %232 : vector<128x64xbf16> to vector<1x128x64xbf16>
    tpu.vector_store %arg20[%c0_90, %c0_91, %c0_92], %235 {strides = array<i32>} : memref<1x128x64xbf16, #tpu.memory_space<vmem>>, vector<1x128x64xbf16>,
    return
  }
  func.func @transform_0(%arg0: i32) -> (i32, i32, i32) {
    %c0_i32 = arith.constant 0 : i32
    %c0_i32_0 = arith.constant 0 : i32
    %c0_i32_1 = arith.constant 0 : i32
    return %arg0, %c0_i32, %c0_i32_0 : i32, i32, i32
  }
  func.func @transform_1(%arg0: i32) -> (i32, i32, i32) {
    %c0_i32 = arith.constant 0 : i32
    %c0_i32_0 = arith.constant 0 : i32
    %c0_i32_1 = arith.constant 0 : i32
    return %arg0, %c0_i32, %c0_i32_0 : i32, i32, i32
  }
  func.func @transform_2(%arg0: i32) -> (i32, i32, i32) {
    %c0_i32 = arith.constant 0 : i32
    %c0_i32_0 = arith.constant 0 : i32
    %c0_i32_1 = arith.constant 0 : i32
    return %arg0, %c0_i32, %c0_i32_0 : i32, i32, i32
  }
  func.func @transform_3(%arg0: i32) -> (i32, i32, i32) {
    %c0_i32 = arith.constant 0 : i32
    %c0_i32_0 = arith.constant 0 : i32
    %c0_i32_1 = arith.constant 0 : i32
    return %arg0, %c0_i32, %c0_i32_0 : i32, i32, i32
  }
  func.func @transform_4(%arg0: i32) -> (i32, i32) {
    %c0_i32 = arith.constant 0 : i32
    %c0_i32_0 = arith.constant 0 : i32
    %c0_i32_1 = arith.constant 0 : i32
    return %c0_i32, %c0_i32_0 : i32, i32
  }
  func.func @transform_5(%arg0: i32) -> (i32, i32) {
    %c0_i32 = arith.constant 0 : i32
    %c0_i32_0 = arith.constant 0 : i32
    %c0_i32_1 = arith.constant 0 : i32
    return %c0_i32, %c0_i32_0 : i32, i32
  }
  func.func @transform_6(%arg0: i32) -> (i32, i32) {
    %c0_i32 = arith.constant 0 : i32
    %c0_i32_0 = arith.constant 0 : i32
    %c0_i32_1 = arith.constant 0 : i32
    return %c0_i32, %c0_i32_0 : i32, i32
  }
  func.func @transform_7(%arg0: i32) -> (i32, i32) {
    %c0_i32 = arith.constant 0 : i32
    %c0_i32_0 = arith.constant 0 : i32
    %c0_i32_1 = arith.constant 0 : i32
    return %c0_i32, %c0_i32_0 : i32, i32
  }
  func.func @transform_8(%arg0: i32) -> (i32, i32) {
    %c0_i32 = arith.constant 0 : i32
    %c0_i32_0 = arith.constant 0 : i32
    %c0_i32_1 = arith.constant 0 : i32
    return %c0_i32, %c0_i32_0 : i32, i32
  }
  func.func @transform_9(%arg0: i32) -> (i32, i32) {
    %c0_i32 = arith.constant 0 : i32
    %c0_i32_0 = arith.constant 0 : i32
    %c0_i32_1 = arith.constant 0 : i32
    return %c0_i32, %c0_i32_0 : i32, i32
  }
  func.func @transform_10(%arg0: i32) -> (i32, i32) {
    %c0_i32 = arith.constant 0 : i32
    %c0_i32_0 = arith.constant 0 : i32
    %c0_i32_1 = arith.constant 0 : i32
    return %c0_i32, %c0_i32_0 : i32, i32
  }
  func.func @transform_11(%arg0: i32) -> (i32, i32) {
    %c0_i32 = arith.constant 0 : i32
    %c0_i32_0 = arith.constant 0 : i32
    %c0_i32_1 = arith.constant 0 : i32
    return %c0_i32, %c0_i32_0 : i32, i32
  }
  func.func @transform_12(%arg0: i32) -> (i32, i32) {
    %c0_i32 = arith.constant 0 : i32
    %c0_i32_0 = arith.constant 0 : i32
    %c0_i32_1 = arith.constant 0 : i32
    return %c0_i32, %c0_i32_0 : i32, i32
  }
  func.func @transform_13(%arg0: i32) -> (i32, i32) {
    %c0_i32 = arith.constant 0 : i32
    %c0_i32_0 = arith.constant 0 : i32
    %c0_i32_1 = arith.constant 0 : i32
    return %c0_i32, %c0_i32_0 : i32, i32
  }
  func.func @transform_14(%arg0: i32) -> (i32, i32) {
    %c0_i32 = arith.constant 0 : i32
    %c0_i32_0 = arith.constant 0 : i32
    %c0_i32_1 = arith.constant 0 : i32
    return %c0_i32, %c0_i32_0 : i32, i32
  }
  func.func @transform_15(%arg0: i32) -> (i32, i32) {
    %c0_i32 = arith.constant 0 : i32
    %c0_i32_0 = arith.constant 0 : i32
    %c0_i32_1 = arith.constant 0 : i32
    return %c0_i32, %c0_i32_0 : i32, i32
  }
  func.func @transform_16(%arg0: i32) -> (i32, i32) {
    %c0_i32 = arith.constant 0 : i32
    %c0_i32_0 = arith.constant 0 : i32
    %c0_i32_1 = arith.constant 0 : i32
    return %c0_i32, %c0_i32_0 : i32, i32
  }
  func.func @transform_17(%arg0: i32) -> (i32, i32) {
    %c0_i32 = arith.constant 0 : i32
    %c0_i32_0 = arith.constant 0 : i32
    %c0_i32_1 = arith.constant 0 : i32
    return %c0_i32, %c0_i32_0 : i32, i32
  }
  func.func @transform_18(%arg0: i32) -> (i32, i32) {
    %c0_i32 = arith.constant 0 : i32
    %c0_i32_0 = arith.constant 0 : i32
    %c0_i32_1 = arith.constant 0 : i32
    return %c0_i32, %c0_i32_0 : i32, i32
  }
  func.func @transform_19(%arg0: i32) -> (i32, i32, i32) {
    %c0_i32 = arith.constant 0 : i32
    %c0_i32_0 = arith.constant 0 : i32
    %c0_i32_1 = arith.constant 0 : i32
    return %arg0, %c0_i32, %c0_i32_0 : i32, i32, i32
  }
}

</mosaic_0001>

<bundles_post_ra>
// kernel: ltxv_forward.8
= control target key start
LH: loop header
LB: loop body
LE: loop exit
PB: predicated region body
PF: predicated region fallthrough
CT: control target
= control target key end

     0   :  { %v128_v0 = vmov 0.0   ;;  %vm129_vm0 = vmmov 0   ;;  %vm44_vm1 = vcmask 261120   ;;  %v23_v4 = vlaneseq  ;;  %s168_s1 = inlined_call_operand.vmem [shape: bf16[32,64], index: 1, kind: input, shape index: {}]   ;;  %s169_s0 = inlined_call_operand.vmem [shape: bf16[16,32], index: 0, kind: input, shape index: {}]   ;;  %s170_s2 = inlined_call_operand.vmem [shape: bf16[1,64], index: 2, kind: input, shape index: {}]   ;;  %s171_s3 = inlined_call_operand.vmem [shape: bf16[16,64], index: 3, kind: output, shape index: {}]  }
   0x1   :  { %115 = vmatprep.subr.bf16.mxu0 %v128_v0  ;;  %v125_v1 = vld [vmem:[%s168_s1 + $0x8] sm:$0xff]   ;;  %119 = vmatprep.mubr.msk.bf16.mxu0 %vm129_vm0, %v128_v0  ;;  %v126_v2 = vld [vmem:[%s168_s1] sm:$0xff]   ;;  %vm97_vm2 = vcmask 519168  }
   0x2   :  { %116 = vmatpush3.bf16.msra.mxu0 %v125_v1  ;;  %v127_v3 = vld [vmem:[%s169_s0] sm:$0xff]   ;;  %v24_v5 = vshrl.u32 %v23_v4, 7 }
   0x3   :  { %117 = vmatprep.subr.bf16.mxu0 %v128_v0  ;;  %v21_v6 = vld [vmem:[%s170_s2] sm:$0x1] }
   0x4   :  { %v22_v7 = vunpack.c.l.bf16 %v21_v6  ;;  %v25_v8 = vsub.s32 0, %v24_v5 }
   0x6   :  { %118 = vmatpush3.bf16.msra.mxu0 %v126_v2  ;;  %v26_v9 = vrot.slane %v22_v7, %v25_v8 }
   0x9   :  { %120 = vmatmul.mubr.msk.bf16.vlgmr.msra.gmra.mxu0 %vm44_vm1, %v127_v3 }
  0xc9   :  { %v82_v10 = vpop.f32.mrf.mxu0 }
  0xca   :  { %v83_v11 = vadd.f32 %v82_v10, %v26_v9 }
  0xcb   :  { %v121_v12 = vpop.f32.mrf.mxu0 }
  0xcc   :  { %v110_v13 = vpack.c.bf16 %v83_v11, %v83_v11 }
  0xcd   :  { %v85_v14 = vpop.f32.mrf.mxu0 }
  0xce   :  { %98 = vst.msk [vmem:[%s171_s3] sm:$0xf] %vm97_vm2, %v110_v13  ;;  %v86_v15 = vadd.f32 %v85_v14, %v26_v9 }
  0xcf   :  { %v122_v16 = vpop.f32.mrf.mxu0 }
  0xd0   :  { %v111_v17 = vpack.c.bf16 %v86_v15, %v86_v15 }
  0xd2   :  { %99 = vst.msk [vmem:[%s171_s3 + $0x4] sm:$0xf] %vm97_vm2, %v111_v17 }

// kernel: ltxv_forward.7
= control target key start
LH: loop header
LB: loop body
LE: loop exit
PB: predicated region body
PF: predicated region fallthrough
CT: control target
= control target key end

     0   :  { %16 = vsyncpa [#allocation3], 0  ;;  %s974_s0 = inlined_call_operand.vmem [shape: bf16[2,64], index: 0, kind: input, shape index: {}]   ;;  %s975_s1 = inlined_call_operand.hbm [shape: bf16[64,64], index: 1, kind: input, shape index: {}]   ;;  %s976_s2 = inlined_call_operand.vmem [shape: bf16[1,64], index: 2, kind: input, shape index: {}]   ;;  %s977_s3 = inlined_call_operand.hbm [shape: bf16[64,64], index: 3, kind: input, shape index: {}]   ;;  %s978_s4 = inlined_call_operand.vmem [shape: bf16[1,64], index: 4, kind: input, shape index: {}]   ;;  %s979_s5 = inlined_call_operand.hbm [shape: bf16[64,384], index: 5, kind: input, shape index: {}]   ;;  %s980_s6 = inlined_call_operand.vmem [shape: bf16[1,384], index: 6, kind: input, shape index: {}]   ;;  %s981_s7 = inlined_call_operand.hbm [shape: bf16[64,128], index: 7, kind: input, shape index: {}]   ;;  %s982_s8 = inlined_call_operand.vmem [shape: bf16[1,128], index: 8, kind: input, shape index: {}]   ;;  %s983_s9 = inlined_call_operand.vmem [shape: bf16[2,384], index: 9, kind: output, shape index: {0}]   ;;  %s984_s10 = inlined_call_operand.vmem [shape: bf16[2,128], index: 10, kind: output, shape index: {1}]  }
   0x1   :  { %17 = vsyncpa [#allocation5], 0 }
   0x2   :  { %18 = vsyncpa [#allocation8], 0  ;;  %s821_s13 = smov [#allocation4]   ;;  %s822_s15 = smov [#allocation2]  }
   0x3   :  { %s40_s14 = sshll.u32 %s821_s13, 4  ;;  %s26_s16 = sshll.u32 %s822_s15, 4  ;;  %s41_s14 = int_to_ptr.vmem [resolvable:$true] %s40_s14  ;;  %s27_s16 = int_to_ptr.vmem [resolvable:$true] %s26_s16 }
   0x4   :  { %s743_s17 = scalar_lea.vmem %s41_s14, 512  ;;  %p748_p1 = scmp.lt.s32.totalorder %s41_s14, %s41_s14 }
   0x5   :  { %p744_p0 = scmp.ne.s32.totalorder %s41_s14, %s743_s17  ;;  %p749_p2 = scmp.lt.s32.totalorder %s743_s17, %s743_s17 }
   0x7   :  { %p750_p3 = por %p749_p2, %p748_p1 }
   0x9   :  { %p751_p4 = pnand %p750_p3, %p744_p0 }
   0xb   :  { %754 = shalt.err (!%p751_p4)
}
   0xc   :  { %s823_s18 = smov 64   ;;  %s824_s19 = smov 4  }
   0xd   :  { %46 = dma.hbm_to_vmem [thread:$0]  %s977_s3, 512, %s41_s14, [#allocation5], %s823_s18, %s823_s18, %s824_s19  }
   0xe   :  { %s763_s22 = scalar_lea.vmem %s27_s16, 512  ;;  %p768_p6 = scmp.lt.s32.totalorder %s27_s16, %s27_s16 }
   0xf   :  { %p764_p5 = scmp.ne.s32.totalorder %s27_s16, %s763_s22  ;;  %p769_p7 = scmp.lt.s32.totalorder %s763_s22, %s763_s22 }
  0x11   :  { %p770_p8 = por %p769_p7, %p768_p6 }
  0x13   :  { %p771_p9 = pnand %p770_p8, %p764_p5 }
  0x15   :  { %774 = shalt.err (!%p771_p9)
}
  0x16   :  { %32 = dma.hbm_to_vmem [thread:$0]  %s975_s1, 512, %s27_s16, [#allocation3], %s823_s18, %s823_s18, %s824_s19  }
  0x17   :  { %s825_s25 = smov [#allocation6]  }
  0x18   :  { %s54_s26 = sshll.u32 %s825_s25, 4  ;;  %s55_s26 = int_to_ptr.vmem [resolvable:$true] %s54_s26 }
  0x19   :  { %s783_s27 = scalar_lea.vmem %s55_s26, 1536  ;;  %p788_p11 = scmp.lt.s32.totalorder %s55_s26, %s55_s26 }
  0x1a   :  { %p784_p10 = scmp.ne.s32.totalorder %s55_s26, %s783_s27  ;;  %p789_p12 = scmp.lt.s32.totalorder %s783_s27, %s783_s27 }
  0x1c   :  { %p790_p13 = por %p789_p12, %p788_p11 }
  0x1e   :  { %p791_p0 = pnand %p790_p13, %p784_p10 }
  0x20   :  { %794 = shalt.err (!%p791_p0)
}
  0x21   :  { %s826_s3 = smov 192   ;;  %s827_s28 = smov 12  }
  0x22   :  { %60 = dma.hbm_to_vmem [thread:$0]  %s979_s5, 1536, %s55_s26, [#allocation5], %s826_s3, %s826_s3, %s827_s28  }
  0x23   :  { %s828_s11 = smov [#allocation7]  }
  0x24   :  { %s68_s12 = sshll.u32 %s828_s11, 4  ;;  %s69_s12 = int_to_ptr.vmem [resolvable:$true] %s68_s12 }
  0x25   :  { %s803_s1 = scalar_lea.vmem %s69_s12, 512  ;;  %p808_p2 = scmp.lt.s32.totalorder %s69_s12, %s69_s12 }
  0x26   :  { %p804_p1 = scmp.ne.s32.totalorder %s69_s12, %s803_s1  ;;  %p809_p3 = scmp.lt.s32.totalorder %s803_s1, %s803_s1 }
  0x28   :  { %p810_p4 = por %p809_p3, %p808_p2 }
  0x2a   :  { %p811_p5 = pnand %p810_p4, %p804_p1 }
  0x2c   :  { %814 = shalt.err (!%p811_p5)
}
  0x2d   :  { %74 = dma.hbm_to_vmem [thread:$0]  %s981_s7, 512, %s69_s12, [#allocation8], %s823_s18, %s823_s18, %s824_s19  }
  0x2e   :  { %815 = dma.done.wait [#allocation3], 512  }
  0x2f   :  { %816 = vsyncadd [#allocation3], 4294966784 }
  0x30   :  { %817 = dma.done.wait [#allocation5], 2048  }
  0x31   :  { %818 = vsyncadd [#allocation5], 4294965248 }
  0x32   :  { %819 = dma.done.wait [#allocation8], 512  }
  0x33   :  { %820 = vsyncadd [#allocation8], 4294966784  ;;  %v829_v0 = vmov 0.0   ;;  %vm830_vm0 = vmmov 0   ;;  %v699_v1 = vld [vmem:[#allocation2 + $0x18] sm:$0xff]   ;;  %v700_v2 = vld [vmem:[#allocation2 + $0x10] sm:$0xff]   ;;  %v101_v10 = vlaneseq }
  0x34   :  { %639 = vmatprep.subr.bf16.mxu0 %v829_v0  ;;  %647 = vmatprep.mubr.msk.bf16.mxu0 %vm830_vm0, %v829_v0  ;;  %v701_v3 = vld [vmem:[#allocation2 + $0x8] sm:$0xff]   ;;  %v702_v4 = vld [vmem:[#allocation2] sm:$0xff]   ;;  %vm129_vm1 = vcmask 523264   ;;  %v703_v6 = vld [vmem:[#allocation4 + $0x18] sm:$0xff]   ;;  %v831_v39 = vmov 0  }
  0x35   :  { %651 = vmatprep.subr.bf16.mxu1 %v829_v0  ;;  %659 = vmatprep.mubr.msk.bf16.mxu1 %vm830_vm0, %v829_v0  ;;  %v90_v5 = vld [vmem:[%s974_s0] sm:$0x1]  ;;  %v704_v7 = vld [vmem:[#allocation4 + $0x10] sm:$0xff]   ;;  %v705_v8 = vld [vmem:[#allocation4 + $0x8] sm:$0xff]   ;;  %v926_v11 = vshrl.u32 %v101_v10, 7 }
  0x36   :  { %640 = vmatpush3.bf16.msra.mxu0 %v699_v1  ;;  %652 = vmatpush3.bf16.msra.mxu1 %v703_v6  ;;  %v706_v9 = vld [vmem:[#allocation4] sm:$0xff]   ;;  %v709_v27 = vld [vmem:[#allocation6 + $0x4c] ss:$12 sps:$4 sm:$0xff]   ;;  %v707_v28 = vld [vmem:[#allocation6 + $0x48] ss:$12 sps:$4 sm:$0xff]  }
  0x37   :  { %641 = vmatprep.subr.bf16.mxu0 %v829_v0  ;;  %653 = vmatprep.subr.bf16.mxu1 %v829_v0  ;;  %v99_v12 = vld [vmem:[%s976_s2] sm:$0x1]  ;;  %v932_v14 = vsub.s32 0, %v926_v11  ;;  %v710_v29 = vld [vmem:[#allocation6 + $0x50] ss:$12 sps:$4 sm:$0xff]   ;;  %v725_v56 = vld [vmem:[#allocation7 + $0x8] sm:$0xff]  }
  0x38   :  { %v100_v13 = vunpack.c.l.bf16 %v99_v12  ;;  %v713_v30 = vld [vmem:[#allocation6 + $0x34] ss:$12 sps:$4 sm:$0xff]   ;;  %v711_v31 = vld [vmem:[#allocation6 + $0x30] ss:$12 sps:$4 sm:$0xff]   ;;  %v714_v32 = vld [vmem:[#allocation6 + $0x38] ss:$12 sps:$4 sm:$0xff]  }
  0x39   :  { %v717_v33 = vld [vmem:[#allocation6 + $0x1c] ss:$12 sps:$4 sm:$0xff]   ;;  %v715_v34 = vld [vmem:[#allocation6 + $0x18] ss:$12 sps:$4 sm:$0xff]   ;;  %v718_v35 = vld [vmem:[#allocation6 + $0x20] ss:$12 sps:$4 sm:$0xff]  }
  0x3a   :  { %642 = vmatpush3.bf16.msra.mxu0 %v700_v2  ;;  %654 = vmatpush3.bf16.msra.mxu1 %v704_v7  ;;  %v104_v15 = vrot.slane %v100_v13, %v932_v14  ;;  %v721_v36 = vld [vmem:[#allocation6 + $0x4] ss:$12 sps:$4 sm:$0xff]   ;;  %v719_v37 = vld [vmem:[#allocation6] ss:$12 sps:$4 sm:$0xff]   ;;  %v722_v38 = vld [vmem:[#allocation6 + $0x8] ss:$12 sps:$4 sm:$0xff]  }
  0x3b   :  { %643 = vmatprep.subr.bf16.mxu0 %v829_v0  ;;  %655 = vmatprep.subr.bf16.mxu1 %v829_v0  ;;  %v189_v40 = vld [vmem:[%s978_s4] sm:$0x1]  ;;  %v723_v53 = vld [vmem:[#allocation7 + $0x18] sm:$0xff]   ;;  %v724_v55 = vld [vmem:[#allocation7 + $0x10] sm:$0xff]   ;;  %v299_v60 = vsub.s32 4, %v926_v11  ;;  %v295_v61 = vsub.s32 2, %v926_v11 }
  0x3c   :  { %v190_v41 = vunpack.c.l.bf16 %v189_v40  ;;  %v726_v57 = vld [vmem:[#allocation7] sm:$0xff]   ;;  %v832_v1 = vmov 1966171168  }
  0x3d   :  { %v286_v58 = vld [vmem:[%s980_s6] sm:$0x7]  ;;  %v550_v2 = vunpack.c.l.s4 %v832_v1 }
  0x3e   :  { %644 = vmatpush3.bf16.msra.mxu0 %v701_v3  ;;  %656 = vmatpush3.bf16.msra.mxu1 %v705_v8  ;;  %v194_v42 = vrot.slane %v190_v41, %v932_v14  ;;  %v287_v59 = vunpack.c.l.bf16 %v286_v58 }
  0x3f   :  { %645 = vmatprep.subr.bf16.mxu0 %v829_v0  ;;  %657 = vmatprep.subr.bf16.mxu1 %v829_v0 }
  0x40   :  { %v300_v62 = vrot.slane %v287_v59, %v299_v60  ;;  %v292_v63 = vrot.slane %v287_v59, %v932_v14  ;;  %v296_v3 = vrot.slane %v287_v59, %v295_v61 }
  0x42   :  { %646 = vmatpush3.bf16.msra.mxu0 %v702_v4  ;;  %658 = vmatpush3.bf16.msra.mxu1 %v706_v9  ;;  %v307_v4 = vrot.slane %v292_v63, %v932_v14  ;;  %v311_v6 = vrot.slane %v296_v3, %v932_v14 }
  0x43   :  { %663 = vmatprep.subr.bf16.mxu1 %v829_v0  ;;  %391 = vmatprep.subr.bf16.mxu0 %v709_v27 }
  0x45   :  { %648 = vmatmul.mubr.msk.bf16.vlgmr.msra.gmra.mxu0 %vm129_vm1, %v90_v5  ;;  %v551_v5 = vunpack.c.0.s8 %v550_v2 }
  0x46   :  { %392 = vmatpush1.bf16.msra.mxu0 %v707_v28  ;;  %415 = vmatprep.mubr.bf16.mxu0 %v831_v39 }
  0x47   :  { %393 = vmatprep.subr.bf16.mxu0 %v713_v30 }
  0x4a   :  { %394 = vmatpush1.bf16.msra.mxu0 %v711_v31 }
  0x4b   :  { %395 = vmatprep.subr.bf16.mxu0 %v717_v33 }
  0x4e   :  { %396 = vmatpush1.bf16.msra.mxu0 %v715_v34 }
  0x4f   :  { %397 = vmatprep.subr.bf16.mxu0 %v721_v36 }
  0x52   :  { %398 = vmatpush1.bf16.msra.mxu0 %v719_v37 }
  0x53   :  { %675 = vmatprep.subr.bf16.mxu0 %v829_v0 }
 0x105   :  { %v167_v16 = vpop.f32.mrf.mxu0 }
 0x106   :  { %v168_v17 = vadd.f32 %v167_v16, %v104_v15  ;;  %v554_v16 = vsub.s32 %v551_v5, %v926_v11 }
 0x107   :  { %v649_v18 = vpop.f32.mrf.mxu0 }
 0x108   :  { %v591_v19 = vmul.f32 -1.442695, %v168_v17 }
 0x109   :  { %v170_v20 = vpop.f32.mrf.mxu0 }
 0x10a   :  { %727 = vpow2.f32 %v591_v19 }
 0x10b   :  { %v650_v21 = vpop.f32.mrf.mxu0 }
 0x117   :  { %v728_v22 = vpop.eup %727 }
 0x118   :  { %v176_v23 = vadd.f32 1.0, %v728_v22 }
 0x11a   :  { %729 = vrcp.f32 %v176_v23  ;;  %v472_v23 = vld [vmem:[%s982_s8] sm:$0x1] }
 0x11b   :  { %v473_v27 = vunpack.c.l.bf16 %v472_v23 }
 0x11d   :  { %v477_v11 = vrot.slane %v473_v27, %v932_v14 }
 0x127   :  { %v730_v24 = vpop.eup %729 }
 0x128   :  { %v179_v25 = vmul.f32 %v730_v24, %v168_v17 }
 0x12a   :  { %v180_v26 = vpack.c.bf16 %v179_v25, %v179_v25 }
 0x12c   :  { %660 = vmatmul.mubr.msk.bf16.vlgmr.msra.gmra.mxu1 %vm129_vm1, %v180_v26 }
 0x12d   :  { %671 = vmatprep.mubr.msk.bf16.mxu1 %vm830_vm0, %v829_v0  ;;  %664 = vmatpush3.bf16.msra.mxu1 %v710_v29 }
 0x12e   :  { %665 = vmatprep.subr.bf16.mxu1 %v829_v0 }
 0x131   :  { %666 = vmatpush3.bf16.msra.mxu1 %v714_v32 }
 0x132   :  { %667 = vmatprep.subr.bf16.mxu1 %v829_v0 }
 0x135   :  { %668 = vmatpush3.bf16.msra.mxu1 %v718_v35 }
 0x136   :  { %669 = vmatprep.subr.bf16.mxu1 %v829_v0 }
 0x139   :  { %670 = vmatpush3.bf16.msra.mxu1 %v722_v38 }
 0x1ec   :  { %v256_v43 = vpop.f32.mrf.mxu1 }
 0x1ed   :  { %v257_v44 = vadd.f32 %v256_v43, %v194_v42 }
 0x1ee   :  { %v661_v45 = vpop.f32.mrf.mxu1 }
 0x1ef   :  { %v597_v46 = vmul.f32 -1.442695, %v257_v44 }
 0x1f0   :  { %v259_v47 = vpop.f32.mrf.mxu1 }
 0x1f1   :  { %731 = vpow2.f32 %v597_v46 }
 0x1f2   :  { %v662_v48 = vpop.f32.mrf.mxu1 }
 0x1fe   :  { %v732_v49 = vpop.eup %731 }
 0x1ff   :  { %v265_v50 = vadd.f32 1.0, %v732_v49 }
 0x201   :  { %733 = vrcp.f32 %v265_v50 }
 0x20e   :  { %v734_v51 = vpop.eup %733 }
 0x20f   :  { %v268_v52 = vmul.f32 %v734_v51, %v257_v44 }
 0x211   :  { %v269_v54 = vpack.c.bf16 %v268_v52, %v268_v52 }
 0x213   :  { %610 = vmatmul.mubr.msk.bf16.vlgmr.msra.gmra.mxu0 %vm129_vm1, %v269_v54  ;;  %672 = vmatmul.mubr.msk.bf16.vlgmr.msra.gmra.mxu1 %vm129_vm1, %v269_v54 }
 0x214   :  { %676 = vmatpush3.bf16.msra.mxu0 %v723_v53  ;;  %683 = vmatprep.mubr.msk.bf16.mxu0 %vm830_vm0, %v829_v0 }
 0x215   :  { %677 = vmatprep.subr.bf16.mxu0 %v829_v0 }
 0x218   :  { %678 = vmatpush3.bf16.msra.mxu0 %v724_v55 }
 0x219   :  { %679 = vmatprep.subr.bf16.mxu0 %v829_v0 }
 0x21c   :  { %680 = vmatpush3.bf16.msra.mxu0 %v725_v56 }
 0x21d   :  { %681 = vmatprep.subr.bf16.mxu0 %v829_v0  ;;  %v315_v0 = vrot.slane %v300_v62, %v932_v14 }
 0x220   :  { %682 = vmatpush3.bf16.msra.mxu0 %v726_v57 }
 0x223   :  { %684 = vmatmul.mubr.msk.bf16.vlgmr.msra.gmra.mxu0 %vm129_vm1, %v269_v54 }
 0x2d3   :  { %v417_v7 = vpop.f32.mrf.mxu0  ;;  %v458_v8 = vpop.f32.mrf.mxu1 }
 0x2d4   :  { %v459_v9 = vadd.f32 %v458_v8, %v315_v0  ;;  %v418_v13 = vadd.f32 %v417_v7, %v307_v4 }
 0x2d5   :  { %v419_v10 = vpop.f32.mrf.mxu0  ;;  %v673_v12 = vpop.f32.mrf.mxu1 }
 0x2d6   :  { %v544_v15 = vpack.c.bf16 %v459_v9, %v459_v9  ;;  %v420_v17 = vadd.f32 %v419_v10, %v311_v6 }
 0x2d7   :  { %v421_v18 = vpop.f32.mrf.mxu0  ;;  %v461_v19 = vpop.f32.mrf.mxu1 }
 0x2d8   :  { %v617_v20 = vpack.c.bf16 %v420_v17, %v418_v13  ;;  %v562_v24 = vrot.slane %v544_v15, %v554_v16 }
 0x2d9   :  { %v422_v21 = vpop.f32.mrf.mxu0  ;;  %v674_v22 = vpop.f32.mrf.mxu1 }
 0x2da   :  { %v555_v25 = vrot.slane %v617_v20, %v554_v16 }
 0x2dc   :  { %v563_v26 = vcombine.low %v555_v25, %v562_v24 }
 0x2de   :  { %618 = vst.sshfl [vmem:[%s983_s9] sm:$0x15 pattern:$0x73625140] %v563_v26 }
 0x2e3   :  { %v536_v28 = vpop.f32.mrf.mxu0 }
 0x2e4   :  { %v537_v29 = vadd.f32 %v536_v28, %v477_v11 }
 0x2e5   :  { %v685_v30 = vpop.f32.mrf.mxu0 }
 0x2e6   :  { %v573_v31 = vpack.c.bf16 %v537_v29, %v537_v29 }
 0x2e7   :  { %v539_v32 = vpop.f32.mrf.mxu0 }
 0x2e8   :  { %574 = vst [vmem:[%s984_s10] sm:$0x1] %v573_v31 }
 0x2e9   :  { %v686_v33 = vpop.f32.mrf.mxu0 }
 0x2ea   :  { %583 = vsyncpa [#allocation3], 1 }
 0x2eb   :  { %584 = vsyncpa [#allocation5], 1 }
 0x2ec   :  { %585 = vsyncpa [#allocation8], 1 }

// kernel: ltxv_forward.6
= control target key start
LH: loop header
LB: loop body
LE: loop exit
PB: predicated region body
PF: predicated region fallthrough
CT: control target
= control target key end

     0   :  { %vm194_vm0 = vcmask 1040384   ;;  %vm195_vm1 = vcmask 1041408   ;;  %v702_v1 = vmov 65535   ;;  %vm145_vm2 = vcmask 154624   ;;  %s958_s1 = inlined_call_operand.vmem [shape: bf16[19,64], index: 1, kind: input, shape index: {}]   ;;  %s959_s0 = inlined_call_operand.vmem [shape: bf16[256,19], index: 0, kind: input, shape index: {}]   ;;  %s960_s2 = inlined_call_operand.vmem [shape: bf16[1,64], index: 2, kind: input, shape index: {}]   ;;  %s961_s3 = inlined_call_operand.vmem [shape: bf16[256,64], index: 3, kind: output, shape index: {}]  }
   0x1   :  { %v684_v0 = vld [vmem:[%s958_s1 + $0x8] ss:$0 sps:$4 sm:$0x33]   ;;  %v196_v2 = vsel %vm194_vm0, 4294967295, %v702_v1  ;;  %v685_v4 = vld [vmem:[%s958_s1] sm:$0xff]   ;;  %v690_v10 = vld [vmem:[%s959_s0 + $0x10] sm:$0xff]   ;;  %v52_v22 = vlaneseq }
   0x2   :  { %v197_v3 = vsel %vm195_vm1, %v196_v2, 0  ;;  %v686_v6 = vld [vmem:[%s959_s0] sm:$0xff]   ;;  %v688_v8 = vld [vmem:[%s959_s0 + $0x8] sm:$0xff]   ;;  %v691_v11 = vld [vmem:[%s959_s0 + $0x50] sm:$0xff]   ;;  %vm490_vm3 = vcmask 519168  }
   0x3   :  { %v199_v5 = vand.u32 %v684_v0, %v197_v3  ;;  %v687_v7 = vld [vmem:[%s959_s0 + $0x40] sm:$0xff]   ;;  %647 = vmatprep.mubr.msk.bf16.mxu0 %vm145_vm2, %v686_v6  ;;  %v689_v9 = vld [vmem:[%s959_s0 + $0x48] sm:$0xff]   ;;  %v692_v12 = vld [vmem:[%s959_s0 + $0x18] sm:$0xff]   ;;  %v53_v23 = vshrl.u32 %v52_v22, 7 }
   0x4   :  { %663 = vmatprep.mubr.msk.bf16.mxu1 %vm145_vm2, %v687_v7  ;;  %v693_v13 = vld [vmem:[%s959_s0 + $0x58] sm:$0xff]   ;;  %v694_v14 = vld [vmem:[%s959_s0 + $0x20] sm:$0xff]   ;;  %v696_v16 = vld [vmem:[%s959_s0 + $0x28] sm:$0xff]  }
   0x5   :  { %643 = vmatprep.subr.bf16.mxu0 %v199_v5  ;;  %679 = vmatprep.subr.bf16.mxu1 %v199_v5  ;;  %v695_v15 = vld [vmem:[%s959_s0 + $0x60] sm:$0xff]   ;;  %v697_v17 = vld [vmem:[%s959_s0 + $0x68] sm:$0xff]   ;;  %v698_v18 = vld [vmem:[%s959_s0 + $0x30] sm:$0xff]   ;;  %v54_v26 = vsub.s32 0, %v53_v23 }
   0x6   :  { %644 = vmatpush3.bf16.msra.mxu0 %v199_v5  ;;  %681 = vmatpush3.bf16.msra.mxu1 %v199_v5  ;;  %v699_v19 = vld [vmem:[%s959_s0 + $0x70] sm:$0xff]   ;;  %v700_v20 = vld [vmem:[%s959_s0 + $0x38] sm:$0xff]   ;;  %v50_v24 = vld [vmem:[%s960_s2] sm:$0x1] }
   0x7   :  { %645 = vmatprep.subr.bf16.mxu0 %v685_v4  ;;  %680 = vmatprep.subr.bf16.mxu1 %v685_v4  ;;  %v701_v21 = vld [vmem:[%s959_s0 + $0x78] sm:$0xff]   ;;  %v51_v25 = vunpack.c.l.bf16 %v50_v24 }
   0x9   :  { %v796_v27 = vrot.slane %v51_v25, %v54_v26 }
   0xa   :  { %646 = vmatpush3.bf16.msra.mxu0 %v685_v4  ;;  %682 = vmatpush3.bf16.msra.mxu1 %v685_v4 }
   0xd   :  { %648 = vmatmul.mubr.msk.bf16.vlgmr.msra.gmra.mxu0 %vm145_vm2, %v688_v8  ;;  %664 = vmatmul.mubr.msk.bf16.vlgmr.msra.gmra.mxu1 %vm145_vm2, %v689_v9 }
   0xe   :  { %651 = vmatprep.mubr.msk.bf16.mxu0 %vm145_vm2, %v690_v10  ;;  %667 = vmatprep.mubr.msk.bf16.mxu1 %vm145_vm2, %v691_v11 }
  0x15   :  { %652 = vmatmul.mubr.msk.bf16.gmra.mxu0 %vm145_vm2, %v692_v12  ;;  %668 = vmatmul.mubr.msk.bf16.gmra.mxu1 %vm145_vm2, %v693_v13 }
  0x16   :  { %655 = vmatprep.mubr.msk.bf16.mxu0 %vm145_vm2, %v694_v14  ;;  %671 = vmatprep.mubr.msk.bf16.mxu1 %vm145_vm2, %v695_v15 }
  0x1d   :  { %656 = vmatmul.mubr.msk.bf16.gmra.mxu0 %vm145_vm2, %v696_v16  ;;  %672 = vmatmul.mubr.msk.bf16.gmra.mxu1 %vm145_vm2, %v697_v17 }
  0x1e   :  { %659 = vmatprep.mubr.msk.bf16.mxu0 %vm145_vm2, %v698_v18  ;;  %675 = vmatprep.mubr.msk.bf16.mxu1 %vm145_vm2, %v699_v19 }
  0x25   :  { %660 = vmatmul.mubr.msk.bf16.gmra.mxu0 %vm145_vm2, %v700_v20  ;;  %676 = vmatmul.mubr.msk.bf16.gmra.mxu1 %vm145_vm2, %v701_v21 }
  0xcd   :  { %v649_v28 = vpop.f32.mrf.mxu0  ;;  %v665_v29 = vpop.f32.mrf.mxu1 }
  0xce   :  { %v244_v30 = vadd.f32 %v649_v28, %v796_v27  ;;  %v308_v31 = vadd.f32 %v665_v29, %v796_v27 }
  0xcf   :  { %v235_v32 = vpop.f32.mrf.mxu0  ;;  %v299_v33 = vpop.f32.mrf.mxu1 }
  0xd0   :  { %v595_v34 = vpack.c.bf16 %v244_v30, %v244_v30  ;;  %v611_v35 = vpack.c.bf16 %v308_v31, %v308_v31  ;;  %v236_v36 = vadd.f32 %v235_v32, %v796_v27  ;;  %v300_v37 = vadd.f32 %v299_v33, %v796_v27 }
  0xd1   :  { %v650_v38 = vpop.f32.mrf.mxu0  ;;  %v666_v39 = vpop.f32.mrf.mxu1 }
  0xd2   :  { %493 = vst.msk [vmem:[%s961_s3 + $0x8] sm:$0xf] %vm490_vm3, %v595_v34  ;;  %509 = vst.msk [vmem:[%s961_s3 + $0x48] sm:$0xf] %vm490_vm3, %v611_v35  ;;  %v593_v40 = vpack.c.bf16 %v236_v36, %v236_v36  ;;  %v609_v41 = vpack.c.bf16 %v300_v37, %v300_v37  ;;  %v247_v42 = vadd.f32 %v650_v38, %v796_v27 }
  0xd3   :  { %v311_v43 = vadd.f32 %v666_v39, %v796_v27  ;;  %v238_v44 = vpop.f32.mrf.mxu0  ;;  %v302_v45 = vpop.f32.mrf.mxu1 }
  0xd4   :  { %491 = vst.msk [vmem:[%s961_s3] sm:$0xf] %vm490_vm3, %v593_v40  ;;  %507 = vst.msk [vmem:[%s961_s3 + $0x40] sm:$0xf] %vm490_vm3, %v609_v41  ;;  %v596_v46 = vpack.c.bf16 %v247_v42, %v247_v42  ;;  %v239_v48 = vadd.f32 %v238_v44, %v796_v27  ;;  %v303_v49 = vadd.f32 %v302_v45, %v796_v27 }
  0xd5   :  { %v612_v47 = vpack.c.bf16 %v311_v43, %v311_v43  ;;  %v653_v50 = vpop.f32.mrf.mxu0  ;;  %v669_v51 = vpop.f32.mrf.mxu1 }
  0xd6   :  { %494 = vst.msk [vmem:[%s961_s3 + $0xc] sm:$0xf] %vm490_vm3, %v596_v46  ;;  %v594_v52 = vpack.c.bf16 %v239_v48, %v239_v48  ;;  %v610_v53 = vpack.c.bf16 %v303_v49, %v303_v49  ;;  %v260_v54 = vadd.f32 %v653_v50, %v796_v27  ;;  %v324_v55 = vadd.f32 %v669_v51, %v796_v27 }
  0xd7   :  { %510 = vst.msk [vmem:[%s961_s3 + $0x4c] sm:$0xf] %vm490_vm3, %v612_v47  ;;  %v251_v56 = vpop.f32.mrf.mxu0  ;;  %v315_v57 = vpop.f32.mrf.mxu1 }
  0xd8   :  { %492 = vst.msk [vmem:[%s961_s3 + $0x4] sm:$0xf] %vm490_vm3, %v594_v52  ;;  %508 = vst.msk [vmem:[%s961_s3 + $0x44] sm:$0xf] %vm490_vm3, %v610_v53  ;;  %v599_v58 = vpack.c.bf16 %v260_v54, %v260_v54  ;;  %v615_v59 = vpack.c.bf16 %v324_v55, %v324_v55  ;;  %v252_v60 = vadd.f32 %v251_v56, %v796_v27 }
  0xd9   :  { %v316_v61 = vadd.f32 %v315_v57, %v796_v27  ;;  %v654_v62 = vpop.f32.mrf.mxu0  ;;  %v670_v63 = vpop.f32.mrf.mxu1 }
  0xda   :  { %497 = vst.msk [vmem:[%s961_s3 + $0x18] sm:$0xf] %vm490_vm3, %v599_v58  ;;  %513 = vst.msk [vmem:[%s961_s3 + $0x58] sm:$0xf] %vm490_vm3, %v615_v59  ;;  %v597_v0 = vpack.c.bf16 %v252_v60, %v252_v60  ;;  %v263_v2 = vadd.f32 %v654_v62, %v796_v27  ;;  %v327_v3 = vadd.f32 %v670_v63, %v796_v27 }
  0xdb   :  { %v613_v1 = vpack.c.bf16 %v316_v61, %v316_v61  ;;  %v254_v4 = vpop.f32.mrf.mxu0  ;;  %v318_v5 = vpop.f32.mrf.mxu1 }
  0xdc   :  { %495 = vst.msk [vmem:[%s961_s3 + $0x10] sm:$0xf] %vm490_vm3, %v597_v0  ;;  %v600_v6 = vpack.c.bf16 %v263_v2, %v263_v2  ;;  %v616_v7 = vpack.c.bf16 %v327_v3, %v327_v3  ;;  %v255_v8 = vadd.f32 %v254_v4, %v796_v27  ;;  %v319_v9 = vadd.f32 %v318_v5, %v796_v27 }
  0xdd   :  { %511 = vst.msk [vmem:[%s961_s3 + $0x50] sm:$0xf] %vm490_vm3, %v613_v1  ;;  %v657_v10 = vpop.f32.mrf.mxu0  ;;  %v673_v11 = vpop.f32.mrf.mxu1 }
  0xde   :  { %498 = vst.msk [vmem:[%s961_s3 + $0x1c] sm:$0xf] %vm490_vm3, %v600_v6  ;;  %514 = vst.msk [vmem:[%s961_s3 + $0x5c] sm:$0xf] %vm490_vm3, %v616_v7  ;;  %v598_v12 = vpack.c.bf16 %v255_v8, %v255_v8  ;;  %v614_v13 = vpack.c.bf16 %v319_v9, %v319_v9  ;;  %v276_v14 = vadd.f32 %v657_v10, %v796_v27 }
  0xdf   :  { %v340_v15 = vadd.f32 %v673_v11, %v796_v27  ;;  %v267_v16 = vpop.f32.mrf.mxu0  ;;  %v331_v17 = vpop.f32.mrf.mxu1 }
  0xe0   :  { %496 = vst.msk [vmem:[%s961_s3 + $0x14] sm:$0xf] %vm490_vm3, %v598_v12  ;;  %512 = vst.msk [vmem:[%s961_s3 + $0x54] sm:$0xf] %vm490_vm3, %v614_v13  ;;  %v603_v18 = vpack.c.bf16 %v276_v14, %v276_v14  ;;  %v268_v20 = vadd.f32 %v267_v16, %v796_v27  ;;  %v332_v21 = vadd.f32 %v331_v17, %v796_v27 }
  0xe1   :  { %v619_v19 = vpack.c.bf16 %v340_v15, %v340_v15  ;;  %v658_v22 = vpop.f32.mrf.mxu0  ;;  %v674_v23 = vpop.f32.mrf.mxu1 }
  0xe2   :  { %501 = vst.msk [vmem:[%s961_s3 + $0x28] sm:$0xf] %vm490_vm3, %v603_v18  ;;  %v601_v24 = vpack.c.bf16 %v268_v20, %v268_v20  ;;  %v617_v25 = vpack.c.bf16 %v332_v21, %v332_v21  ;;  %v279_v26 = vadd.f32 %v658_v22, %v796_v27  ;;  %v343_v28 = vadd.f32 %v674_v23, %v796_v27 }
  0xe3   :  { %517 = vst.msk [vmem:[%s961_s3 + $0x68] sm:$0xf] %vm490_vm3, %v619_v19  ;;  %v270_v29 = vpop.f32.mrf.mxu0  ;;  %v334_v30 = vpop.f32.mrf.mxu1 }
  0xe4   :  { %499 = vst.msk [vmem:[%s961_s3 + $0x20] sm:$0xf] %vm490_vm3, %v601_v24  ;;  %515 = vst.msk [vmem:[%s961_s3 + $0x60] sm:$0xf] %vm490_vm3, %v617_v25  ;;  %v604_v31 = vpack.c.bf16 %v279_v26, %v279_v26  ;;  %v620_v32 = vpack.c.bf16 %v343_v28, %v343_v28  ;;  %v271_v33 = vadd.f32 %v270_v29, %v796_v27 }
  0xe5   :  { %v335_v34 = vadd.f32 %v334_v30, %v796_v27  ;;  %v661_v35 = vpop.f32.mrf.mxu0  ;;  %v677_v36 = vpop.f32.mrf.mxu1 }
  0xe6   :  { %502 = vst.msk [vmem:[%s961_s3 + $0x2c] sm:$0xf] %vm490_vm3, %v604_v31  ;;  %518 = vst.msk [vmem:[%s961_s3 + $0x6c] sm:$0xf] %vm490_vm3, %v620_v32  ;;  %v602_v37 = vpack.c.bf16 %v271_v33, %v271_v33  ;;  %v292_v39 = vadd.f32 %v661_v35, %v796_v27  ;;  %v356_v40 = vadd.f32 %v677_v36, %v796_v27 }
  0xe7   :  { %v618_v38 = vpack.c.bf16 %v335_v34, %v335_v34  ;;  %v283_v41 = vpop.f32.mrf.mxu0  ;;  %v347_v42 = vpop.f32.mrf.mxu1 }
  0xe8   :  { %500 = vst.msk [vmem:[%s961_s3 + $0x24] sm:$0xf] %vm490_vm3, %v602_v37  ;;  %v607_v43 = vpack.c.bf16 %v292_v39, %v292_v39  ;;  %v623_v44 = vpack.c.bf16 %v356_v40, %v356_v40  ;;  %v284_v45 = vadd.f32 %v283_v41, %v796_v27  ;;  %v348_v46 = vadd.f32 %v347_v42, %v796_v27 }
  0xe9   :  { %516 = vst.msk [vmem:[%s961_s3 + $0x64] sm:$0xf] %vm490_vm3, %v618_v38  ;;  %v662_v47 = vpop.f32.mrf.mxu0  ;;  %v678_v48 = vpop.f32.mrf.mxu1 }
  0xea   :  { %505 = vst.msk [vmem:[%s961_s3 + $0x38] sm:$0xf] %vm490_vm3, %v607_v43  ;;  %521 = vst.msk [vmem:[%s961_s3 + $0x78] sm:$0xf] %vm490_vm3, %v623_v44  ;;  %v605_v49 = vpack.c.bf16 %v284_v45, %v284_v45  ;;  %v621_v50 = vpack.c.bf16 %v348_v46, %v348_v46  ;;  %v295_v51 = vadd.f32 %v662_v47, %v796_v27 }
  0xeb   :  { %v359_v52 = vadd.f32 %v678_v48, %v796_v27  ;;  %v286_v53 = vpop.f32.mrf.mxu0  ;;  %v350_v54 = vpop.f32.mrf.mxu1 }
  0xec   :  { %503 = vst.msk [vmem:[%s961_s3 + $0x30] sm:$0xf] %vm490_vm3, %v605_v49  ;;  %519 = vst.msk [vmem:[%s961_s3 + $0x70] sm:$0xf] %vm490_vm3, %v621_v50  ;;  %v608_v55 = vpack.c.bf16 %v295_v51, %v295_v51  ;;  %v287_v57 = vadd.f32 %v286_v53, %v796_v27  ;;  %v351_v58 = vadd.f32 %v350_v54, %v796_v27 }
  0xed   :  { %v624_v56 = vpack.c.bf16 %v359_v52, %v359_v52 }
  0xee   :  { %506 = vst.msk [vmem:[%s961_s3 + $0x3c] sm:$0xf] %vm490_vm3, %v608_v55  ;;  %v606_v59 = vpack.c.bf16 %v287_v57, %v287_v57  ;;  %v622_v60 = vpack.c.bf16 %v351_v58, %v351_v58 }
  0xef   :  { %522 = vst.msk [vmem:[%s961_s3 + $0x7c] sm:$0xf] %vm490_vm3, %v624_v56 }
  0xf0   :  { %504 = vst.msk [vmem:[%s961_s3 + $0x34] sm:$0xf] %vm490_vm3, %v606_v59  ;;  %520 = vst.msk [vmem:[%s961_s3 + $0x74] sm:$0xf] %vm490_vm3, %v622_v60 }

// kernel: ltxv_forward.11
= control target key start
LH: loop header
LB: loop body
LE: loop exit
PB: predicated region body
PF: predicated region fallthrough
CT: control target
= control target key end

     0   :  { %9 = vsyncpa [#allocation3], 0  ;;  %s1580_s0 = inlined_call_operand.vmem [shape: bf16[2,128,64], index: 0, kind: input, shape index: {}]   ;;  %s1581_s1 = inlined_call_operand.vmem [shape: bf16[2,2,64], index: 1, kind: input, shape index: {}]   ;;  %s1582_s2 = inlined_call_operand.vmem [shape: bf16[64,16], index: 2, kind: input, shape index: {}]   ;;  %s1583_s3 = inlined_call_operand.vmem [shape: bf16[1,16], index: 3, kind: input, shape index: {}]   ;;  %s1584_s4 = inlined_call_operand.hbm [shape: bf16[2,128,16], index: 4, kind: output, shape index: {}]  }
   0x1   :  { %11 = vsyncpa [#allocation3 + $0x1], 0  ;;  %s1137_s15 = smov 0   ;;  %s1139_s16 = smov 0  }
   0x2   :  { %s1141_s17 = smov 0   ;;  %s1143_s18 = smov 0  }
   0x3 LB: > { %s1158_s19 = sadd.s32 4294967295, %s1107_s18   ;;  %s829_s20 = sadd.s32 4294967294, %s1107_s18   ;;  %s1107_s18 = sphi %s1143_s18, %s1590_s18   ;;  %s1103_s17 = sphi %s1141_s17, %s1589_s17   ;;  %s1099_s16 = sphi %s1139_s16, %s1588_s16   ;;  %s1095_s15 = sphi %s1137_s15, %s1587_s15  }
   0x4   : > { %s1162_s21 = sadd.s32 1, %s1107_s18   ;;  %s118_s22 = sadd.s32 1, %s1103_s17 }
   0x5   : > { %s115_s23 = ssub.s32 %s1107_s18, %s1162_s21  ;;  %p128_p0 = scmp.ne.s32.totalorder %s1103_s17, %s1099_s16 }
   0x6   : > { %p116_p1 = scmp.eq.s32.totalorder %s115_s23, 0  ;;  %p129_p2 = scmp.eq.s32.totalorder %s1158_s19, 1 }
   0x7   : > { %p134_p3 = scmp.ne.s32.totalorder %s1099_s16, %s1095_s15  ;;  %p135_p4 = scmp.eq.s32.totalorder %s829_s20, 1 }
   0x8   : > { %s1173_s24 = scalar_select %p116_p1, %s1103_s17, %s118_s22  }
   0x9   : > { %p1175_p5 = por %p129_p2, %p128_p0  ;;  %p1179_p6 = por %p135_p4, %p134_p3 }
   0xa   : > { %p832_p7 = scmp.ge.s32.totalorder %s1107_s18, 1  ;;  %p173_p8 = scmp.lt.s32.totalorder %s1107_s18, 3 }
   0xc   : > { %p174_p9 = pnand %p832_p7, %p173_p8 }
   0xd   : > { %p202_p10 = scmp.lt.s32.totalorder (!%p174_p9), %s1158_s19, 1  ;;  %s1109_s11 = smov (!%p174_p9), [#allocation2]  }
   0xe   : > { %177 = sbr.rel (%p174_p9) target bundleno = 585 (0x249), region = 36  ;;  %s1051_s12 = sshll.u32 (!%p174_p9), %s1109_s11, 4  ;;  %s1052_s12 = int_to_ptr.vmem [resolvable:$false] %s1051_s12 }
   0xf   : > { %s1053_s13 = scalar_lea.vmem (!%p174_p9), %s1052_s12, 2048 }
  0x13   : > { %s1187_s27 = scalar_select %p202_p10, %s1158_s19, 1  ;;  %vm245_vm0 = vcmask 523264   ;;  %vm727_vm1 = vcmask 125952  }
  0x15   : > { %s869_s28 = sshll.u32 %s1187_s27, 6  ;;  %s209_s22 = scalar_lea.vmem %s1581_s1, %s1187_s27 }
  0x16   : > { %s1193_s5 = scalar_lea.vmem %s1580_s0, %s869_s28  ;;  %s199_s28 = sand.u32 1, %s1099_s16  }
  0x17   : > { %v1196_v0 = vld [vmem:[%s1193_s5] sm:$0xff]   ;;  %v1206_v6 = vld [vmem:[%s1193_s5 + $0x8] sm:$0xff]   ;;  %v1230_v18 = vld [vmem:[%s1193_s5 + $0x10] sm:$0xff]   ;;  %s833_s29 = sshll.u32 %s199_s28, 6 }
  0x18   : > { %v1199_v1 = vld [vmem:[%s1193_s5 + $0x20] sm:$0xff]   ;;  %v889_v2 = vunpack.c.l.bf16 %v1196_v0  ;;  %v890_v4 = vunpack.c.h.bf16 %v1196_v0  ;;  %v893_v11 = vunpack.c.l.bf16 %v1206_v6  ;;  %v894_v12 = vunpack.c.h.bf16 %v1206_v6  ;;  %v1219_v13 = vld [vmem:[%s1193_s5 + $0x28] sm:$0xff]   ;;  %v1241_v23 = vld [vmem:[%s1193_s5 + $0x30] sm:$0xff]   ;;  %s1481_s30 = scalar_lea.vmem [#allocation2], %s833_s29 }
  0x19   : > { %v905_v3 = vunpack.c.l.bf16 %v1199_v1  ;;  %v906_v5 = vunpack.c.h.bf16 %v1199_v1  ;;  %v909_v16 = vunpack.c.l.bf16 %v1219_v13  ;;  %v910_v17 = vunpack.c.h.bf16 %v1219_v13  ;;  %v1252_v28 = vld [vmem:[%s1193_s5 + $0x18] sm:$0xff]   ;;  %s758_s6 = sshll.u32 %s1481_s30, 4  ;;  %s1532_s6 = int_to_ptr.vmem [resolvable:$true] %s758_s6 }
  0x1a   : > { %v246_v7 = vsel %vm245_vm0, %v889_v2, 0.0  ;;  %v249_v9 = vsel %vm245_vm0, %v890_v4, 0.0  ;;  %v252_v14 = vsel %vm245_vm0, %v893_v11, 0.0  ;;  %v255_v15 = vsel %vm245_vm0, %v894_v12, 0.0  ;;  %v1263_v33 = vld [vmem:[%s1193_s5 + $0x38] sm:$0xff]   ;;  %s886_s5 = sshll.u32 %s1158_s19, 10  ;;  %p1054_p0 = scmp.lt.s32.totalorder %s1532_s6, %s1052_s12 }
  0x1b   : > { %v270_v8 = vsel %vm245_vm0, %v905_v3, 0.0  ;;  %247 = vadd.xlane.f32.xlu0 %v246_v7  ;;  %v273_v10 = vsel %vm245_vm0, %v906_v5, 0.0  ;;  %v276_v19 = vsel %vm245_vm0, %v909_v16, 0.0  ;;  %v279_v20 = vsel %vm245_vm0, %v910_v17, 0.0  ;;  %s1530_s9 = scalar_lea.hbm %s1584_s4, %s886_s5  ;;  %s1540_s19 = scalar_lea.sflag [#allocation3], %s199_s28 }
  0x1c   : > { %271 = vadd.xlane.f32.xlu1 %v270_v8  ;;  %v897_v21 = vunpack.c.l.bf16 %v1230_v18  ;;  %v898_v22 = vunpack.c.h.bf16 %v1230_v18  ;;  %v913_v26 = vunpack.c.l.bf16 %v1241_v23  ;;  %v914_v27 = vunpack.c.h.bf16 %v1241_v23  ;;  %s1047_s10 = scalar_lea.vmem %s1532_s6, 1024 }
  0x1d   : > { %v901_v31 = vunpack.c.l.bf16 %v1252_v28  ;;  %v902_v32 = vunpack.c.h.bf16 %v1252_v28  ;;  %v917_v36 = vunpack.c.l.bf16 %v1263_v33  ;;  %v918_v37 = vunpack.c.h.bf16 %v1263_v33  ;;  %p1048_p11 = scmp.ne.s32.totalorder %s1532_s6, %s1047_s10  ;;  %p1055_p1 = scmp.lt.s32.totalorder %s1053_s13, %s1047_s10 }
  0x1e   : > { %v258_v24 = vsel %vm245_vm0, %v897_v21, 0.0  ;;  %v261_v25 = vsel %vm245_vm0, %v898_v22, 0.0  ;;  %v282_v29 = vsel %vm245_vm0, %v913_v26, 0.0  ;;  %v285_v30 = vsel %vm245_vm0, %v914_v27, 0.0 }
  0x1f   : > { %250 = vadd.xlane.f32.xlu0 %v249_v9  ;;  %v264_v34 = vsel %vm245_vm0, %v901_v31, 0.0  ;;  %v267_v35 = vsel %vm245_vm0, %v902_v32, 0.0  ;;  %v288_v38 = vsel %vm245_vm0, %v917_v36, 0.0  ;;  %v291_v39 = vsel %vm245_vm0, %v918_v37, 0.0  ;;  %p1049_p12 = pnand %p1048_p11, %p1175_p5  ;;  %p1056_p2 = por %p1055_p1, %p1054_p0 }
  0x20   : > { %274 = vadd.xlane.f32.xlu1 %v273_v10 }
  0x21   : > { %p1050_p13 = pneg %p1049_p12 }
  0x23   : > { %253 = vadd.xlane.f32.xlu0 %v252_v14  ;;  %p1057_p3 = pnand %p1056_p2, %p1050_p13 }
  0x24   : > { %256 = vadd.xlane.f32.xlu1 %v255_v15 }
  0x27   : > { %277 = vadd.xlane.f32.xlu0 %v276_v19 }
  0x28   : > { %280 = vadd.xlane.f32.xlu1 %v279_v20 }
  0x2b   : > { %259 = vadd.xlane.f32.xlu0 %v258_v24 }
  0x2c   : > { %262 = vadd.xlane.f32.xlu1 %v261_v25 }
  0x2f   : > { %283 = vadd.xlane.f32.xlu0 %v282_v29 }
  0x30   : > { %286 = vadd.xlane.f32.xlu1 %v285_v30 }
  0x33   : > { %265 = vadd.xlane.f32.xlu0 %v264_v34 }
  0x34   : > { %268 = vadd.xlane.f32.xlu1 %v267_v35 }
  0x37   : > { %289 = vadd.xlane.f32.xlu0 %v288_v38 }
  0x38   : > { %292 = vadd.xlane.f32.xlu1 %v291_v39 }
  0xa4   : > { %v248_v40 = vpop.xlane.xlu0 %247 }
  0xa5   : > { %v272_v41 = vpop.xlane.xlu1 %271  ;;  %v295_v42 = vmul.f32 0.015625, %v248_v40 }
  0xa6   : > { %v303_v43 = vmul.f32 0.015625, %v272_v41 }
  0xa7   : > { %v1279_v44 = vsub.f32 %v889_v2, %v295_v42 }
  0xa8   : > { %v1281_v45 = vsub.f32 %v905_v3, %v303_v43  ;;  %v251_v46 = vpop.xlane.xlu0 %250 }
  0xa9   : > { %v275_v47 = vpop.xlane.xlu1 %274  ;;  %v296_v48 = vmul.f32 0.015625, %v251_v46  ;;  %v327_v50 = vmul.f32 %v1279_v44, %v1279_v44 }
  0xaa   : > { %v304_v49 = vmul.f32 0.015625, %v275_v47  ;;  %v335_v51 = vmul.f32 %v1281_v45, %v1281_v45 }
  0xab   : > { %v1289_v52 = vsub.f32 %v890_v4, %v296_v48  ;;  %v343_v54 = vsel %vm245_vm0, %v327_v50, 0.0 }
  0xac   : > { %v1293_v53 = vsub.f32 %v906_v5, %v304_v49  ;;  %344 = vadd.xlane.f32.xlu0 %v343_v54  ;;  %v254_v55 = vpop.xlane.xlu0 %253  ;;  %v367_v57 = vsel %vm245_vm0, %v335_v51, 0.0 }
  0xad   : > { %v257_v56 = vpop.xlane.xlu1 %256  ;;  %v297_v58 = vmul.f32 0.015625, %v254_v55  ;;  %v328_v60 = vmul.f32 %v1289_v52, %v1289_v52 }
  0xae   : > { %v298_v59 = vmul.f32 0.015625, %v257_v56  ;;  %v336_v61 = vmul.f32 %v1293_v53, %v1293_v53 }
  0xaf   : > { %v1303_v62 = vsub.f32 %v893_v11, %v297_v58  ;;  %v346_v0 = vsel %vm245_vm0, %v328_v60, 0.0 }
  0xb0   : > { %v1307_v63 = vsub.f32 %v894_v12, %v298_v59  ;;  %368 = vadd.xlane.f32.xlu0 %v367_v57  ;;  %347 = vadd.xlane.f32.xlu1 %v346_v0  ;;  %v278_v1 = vpop.xlane.xlu0 %277  ;;  %v370_v3 = vsel %vm245_vm0, %v336_v61, 0.0  ;;  %v1013_v0 = vld [vmem:[%s1582_s2 + $0x8] sm:$0xff]  }
  0xb1   : > { %v281_v2 = vpop.xlane.xlu1 %280  ;;  %v305_v4 = vmul.f32 0.015625, %v278_v1  ;;  %v329_v7 = vmul.f32 %v1303_v62, %v1303_v62  ;;  %v1014_v1 = vld [vmem:[%s1582_s2] sm:$0xff]  }
  0xb2   : > { %v306_v5 = vmul.f32 0.015625, %v281_v2  ;;  %v330_v8 = vmul.f32 %v1307_v63, %v1307_v63 }
  0xb3   : > { %v1317_v6 = vsub.f32 %v909_v16, %v305_v4  ;;  %v349_v10 = vsel %vm245_vm0, %v329_v7, 0.0 }
  0xb4   : > { %v1321_v9 = vsub.f32 %v910_v17, %v306_v5  ;;  %371 = vadd.xlane.f32.xlu1 %v370_v3  ;;  %350 = vadd.xlane.f32.xlu0 %v349_v10  ;;  %v260_v11 = vpop.xlane.xlu0 %259  ;;  %v352_v14 = vsel %vm245_vm0, %v330_v8, 0.0 }
  0xb5   : > { %v263_v12 = vpop.xlane.xlu1 %262  ;;  %v299_v15 = vmul.f32 0.015625, %v260_v11  ;;  %v337_v20 = vmul.f32 %v1317_v6, %v1317_v6  ;;  %v456_v11 = vlaneseq }
  0xb6   : > { %v300_v19 = vmul.f32 0.015625, %v263_v12  ;;  %v338_v16 = vmul.f32 %v1321_v9, %v1321_v9  ;;  %v243_v12 = vld [vmem:[%s209_s22] sm:$0x1] }
  0xb7   : > { %v1331_v13 = vsub.f32 %v897_v21, %v299_v15  ;;  %v373_v24 = vsel %vm245_vm0, %v337_v20, 0.0 }
  0xb8   : > { %v1335_v17 = vsub.f32 %v898_v22, %v300_v19  ;;  %353 = vadd.xlane.f32.xlu1 %v352_v14  ;;  %374 = vadd.xlane.f32.xlu0 %v373_v24  ;;  %v284_v25 = vpop.xlane.xlu0 %283  ;;  %v376_v30 = vsel %vm245_vm0, %v338_v16, 0.0 }
  0xb9   : > { %v287_v29 = vpop.xlane.xlu1 %286  ;;  %v307_v34 = vmul.f32 0.015625, %v284_v25  ;;  %v331_v38 = vmul.f32 %v1331_v13, %v1331_v13  ;;  %v244_v25 = vunpack.c.l.bf16 %v243_v12 }
  0xba   : > { %v308_v35 = vmul.f32 0.015625, %v287_v29  ;;  %v332_v21 = vmul.f32 %v1335_v17, %v1335_v17  ;;  %v1403_v29 = vshrl.u32 %v456_v11, 7 }
  0xbb   : > { %v1345_v18 = vsub.f32 %v913_v26, %v307_v34  ;;  %v355_v39 = vsel %vm245_vm0, %v331_v38, 0.0 }
  0xbc   : > { %v1349_v22 = vsub.f32 %v914_v27, %v308_v35  ;;  %377 = vadd.xlane.f32.xlu1 %v376_v30  ;;  %356 = vadd.xlane.f32.xlu0 %v355_v39  ;;  %v266_v40 = vpop.xlane.xlu0 %265  ;;  %v358_v42 = vsel %vm245_vm0, %v332_v21, 0.0 }
  0xbd   : > { %v269_v41 = vpop.xlane.xlu1 %268  ;;  %v301_v43 = vmul.f32 0.015625, %v266_v40  ;;  %v339_v47 = vmul.f32 %v1345_v18, %v1345_v18  ;;  %v455_v40 = vadd.f32 1.0, %v244_v25 }
  0xbe   : > { %v302_v46 = vmul.f32 0.015625, %v269_v41  ;;  %v340_v26 = vmul.f32 %v1349_v22, %v1349_v22  ;;  %v458_v41 = vsub.s32 1, %v1403_v29 }
  0xbf   : > { %v1359_v23 = vsub.f32 %v901_v31, %v301_v43  ;;  %v379_v48 = vsel %vm245_vm0, %v339_v47, 0.0 }
  0xc0   : > { %v1363_v27 = vsub.f32 %v902_v32, %v302_v46  ;;  %359 = vadd.xlane.f32.xlu1 %v358_v42  ;;  %380 = vadd.xlane.f32.xlu0 %v379_v48  ;;  %v290_v49 = vpop.xlane.xlu0 %289  ;;  %v382_v51 = vsel %vm245_vm0, %v340_v26, 0.0 }
  0xc1   : > { %v293_v50 = vpop.xlane.xlu1 %292  ;;  %v309_v54 = vmul.f32 0.015625, %v290_v49  ;;  %v333_v56 = vmul.f32 %v1359_v23, %v1359_v23 }
  0xc2   : > { %v310_v55 = vmul.f32 0.015625, %v293_v50  ;;  %v334_v31 = vmul.f32 %v1363_v27, %v1363_v27  ;;  %v1406_v50 = vrot.slane %v455_v40, %v458_v41 }
  0xc3   : > { %v1373_v28 = vsub.f32 %v917_v36, %v309_v54  ;;  %v361_v57 = vsel %vm245_vm0, %v333_v56, 0.0  ;;  %v1011_v36 = vld [vmem:[%s1582_s2 + $0x18] sm:$0xff]  }
  0xc4   : > { %v1377_v32 = vsub.f32 %v918_v37, %v310_v55  ;;  %383 = vadd.xlane.f32.xlu1 %v382_v51  ;;  %362 = vadd.xlane.f32.xlu0 %v361_v57  ;;  %v364_v58 = vsel %vm245_vm0, %v334_v31, 0.0  ;;  %v1012_v37 = vld [vmem:[%s1582_s2 + $0x10] sm:$0xff]   ;;  %v478_v51 = vsub.s32 0, %v1403_v29 }
  0xc5   : > { %v341_v59 = vmul.f32 %v1373_v28, %v1373_v28  ;;  %938 = vmatprep.subr.bf16.mxu0 %v1011_v36  ;;  %962 = vmatprep.subr.bf16.mxu1 %v1011_v36 }
  0xc6   : > { %v342_v60 = vmul.f32 %v1377_v32, %v1377_v32  ;;  %939 = vmatpush3.bf16.msra.mxu0 %v1011_v36  ;;  %966 = vmatpush3.bf16.msra.mxu1 %v1011_v36 }
  0xc7   : > { %v385_v61 = vsel %vm245_vm0, %v341_v59, 0.0  ;;  %940 = vmatprep.subr.bf16.mxu0 %v1012_v37  ;;  %963 = vmatprep.subr.bf16.mxu1 %v1012_v37 }
  0xc8   : > { %365 = vadd.xlane.f32.xlu1 %v364_v58  ;;  %386 = vadd.xlane.f32.xlu0 %v385_v61  ;;  %v388_v33 = vsel %vm245_vm0, %v342_v60, 0.0  ;;  %v1412_v61 = vrot.slane %v244_v25, %v478_v51 }
  0xca   : > { %941 = vmatpush3.bf16.msra.mxu0 %v1012_v37  ;;  %967 = vmatpush3.bf16.msra.mxu1 %v1012_v37 }
  0xcb   : > { %942 = vmatprep.subr.bf16.mxu0 %v1013_v0  ;;  %964 = vmatprep.subr.bf16.mxu1 %v1013_v0 }
  0xcc   : > { %389 = vadd.xlane.f32.xlu1 %v388_v33 }
  0xce   : > { %943 = vmatpush3.bf16.msra.mxu0 %v1013_v0  ;;  %968 = vmatpush3.bf16.msra.mxu1 %v1013_v0 }
  0xcf   : > { %944 = vmatprep.subr.bf16.mxu0 %v1014_v1  ;;  %965 = vmatprep.subr.bf16.mxu1 %v1014_v1 }
  0xd2   : > { %945 = vmatpush3.bf16.msra.mxu0 %v1014_v1  ;;  %969 = vmatpush3.bf16.msra.mxu1 %v1014_v1 }
 0x135   : > { %v345_v2 = vpop.xlane.xlu0 %344 }
 0x136   : > { %v391_v3 = vmul.f32 0.015625, %v345_v2 }
 0x138   : > { %v407_v4 = vadd.f32 1e-06, %v391_v3 }
 0x139   : > { %v348_v5 = vpop.xlane.xlu1 %347  ;;  %v369_v7 = vpop.xlane.xlu0 %368 }
 0x13a   : > { %1015 = vrsqrt.f32 %v407_v4  ;;  %v392_v8 = vmul.f32 0.015625, %v348_v5  ;;  %v399_v10 = vmul.f32 0.015625, %v369_v7 }
 0x13c   : > { %v408_v14 = vadd.f32 1e-06, %v392_v8  ;;  %v415_v15 = vadd.f32 1e-06, %v399_v10 }
 0x13d   : > { %v372_v19 = vpop.xlane.xlu1 %371  ;;  %v351_v20 = vpop.xlane.xlu0 %350 }
 0x13e   : > { %1017 = vrsqrt.f32 %v408_v14  ;;  %v400_v16 = vmul.f32 0.015625, %v372_v19  ;;  %v393_v24 = vmul.f32 0.015625, %v351_v20 }
 0x13f   : > { %1019 = vrsqrt.f32 %v415_v15 }
 0x140   : > { %v416_v30 = vadd.f32 1e-06, %v400_v16  ;;  %v409_v34 = vadd.f32 1e-06, %v393_v24 }
 0x141   : > { %v354_v35 = vpop.xlane.xlu1 %353  ;;  %v375_v38 = vpop.xlane.xlu0 %374 }
 0x142   : > { %1021 = vrsqrt.f32 %v416_v30  ;;  %v394_v21 = vmul.f32 0.015625, %v354_v35  ;;  %v401_v39 = vmul.f32 0.015625, %v375_v38 }
 0x143   : > { %1023 = vrsqrt.f32 %v409_v34 }
 0x144   : > { %v410_v42 = vadd.f32 1e-06, %v394_v21  ;;  %v417_v43 = vadd.f32 1e-06, %v401_v39 }
 0x145   : > { %v378_v46 = vpop.xlane.xlu1 %377  ;;  %v357_v47 = vpop.xlane.xlu0 %356 }
 0x146   : > { %1025 = vrsqrt.f32 %v410_v42  ;;  %v402_v26 = vmul.f32 0.015625, %v378_v46  ;;  %v395_v48 = vmul.f32 0.015625, %v357_v47 }
 0x147   : > { %v1016_v49 = vpop.eup %1015  ;;  %1027 = vrsqrt.f32 %v417_v43 }
 0x148   : > { %v418_v54 = vadd.f32 1e-06, %v402_v26  ;;  %v411_v55 = vadd.f32 1e-06, %v395_v48  ;;  %v439_v56 = vmul.f32 %v1016_v49, %v1279_v44 }
 0x149   : > { %v360_v31 = vpop.xlane.xlu1 %359  ;;  %v381_v57 = vpop.xlane.xlu0 %380 }
 0x14a   : > { %1029 = vrsqrt.f32 %v418_v54  ;;  %v396_v58 = vmul.f32 0.015625, %v360_v31  ;;  %v403_v59 = vmul.f32 0.015625, %v381_v57  ;;  %v460_v33 = vmul.f32 %v1406_v50, %v439_v56 }
 0x14b   : > { %v1018_v60 = vpop.eup %1017  ;;  %1031 = vrsqrt.f32 %v411_v55 }
 0x14c   : > { %v1020_v36 = vpop.eup %1019  ;;  %v412_v37 = vadd.f32 1e-06, %v396_v58  ;;  %v419_v0 = vadd.f32 1e-06, %v403_v59  ;;  %v440_v1 = vmul.f32 %v1018_v60, %v1289_v52  ;;  %v480_v10 = vadd.f32 %v1412_v61, %v460_v33 }
 0x14d   : > { %v384_v2 = vpop.xlane.xlu1 %383  ;;  %v363_v44 = vpop.xlane.xlu0 %362  ;;  %v447_v3 = vmul.f32 %v1020_v36, %v1281_v45 }
 0x14e   : > { %1033 = vrsqrt.f32 %v412_v37  ;;  %v404_v4 = vmul.f32 0.015625, %v384_v2  ;;  %v397_v5 = vmul.f32 0.015625, %v363_v44  ;;  %v461_v7 = vmul.f32 %v1406_v50, %v440_v1 }
 0x14f   : > { %v1022_v8 = vpop.eup %1021  ;;  %1035 = vrsqrt.f32 %v419_v0  ;;  %v468_v45 = vmul.f32 %v1406_v50, %v447_v3 }
 0x150   : > { %v1024_v11 = vpop.eup %1023  ;;  %v420_v12 = vadd.f32 1e-06, %v404_v4  ;;  %v413_v14 = vadd.f32 1e-06, %v397_v5  ;;  %v481_v15 = vadd.f32 %v1412_v61, %v461_v7  ;;  %v448_v52 = vmul.f32 %v1022_v8, %v1293_v53 }
 0x151   : > { %v366_v19 = vpop.xlane.xlu1 %365  ;;  %v387_v20 = vpop.xlane.xlu0 %386  ;;  %v441_v16 = vmul.f32 %v1024_v11, %v1303_v62  ;;  %v488_v62 = vadd.f32 %v1412_v61, %v468_v45 }
 0x152   : > { %1037 = vrsqrt.f32 %v420_v12  ;;  %v398_v24 = vmul.f32 0.015625, %v366_v19  ;;  %v405_v25 = vmul.f32 0.015625, %v387_v20  ;;  %v496_v30 = vpack.c.bf16 %v481_v15, %v480_v10 }
 0x153   : > { %v1026_v34 = vpop.eup %1025  ;;  %1039 = vrsqrt.f32 %v413_v14  ;;  %v469_v35 = vmul.f32 %v1406_v50, %v448_v52  ;;  %v462_v38 = vmul.f32 %v1406_v50, %v441_v16 }
 0x154   : > { %v1028_v21 = vpop.eup %1027  ;;  %v414_v39 = vadd.f32 1e-06, %v398_v24  ;;  %v421_v40 = vadd.f32 1e-06, %v405_v25  ;;  %946 = vmatprep.mubr.msk.bf16.mxu0 %vm245_vm0, %v496_v30  ;;  %v442_v53 = vmul.f32 %v1026_v34, %v1307_v63 }
 0x155   : > { %v390_v41 = vpop.xlane.xlu1 %389  ;;  %v489_v42 = vadd.f32 %v1412_v61, %v469_v35  ;;  %v449_v43 = vmul.f32 %v1028_v21, %v1317_v6  ;;  %v482_v49 = vadd.f32 %v1412_v61, %v462_v38  ;;  %v512_v38 = vld [vmem:[%s1583_s3] sm:$0x1] }
 0x156   : > { %1041 = vrsqrt.f32 %v414_v39  ;;  %v406_v46 = vmul.f32 0.015625, %v390_v41  ;;  %v463_v47 = vmul.f32 %v1406_v50, %v442_v53  ;;  %v513_v21 = vunpack.c.l.bf16 %v512_v38 }
 0x157   : > { %v1030_v26 = vpop.eup %1029  ;;  %1043 = vrsqrt.f32 %v421_v40  ;;  %v500_v48 = vpack.c.bf16 %v489_v42, %v488_v62  ;;  %v470_v31 = vmul.f32 %v1406_v50, %v449_v43 }
 0x158   : > { %v1032_v54 = vpop.eup %1031  ;;  %v422_v55 = vadd.f32 1e-06, %v406_v46  ;;  %v483_v63 = vadd.f32 %v1412_v61, %v463_v47  ;;  %v450_v56 = vmul.f32 %v1030_v26, %v1321_v9 }
 0x159   : > { %954 = vmatprep.mubr.msk.bf16.mxu1 %vm245_vm0, %v500_v48  ;;  %v443_v6 = vmul.f32 %v1032_v54, %v1331_v13  ;;  %v490_v33 = vadd.f32 %v1412_v61, %v470_v31 }
 0x15a   : > { %1045 = vrsqrt.f32 %v422_v55  ;;  %v497_v57 = vpack.c.bf16 %v483_v63, %v482_v49  ;;  %v471_v58 = vmul.f32 %v1406_v50, %v450_v56 }
 0x15b   : > { %v1034_v59 = vpop.eup %1033  ;;  %v464_v37 = vmul.f32 %v1406_v50, %v443_v6 }
 0x15c   : > { %v1036_v60 = vpop.eup %1035  ;;  %947 = vmatmul.mubr.msk.bf16.vlgmr.msra.gmra.mxu0 %vm245_vm0, %v497_v57  ;;  %v491_v36 = vadd.f32 %v1412_v61, %v471_v58  ;;  %v444_v9 = vmul.f32 %v1034_v59, %v1335_v17 }
 0x15d   : > { %v451_v0 = vmul.f32 %v1036_v60, %v1345_v18  ;;  %v484_v3 = vadd.f32 %v1412_v61, %v464_v37 }
 0x15e   : > { %v501_v1 = vpack.c.bf16 %v491_v36, %v490_v33  ;;  %v465_v13 = vmul.f32 %v1406_v50, %v444_v9 }
 0x15f   : > { %v1038_v2 = vpop.eup %1037  ;;  %v472_v7 = vmul.f32 %v1406_v50, %v451_v0 }
 0x160   : > { %v1040_v44 = vpop.eup %1039  ;;  %955 = vmatmul.mubr.msk.bf16.vlgmr.msra.gmra.mxu1 %vm245_vm0, %v501_v1  ;;  %v485_v4 = vadd.f32 %v1412_v61, %v465_v13  ;;  %v452_v5 = vmul.f32 %v1038_v2, %v1349_v22 }
 0x161   : > { %v445_v17 = vmul.f32 %v1040_v44, %v1359_v23  ;;  %v492_v12 = vadd.f32 %v1412_v61, %v472_v7 }
 0x162   : > { %v498_v8 = vpack.c.bf16 %v485_v4, %v484_v3  ;;  %v473_v18 = vmul.f32 %v1406_v50, %v452_v5 }
 0x163   : > { %v1042_v10 = vpop.eup %1041  ;;  %v466_v52 = vmul.f32 %v1406_v50, %v445_v17 }
 0x164   : > { %v1044_v11 = vpop.eup %1043  ;;  %950 = vmatprep.mubr.msk.bf16.mxu0 %vm245_vm0, %v498_v8  ;;  %v493_v14 = vadd.f32 %v1412_v61, %v473_v18  ;;  %v446_v15 = vmul.f32 %v1042_v10, %v1363_v27 }
 0x165   : > { %v453_v22 = vmul.f32 %v1044_v11, %v1373_v28  ;;  %v486_v45 = vadd.f32 %v1412_v61, %v466_v52 }
 0x166   : > { %v502_v19 = vpack.c.bf16 %v493_v14, %v492_v12  ;;  %v467_v23 = vmul.f32 %v1406_v50, %v446_v15 }
 0x167   : > { %v1046_v20 = vpop.eup %1045  ;;  %v474_v27 = vmul.f32 %v1406_v50, %v453_v22 }
 0x168   : > { %958 = vmatprep.mubr.msk.bf16.mxu1 %vm245_vm0, %v502_v19  ;;  %v487_v16 = vadd.f32 %v1412_v61, %v467_v23  ;;  %v454_v24 = vmul.f32 %v1046_v20, %v1377_v32  ;;  %v1475_v32 = vrot.slane %v513_v21, %v478_v51 }
 0x169   : > { %v494_v28 = vadd.f32 %v1412_v61, %v474_v27 }
 0x16a   : > { %v499_v25 = vpack.c.bf16 %v487_v16, %v486_v45  ;;  %v475_v30 = vmul.f32 %v1406_v50, %v454_v24 }
 0x16c   : > { %951 = vmatmul.mubr.msk.bf16.gmra.mxu0 %vm245_vm0, %v499_v25  ;;  %v495_v34 = vadd.f32 %v1412_v61, %v475_v30 }
 0x16e   : > { %v503_v35 = vpack.c.bf16 %v495_v34, %v494_v28 }
 0x170   : > { %959 = vmatmul.mubr.msk.bf16.gmra.mxu1 %vm245_vm0, %v503_v35 }
 0x21c   : > { %v948_v50 = vpop.f32.mrf.mxu0 }
 0x21d   : > { %v609_v39 = vadd.f32 %v948_v50, %v1475_v32 }
 0x21e   : > { %v600_v61 = vpop.f32.mrf.mxu0 }
 0x21f   : > { %v872_v40 = vpack.c.bf16 %v609_v39, %v609_v39  ;;  %v601_v53 = vadd.f32 %v600_v61, %v1475_v32 }
 0x220   : > { %v949_v41 = vpop.f32.mrf.mxu0  ;;  %v956_v62 = vpop.f32.mrf.mxu1 }
 0x221   : > { %730 = vst.msk [vmem:[%s1481_s30 + $0x8] sm:$0xf] %vm727_vm1, %v872_v40  ;;  %v870_v29 = vpack.c.bf16 %v601_v53, %v601_v53  ;;  %v612_v51 = vadd.f32 %v949_v41, %v1475_v32  ;;  %v641_v42 = vadd.f32 %v956_v62, %v1475_v32 }
 0x222   : > { %v603_v43 = vpop.f32.mrf.mxu0  ;;  %v632_v46 = vpop.f32.mrf.mxu1 }
 0x223   : > { %728 = vst.msk [vmem:[%s1481_s30] sm:$0xf] %vm727_vm1, %v870_v29  ;;  %v873_v47 = vpack.c.bf16 %v612_v51, %v612_v51  ;;  %v880_v26 = vpack.c.bf16 %v641_v42, %v641_v42  ;;  %v604_v48 = vadd.f32 %v603_v43, %v1475_v32  ;;  %v633_v49 = vadd.f32 %v632_v46, %v1475_v32 }
 0x224   : > { %v957_v54 = vpop.f32.mrf.mxu1 }
 0x225   : > { %731 = vst.msk [vmem:[%s1481_s30 + $0xc] sm:$0xf] %vm727_vm1, %v873_v47  ;;  %738 = vst.msk [vmem:[%s1481_s30 + $0x28] sm:$0xf] %vm727_vm1, %v880_v26  ;;  %v871_v55 = vpack.c.bf16 %v604_v48, %v604_v48  ;;  %v878_v63 = vpack.c.bf16 %v633_v49, %v633_v49  ;;  %v644_v56 = vadd.f32 %v957_v54, %v1475_v32 }
 0x226   : > { %v635_v31 = vpop.f32.mrf.mxu1 }
 0x227   : > { %729 = vst.msk [vmem:[%s1481_s30 + $0x4] sm:$0xf] %vm727_vm1, %v871_v55  ;;  %736 = vst.msk [vmem:[%s1481_s30 + $0x20] sm:$0xf] %vm727_vm1, %v878_v63  ;;  %v881_v6 = vpack.c.bf16 %v644_v56, %v644_v56  ;;  %v636_v57 = vadd.f32 %v635_v31, %v1475_v32 }
 0x229   : > { %739 = vst.msk [vmem:[%s1481_s30 + $0x2c] sm:$0xf] %vm727_vm1, %v881_v6  ;;  %v879_v58 = vpack.c.bf16 %v636_v57, %v636_v57 }
 0x22b   : > { %737 = vst.msk [vmem:[%s1481_s30 + $0x24] sm:$0xf] %vm727_vm1, %v879_v58 }
 0x22c   : > { %v952_v59 = vpop.f32.mrf.mxu0 }
 0x22d   : > { %v625_v60 = vadd.f32 %v952_v59, %v1475_v32 }
 0x22e   : > { %v616_v33 = vpop.f32.mrf.mxu0 }
 0x22f   : > { %v876_v36 = vpack.c.bf16 %v625_v60, %v625_v60  ;;  %v617_v9 = vadd.f32 %v616_v33, %v1475_v32 }
 0x230   : > { %v953_v37 = vpop.f32.mrf.mxu0  ;;  %v960_v0 = vpop.f32.mrf.mxu1 }
 0x231   : > { %734 = vst.msk [vmem:[%s1481_s30 + $0x18] sm:$0xf] %vm727_vm1, %v876_v36  ;;  %v874_v1 = vpack.c.bf16 %v617_v9, %v617_v9  ;;  %v628_v13 = vadd.f32 %v953_v37, %v1475_v32  ;;  %v657_v2 = vadd.f32 %v960_v0, %v1475_v32 }
 0x232   : > { %v619_v44 = vpop.f32.mrf.mxu0  ;;  %v648_v3 = vpop.f32.mrf.mxu1 }
 0x233   : > { %732 = vst.msk [vmem:[%s1481_s30 + $0x10] sm:$0xf] %vm727_vm1, %v874_v1  ;;  %v877_v4 = vpack.c.bf16 %v628_v13, %v628_v13  ;;  %v884_v5 = vpack.c.bf16 %v657_v2, %v657_v2  ;;  %v620_v7 = vadd.f32 %v619_v44, %v1475_v32  ;;  %v649_v17 = vadd.f32 %v648_v3, %v1475_v32 }
 0x234   : > { %v961_v8 = vpop.f32.mrf.mxu1 }
 0x235   : > { %735 = vst.msk [vmem:[%s1481_s30 + $0x1c] sm:$0xf] %vm727_vm1, %v877_v4  ;;  %742 = vst.msk [vmem:[%s1481_s30 + $0x38] sm:$0xf] %vm727_vm1, %v884_v5  ;;  %v875_v18 = vpack.c.bf16 %v620_v7, %v620_v7  ;;  %v882_v10 = vpack.c.bf16 %v649_v17, %v649_v17  ;;  %v660_v11 = vadd.f32 %v961_v8, %v1475_v32 }
 0x236   : > { %v651_v12 = vpop.f32.mrf.mxu1 }
 0x237   : > { %733 = vst.msk [vmem:[%s1481_s30 + $0x14] sm:$0xf] %vm727_vm1, %v875_v18  ;;  %740 = vst.msk [vmem:[%s1481_s30 + $0x30] sm:$0xf] %vm727_vm1, %v882_v10  ;;  %v885_v14 = vpack.c.bf16 %v660_v11, %v660_v11  ;;  %v652_v15 = vadd.f32 %v651_v12, %v1475_v32 }
 0x239   : > { %743 = vst.msk [vmem:[%s1481_s30 + $0x3c] sm:$0xf] %vm727_vm1, %v885_v14  ;;  %v883_v52 = vpack.c.bf16 %v652_v15, %v652_v15 }
 0x23b   : > { %741 = vst.msk [vmem:[%s1481_s30 + $0x34] sm:$0xf] %vm727_vm1, %v883_v52 }
 0x23c   : > { %1060 = shalt.err (!%p1057_p3)
}
 0x23d   : > { %s1061_s14 = scalar_lea.hbm %s1530_s9, 1024  ;;  %s1065_s23 = scalar_lea.hbm %s1584_s4, 2048 }
 0x23e   : > { %p1062_p4 = scmp.ne.s32.totalorder %s1530_s9, %s1061_s14  ;;  %p1066_p9 = scmp.lt.s32.totalorder %s1530_s9, %s1584_s4 }
 0x23f   : > { %p1067_p10 = scmp.lt.s32.totalorder %s1065_s23, %s1061_s14 }
 0x240   : > { %p1063_p7 = pnand %p1062_p4, %p1175_p5 }
 0x241   : > { %p1068_p11 = por %p1067_p10, %p1066_p9 }
 0x242   : > { %p1064_p8 = pneg %p1063_p7 }
 0x244   : > { %p1069_p12 = pnand %p1068_p11, %p1064_p8 }
 0x246   : > { %1072 = shalt.err (!%p1069_p12)
}
 0x247   : > { %s1110_s29 = smov 64   ;;  %s1111_s30 = smov 4  }
 0x248   : > { %970 = dma.vmem_to_hbm [thread:$0]  (%p1175_p5), %s1532_s6, 1024, %s1530_s9, %s1540_s19, %s1110_s29, %s1110_s29, %s1111_s30  }
 0x249 PF: > { %p976_p13 = scmp.ge.s32.totalorder %s1107_s18, 2  ;;  %s773_s5 = sand.u32 1, %s1095_s15  }
 0x24a   : > { %s774_s7 = scalar_lea.sflag [#allocation3], %s773_s5 }
 0x24b   : > { %p973_p0 = pnand %p976_p13, %p1179_p6 }
 0x24d   : > { %p974_p1 = pneg %p973_p0 }
 0x24f   : > { %1090 = dma.done.wait (%p974_p1), %s774_s7, 1024  }
 0x250   : > { %1092 = vsyncadd (%p974_p1), %s774_s7, 4294966272  ;;  %p14_p2 = scmp.ge.s32.totalorder %s1162_s21, 4   ;;  %s1587_s15 = smov %s1099_s16 }
 0x251   : > { %s1588_s16 = smov %s1103_s17  ;;  %s1589_s17 = smov %s1173_s24 }
 0x252   : > { %s1590_s18 = smov %s1162_s21  ;;  %16 = sbr.rel (!%p14_p2) target bundleno = 3 (0x3), region = 74 }
 0x257   :  { %779 = vsyncpa [#allocation3], 1 }
 0x258   :  { %781 = vsyncpa [#allocation3 + $0x1], 1 }

// kernel: ltxv_forward.9
= control target key start
LH: loop header
LB: loop body
LE: loop exit
PB: predicated region body
PF: predicated region fallthrough
CT: control target
= control target key end

     0   :  { %s8939_s0 = inlined_call_operand.vmem [shape: bf16[2,128,64], index: 0, kind: input, shape index: {}]   ;;  %s8940_s1 = inlined_call_operand.vmem [shape: bf16[2,8,64], index: 1, kind: input, shape index: {}]   ;;  %s8941_s2 = inlined_call_operand.vmem [shape: bf16[2,6,64], index: 2, kind: input, shape index: {}]   ;;  %s8942_s3 = inlined_call_operand.vmem [shape: f32[2,1,8], index: 3, kind: input, shape index: {}]   ;;  %s8943_s4 = inlined_call_operand.vmem [shape: bf16[6,64], index: 4, kind: input, shape index: {}]   ;;  %s8944_s5 = inlined_call_operand.vmem [shape: bf16[64,192], index: 5, kind: input, shape index: {}]   ;;  %s8945_s6 = inlined_call_operand.vmem [shape: bf16[1,192], index: 6, kind: input, shape index: {}]   ;;  %s8946_s7 = inlined_call_operand.vmem [shape: bf16[64,64], index: 7, kind: input, shape index: {}]   ;;  %s8947_s8 = inlined_call_operand.vmem [shape: bf16[1,64], index: 8, kind: input, shape index: {}]   ;;  %s8948_s9 = inlined_call_operand.vmem [shape: bf16[64,64], index: 9, kind: input, shape index: {}]   ;;  %s8949_s10 = inlined_call_operand.vmem [shape: bf16[1,64], index: 10, kind: input, shape index: {}]   ;;  %s8950_s11 = inlined_call_operand.vmem [shape: bf16[64,128], index: 11, kind: input, shape index: {}]   ;;  %s8951_s12 = inlined_call_operand.vmem [shape: bf16[1,128], index: 12, kind: input, shape index: {}]   ;;  %s8952_s13 = inlined_call_operand.vmem [shape: bf16[64,64], index: 13, kind: input, shape index: {}]   ;;  %s8953_s14 = inlined_call_operand.vmem [shape: bf16[1,64], index: 14, kind: input, shape index: {}]   ;;  %s8954_s15 = inlined_call_operand.vmem [shape: bf16[64,256], index: 15, kind: input, shape index: {}]   ;;  %s8955_s16 = inlined_call_operand.vmem [shape: bf16[1,256], index: 16, kind: input, shape index: {}]   ;;  %s8956_s17 = inlined_call_operand.vmem [shape: bf16[256,64], index: 17, kind: input, shape index: {}]   ;;  %s8957_s18 = inlined_call_operand.vmem [shape: bf16[1,64], index: 18, kind: input, shape index: {}]   ;;  %s8958_s19 = inlined_call_operand.vmem [shape: bf16[2,128,64], index: 19, kind: output, shape index: {}]  }
   0x1   :  { %8968 = sst [smem:[#allocation9_spill]] %s8939_s0  ;;  %s6698_s0 = smov 0  }
   0x2   :  { %8969 = sst [smem:[#allocation10_spill]] %s8940_s1 }
   0x3   :  { %8970 = sst [smem:[#allocation11_spill]] %s8941_s2 }
   0x4   :  { %8971 = sst [smem:[#allocation12_spill]] %s8942_s3 }
   0x5 LB: > { %s5277_s30 = sadd.s32 4294967295, %s6590_s0   ;;  %p5281_p0 = scmp.ge.s32.totalorder %s6590_s0, 1  ;;  %s6590_s0 = sphi %s6698_s0, %s29_s0  }
   0x6   : > { %p563_p1 = scmp.lt.s32.totalorder %s6590_s0, 3 }
   0x8   : > { %p564_p2 = pnand %p5281_p0, %p563_p1 }
   0xa   : > { %567 = sbr.rel (%p564_p2) target bundleno = 4190 (0x105e), region = 96 }
   0xf   : > { %p630_p3 = scmp.lt.s32.totalorder %s5277_s30, 1  ;;  %v686_v0 = vld [vmem:[%s8943_s4] sm:$0x7]  ;;  %v900_v1 = vlaneseq  ;;  %s8972_s24 = sld [smem:[#allocation9_spill]]  ;;  %vm689_vm0 = vcmask 523264   ;;  %vm1194_vm1 = vcmask 261120  }
  0x10   : > { %s8973_s27 = sld [smem:[#allocation11_spill]]  ;;  %v687_v3 = vunpack.c.l.bf16 %v686_v0  ;;  %s6593_s3 = smov 64   ;;  %vm6597_vm2 = vmmov 0   ;;  %vm3007_vm3 = vcmask 64512   ;;  %vm3187_vm4 = vcmask 1043456  }
  0x11   : > { %s8992_s30 = smov (!%p630_p3, %s5277_s30), 1  ;;  %v6713_v2 = vshrl.u32 %v900_v1, 7  ;;  %s6594_s26 = smov 32   ;;  %vm5172_vm5 = vcmask 519168  }
  0x12   : > { %s5444_s1 = sshll.u32 %s8992_s30, 6  ;;  %s5284_s22 = sshll.u32 %s8992_s30, 2 }
  0x13   : > { %v4305_v6 = vsub.s32 3, %v6713_v2  ;;  %v5074_v12 = vsub.s32 5, %v6713_v2  ;;  %v4285_v17 = vsub.s32 4, %v6713_v2  ;;  %s8985_s2 = sld [smem:[#allocation10_spill]] }
  0x14   : > { %s8986_s20 = sld [smem:[#allocation12_spill]] }
  0x15   : > { %s6720_s25 = scalar_lea.vmem %s8972_s24, %s5444_s1  ;;  %s8858_s24 = scalar_lea.vmem %s8958_s19, %s5444_s1 }
  0x16   : > { %s642_s28 = scalar_lea.vmem %s8973_s27, %s5284_s22  ;;  %v5463_v4 = vld [vmem:[%s6720_s25] sm:$0xff]   ;;  %v5494_v7 = vld [vmem:[%s6720_s25 + $0x8] sm:$0xff]   ;;  %v5495_v14 = vld [vmem:[%s6720_s25 + $0x10] sm:$0xff]   ;;  %s6595_s27 = smov 96  }
  0x17   : > { %v684_v5 = vld [vmem:[%s642_s28] sm:$0x7]  ;;  %v6730_v8 = vunpack.c.l.bf16 %v5463_v4  ;;  %v6732_v10 = vunpack.c.l.bf16 %v5494_v7  ;;  %v6734_v11 = vunpack.c.h.bf16 %v5463_v4  ;;  %v6737_v13 = vunpack.c.h.bf16 %v5494_v7  ;;  %v5496_v19 = vld [vmem:[%s6720_s25 + $0x18] sm:$0xff]   ;;  %v5498_v29 = vld [vmem:[%s6720_s25 + $0x28] sm:$0xff]  }
  0x18   : > { %v685_v9 = vunpack.c.l.bf16 %v684_v5  ;;  %v5497_v22 = vld [vmem:[%s6720_s25 + $0x20] sm:$0xff]   ;;  %v6759_v25 = vunpack.c.l.bf16 %v5495_v14  ;;  %v6761_v26 = vunpack.c.h.bf16 %v5495_v14  ;;  %v6766_v28 = vunpack.c.l.bf16 %v5496_v19  ;;  %v5499_v34 = vld [vmem:[%s6720_s25 + $0x30] sm:$0xff]   ;;  %v5500_v49 = vld [vmem:[%s6720_s25 + $0x38] sm:$0xff]  }
  0x19   : > { %v690_v16 = vsel %vm689_vm0, %v6730_v8, 0.0  ;;  %v696_v18 = vsel %vm689_vm0, %v6732_v10, 0.0  ;;  %v693_v20 = vsel %vm689_vm0, %v6734_v11, 0.0  ;;  %v699_v21 = vsel %vm689_vm0, %v6737_v13, 0.0  ;;  %s638_s23 = scalar_lea.vmem %s8985_s2, %s5284_s22 }
  0x1a   : > { %v6740_v15 = vadd.f32 %v687_v3, %v685_v9  ;;  %691 = vadd.xlane.f32.xlu0 %v690_v16  ;;  %697 = vadd.xlane.f32.xlu1 %v696_v18  ;;  %v6772_v31 = vunpack.c.h.bf16 %v5496_v19  ;;  %v6774_v32 = vunpack.c.l.bf16 %v5497_v22  ;;  %v6776_v33 = vunpack.c.h.bf16 %v5497_v22  ;;  %s645_s21 = scalar_lea.vmem %s8986_s20, %s8992_s30 }
  0x1b   : > { %v702_v35 = vsel %vm689_vm0, %v6759_v25, 0.0  ;;  %v705_v36 = vsel %vm689_vm0, %v6761_v26, 0.0  ;;  %v708_v37 = vsel %vm689_vm0, %v6766_v28, 0.0  ;;  %v6789_v40 = vunpack.c.l.bf16 %v5498_v29 }
  0x1c   : > { %v6754_v23 = vadd.f32 1.0, %v6740_v15  ;;  %v6757_v24 = vrot.slane %v6740_v15, %v4305_v6  ;;  %v6764_v27 = vrot.slane %v6740_v15, %v5074_v12  ;;  %v711_v38 = vsel %vm689_vm0, %v6772_v31, 0.0 }
  0x1d   : > { %v714_v39 = vsel %vm689_vm0, %v6774_v32, 0.0  ;;  %v717_v41 = vsel %vm689_vm0, %v6776_v33, 0.0  ;;  %v6793_v42 = vunpack.c.h.bf16 %v5498_v29  ;;  %v6795_v43 = vunpack.c.l.bf16 %v5499_v34 }
  0x1e   : > { %8974 = vst [vmem:[#allocation2_spill] sm:$0xff] %v6757_v24  ;;  %8975 = vst [vmem:[#allocation3_spill] sm:$0xff] %v6764_v27  ;;  %v6770_v30 = vrot.slane %v6754_v23, %v4285_v17  ;;  %694 = vadd.xlane.f32.xlu0 %v693_v20  ;;  %700 = vadd.xlane.f32.xlu1 %v699_v21  ;;  %v6797_v44 = vunpack.c.h.bf16 %v5499_v34  ;;  %v720_v45 = vsel %vm689_vm0, %v6789_v40, 0.0  ;;  %v6808_v50 = vunpack.c.l.bf16 %v5500_v49 }
  0x1f   : > { %8977 = vst [vmem:[#allocation5_spill] sm:$0xff] %v6795_v43  ;;  %v723_v46 = vsel %vm689_vm0, %v6793_v42, 0.0  ;;  %v726_v47 = vsel %vm689_vm0, %v6795_v43, 0.0  ;;  %v6810_v51 = vunpack.c.h.bf16 %v5500_v49 }
  0x20   : > { %8976 = vst [vmem:[#allocation4_spill] sm:$0xff] %v6770_v30  ;;  %8978 = vst [vmem:[#allocation6_spill] sm:$0xff] %v6797_v44  ;;  %v729_v48 = vsel %vm689_vm0, %v6797_v44, 0.0  ;;  %v732_v52 = vsel %vm689_vm0, %v6808_v50, 0.0 }
  0x21   : > { %8979 = vst [vmem:[#allocation7_spill] sm:$0xff] %v6808_v50  ;;  %8980 = vst [vmem:[#allocation8_spill] sm:$0xff] %v6810_v51  ;;  %v735_v53 = vsel %vm689_vm0, %v6810_v51, 0.0 }
  0x22   : > { %703 = vadd.xlane.f32.xlu0 %v702_v35  ;;  %706 = vadd.xlane.f32.xlu1 %v705_v36 }
  0x26   : > { %709 = vadd.xlane.f32.xlu0 %v708_v37  ;;  %712 = vadd.xlane.f32.xlu1 %v711_v38 }
  0x2a   : > { %715 = vadd.xlane.f32.xlu0 %v714_v39  ;;  %718 = vadd.xlane.f32.xlu1 %v717_v41 }
  0x2e   : > { %721 = vadd.xlane.f32.xlu0 %v720_v45  ;;  %724 = vadd.xlane.f32.xlu1 %v723_v46 }
  0x32   : > { %727 = vadd.xlane.f32.xlu0 %v726_v47  ;;  %730 = vadd.xlane.f32.xlu1 %v729_v48 }
  0x36   : > { %733 = vadd.xlane.f32.xlu0 %v732_v52  ;;  %736 = vadd.xlane.f32.xlu1 %v735_v53 }
  0xa3   : > { %v692_v54 = vpop.xlane.xlu0 %691  ;;  %v698_v55 = vpop.xlane.xlu1 %697 }
  0xa4   : > { %v739_v56 = vmul.f32 0.015625, %v692_v54  ;;  %v741_v57 = vmul.f32 0.015625, %v698_v55 }
  0xa6   : > { %v6817_v58 = vsub.f32 %v6730_v8, %v739_v56  ;;  %v6820_v59 = vsub.f32 %v6732_v10, %v741_v57 }
  0xa7   : > { %v695_v60 = vpop.xlane.xlu0 %694  ;;  %v701_v61 = vpop.xlane.xlu1 %700 }
  0xa8   : > { %v740_v62 = vmul.f32 0.015625, %v695_v60  ;;  %v742_v63 = vmul.f32 0.015625, %v701_v61  ;;  %v771_v0 = vmul.f32 %v6817_v58, %v6817_v58  ;;  %v773_v1 = vmul.f32 %v6820_v59, %v6820_v59 }
  0xaa   : > { %v6827_v3 = vsub.f32 %v6734_v11, %v740_v62  ;;  %v6830_v4 = vsub.f32 %v6737_v13, %v742_v63  ;;  %v787_v5 = vsel %vm689_vm0, %v771_v0, 0.0  ;;  %v793_v9 = vsel %vm689_vm0, %v773_v1, 0.0 }
  0xab   : > { %788 = vadd.xlane.f32.xlu0 %v787_v5  ;;  %v704_v6 = vpop.xlane.xlu0 %703  ;;  %v707_v7 = vpop.xlane.xlu1 %706 }
  0xac   : > { %v743_v12 = vmul.f32 0.015625, %v704_v6  ;;  %v744_v14 = vmul.f32 0.015625, %v707_v7  ;;  %v772_v16 = vmul.f32 %v6827_v3, %v6827_v3  ;;  %v774_v17 = vmul.f32 %v6830_v4, %v6830_v4 }
  0xae   : > { %v6839_v18 = vsub.f32 %v6759_v25, %v743_v12  ;;  %v6842_v19 = vsub.f32 %v6761_v26, %v744_v14  ;;  %v790_v20 = vsel %vm689_vm0, %v772_v16, 0.0  ;;  %v796_v29 = vsel %vm689_vm0, %v774_v17, 0.0 }
  0xaf   : > { %794 = vadd.xlane.f32.xlu0 %v793_v9  ;;  %791 = vadd.xlane.f32.xlu1 %v790_v20  ;;  %v710_v21 = vpop.xlane.xlu0 %709  ;;  %v713_v22 = vpop.xlane.xlu1 %712 }
  0xb0   : > { %v745_v34 = vmul.f32 0.015625, %v710_v21  ;;  %v746_v35 = vmul.f32 0.015625, %v713_v22  ;;  %v775_v36 = vmul.f32 %v6839_v18, %v6839_v18  ;;  %v776_v37 = vmul.f32 %v6842_v19, %v6842_v19 }
  0xb2   : > { %v6851_v38 = vsub.f32 %v6766_v28, %v745_v34  ;;  %v6854_v39 = vsub.f32 %v6772_v31, %v746_v35  ;;  %v799_v41 = vsel %vm689_vm0, %v775_v36, 0.0  ;;  %v802_v47 = vsel %vm689_vm0, %v776_v37, 0.0 }
  0xb3   : > { %797 = vadd.xlane.f32.xlu1 %v796_v29  ;;  %800 = vadd.xlane.f32.xlu0 %v799_v41  ;;  %v716_v45 = vpop.xlane.xlu0 %715  ;;  %v719_v46 = vpop.xlane.xlu1 %718 }
  0xb4   : > { %v747_v48 = vmul.f32 0.015625, %v716_v45  ;;  %v748_v49 = vmul.f32 0.015625, %v719_v46  ;;  %v777_v52 = vmul.f32 %v6851_v38, %v6851_v38  ;;  %v778_v53 = vmul.f32 %v6854_v39, %v6854_v39 }
  0xb6   : > { %v6863_v54 = vsub.f32 %v6774_v32, %v747_v48  ;;  %v6866_v55 = vsub.f32 %v6776_v33, %v748_v49  ;;  %v805_v56 = vsel %vm689_vm0, %v777_v52, 0.0  ;;  %v808_v61 = vsel %vm689_vm0, %v778_v53, 0.0  ;;  %v6112_v53 = vld [vmem:[%s8944_s5 + $0x34] ss:$8 sps:$4 sm:$0xff]  }
  0xb7   : > { %803 = vadd.xlane.f32.xlu1 %v802_v47  ;;  %806 = vadd.xlane.f32.xlu0 %v805_v56  ;;  %v722_v57 = vpop.xlane.xlu0 %721  ;;  %v725_v60 = vpop.xlane.xlu1 %724  ;;  %v6114_v56 = vld [vmem:[%s8944_s5 + $0x30] ss:$8 sps:$4 sm:$0xff]  }
  0xb8   : > { %v749_v62 = vmul.f32 0.015625, %v722_v57  ;;  %v750_v63 = vmul.f32 0.015625, %v725_v60  ;;  %v779_v0 = vmul.f32 %v6863_v54, %v6863_v54  ;;  %v780_v1 = vmul.f32 %v6866_v55, %v6866_v55  ;;  %1049 = vmatprep.subr.bf16.mxu1 %v6112_v53 }
  0xb9   : > { %1050 = vmatpush1.bf16.msra.mxu1 %v6114_v56 }
  0xba   : > { %v6875_v5 = vsub.f32 %v6789_v40, %v749_v62  ;;  %v6878_v6 = vsub.f32 %v6793_v42, %v750_v63  ;;  %v811_v7 = vsel %vm689_vm0, %v779_v0, 0.0  ;;  %v814_v14 = vsel %vm689_vm0, %v780_v1, 0.0  ;;  %v6115_v63 = vld [vmem:[%s8944_s5 + $0x24] ss:$8 sps:$4 sm:$0xff]   ;;  %v6117_v0 = vld [vmem:[%s8944_s5 + $0x20] ss:$8 sps:$4 sm:$0xff]  }
  0xbb   : > { %809 = vadd.xlane.f32.xlu1 %v808_v61  ;;  %812 = vadd.xlane.f32.xlu0 %v811_v7  ;;  %v728_v9 = vpop.xlane.xlu0 %727  ;;  %v731_v12 = vpop.xlane.xlu1 %730  ;;  %v6118_v7 = vld [vmem:[%s8944_s5 + $0x14] ss:$8 sps:$4 sm:$0xff]  }
  0xbc   : > { %v751_v16 = vmul.f32 0.015625, %v728_v9  ;;  %v752_v17 = vmul.f32 0.015625, %v731_v12  ;;  %v781_v20 = vmul.f32 %v6875_v5, %v6875_v5  ;;  %v782_v21 = vmul.f32 %v6878_v6, %v6878_v6  ;;  %1051 = vmatprep.subr.bf16.mxu1 %v6115_v63  ;;  %v6120_v9 = vld [vmem:[%s8944_s5 + $0x10] ss:$8 sps:$4 sm:$0xff]   ;;  %v6121_v12 = vld [vmem:[%s8944_s5 + $0x4] ss:$8 sps:$4 sm:$0xff]  }
  0xbd   : > { %1052 = vmatpush1.bf16.msra.mxu1 %v6117_v0 }
  0xbe   : > { %v6887_v22 = vsub.f32 %v6795_v43, %v751_v16  ;;  %v6890_v29 = vsub.f32 %v6797_v44, %v752_v17  ;;  %v817_v34 = vsel %vm689_vm0, %v781_v20, 0.0  ;;  %v820_v37 = vsel %vm689_vm0, %v782_v21, 0.0  ;;  %1053 = vmatprep.subr.bf16.mxu1 %v6118_v7 }
  0xbf   : > { %815 = vadd.xlane.f32.xlu1 %v814_v14  ;;  %818 = vadd.xlane.f32.xlu0 %v817_v34  ;;  %v734_v35 = vpop.xlane.xlu0 %733  ;;  %v737_v36 = vpop.xlane.xlu1 %736  ;;  %v6123_v14 = vld [vmem:[%s8944_s5] ss:$8 sps:$4 sm:$0xff]   ;;  %v8959_v16 = vmov 0  }
  0xc0   : > { %v753_v41 = vmul.f32 0.015625, %v734_v35  ;;  %v754_v45 = vmul.f32 0.015625, %v737_v36  ;;  %v783_v46 = vmul.f32 %v6887_v22, %v6887_v22  ;;  %v784_v47 = vmul.f32 %v6890_v29, %v6890_v29  ;;  %1073 = vmatprep.mubr.bf16.mxu1 %v8959_v16 }
  0xc1   : > { %1054 = vmatpush1.bf16.msra.mxu1 %v6120_v9 }
  0xc2   : > { %v6899_v48 = vsub.f32 %v6808_v50, %v753_v41  ;;  %v6902_v49 = vsub.f32 %v6810_v51, %v754_v45  ;;  %v823_v52 = vsel %vm689_vm0, %v783_v46, 0.0  ;;  %v826_v57 = vsel %vm689_vm0, %v784_v47, 0.0  ;;  %1055 = vmatprep.subr.bf16.mxu1 %v6121_v12 }
  0xc3   : > { %821 = vadd.xlane.f32.xlu1 %v820_v37  ;;  %824 = vadd.xlane.f32.xlu0 %v823_v52 }
  0xc4   : > { %v785_v60 = vmul.f32 %v6899_v48, %v6899_v48  ;;  %v786_v61 = vmul.f32 %v6902_v49, %v6902_v49 }
  0xc5   : > { %1056 = vmatpush1.bf16.msra.mxu1 %v6123_v14 }
  0xc6   : > { %v829_v62 = vsel %vm689_vm0, %v785_v60, 0.0  ;;  %v832_v1 = vsel %vm689_vm0, %v786_v61, 0.0  ;;  %v902_v61 = vsub.s32 1, %v6713_v2 }
  0xc7   : > { %827 = vadd.xlane.f32.xlu1 %v826_v57  ;;  %830 = vadd.xlane.f32.xlu0 %v829_v62 }
  0xc8   : > { %v6939_v14 = vrot.slane %v6754_v23, %v902_v61 }
  0xcb   : > { %833 = vadd.xlane.f32.xlu1 %v832_v1 }
 0x134   : > { %v789_v17 = vpop.xlane.xlu0 %788 }
 0x135   : > { %v835_v20 = vmul.f32 0.015625, %v789_v17  ;;  %v6942_v17 = vsub.s32 0, %v6713_v2 }
 0x137   : > { %v851_v21 = vadd.f32 1e-06, %v835_v20 }
 0x138   : > { %v792_v34 = vpop.xlane.xlu1 %791  ;;  %v795_v35 = vpop.xlane.xlu0 %794 }
 0x139   : > { %6168 = vrsqrt.f32 %v851_v21  ;;  %v836_v36 = vmul.f32 0.015625, %v792_v34  ;;  %v837_v37 = vmul.f32 0.015625, %v795_v35 }
 0x13b   : > { %v852_v41 = vadd.f32 1e-06, %v836_v36  ;;  %v853_v45 = vadd.f32 1e-06, %v837_v37  ;;  %v6947_v37 = vrot.slane %v6740_v15, %v6942_v17 }
 0x13c   : > { %v798_v46 = vpop.xlane.xlu1 %797  ;;  %v801_v47 = vpop.xlane.xlu0 %800 }
 0x13d   : > { %6170 = vrsqrt.f32 %v852_v41  ;;  %v838_v52 = vmul.f32 0.015625, %v798_v46  ;;  %v839_v56 = vmul.f32 0.015625, %v801_v47 }
 0x13e   : > { %6172 = vrsqrt.f32 %v853_v45 }
 0x13f   : > { %v854_v53 = vadd.f32 1e-06, %v838_v52  ;;  %v855_v62 = vadd.f32 1e-06, %v839_v56 }
 0x140   : > { %v804_v57 = vpop.xlane.xlu1 %803  ;;  %v807_v0 = vpop.xlane.xlu0 %806 }
 0x141   : > { %6174 = vrsqrt.f32 %v854_v53  ;;  %v840_v60 = vmul.f32 0.015625, %v804_v57  ;;  %v841_v12 = vmul.f32 0.015625, %v807_v0 }
 0x143   : > { %v856_v63 = vadd.f32 1e-06, %v840_v60  ;;  %v857_v35 = vadd.f32 1e-06, %v841_v12 }
 0x144   : > { %v810_v1 = vpop.xlane.xlu1 %809  ;;  %v813_v41 = vpop.xlane.xlu0 %812 }
 0x145   : > { %6176 = vrsqrt.f32 %v856_v63  ;;  %v842_v7 = vmul.f32 0.015625, %v810_v1 }
 0x146   : > { %v6169_v9 = vpop.eup %6168  ;;  %6178 = vrsqrt.f32 %v855_v62 }
 0x147   : > { %v883_v20 = vmul.f32 %v6169_v9, %v6817_v58  ;;  %v858_v21 = vadd.f32 1e-06, %v842_v7  ;;  %v843_v58 = vmul.f32 0.015625, %v813_v41 }
 0x148   : > { %v816_v36 = vpop.xlane.xlu1 %815 }
 0x149   : > { %v904_v23 = vmul.f32 %v6939_v14, %v883_v20  ;;  %6180 = vrsqrt.f32 %v858_v21  ;;  %v844_v47 = vmul.f32 0.015625, %v816_v36  ;;  %v859_v7 = vadd.f32 1e-06, %v843_v58  ;;  %v819_v20 = vpop.xlane.xlu0 %818 }
 0x14a   : > { %v6171_v34 = vpop.eup %6170  ;;  %6182 = vrsqrt.f32 %v857_v35 }
 0x14b   : > { %v884_v45 = vmul.f32 %v6171_v34, %v6827_v3  ;;  %v6173_v46 = vpop.eup %6172  ;;  %v924_v56 = vadd.f32 %v6947_v37, %v904_v23  ;;  %v860_v62 = vadd.f32 1e-06, %v844_v47  ;;  %v845_v34 = vmul.f32 0.015625, %v819_v20 }
 0x14c   : > { %v885_v60 = vmul.f32 %v6173_v46, %v6820_v59  ;;  %v822_v0 = vpop.xlane.xlu1 %821 }
 0x14d   : > { %v905_v52 = vmul.f32 %v6939_v14, %v884_v45  ;;  %6184 = vrsqrt.f32 %v860_v62  ;;  %v846_v21 = vmul.f32 0.015625, %v822_v0 }
 0x14e   : > { %v6175_v53 = vpop.eup %6174  ;;  %v906_v9 = vmul.f32 %v6939_v14, %v885_v60  ;;  %6186 = vrsqrt.f32 %v859_v7 }
 0x14f   : > { %v925_v57 = vadd.f32 %v6947_v37, %v905_v52  ;;  %v886_v61 = vmul.f32 %v6175_v53, %v6830_v4  ;;  %v862_v41 = vadd.f32 1e-06, %v846_v21  ;;  %v861_v53 = vadd.f32 1e-06, %v845_v34 }
 0x150   : > { %v926_v35 = vadd.f32 %v6947_v37, %v906_v9  ;;  %v828_v47 = vpop.xlane.xlu1 %827 }
 0x151   : > { %v940_v3 = vpack.c.bf16 %v925_v57, %v924_v56  ;;  %v907_v1 = vmul.f32 %v6939_v14, %v886_v61  ;;  %v825_v56 = vpop.xlane.xlu0 %824  ;;  %6188 = vrsqrt.f32 %v862_v41 }
 0x152   : > { %v6177_v63 = vpop.eup %6176  ;;  %6190 = vrsqrt.f32 %v861_v53  ;;  %v847_v60 = vmul.f32 0.015625, %v825_v56 }
 0x153   : > { %5296 = vmatmul.mubr.msk.bf16.vlgmr.msra.gmra.mxu1 %vm689_vm0, %v940_v3  ;;  %v6179_v12 = vpop.eup %6178  ;;  %v927_v59 = vadd.f32 %v6947_v37, %v907_v1  ;;  %v888_v4 = vmul.f32 %v6177_v63, %v6842_v19  ;;  %v848_v19 = vmul.f32 0.015625, %v828_v47 }
 0x154   : > { %1083 = vmatprep.mubr.bf16.mxu1 %v8959_v16  ;;  %v887_v36 = vmul.f32 %v6179_v12, %v6839_v18  ;;  %v834_v7 = vpop.xlane.xlu1 %833  ;;  %v863_v9 = vadd.f32 1e-06, %v847_v60 }
 0x155   : > { %v941_v45 = vpack.c.bf16 %v927_v59, %v926_v35  ;;  %v909_v23 = vmul.f32 %v6939_v14, %v888_v4  ;;  %v864_v3 = vadd.f32 1e-06, %v848_v19  ;;  %v831_v21 = vpop.xlane.xlu0 %830 }
 0x156   : > { %v6181_v46 = vpop.eup %6180  ;;  %v908_v58 = vmul.f32 %v6939_v14, %v887_v36  ;;  %v849_v4 = vmul.f32 0.015625, %v831_v21 }
 0x157   : > { %v6183_v52 = vpop.eup %6182  ;;  %v929_v57 = vadd.f32 %v6947_v37, %v909_v23  ;;  %v890_v18 = vmul.f32 %v6181_v46, %v6854_v39  ;;  %6192 = vrsqrt.f32 %v864_v3  ;;  %v850_v39 = vmul.f32 0.015625, %v834_v7 }
 0x158   : > { %v928_v61 = vadd.f32 %v6947_v37, %v908_v58  ;;  %v889_v62 = vmul.f32 %v6183_v52, %v6851_v38  ;;  %6194 = vrsqrt.f32 %v863_v9  ;;  %v865_v46 = vadd.f32 1e-06, %v849_v4 }
 0x159   : > { %v911_v0 = vmul.f32 %v6939_v14, %v890_v18  ;;  %v866_v36 = vadd.f32 1e-06, %v850_v39 }
 0x15a   : > { %v942_v63 = vpack.c.bf16 %v929_v57, %v928_v61  ;;  %v6185_v1 = vpop.eup %6184  ;;  %v910_v12 = vmul.f32 %v6939_v14, %v889_v62 }
 0x15b   : > { %5297 = vmatmul.mubr.msk.bf16.gmra.mxu1 %vm689_vm0, %v941_v45  ;;  %v6187_v20 = vpop.eup %6186  ;;  %v931_v59 = vadd.f32 %v6947_v37, %v911_v0  ;;  %v892_v38 = vmul.f32 %v6185_v1, %v6866_v55  ;;  %6196 = vrsqrt.f32 %v866_v36 }
 0x15c   : > { %1093 = vmatprep.mubr.bf16.mxu1 %v8959_v16  ;;  %v930_v34 = vadd.f32 %v6947_v37, %v910_v12  ;;  %v891_v35 = vmul.f32 %v6187_v20, %v6863_v54  ;;  %6198 = vrsqrt.f32 %v865_v46 }
 0x15d   : > { %v913_v45 = vmul.f32 %v6939_v14, %v892_v38 }
 0x15e   : > { %v943_v41 = vpack.c.bf16 %v931_v59, %v930_v34  ;;  %v6189_v23 = vpop.eup %6188  ;;  %v912_v47 = vmul.f32 %v6939_v14, %v891_v35 }
 0x15f   : > { %v6191_v52 = vpop.eup %6190  ;;  %v933_v55 = vadd.f32 %v6947_v37, %v913_v45  ;;  %v894_v53 = vmul.f32 %v6189_v23, %v6878_v6 }
 0x160   : > { %v932_v54 = vadd.f32 %v6947_v37, %v912_v47  ;;  %v893_v58 = vmul.f32 %v6191_v52, %v6875_v5 }
 0x161   : > { %v915_v19 = vmul.f32 %v6939_v14, %v894_v53 }
 0x162   : > { %v944_v56 = vpack.c.bf16 %v933_v55, %v932_v54  ;;  %v914_v18 = vmul.f32 %v6939_v14, %v893_v58 }
 0x163   : > { %5298 = vmatmul.mubr.msk.bf16.gmra.mxu1 %vm689_vm0, %v942_v63  ;;  %v935_v61 = vadd.f32 %v6947_v37, %v915_v19 }
 0x164   : > { %1103 = vmatprep.mubr.bf16.mxu1 %v8959_v16  ;;  %v6193_v57 = vpop.eup %6192  ;;  %v934_v62 = vadd.f32 %v6947_v37, %v914_v18 }
 0x165   : > { %v6195_v60 = vpop.eup %6194  ;;  %v896_v6 = vmul.f32 %v6193_v57, %v6890_v29 }
 0x166   : > { %v895_v3 = vmul.f32 %v6195_v60, %v6887_v22  ;;  %v945_v5 = vpack.c.bf16 %v935_v61, %v934_v62 }
 0x167   : > { %v917_v63 = vmul.f32 %v6939_v14, %v896_v6 }
 0x168   : > { %v6197_v0 = vpop.eup %6196  ;;  %v916_v1 = vmul.f32 %v6939_v14, %v895_v3 }
 0x169   : > { %v6199_v7 = vpop.eup %6198  ;;  %v937_v9 = vadd.f32 %v6947_v37, %v917_v63  ;;  %v898_v12 = vmul.f32 %v6197_v0, %v6902_v49 }
 0x16a   : > { %v936_v29 = vadd.f32 %v6947_v37, %v916_v1  ;;  %v897_v20 = vmul.f32 %v6199_v7, %v6899_v48  ;;  %v956_v48 = vld [vmem:[%s8945_s6] sm:$0x3] }
 0x16b   : > { %5299 = vmatmul.mubr.msk.bf16.gmra.mxu1 %vm689_vm0, %v943_v41  ;;  %v919_v21 = vmul.f32 %v6939_v14, %v898_v12  ;;  %v957_v49 = vunpack.c.l.bf16 %v956_v48 }
 0x16c   : > { %1113 = vmatprep.mubr.bf16.mxu1 %v8959_v16  ;;  %v946_v22 = vpack.c.bf16 %v937_v9, %v936_v29  ;;  %v918_v39 = vmul.f32 %v6939_v14, %v897_v20  ;;  %v7043_v20 = vsub.s32 2, %v6713_v2 }
 0x16d   : > { %v939_v59 = vadd.f32 %v6947_v37, %v919_v21  ;;  %v962_v34 = vrot.slane %v957_v49, %v6942_v17 }
 0x16e   : > { %v938_v38 = vadd.f32 %v6947_v37, %v918_v39  ;;  %v966_v48 = vrot.slane %v957_v49, %v7043_v20 }
 0x16f   : > { %v7016_v36 = vrot.slane %v962_v34, %v6942_v17 }
 0x170   : > { %v947_v4 = vpack.c.bf16 %v939_v59, %v938_v38 }
 0x173   : > { %5300 = vmatmul.mubr.msk.bf16.gmra.mxu1 %vm689_vm0, %v944_v56 }
 0x174   : > { %1123 = vmatprep.mubr.bf16.mxu1 %v8959_v16 }
 0x17b   : > { %5301 = vmatmul.mubr.msk.bf16.gmra.mxu1 %vm689_vm0, %v945_v5 }
 0x17c   : > { %1133 = vmatprep.mubr.bf16.mxu1 %v8959_v16 }
 0x183   : > { %5302 = vmatmul.mubr.msk.bf16.gmra.mxu1 %vm689_vm0, %v946_v22 }
 0x184   : > { %1143 = vmatprep.mubr.bf16.mxu1 %v8959_v16 }
 0x18b   : > { %5303 = vmatmul.mubr.msk.bf16.gmra.mxu1 %vm689_vm0, %v947_v4 }
 0x213   : > { %v1075_v35 = vpop.f32.mrf.mxu1 }
 0x214   : > { %v1076_v45 = vadd.f32 %v1075_v35, %v7016_v36 }
 0x215   : > { %v7018_v14 = vpop.f32.mrf.mxu1 }
 0x217   : > { %v1079_v41 = vpop.f32.mrf.mxu1 }
 0x218   : > { %v1080_v37 = vadd.f32 %v1079_v41, %v7016_v36 }
 0x219   : > { %v7022_v23 = vpop.f32.mrf.mxu1 }
 0x21a   : > { %v7024_v46 = vpack.c.bf16 %v1080_v37, %v1076_v45 }
 0x21b   : > { %v7026_v47 = vpop.f32.mrf.mxu1 }
 0x21c   : > { %5722 = vmatprep.mubr.msk.bf16.mxu1 %vm1194_vm1, %v7024_v46 }
 0x21d   : > { %v7030_v52 = vpop.f32.mrf.mxu1 }
 0x21f   : > { %v1089_v55 = vpop.f32.mrf.mxu1 }
 0x221   : > { %v7032_v53 = vpop.f32.mrf.mxu1 }
 0x223   : > { %v1095_v54 = vpop.f32.mrf.mxu1 }
 0x225   : > { %v7034_v58 = vpop.f32.mrf.mxu1 }
 0x227   : > { %v1099_v56 = vpop.f32.mrf.mxu1 }
 0x229   : > { %v7036_v19 = vpop.f32.mrf.mxu1 }
 0x22b   : > { %v1105_v57 = vpop.f32.mrf.mxu1 }
 0x22d   : > { %v7038_v18 = vpop.f32.mrf.mxu1 }
 0x22f   : > { %v1109_v60 = vpop.f32.mrf.mxu1 }
 0x231   : > { %v7040_v61 = vpop.f32.mrf.mxu1 }
 0x233   : > { %v1115_v6 = vpop.f32.mrf.mxu1 }
 0x234   : > { %v1116_v45 = vadd.f32 %v1115_v6, %v7016_v36 }
 0x235   : > { %v1117_v62 = vpop.f32.mrf.mxu1 }
 0x237   : > { %v1119_v3 = vpop.f32.mrf.mxu1 }
 0x238   : > { %v1120_v2 = vadd.f32 %v1119_v3, %v7016_v36 }
 0x239   : > { %v1121_v5 = vpop.f32.mrf.mxu1 }
 0x23b   : > { %v1125_v63 = vpop.f32.mrf.mxu1 }
 0x23c   : > { %v1126_v34 = vadd.f32 %v1125_v63, %v7016_v36  ;;  %v1100_v63 = vadd.f32 %v1099_v56, %v7016_v36  ;;  %v1106_v56 = vadd.f32 %v1105_v57, %v7016_v36  ;;  %v1086_v57 = vadd.f32 %v7026_v47, %v7016_v36 }
 0x23d   : > { %v1127_v0 = vpop.f32.mrf.mxu1 }
 0x23f   : > { %v1129_v1 = vpop.f32.mrf.mxu1 }
 0x240   : > { %v1130_v59 = vadd.f32 %v1129_v1, %v7016_v36  ;;  %v7059_v1 = vrot.slane %v966_v48, %v6942_v17  ;;  %v1096_v48 = vadd.f32 %v1095_v54, %v7016_v36  ;;  %v1090_v54 = vadd.f32 %v1089_v55, %v7016_v36 }
 0x241   : > { %v1131_v7 = vpop.f32.mrf.mxu1 }
 0x242   : > { %v7055_v41 = vpack.c.bf16 %v1130_v59, %v1126_v34  ;;  %v7099_v55 = vpack.c.bf16 %v1090_v54, %v1086_v57 }
 0x243   : > { %v1135_v9 = vpop.f32.mrf.mxu1 }
 0x244   : > { %v1136_v22 = vadd.f32 %v1135_v9, %v7016_v36 }
 0x245   : > { %v1137_v12 = vpop.f32.mrf.mxu1 }
 0x246   : > { %v1138_v34 = vadd.f32 %v1137_v12, %v7059_v1  ;;  %v1128_v12 = vadd.f32 %v1127_v0, %v7059_v1 }
 0x247   : > { %v1139_v29 = vpop.f32.mrf.mxu1 }
 0x248   : > { %v1140_v21 = vadd.f32 %v1139_v29, %v7016_v36  ;;  %v7066_v29 = vpack.c.bf16 %v1120_v2, %v1116_v45  ;;  %v1132_v2 = vadd.f32 %v1131_v7, %v7059_v1  ;;  %v1122_v7 = vadd.f32 %v1121_v5, %v7059_v1 }
 0x249   : > { %v1141_v39 = vpop.f32.mrf.mxu1  ;;  %v1108_v5 = vadd.f32 %v7038_v18, %v7059_v1  ;;  %v1092_v18 = vadd.f32 %v7032_v53, %v7059_v1  ;;  %v1078_v53 = vadd.f32 %v7018_v14, %v7059_v1 }
 0x24a   : > { %v7048_v38 = vpack.c.bf16 %v1140_v21, %v1136_v22  ;;  %v1142_v22 = vadd.f32 %v1141_v39, %v7059_v1  ;;  %v7083_v39 = vpack.c.bf16 %v1100_v63, %v1096_v48  ;;  %v1165_v45 = vpack.c.bf16 %v1132_v2, %v1128_v12 }
 0x24b   : > { %v1145_v4 = vpop.f32.mrf.mxu1 }
 0x24c   : > { %1190 = vrot.lane.b32.xlu1 %v7048_v38, %s6593_s3  ;;  %v1146_v9 = vadd.f32 %v1145_v4, %v7016_v36  ;;  %v1110_v4 = vadd.f32 %v1109_v60, %v7016_v36 }
 0x24d   : > { %v1147_v35 = vpop.f32.mrf.mxu1 }
 0x24e   : > { %v1148_v6 = vadd.f32 %v1147_v35, %v7059_v1  ;;  %v1167_v35 = vpack.c.bf16 %v1142_v22, %v1138_v34  ;;  %v7088_v60 = vpack.c.bf16 %v1110_v4, %v1106_v56 }
 0x24f   : > { %v1149_v37 = vpop.f32.mrf.mxu1 }
 0x250   : > { %v1150_v49 = vadd.f32 %v1149_v37, %v7016_v36  ;;  %1188 = vrot.lane.b32.xlu1 %v7055_v41, %s6593_s3  ;;  %v1112_v36 = vadd.f32 %v7040_v61, %v7059_v1  ;;  %v1098_v61 = vadd.f32 %v7034_v58, %v7059_v1  ;;  %v1082_v58 = vadd.f32 %v7022_v23, %v7059_v1 }
 0x251   : > { %v1151_v3 = vpop.f32.mrf.mxu1 }
 0x252   : > { %v7070_v21 = vpack.c.bf16 %v1150_v49, %v1146_v9  ;;  %v1152_v59 = vadd.f32 %v1151_v3, %v7059_v1  ;;  %v1118_v9 = vadd.f32 %v1117_v62, %v7059_v1  ;;  %v1102_v62 = vadd.f32 %v7036_v19, %v7059_v1 }
 0x253   : > { %v7116_v0 = vpack.c.bf16 %v1112_v36, %v1108_v5  ;;  %v1088_v19 = vadd.f32 %v7030_v52, %v7059_v1  ;;  %v7149_v52 = vpack.c.bf16 %v1082_v58, %v1078_v53 }
 0x254   : > { %v7076_v37 = vpack.c.bf16 %v1152_v59, %v1148_v6  ;;  %1186 = vrot.lane.b32.xlu1 %v7066_v29, %s6593_s3  ;;  %1192 = vrot.lane.b32.xlu0 %v7070_v21, %s6593_s3  ;;  %v1163_v47 = vpack.c.bf16 %v1122_v7, %v1118_v9  ;;  %v7127_v49 = vpack.c.bf16 %v1102_v62, %v1098_v61 }
 0x255   : > { %v7139_v63 = vpack.c.bf16 %v1092_v18, %v1088_v19 }
 0x256   : > { %5738 = vmatprep.subr.bf16.mxu0 %v7076_v37 }
 0x257   : > { %5739 = vmatpush3.bf16.msra.mxu0 %v7076_v37 }
 0x258   : > { %1182 = vrot.lane.b32.xlu1 %v7083_v39, %s6593_s3  ;;  %5740 = vmatprep.subr.bf16.mxu0 %v1167_v35 }
 0x259   : > { %1184 = vrot.lane.b32.xlu0 %v7088_v60, %s6593_s3 }
 0x25b   : > { %5741 = vmatpush3.bf16.msra.mxu0 %v1167_v35 }
 0x25c   : > { %1178 = vrot.lane.b32.xlu1 %v7024_v46, %s6593_s3  ;;  %5742 = vmatprep.subr.bf16.mxu0 %v1165_v45 }
 0x25d   : > { %1180 = vrot.lane.b32.xlu0 %v7099_v55, %s6593_s3 }
 0x25f   : > { %5743 = vmatpush3.bf16.msra.mxu0 %v1165_v45 }
 0x260   : > { %1633 = vrot.lane.b32.xlu1 %v7048_v38, %s6594_s26  ;;  %5744 = vmatprep.subr.bf16.mxu0 %v1163_v47 }
 0x261   : > { %1635 = vrot.lane.b32.xlu0 %v7070_v21, %s6594_s26 }
 0x263   : > { %5745 = vmatpush3.bf16.msra.mxu0 %v1163_v47 }
 0x264   : > { %1629 = vrot.lane.b32.xlu1 %v7066_v29, %s6594_s26  ;;  %5746 = vmatprep.subr.bf16.mxu0 %v7116_v0 }
 0x265   : > { %1631 = vrot.lane.b32.xlu0 %v7055_v41, %s6594_s26 }
 0x267   : > { %5747 = vmatpush3.bf16.msra.mxu0 %v7116_v0 }
 0x268   : > { %1625 = vrot.lane.b32.xlu1 %v7083_v39, %s6594_s26  ;;  %5748 = vmatprep.subr.bf16.mxu0 %v7127_v49 }
 0x269   : > { %1627 = vrot.lane.b32.xlu0 %v7088_v60, %s6594_s26 }
 0x26b   : > { %5749 = vmatpush3.bf16.msra.mxu0 %v7127_v49 }
 0x26c   : > { %1621 = vrot.lane.b32.xlu1 %v7024_v46, %s6594_s26  ;;  %5750 = vmatprep.subr.bf16.mxu0 %v7139_v63 }
 0x26d   : > { %1623 = vrot.lane.b32.xlu0 %v7099_v55, %s6594_s26 }
 0x26f   : > { %5751 = vmatpush3.bf16.msra.mxu0 %v7139_v63 }
 0x270   : > { %1607 = vrot.lane.b32.xlu1 %v7099_v55, %s6595_s27  ;;  %5752 = vmatprep.subr.bf16.mxu0 %v7149_v52 }
 0x271   : > { %1605 = vrot.lane.b32.xlu0 %v7024_v46, %s6595_s27 }
 0x273   : > { %5753 = vmatpush3.bf16.msra.mxu0 %v7149_v52 }
 0x274   : > { %1611 = vrot.lane.b32.xlu1 %v7088_v60, %s6595_s27 }
 0x275   : > { %1609 = vrot.lane.b32.xlu0 %v7083_v39, %s6595_s27 }
 0x278   : > { %1615 = vrot.lane.b32.xlu1 %v7055_v41, %s6595_s27 }
 0x279   : > { %1613 = vrot.lane.b32.xlu0 %v7066_v29, %s6595_s27 }
 0x27c   : > { %1619 = vrot.lane.b32.xlu1 %v7070_v21, %s6595_s27 }
 0x27d   : > { %1617 = vrot.lane.b32.xlu0 %v7048_v38, %s6595_s27 }
 0x280   : > { %1938 = vrot.lane.b32.xlu1 %v1167_v35, %s6595_s27 }
 0x281   : > { %1936 = vrot.lane.b32.xlu0 %v1165_v45, %s6595_s27 }
 0x284   : > { %1934 = vrot.lane.b32.xlu1 %v1163_v47, %s6595_s27 }
 0x285   : > { %1940 = vrot.lane.b32.xlu0 %v7076_v37, %s6595_s27 }
 0x2be   : > { %v1191_v46 = vpop.permute.xlu1 %1190 }
 0x2bf   : > { %v1238_v22 = vsel %vm1194_vm1, %v1191_v46, 0 }
 0x2c2   : > { %v1189_v6 = vpop.permute.xlu1 %1188 }
 0x2c3   : > { %v1235_v48 = vsel %vm1194_vm1, %v1189_v6, 0 }
 0x2c6   : > { %v1193_v14 = vpop.permute.xlu0 %1192  ;;  %v1187_v34 = vpop.permute.xlu1 %1186 }
 0x2c7   : > { %5998 = vmatprep.subr.msk.bf16.mxu1 %vm1194_vm1, %v1193_v14  ;;  %v1241_v23 = vsel %vm1194_vm1, %v1193_v14, 0  ;;  %v1232_v2 = vsel %vm1194_vm1, %v1187_v34, 0 }
 0x2c8   : > { %5707 = vmatpush3.bf16.xpose.msra.mxu1 %v1241_v23 }
 0x2c9   : > { %5999 = vmatprep.subr.msk.bf16.mxu1 %vm1194_vm1, %v1191_v46 }
 0x2ca   : > { %v1183_v57 = vpop.permute.xlu1 %1182 }
 0x2cb   : > { %v1185_v1 = vpop.permute.xlu0 %1184  ;;  %v1226_v9 = vsel %vm1194_vm1, %v1183_v57, 0 }
 0x2cc   : > { %v1229_v12 = vsel %vm1194_vm1, %v1185_v1, 0 }
 0x2ce   : > { %v1179_v62 = vpop.permute.xlu1 %1178 }
 0x2cf   : > { %v1181_v3 = vpop.permute.xlu0 %1180  ;;  %v1220_v61 = vsel %vm1194_vm1, %v1179_v62, 0 }
 0x2d0   : > { %5709 = vmatpush3.bf16.xpose.msra.mxu1 %v1238_v22  ;;  %v1223_v5 = vsel %vm1194_vm1, %v1181_v3, 0 }
 0x2d1   : > { %6000 = vmatprep.subr.msk.bf16.mxu1 %vm1194_vm1, %v1189_v6 }
 0x2d2   : > { %v1634_v19 = vpop.permute.xlu1 %1633 }
 0x2d3   : > { %v1636_v59 = vpop.permute.xlu0 %1635  ;;  %v1680_v58 = vsel %vm1194_vm1, %v1634_v19, 0 }
 0x2d4   : > { %v1683_v18 = vsel %vm1194_vm1, %v1636_v59, 0 }
 0x2d7   : > { %v1632_v4 = vpop.permute.xlu0 %1631 }
 0x2d8   : > { %5711 = vmatpush3.bf16.xpose.msra.mxu1 %v1235_v48 }
 0x2d9   : > { %6001 = vmatprep.subr.msk.bf16.mxu1 %vm1194_vm1, %v1187_v34 }
 0x2db   : > { %v1628_v37 = vpop.permute.xlu0 %1627 }
 0x2df   : > { %v1624_v56 = vpop.permute.xlu0 %1623 }
 0x2e0   : > { %5713 = vmatpush3.bf16.xpose.msra.mxu1 %v1232_v2 }
 0x2e1   : > { %6002 = vmatprep.subr.msk.bf16.mxu1 %vm1194_vm1, %v1185_v1 }
 0x2e3   : > { %v1606_v35 = vpop.permute.xlu0 %1605 }
 0x2e7   : > { %v1610_v54 = vpop.permute.xlu0 %1609 }
 0x2e8   : > { %5715 = vmatpush3.bf16.xpose.msra.mxu1 %v1229_v12 }
 0x2e9   : > { %6003 = vmatprep.subr.msk.bf16.mxu1 %vm1194_vm1, %v1183_v57 }
 0x2eb   : > { %v1614_v7 = vpop.permute.xlu0 %1613 }
 0x2ef   : > { %v1618_v45 = vpop.permute.xlu0 %1617 }
 0x2f0   : > { %5717 = vmatpush3.bf16.xpose.msra.mxu1 %v1226_v9 }
 0x2f1   : > { %6004 = vmatprep.subr.msk.bf16.mxu1 %vm1194_vm1, %v1181_v3 }
 0x2f3   : > { %v7188_v36 = vpop.permute.xlu0 %1936 }
 0x2f7   : > { %v7190_v47 = vpop.permute.xlu0 %1940 }
 0x2f8   : > { %5802 = vmatprep.subr.bf16.mxu0 %v7190_v47  ;;  %5719 = vmatpush3.bf16.xpose.msra.mxu1 %v1223_v5 }
 0x2f9   : > { %6005 = vmatprep.subr.msk.bf16.mxu1 %vm1194_vm1, %v1179_v62 }
 0x300   : > { %5721 = vmatpush3.bf16.xpose.msra.mxu1 %v1220_v61 }
 0x301   : > { %6006 = vmatprep.subr.msk.bf16.mxu1 %vm1194_vm1, %v1636_v59 }
 0x307   : > { %5723 = vmatmul.mubr.msk.bf16.vlgmr.msra.gmra.mxu1 %vm1194_vm1, %v7099_v55  ;;  %v1677_v55 = vsel %vm1194_vm1, %v1632_v4, 0 }
 0x308   : > { %5726 = vmatprep.mubr.msk.bf16.mxu1 %vm1194_vm1, %v7083_v39  ;;  %5771 = vmatpush3.bf16.xpose.msra.mxu1 %v1683_v18  ;;  %v1630_v39 = vpop.permute.xlu1 %1629 }
 0x309   : > { %6007 = vmatprep.subr.msk.bf16.mxu1 %vm1194_vm1, %v1634_v19 }
 0x30f   : > { %5727 = vmatmul.mubr.msk.bf16.gmra.mxu1 %vm1194_vm1, %v7088_v60  ;;  %v1626_v60 = vpop.permute.xlu1 %1625 }
 0x310   : > { %5730 = vmatprep.mubr.msk.bf16.mxu1 %vm1194_vm1, %v7066_v29  ;;  %5773 = vmatpush3.bf16.xpose.msra.mxu1 %v1680_v58  ;;  %v1674_v29 = vsel %vm1194_vm1, %v1630_v39, 0 }
 0x311   : > { %6008 = vmatprep.subr.msk.bf16.mxu1 %vm1194_vm1, %v1632_v4 }
 0x313   : > { %v1622_v53 = vpop.permute.xlu1 %1621 }
 0x314   : > { %v1662_v14 = vsel %vm1194_vm1, %v1622_v53, 0 }
 0x317   : > { %5731 = vmatmul.mubr.msk.bf16.gmra.mxu1 %vm1194_vm1, %v7055_v41  ;;  %v1671_v41 = vsel %vm1194_vm1, %v1628_v37, 0  ;;  %v1608_v23 = vpop.permute.xlu1 %1607 }
 0x318   : > { %5734 = vmatprep.mubr.msk.bf16.mxu1 %vm1194_vm1, %v7048_v38  ;;  %5775 = vmatpush3.bf16.xpose.msra.mxu1 %v1677_v55  ;;  %v1668_v38 = vsel %vm1194_vm1, %v1626_v60, 0 }
 0x319   : > { %6009 = vmatprep.subr.msk.bf16.mxu1 %vm1194_vm1, %v1630_v39 }
 0x31b   : > { %v1612_v46 = vpop.permute.xlu1 %1611 }
 0x31f   : > { %5735 = vmatmul.mubr.msk.bf16.gmra.mxu1 %vm1194_vm1, %v7070_v21  ;;  %v1665_v21 = vsel %vm1194_vm1, %v1624_v56, 0  ;;  %v1616_v1 = vpop.permute.xlu1 %1615 }
 0x320   : > { %5777 = vmatpush3.bf16.xpose.msra.mxu1 %v1674_v29  ;;  %5786 = vmatprep.mubr.msk.bf16.mxu1 %vm1194_vm1, %v1606_v35 }
 0x321   : > { %6010 = vmatprep.subr.msk.bf16.mxu1 %vm1194_vm1, %v1628_v37 }
 0x323   : > { %v1620_v3 = vpop.permute.xlu1 %1619 }
 0x328   : > { %5779 = vmatpush3.bf16.xpose.msra.mxu1 %v1671_v41 }
 0x329   : > { %6011 = vmatprep.subr.msk.bf16.mxu1 %vm1194_vm1, %v1626_v60 }
 0x330   : > { %5781 = vmatpush3.bf16.xpose.msra.mxu1 %v1668_v38 }
 0x331   : > { %6012 = vmatprep.subr.msk.bf16.mxu1 %vm1194_vm1, %v1624_v56 }
 0x338   : > { %5783 = vmatpush3.bf16.xpose.msra.mxu1 %v1665_v21 }
 0x339   : > { %6013 = vmatprep.subr.msk.bf16.mxu1 %vm1194_vm1, %v1622_v53 }
 0x340   : > { %5785 = vmatpush3.bf16.xpose.msra.mxu1 %v1662_v14 }
 0x347   : > { %5787 = vmatmul.mubr.msk.bf16.vlgmr.msra.gmra.mxu1 %vm1194_vm1, %v1608_v23 }
 0x348   : > { %5790 = vmatprep.mubr.msk.bf16.mxu1 %vm1194_vm1, %v1610_v54 }
 0x34f   : > { %5791 = vmatmul.mubr.msk.bf16.gmra.mxu1 %vm1194_vm1, %v1612_v46 }
 0x350   : > { %5794 = vmatprep.mubr.msk.bf16.mxu1 %vm1194_vm1, %v1614_v7 }
 0x357   : > { %5795 = vmatmul.mubr.msk.bf16.gmra.mxu1 %vm1194_vm1, %v1616_v1 }
 0x358   : > { %5798 = vmatprep.mubr.msk.bf16.mxu1 %vm1194_vm1, %v1618_v45 }
 0x35f   : > { %5799 = vmatmul.mubr.msk.bf16.gmra.mxu1 %vm1194_vm1, %v1620_v3 }
 0x3c7   : > { %v5724_v22 = vpop.f32.mrf.mxu1 }
 0x3c8   : > { %v7234_v6 = vmul.f32 0.17677669, %v5724_v22 }
 0x3c9   : > { %v1277_v59 = vpop.f32.mrf.mxu1 }
 0x3ca   : > { %1360 = vmax.xlane.f32.xlu0 %v7234_v6  ;;  %v7237_v48 = vmul.f32 0.17677669, %v1277_v59 }
 0x3cb   : > { %v5725_v4 = vpop.f32.mrf.mxu1 }
 0x3cc   : > { %v7242_v2 = vmul.f32 0.17677669, %v5725_v4 }
 0x3cd   : > { %v1280_v34 = vpop.f32.mrf.mxu1 }
 0x3ce   : > { %v7239_v37 = vmul.f32 0.17677669, %v1280_v34  ;;  %1356 = vmax.xlane.f32.xlu0 %v7237_v48 }
 0x3cf   : > { %v5728_v56 = vpop.f32.mrf.mxu1 }
 0x3d0   : > { %1358 = vmax.xlane.f32.xlu1 %v7239_v37  ;;  %v7246_v12 = vmul.f32 0.17677669, %v5728_v56 }
 0x3d1   : > { %v1293_v35 = vpop.f32.mrf.mxu1 }
 0x3d2   : > { %1362 = vmax.xlane.f32.xlu0 %v7242_v2  ;;  %v7252_v9 = vmul.f32 0.17677669, %v1293_v35 }
 0x3d3   : > { %v5729_v54 = vpop.f32.mrf.mxu1 }
 0x3d4   : > { %v7248_v57 = vmul.f32 0.17677669, %v5729_v54 }
 0x3d5   : > { %v1296_v7 = vpop.f32.mrf.mxu1 }
 0x3d6   : > { %1368 = vmax.xlane.f32.xlu0 %v7246_v12  ;;  %1370 = vmax.xlane.f32.xlu1 %v7248_v57  ;;  %v7254_v5 = vmul.f32 0.17677669, %v1296_v7 }
 0x3d7   : > { %v5732_v45 = vpop.f32.mrf.mxu1 }
 0x3d8   : > { %v7258_v18 = vmul.f32 0.17677669, %v5732_v45 }
 0x3d9   : > { %v1309_v62 = vpop.f32.mrf.mxu1 }
 0x3da   : > { %1364 = vmax.xlane.f32.xlu0 %v7252_v9  ;;  %1366 = vmax.xlane.f32.xlu1 %v7254_v5  ;;  %v7264_v39 = vmul.f32 0.17677669, %v1309_v62 }
 0x3db   : > { %v5733_v61 = vpop.f32.mrf.mxu1 }
 0x3dc   : > { %v7260_v19 = vmul.f32 0.17677669, %v5733_v61 }
 0x3dd   : > { %v1312_v58 = vpop.f32.mrf.mxu1 }
 0x3de   : > { %1376 = vmax.xlane.f32.xlu0 %v7258_v18  ;;  %1378 = vmax.xlane.f32.xlu1 %v7260_v19  ;;  %v7266_v29 = vmul.f32 0.17677669, %v1312_v58 }
 0x3df   : > { %v5736_v55 = vpop.f32.mrf.mxu1 }
 0x3e0   : > { %v7270_v38 = vmul.f32 0.17677669, %v5736_v55 }
 0x3e1   : > { %v1325_v41 = vpop.f32.mrf.mxu1 }
 0x3e2   : > { %1372 = vmax.xlane.f32.xlu0 %v7264_v39  ;;  %1374 = vmax.xlane.f32.xlu1 %v7266_v29  ;;  %v7276_v14 = vmul.f32 0.17677669, %v1325_v41 }
 0x3e3   : > { %v5737_v60 = vpop.f32.mrf.mxu1 }
 0x3e4   : > { %v7272_v21 = vmul.f32 0.17677669, %v5737_v60 }
 0x3e5   : > { %v1328_v53 = vpop.f32.mrf.mxu1 }
 0x3e6   : > { %1384 = vmax.xlane.f32.xlu0 %v7270_v38  ;;  %1386 = vmax.xlane.f32.xlu1 %v7272_v21  ;;  %v7278_v23 = vmul.f32 0.17677669, %v1328_v53 }
 0x3ea   : > { %1380 = vmax.xlane.f32.xlu0 %v7276_v14  ;;  %1382 = vmax.xlane.f32.xlu1 %v7278_v23 }
 0x407   : > { %v5788_v46 = vpop.f32.mrf.mxu1 }
 0x408   : > { %v7282_v1 = vmul.f32 0.17677669, %v5788_v46 }
 0x409   : > { %v1719_v3 = vpop.f32.mrf.mxu1 }
 0x40a   : > { %1802 = vmax.xlane.f32.xlu0 %v7282_v1  ;;  %v7285_v59 = vmul.f32 0.17677669, %v1719_v3 }
 0x40b   : > { %v5789_v22 = vpop.f32.mrf.mxu1 }
 0x40c   : > { %v7287_v4 = vmul.f32 0.17677669, %v5789_v22 }
 0x40d   : > { %v1722_v34 = vpop.f32.mrf.mxu1 }
 0x40e   : > { %1798 = vmax.xlane.f32.xlu0 %v7285_v59  ;;  %1804 = vmax.xlane.f32.xlu1 %v7287_v4  ;;  %v7291_v35 = vmul.f32 0.17677669, %v1722_v34 }
 0x40f   : > { %v5792_v56 = vpop.f32.mrf.mxu1 }
 0x410   : > { %v7293_v54 = vmul.f32 0.17677669, %v5792_v56 }
 0x411   : > { %v1735_v7 = vpop.f32.mrf.mxu1 }
 0x412   : > { %1800 = vmax.xlane.f32.xlu1 %v7291_v35  ;;  %1810 = vmax.xlane.f32.xlu0 %v7293_v54  ;;  %v7297_v62 = vmul.f32 0.17677669, %v1735_v7 }
 0x413   : > { %v5793_v45 = vpop.f32.mrf.mxu1 }
 0x414   : > { %v7302_v41 = vmul.f32 0.17677669, %v5793_v45  ;;  %v7326_v45 = vpop.permute.xlu1 %1938 }
 0x415   : > { %v1738_v61 = vpop.f32.mrf.mxu1 }
 0x416   : > { %v7299_v58 = vmul.f32 0.17677669, %v1738_v61  ;;  %1806 = vmax.xlane.f32.xlu1 %v7297_v62 }
 0x417   : > { %v5796_v55 = vpop.f32.mrf.mxu1 }
 0x418   : > { %1808 = vmax.xlane.f32.xlu0 %v7299_v58  ;;  %v7305_v53 = vmul.f32 0.17677669, %v5796_v55 }
 0x419   : > { %v1751_v60 = vpop.f32.mrf.mxu1 }
 0x41a   : > { %1812 = vmax.xlane.f32.xlu1 %v7302_v41  ;;  %v7308_v3 = vmul.f32 0.17677669, %v1751_v60 }
 0x41b   : > { %v5797_v46 = vpop.f32.mrf.mxu1 }
 0x41c   : > { %1818 = vmax.xlane.f32.xlu0 %v7305_v53  ;;  %v7314_v56 = vmul.f32 0.17677669, %v5797_v46  ;;  %v7330_v46 = vpop.permute.xlu1 %1934 }
 0x41d   : > { %v1754_v22 = vpop.f32.mrf.mxu1 }
 0x41e   : > { %v7311_v34 = vmul.f32 0.17677669, %v1754_v22  ;;  %1814 = vmax.xlane.f32.xlu1 %v7308_v3 }
 0x41f   : > { %v5800_v7 = vpop.f32.mrf.mxu1 }
 0x420   : > { %1816 = vmax.xlane.f32.xlu0 %v7311_v34  ;;  %v7333_v22 = vmul.f32 0.17677669, %v5800_v7 }
 0x421   : > { %v1767_v61 = vpop.f32.mrf.mxu1 }
 0x422   : > { %1820 = vmax.xlane.f32.xlu1 %v7314_v56  ;;  %v7328_v55 = vmul.f32 0.17677669, %v1767_v61 }
 0x433   : > { %1930 = vrot.lane.b32.xlu1 %v7127_v49, %s6595_s27  ;;  %v5801_v49 = vpop.f32.mrf.mxu1 }
 0x434   : > { %v7339_v30 = vmul.f32 0.17677669, %v5801_v49 }
 0x435   : > { %v1770_v27 = vpop.f32.mrf.mxu1 }
 0x436   : > { %1932 = vrot.lane.b32.xlu0 %v7116_v0, %s6595_s27  ;;  %v7342_v50 = vmul.f32 0.17677669, %v1770_v27 }
 0x437   : > { %1928 = vrot.lane.b32.xlu1 %v7139_v63, %s6595_s27 }
 0x43b   : > { %1926 = vrot.lane.b32.xlu1 %v7149_v52, %s6595_s27 }
 0x453   : > { %v1361_v60 = vpop.xlane.xlu0 %1360 }
 0x454   : > { %v1390_v0 = vsub.f32 %v7234_v6, %v1361_v60 }
 0x455   : > { %1822 = vmax.xlane.f32.xlu0 %v7328_v55 }
 0x456   : > { %v1408_v44 = vmul.f32 1.442695, %v1390_v0 }
 0x457   : > { %v1357_v63 = vpop.xlane.xlu0 %1356 }
 0x458   : > { %v1388_v16 = vsub.f32 %v7237_v48, %v1357_v63 }
 0x459   : > { %v1359_v52 = vpop.xlane.xlu1 %1358  ;;  %1826 = vmax.xlane.f32.xlu0 %v7333_v22 }
 0x45a   : > { %v1404_v24 = vmul.f32 1.442695, %v1388_v16  ;;  %v1389_v61 = vsub.f32 %v7239_v37, %v1359_v52 }
 0x45b   : > { %v1363_v51 = vpop.xlane.xlu0 %1362 }
 0x45c   : > { %v1406_v43 = vmul.f32 1.442695, %v1389_v61  ;;  %v1391_v7 = vsub.f32 %v7242_v2, %v1363_v51  ;;  %6200 = vpow2.f32 %v1404_v24 }
 0x45d   : > { %1828 = vmax.xlane.f32.xlu0 %v7339_v30 }
 0x45e   : > { %6202 = vpow2.f32 %v1406_v43  ;;  %v1410_v6 = vmul.f32 1.442695, %v1391_v7 }
 0x45f   : > { %6204 = vpow2.f32 %v1408_v44  ;;  %v1371_v48 = vpop.xlane.xlu1 %1370  ;;  %1824 = vmax.xlane.f32.xlu1 %v7342_v50  ;;  %v1369_v16 = vpop.xlane.xlu0 %1368 }
 0x460   : > { %6206 = vpow2.f32 %v1410_v6  ;;  %v1395_v37 = vsub.f32 %v7248_v57, %v1371_v48  ;;  %v1394_v60 = vsub.f32 %v7246_v12, %v1369_v16 }
 0x462   : > { %v1418_v49 = vmul.f32 1.442695, %v1395_v37  ;;  %v1416_v0 = vmul.f32 1.442695, %v1394_v60 }
 0x463   : > { %v1367_v51 = vpop.xlane.xlu1 %1366  ;;  %v1365_v27 = vpop.xlane.xlu0 %1364 }
 0x464   : > { %v1393_v24 = vsub.f32 %v7254_v5, %v1367_v51  ;;  %v1392_v2 = vsub.f32 %v7252_v9, %v1365_v27  ;;  %6208 = vpow2.f32 %v1418_v49 }
 0x465   : > { %6210 = vpow2.f32 %v1416_v0 }
 0x466   : > { %v1414_v43 = vmul.f32 1.442695, %v1393_v24  ;;  %v1412_v44 = vmul.f32 1.442695, %v1392_v2 }
 0x467   : > { %v1379_v63 = vpop.xlane.xlu1 %1378  ;;  %v1377_v52 = vpop.xlane.xlu0 %1376 }
 0x468   : > { %6212 = vpow2.f32 %v1414_v43  ;;  %v1399_v61 = vsub.f32 %v7260_v19, %v1379_v63  ;;  %v1398_v57 = vsub.f32 %v7258_v18, %v1377_v52 }
 0x469   : > { %6214 = vpow2.f32 %v1412_v44  ;;  %v7352_v12 = vpop.eup %6200 }
 0x46a   : > { %v1426_v7 = vmul.f32 1.442695, %v1399_v61  ;;  %v1424_v5 = vmul.f32 1.442695, %v1398_v57 }
 0x46b   : > { %v7354_v6 = vpop.eup %6202  ;;  %v1375_v48 = vpop.xlane.xlu1 %1374 }
 0x46c   : > { %v1373_v9 = vpop.xlane.xlu0 %1372  ;;  %v7356_v16 = vpop.eup %6204  ;;  %v1397_v37 = vsub.f32 %v7266_v29, %v1375_v48  ;;  %v1468_v19 = vpack.c.bf16 %v7354_v6, %v7352_v12  ;;  %6216 = vpow2.f32 %v1426_v7 }
 0x46d   : > { %v1396_v60 = vsub.f32 %v7264_v39, %v1373_v9  ;;  %v7362_v49 = vpop.eup %6206  ;;  %6218 = vpow2.f32 %v1424_v5 }
 0x46e   : > { %v1422_v18 = vmul.f32 1.442695, %v1397_v37  ;;  %5754 = vmatprep.mubr.bf16.mxu0 %v1468_v19  ;;  %v1469_v51 = vpack.c.bf16 %v7362_v49, %v7356_v16 }
 0x46f   : > { %v1420_v0 = vmul.f32 1.442695, %v1396_v60  ;;  %v1387_v27 = vpop.xlane.xlu1 %1386 }
 0x470   : > { %v1385_v24 = vpop.xlane.xlu0 %1384  ;;  %6220 = vpow2.f32 %v1422_v18  ;;  %v1403_v29 = vsub.f32 %v7272_v21, %v1387_v27  ;;  %5755 = vmatmul.mubr.bf16.vlgmr.msra.gmra.mxu0 %v1469_v51 }
 0x471   : > { %v1402_v39 = vsub.f32 %v7270_v38, %v1385_v24  ;;  %6222 = vpow2.f32 %v1420_v0  ;;  %5803 = vmatpush3.bf16.msra.mxu0 %v7190_v47  ;;  %v7370_v43 = vpop.eup %6208 }
 0x472   : > { %v1434_v2 = vmul.f32 1.442695, %v1403_v29  ;;  %5804 = vmatprep.subr.bf16.mxu0 %v7326_v45  ;;  %v7372_v61 = vpop.eup %6210 }
 0x473   : > { %v1432_v44 = vmul.f32 1.442695, %v1402_v39  ;;  %v1383_v63 = vpop.xlane.xlu1 %1382 }
 0x474   : > { %v1381_v52 = vpop.xlane.xlu0 %1380  ;;  %v1401_v57 = vsub.f32 %v7278_v23, %v1383_v63  ;;  %6224 = vpow2.f32 %v1434_v2  ;;  %v1471_v23 = vpack.c.bf16 %v7370_v43, %v7372_v61 }
 0x475   : > { %v1400_v21 = vsub.f32 %v7276_v14, %v1381_v52  ;;  %v7376_v7 = vpop.eup %6212  ;;  %5805 = vmatpush3.bf16.msra.mxu0 %v7326_v45  ;;  %6226 = vpow2.f32 %v1432_v44 }
 0x476   : > { %v7379_v38 = vpop.eup %6214  ;;  %v1430_v47 = vmul.f32 1.442695, %v1401_v57  ;;  %5806 = vmatprep.subr.bf16.mxu0 %v7188_v36 }
 0x477   : > { %v1428_v5 = vmul.f32 1.442695, %v1400_v21  ;;  %v1470_v48 = vpack.c.bf16 %v7376_v7, %v7379_v38 }
 0x478   : > { %6228 = vpow2.f32 %v1430_v47 }
 0x479   : > { %6230 = vpow2.f32 %v1428_v5  ;;  %5758 = vmatprep.mubr.bf16.mxu0 %v1470_v48  ;;  %5807 = vmatpush3.bf16.msra.mxu0 %v7188_v36  ;;  %v7388_v14 = vpop.eup %6216 }
 0x47a   : > { %5759 = vmatmul.mubr.bf16.gmra.mxu0 %v1471_v23  ;;  %5808 = vmatprep.subr.bf16.mxu0 %v7330_v46  ;;  %v7390_v45 = vpop.eup %6218 }
 0x47b   : > { %v1473_v19 = vpack.c.bf16 %v7388_v14, %v7390_v45 }
 0x47d   : > { %v7392_v9 = vpop.eup %6220  ;;  %5809 = vmatpush3.bf16.msra.mxu0 %v7330_v46 }
 0x47e   : > { %v7395_v37 = vpop.eup %6222 }
 0x47f   : > { %v1472_v60 = vpack.c.bf16 %v7392_v9, %v7395_v37 }
 0x481   : > { %5762 = vmatprep.mubr.bf16.mxu0 %v1472_v60  ;;  %v7401_v36 = vpop.eup %6224 }
 0x482   : > { %5763 = vmatmul.mubr.bf16.gmra.mxu0 %v1473_v19  ;;  %v7403_v18 = vpop.eup %6226 }
 0x483   : > { %v1475_v27 = vpack.c.bf16 %v7401_v36, %v7403_v18 }
 0x485   : > { %v7405_v0 = vpop.eup %6228 }
 0x486   : > { %v7407_v51 = vpop.eup %6230 }
 0x487   : > { %v1474_v46 = vpack.c.bf16 %v7405_v0, %v7407_v51 }
 0x489   : > { %5766 = vmatprep.mubr.bf16.mxu0 %v1474_v46 }
 0x48a   : > { %5767 = vmatmul.mubr.bf16.gmra.mxu0 %v1475_v27 }
 0x493   : > { %v1803_v24 = vpop.xlane.xlu0 %1802 }
 0x494   : > { %v1832_v29 = vsub.f32 %v7282_v1, %v1803_v24 }
 0x496   : > { %v1850_v39 = vmul.f32 1.442695, %v1832_v29 }
 0x497   : > { %v1805_v2 = vpop.xlane.xlu1 %1804  ;;  %v1799_v44 = vpop.xlane.xlu0 %1798 }
 0x498   : > { %6232 = vpow2.f32 %v1850_v39  ;;  %v1830_v63 = vsub.f32 %v7285_v59, %v1799_v44  ;;  %v1833_v57 = vsub.f32 %v7287_v4, %v1805_v2 }
 0x49a   : > { %v1846_v52 = vmul.f32 1.442695, %v1830_v63  ;;  %v1852_v19 = vmul.f32 1.442695, %v1833_v57 }
 0x49b   : > { %v1801_v21 = vpop.xlane.xlu1 %1800  ;;  %v1811_v47 = vpop.xlane.xlu0 %1810 }
 0x49c   : > { %v1831_v5 = vsub.f32 %v7291_v35, %v1801_v21  ;;  %v1836_v48 = vsub.f32 %v7293_v54, %v1811_v47  ;;  %6234 = vpow2.f32 %v1846_v52 }
 0x49e   : > { %v1848_v23 = vmul.f32 1.442695, %v1831_v5  ;;  %v1858_v60 = vmul.f32 1.442695, %v1836_v48 }
 0x49f   : > { %v1807_v1 = vpop.xlane.xlu1 %1806 }
 0x4a0   : > { %6236 = vpow2.f32 %v1848_v23  ;;  %v1834_v46 = vsub.f32 %v7297_v62, %v1807_v1 }
 0x4a1   : > { %6238 = vpow2.f32 %v1858_v60  ;;  %v1809_v27 = vpop.xlane.xlu0 %1808 }
 0x4a2   : > { %v1854_v59 = vmul.f32 1.442695, %v1834_v46  ;;  %v1835_v24 = vsub.f32 %v7299_v58, %v1809_v27  ;;  %6240 = vpow2.f32 %v1852_v19 }
 0x4a3   : > { %v1813_v4 = vpop.xlane.xlu1 %1812 }
 0x4a4   : > { %6242 = vpow2.f32 %v1854_v59  ;;  %v1856_v29 = vmul.f32 1.442695, %v1835_v24  ;;  %v1837_v35 = vsub.f32 %v7302_v41, %v1813_v4 }
 0x4a5   : > { %v6233_v54 = vpop.eup %6232  ;;  %v1819_v39 = vpop.xlane.xlu0 %1818 }
 0x4a6   : > { %v1840_v2 = vsub.f32 %v7305_v53, %v1819_v39  ;;  %1882 = vadd.xlane.f32.xlu0 %v6233_v54  ;;  %6244 = vpow2.f32 %v1856_v29  ;;  %v1860_v63 = vmul.f32 1.442695, %v1837_v35 }
 0x4a7   : > { %v1815_v44 = vpop.xlane.xlu1 %1814 }
 0x4a8   : > { %v1866_v62 = vmul.f32 1.442695, %v1840_v2  ;;  %v1838_v52 = vsub.f32 %v7308_v3, %v1815_v44 }
 0x4a9   : > { %v1817_v57 = vpop.xlane.xlu0 %1816  ;;  %v6235_v21 = vpop.eup %6234 }
 0x4aa   : > { %6246 = vpow2.f32 %v1866_v62  ;;  %v1862_v58 = vmul.f32 1.442695, %v1838_v52  ;;  %v1839_v47 = vsub.f32 %v7311_v34, %v1817_v57  ;;  %1878 = vadd.xlane.f32.xlu0 %v6235_v21 }
 0x4ab   : > { %v1821_v5 = vpop.xlane.xlu1 %1820  ;;  %6248 = vpow2.f32 %v1860_v63 }
 0x4ac   : > { %v1864_v41 = vmul.f32 1.442695, %v1839_v47  ;;  %v1841_v48 = vsub.f32 %v7314_v56, %v1821_v5  ;;  %6250 = vpow2.f32 %v1862_v58 }
 0x4ad   : > { %v6237_v53 = vpop.eup %6236  ;;  %v1933_v23 = vpop.permute.xlu0 %1932 }
 0x4ae   : > { %v6239_v60 = vpop.eup %6238  ;;  %1880 = vadd.xlane.f32.xlu1 %v6237_v53  ;;  %5810 = vmatprep.subr.bf16.mxu0 %v1933_v23  ;;  %v1910_v19 = vpack.c.bf16 %v6237_v53, %v6235_v21  ;;  %6252 = vpow2.f32 %v1864_v41  ;;  %v1868_v46 = vmul.f32 1.442695, %v1841_v48 }
 0x4af   : > { %1890 = vadd.xlane.f32.xlu0 %v6239_v60  ;;  %v1931_v3 = vpop.permute.xlu1 %1930  ;;  %5811 = vmatpush3.bf16.msra.mxu0 %v1933_v23  ;;  %v6241_v1 = vpop.eup %6240 }
 0x4b0   : > { %5812 = vmatprep.subr.bf16.mxu0 %v1931_v3  ;;  %5818 = vmatprep.mubr.bf16.mxu0 %v1910_v19  ;;  %6254 = vpow2.f32 %v1868_v46  ;;  %v1911_v35 = vpack.c.bf16 %v6241_v1, %v6233_v54  ;;  %v6124_v19 = vld [vmem:[%s8946_s7 + $0x18] sm:$0xff]  }
 0x4b1   : > { %v6243_v34 = vpop.eup %6242 }
 0x4b2   : > { %1884 = vadd.xlane.f32.xlu1 %v6241_v1 }
 0x4b3   : > { %1886 = vadd.xlane.f32.xlu0 %v6243_v34  ;;  %v1929_v27 = vpop.permute.xlu1 %1928  ;;  %5813 = vmatpush3.bf16.msra.mxu0 %v1931_v3  ;;  %v6245_v56 = vpop.eup %6244  ;;  %v6125_v3 = vld [vmem:[%s8946_s7 + $0x10] sm:$0xff]  }
 0x4b4   : > { %5814 = vmatprep.subr.bf16.mxu0 %v1929_v27  ;;  %v1912_v2 = vpack.c.bf16 %v6245_v56, %v6243_v34 }
 0x4b6   : > { %1888 = vadd.xlane.f32.xlu1 %v6245_v56 }
 0x4b7   : > { %v6247_v59 = vpop.eup %6246  ;;  %v1927_v24 = vpop.permute.xlu1 %1926  ;;  %5815 = vmatpush3.bf16.msra.mxu0 %v1929_v27 }
 0x4b8   : > { %1898 = vadd.xlane.f32.xlu0 %v6247_v59  ;;  %5816 = vmatprep.subr.bf16.mxu0 %v1927_v24  ;;  %v6249_v4 = vpop.eup %6248 }
 0x4b9   : > { %v6251_v29 = vpop.eup %6250  ;;  %v1913_v63 = vpack.c.bf16 %v6249_v4, %v6239_v60 }
 0x4ba   : > { %1892 = vadd.xlane.f32.xlu1 %v6249_v4 }
 0x4bb   : > { %5817 = vmatpush3.bf16.msra.mxu0 %v1927_v24  ;;  %v6253_v39 = vpop.eup %6252 }
 0x4bc   : > { %1894 = vadd.xlane.f32.xlu0 %v6251_v29  ;;  %v1914_v62 = vpack.c.bf16 %v6253_v39, %v6251_v29  ;;  %5834 = vmatprep.subr.bf16.mxu0 %v6124_v19 }
 0x4bd   : > { %v6255_v44 = vpop.eup %6254 }
 0x4be   : > { %1896 = vadd.xlane.f32.xlu1 %v6253_v39  ;;  %5819 = vmatmul.mubr.bf16.vlgmr.msra.gmra.mxu0 %v1911_v35  ;;  %v1915_v54 = vpack.c.bf16 %v6255_v44, %v6247_v59 }
 0x4bf   : > { %5822 = vmatprep.mubr.bf16.mxu0 %v1912_v2  ;;  %5835 = vmatpush3.bf16.msra.mxu0 %v6124_v19 }
 0x4c0   : > { %1436 = vadd.xlane.f32.xlu0 %v7352_v12  ;;  %5836 = vmatprep.subr.bf16.mxu0 %v6125_v3 }
 0x4c2   : > { %1900 = vadd.xlane.f32.xlu1 %v6255_v44 }
 0x4c3   : > { %5837 = vmatpush3.bf16.msra.mxu0 %v6125_v3 }
 0x4c4   : > { %1440 = vadd.xlane.f32.xlu0 %v7356_v16 }
 0x4c6   : > { %1438 = vadd.xlane.f32.xlu1 %v7354_v6  ;;  %5823 = vmatmul.mubr.bf16.gmra.mxu0 %v1913_v63  ;;  %v6126_v63 = vld [vmem:[%s8946_s7 + $0x8] sm:$0xff]  }
 0x4c7   : > { %5826 = vmatprep.mubr.bf16.mxu0 %v1914_v62  ;;  %5838 = vmatprep.subr.bf16.mxu0 %v6126_v63 }
 0x4c8   : > { %1444 = vadd.xlane.f32.xlu0 %v7379_v38  ;;  %5839 = vmatpush3.bf16.msra.mxu0 %v6126_v63 }
 0x4ca   : > { %1442 = vadd.xlane.f32.xlu1 %v7362_v49 }
 0x4cc   : > { %1448 = vadd.xlane.f32.xlu0 %v7372_v61 }
 0x4ce   : > { %1446 = vadd.xlane.f32.xlu1 %v7376_v7  ;;  %5827 = vmatmul.mubr.bf16.gmra.mxu0 %v1915_v54 }
 0x4d0   : > { %1452 = vadd.xlane.f32.xlu0 %v7395_v37 }
 0x4d2   : > { %1450 = vadd.xlane.f32.xlu1 %v7370_v43 }
 0x4d4   : > { %1456 = vadd.xlane.f32.xlu0 %v7390_v45 }
 0x4d6   : > { %1454 = vadd.xlane.f32.xlu1 %v7392_v9 }
 0x4da   : > { %1458 = vadd.xlane.f32.xlu1 %v7388_v14 }
 0x4de   : > { %v1823_v12 = vpop.xlane.xlu0 %1822 }
 0x4df   : > { %v1842_v6 = vsub.f32 %v7328_v55, %v1823_v12 }
 0x4e1   : > { %v1870_v38 = vmul.f32 1.442695, %v1842_v6  ;;  %v6127_v6 = vld [vmem:[%s8946_s7] sm:$0xff]  }
 0x4e2   : > { %v1827_v16 = vpop.xlane.xlu0 %1826  ;;  %5840 = vmatprep.subr.bf16.mxu0 %v6127_v6 }
 0x4e3   : > { %v1844_v49 = vsub.f32 %v7333_v22, %v1827_v16  ;;  %5841 = vmatpush3.bf16.msra.mxu0 %v6127_v6 }
 0x4e5   : > { %v1874_v61 = vmul.f32 1.442695, %v1844_v49 }
 0x4e6   : > { %v1829_v7 = vpop.xlane.xlu0 %1828 }
 0x4e7   : > { %6256 = vpow2.f32 %v1874_v61  ;;  %v1845_v37 = vsub.f32 %v7339_v30, %v1829_v7 }
 0x4e8   : > { %v1825_v52 = vpop.xlane.xlu1 %1824  ;;  %6258 = vpow2.f32 %v1870_v38 }
 0x4e9   : > { %v1876_v43 = vmul.f32 1.442695, %v1845_v37  ;;  %v1843_v45 = vsub.f32 %v7342_v50, %v1825_v52 }
 0x4eb   : > { %6260 = vpow2.f32 %v1876_v43  ;;  %v1872_v9 = vmul.f32 1.442695, %v1843_v45 }
 0x4ed   : > { %6262 = vpow2.f32 %v1872_v9 }
 0x4f4   : > { %v6257_v14 = vpop.eup %6256 }
 0x4f5   : > { %1906 = vadd.xlane.f32.xlu0 %v6257_v14  ;;  %v6259_v55 = vpop.eup %6258 }
 0x4f8   : > { %v6261_v57 = vpop.eup %6260 }
 0x4f9   : > { %1902 = vadd.xlane.f32.xlu0 %v6259_v55  ;;  %1908 = vadd.xlane.f32.xlu1 %v6261_v57  ;;  %v1917_v58 = vpack.c.bf16 %v6261_v57, %v6257_v14 }
 0x4fa   : > { %v6263_v22 = vpop.eup %6262 }
 0x4fb   : > { %v1916_v21 = vpack.c.bf16 %v6263_v22, %v6259_v55 }
 0x4fd   : > { %5830 = vmatprep.mubr.bf16.mxu0 %v1916_v21  ;;  %1904 = vadd.xlane.f32.xlu1 %v6263_v22 }
 0x4fe   : > { %5831 = vmatmul.mubr.bf16.gmra.mxu0 %v1917_v58 }
 0x52f   : > { %v1883_v27 = vpop.xlane.xlu0 %1882 }
 0x530   : > { %v7441_v30 = vpop.f32.mrf.mxu0  ;;  %6264 = vrcp.f32 %v1883_v27 }
 0x532   : > { %v7443_v47 = vpop.f32.mrf.mxu0 }
 0x533   : > { %v1879_v24 = vpop.xlane.xlu0 %1878 }
 0x534   : > { %v7445_v50 = vpop.f32.mrf.mxu0 }
 0x536   : > { %v7447_v5 = vpop.f32.mrf.mxu0 }
 0x537   : > { %v1881_v1 = vpop.xlane.xlu1 %1880 }
 0x538   : > { %v1891_v39 = vpop.xlane.xlu0 %1890 }
 0x53a   : > { %v7449_v41 = vpop.f32.mrf.mxu0 }
 0x53b   : > { %v1885_v56 = vpop.xlane.xlu1 %1884 }
 0x53c   : > { %v7451_v48 = vpop.f32.mrf.mxu0  ;;  %6266 = vrcp.f32 %v1885_v56  ;;  %v1887_v62 = vpop.xlane.xlu0 %1886 }
 0x53d   : > { %6268 = vrcp.f32 %v1879_v24  ;;  %v6265_v61 = vpop.eup %6264 }
 0x53e   : > { %v7453_v53 = vpop.f32.mrf.mxu0  ;;  %6270 = vrcp.f32 %v1881_v1 }
 0x53f   : > { %v1889_v4 = vpop.xlane.xlu1 %1888  ;;  %6272 = vrcp.f32 %v1887_v62 }
 0x540   : > { %v7455_v23 = vpop.f32.mrf.mxu0  ;;  %6274 = vrcp.f32 %v1889_v4 }
 0x541   : > { %v1899_v14 = vpop.xlane.xlu0 %1898 }
 0x542   : > { %v7457_v60 = vpop.f32.mrf.mxu0 }
 0x543   : > { %v1893_v2 = vpop.xlane.xlu1 %1892 }
 0x544   : > { %v7465_v46 = vpop.f32.mrf.mxu0  ;;  %6276 = vrcp.f32 %v1893_v2 }
 0x545   : > { %6278 = vrcp.f32 %v1891_v39 }
 0x546   : > { %v7467_v34 = vpop.f32.mrf.mxu0 }
 0x547   : > { %v7480_v54 = vpop.xlane.xlu1 %1896 }
 0x548   : > { %v7469_v59 = vpop.f32.mrf.mxu0 }
 0x549   : > { %v6267_v38 = vpop.eup %6266 }
 0x54a   : > { %v7471_v29 = vpop.f32.mrf.mxu0  ;;  %v6269_v52 = vpop.eup %6268 }
 0x54b   : > { %v1901_v7 = vpop.xlane.xlu1 %1900  ;;  %v6271_v9 = vpop.eup %6270 }
 0x54c   : > { %v7473_v35 = vpop.f32.mrf.mxu0  ;;  %6280 = vrcp.f32 %v1901_v7  ;;  %v6273_v27 = vpop.eup %6272 }
 0x54d   : > { %6282 = vrcp.f32 %v1899_v14  ;;  %v6275_v56 = vpop.eup %6274 }
 0x54e   : > { %v7475_v44 = vpop.f32.mrf.mxu0  ;;  %6284 = vrcp.f32 %v7480_v54 }
 0x550   : > { %v7482_v12 = vpop.f32.mrf.mxu0 }
 0x551   : > { %v6277_v2 = vpop.eup %6276 }
 0x57e   : > { %v5820_v16 = vpop.f32.mrf.mxu0 }
 0x57f   : > { %v2065_v43 = vmul.f32 %v6265_v61, %v5820_v16  ;;  %v6279_v16 = vpop.eup %6278  ;;  %v1895_v61 = vpop.xlane.xlu0 %1894 }
 0x580   : > { %v1984_v49 = vpop.f32.mrf.mxu0  ;;  %v6281_v7 = vpop.eup %6280  ;;  %6286 = vrcp.f32 %v1895_v61 }
 0x581   : > { %v2063_v57 = vmul.f32 %v6269_v52, %v1984_v49 }
 0x582   : > { %v5821_v37 = vpop.f32.mrf.mxu0 }
 0x583   : > { %v2066_v45 = vmul.f32 %v6267_v38, %v5821_v37 }
 0x584   : > { %v1987_v55 = vpop.f32.mrf.mxu0 }
 0x585   : > { %v6032_v22 = vpack.i.bf16 %v2066_v45, %v2065_v43  ;;  %v2064_v21 = vmul.f32 %v6271_v9, %v1987_v55  ;;  %v6283_v45 = vpop.eup %6282  ;;  %v1439_v9 = vpop.xlane.xlu1 %1438 }
 0x586   : > { %v5824_v58 = vpop.f32.mrf.mxu0  ;;  %v1437_v55 = vpop.xlane.xlu0 %1436 }
 0x587   : > { %v6037_v19 = vpack.i.bf16 %v2064_v21, %v2063_v57  ;;  %6033 = vrot.lane.b32.xlu1 %v6032_v22, %s6594_s26  ;;  %v2069_v38 = vmul.f32 %v6279_v16, %v5824_v58 }
 0x588   : > { %v2000_v3 = vpop.f32.mrf.mxu0 }
 0x589   : > { %6038 = vrot.lane.b32.xlu0 %v6037_v19, %s6594_s26  ;;  %v2067_v4 = vmul.f32 %v6273_v27, %v2000_v3  ;;  %v1443_v22 = vpop.xlane.xlu1 %1442 }
 0x58a   : > { %v5825_v1 = vpop.f32.mrf.mxu0  ;;  %v1441_v21 = vpop.xlane.xlu0 %1440 }
 0x58b   : > { %v2070_v62 = vmul.f32 %v6277_v2, %v5825_v1  ;;  %v6285_v2 = vpop.eup %6284 }
 0x58c   : > { %v2003_v24 = vpop.f32.mrf.mxu0 }
 0x58d   : > { %v2068_v39 = vmul.f32 %v6275_v56, %v2003_v24  ;;  %v6047_v52 = vpack.i.bf16 %v2070_v62, %v2069_v38  ;;  %v1447_v19 = vpop.xlane.xlu1 %1446 }
 0x58e   : > { %v5828_v63 = vpop.f32.mrf.mxu0  ;;  %v1445_v3 = vpop.xlane.xlu0 %1444 }
 0x58f   : > { %v6042_v6 = vpack.i.bf16 %v2068_v39, %v2067_v4  ;;  %v2073_v14 = vmul.f32 %v6283_v45, %v5828_v63 }
 0x590   : > { %v2016_v49 = vpop.f32.mrf.mxu0 }
 0x591   : > { %6043 = vrot.lane.b32.xlu1 %v6042_v6, %s6594_s26  ;;  %v1451_v58 = vpop.xlane.xlu1 %1450  ;;  %v6287_v6 = vpop.eup %6286 }
 0x592   : > { %v5829_v37 = vpop.f32.mrf.mxu0  ;;  %v1449_v1 = vpop.xlane.xlu0 %1448  ;;  %v2071_v38 = vmul.f32 %v6287_v6, %v2016_v49 }
 0x593   : > { %v2074_v43 = vmul.f32 %v6281_v7, %v5829_v37 }
 0x594   : > { %v2019_v39 = vpop.f32.mrf.mxu0 }
 0x595   : > { %6048 = vrot.lane.b32.xlu1 %v6047_v52, %s6594_s26  ;;  %v6052_v57 = vpack.i.bf16 %v2074_v43, %v2073_v14  ;;  %v7494_v27 = vpop.xlane.xlu1 %1454  ;;  %v2072_v62 = vmul.f32 %v6285_v2, %v2019_v39 }
 0x596   : > { %v7496_v56 = vpop.xlane.xlu0 %1452 }
 0x599   : > { %6053 = vrot.lane.b32.xlu1 %v6052_v57, %s6594_s26  ;;  %v1459_v24 = vpop.xlane.xlu1 %1458 }
 0x59a   : > { %v1457_v4 = vpop.xlane.xlu0 %1456 }
 0x59d   : > { %v1909_v63 = vpop.xlane.xlu1 %1908 }
 0x59e   : > { %v1907_v16 = vpop.xlane.xlu0 %1906  ;;  %6288 = vrcp.f32 %v1909_v63 }
 0x59f   : > { %6290 = vrcp.f32 %v1907_v16 }
 0x5a1   : > { %v1905_v57 = vpop.xlane.xlu1 %1904 }
 0x5a2   : > { %v1903_v49 = vpop.xlane.xlu0 %1902  ;;  %6292 = vrcp.f32 %v1905_v57 }
 0x5a3   : > { %6294 = vrcp.f32 %v1903_v49 }
 0x5a4   : > { %6296 = vrcp.f32 %v1437_v55 }
 0x5a5   : > { %6298 = vrcp.f32 %v1441_v21 }
 0x5a6   : > { %6300 = vrcp.f32 %v1443_v22 }
 0x5a7   : > { %6302 = vrcp.f32 %v1439_v9 }
 0x5a8   : > { %1460 = vadd.xlane.f32.xlu0 %v7407_v51  ;;  %v6057_v51 = vpack.i.bf16 %v2072_v62, %v2071_v38  ;;  %6304 = vrcp.f32 %v1445_v3 }
 0x5a9   : > { %6306 = vrcp.f32 %v1447_v19 }
 0x5aa   : > { %6308 = vrcp.f32 %v1449_v1 }
 0x5ab   : > { %v6289_v37 = vpop.eup %6288  ;;  %6310 = vrcp.f32 %v1451_v58 }
 0x5ac   : > { %v6291_v43 = vpop.eup %6290  ;;  %6312 = vrcp.f32 %v1457_v4 }
 0x5ad   : > { %6314 = vrcp.f32 %v1459_v24 }
 0x5ae   : > { %6316 = vrcp.f32 %v7496_v56 }
 0x5af   : > { %v6293_v39 = vpop.eup %6292  ;;  %6318 = vrcp.f32 %v7494_v27 }
 0x5b0   : > { %v6295_v63 = vpop.eup %6294 }
 0x5b1   : > { %v6297_v6 = vpop.eup %6296 }
 0x5b2   : > { %v1589_v19 = vmul.f32 %v6297_v6, %v7443_v47 }
 0x5bd   : > { %1462 = vadd.xlane.f32.xlu1 %v7405_v0 }
 0x5be   : > { %v5832_v54 = vpop.f32.mrf.mxu0  ;;  %6058 = vrot.lane.b32.xlu0 %v6057_v51, %s6594_s26 }
 0x5bf   : > { %v2077_v45 = vmul.f32 %v6291_v43, %v5832_v54 }
 0x5c0   : > { %v2032_v61 = vpop.f32.mrf.mxu0 }
 0x5c1   : > { %v2075_v62 = vmul.f32 %v6295_v63, %v2032_v61 }
 0x5c2   : > { %v5833_v7 = vpop.f32.mrf.mxu0 }
 0x5c3   : > { %v2078_v52 = vmul.f32 %v6289_v37, %v5833_v7 }
 0x5c4   : > { %v2035_v0 = vpop.f32.mrf.mxu0 }
 0x5c5   : > { %v6067_v14 = vpack.i.bf16 %v2078_v52, %v2077_v45  ;;  %v2076_v2 = vmul.f32 %v6293_v39, %v2035_v0 }
 0x5c7   : > { %v6062_v16 = vpack.i.bf16 %v2076_v2, %v2075_v62 }
 0x5ce   : > { %6068 = vrot.lane.b32.xlu1 %v6067_v14, %s6594_s26 }
 0x5dd   : > { %1464 = vadd.xlane.f32.xlu0 %v7403_v18  ;;  %v6299_v18 = vpop.eup %6298 }
 0x5de   : > { %v6301_v38 = vpop.eup %6300  ;;  %v1591_v22 = vmul.f32 %v6299_v18, %v7441_v30 }
 0x5df   : > { %v1592_v9 = vmul.f32 %v6301_v38, %v7445_v50 }
 0x5e1   : > { %1466 = vadd.xlane.f32.xlu0 %v7401_v36  ;;  %v6303_v36 = vpop.eup %6302 }
 0x5e2   : > { %v1590_v3 = vmul.f32 %v6303_v36, %v7447_v5  ;;  %v6305_v52 = vpop.eup %6304 }
 0x5e3   : > { %v6307_v43 = vpop.eup %6306  ;;  %v1593_v57 = vmul.f32 %v6305_v52, %v7451_v48 }
 0x5e4   : > { %v6309_v5 = vpop.eup %6308  ;;  %v1594_v24 = vmul.f32 %v6307_v43, %v7455_v23 }
 0x5e5   : > { %v6311_v49 = vpop.eup %6310  ;;  %v1595_v36 = vmul.f32 %v6309_v5, %v7449_v41 }
 0x5e6   : > { %v6313_v2 = vpop.eup %6312 }
 0x5e7   : > { %v6315_v6 = vpop.eup %6314 }
 0x5f7   : > { %6063 = vrot.lane.b32.xlu0 %v6062_v16, %s6594_s26  ;;  %v1596_v16 = vmul.f32 %v6311_v49, %v7453_v53 }
 0x5f9   : > { %v6034_v55 = vpop.permute.xlu1 %6033 }
 0x5fa   : > { %v6036_v21 = vunpack.i.h.bf16 %v6034_v55  ;;  %v6035_v51 = vunpack.i.l.bf16 %v6034_v55 }
 0x5fb   : > { %v6039_v54 = vpop.permute.xlu0 %6038 }
 0x5fc   : > { %v2146_v1 = vsel %vm1194_vm1, %v1592_v9, %v6036_v21  ;;  %v2145_v61 = vsel %vm1194_vm1, %v1591_v22, %v6035_v51  ;;  %v6041_v7 = vunpack.i.h.bf16 %v6039_v54  ;;  %v6040_v58 = vunpack.i.l.bf16 %v6039_v54 }
 0x5fd   : > { %v2160_v37 = vpack.c.bf16 %v2146_v1, %v2145_v61  ;;  %v1600_v9 = vmul.f32 %v6315_v6, %v7467_v34  ;;  %v6317_v1 = vpop.eup %6316 }
 0x5fe   : > { %v2144_v30 = vsel %vm1194_vm1, %v1590_v3, %v6041_v7  ;;  %v2143_v4 = vsel %vm1194_vm1, %v1589_v19, %v6040_v58  ;;  %v1599_v19 = vmul.f32 %v6313_v2, %v7457_v60  ;;  %v6319_v61 = vpop.eup %6318  ;;  %v1597_v34 = vmul.f32 %v6317_v1, %v7465_v46 }
 0x5ff   : > { %v2159_v50 = vpack.c.bf16 %v2144_v30, %v2143_v4  ;;  %v1598_v58 = vmul.f32 %v6319_v61, %v7469_v59 }
 0x601   : > { %5842 = vmatprep.mubr.msk.bf16.mxu0 %vm689_vm0, %v2159_v50 }
 0x602   : > { %5843 = vmatmul.mubr.msk.bf16.vlgmr.msra.gmra.mxu0 %vm689_vm0, %v2160_v37 }
 0x603   : > { %v6044_v47 = vpop.permute.xlu1 %6043 }
 0x604   : > { %v6046_v45 = vunpack.i.h.bf16 %v6044_v47  ;;  %v6045_v14 = vunpack.i.l.bf16 %v6044_v47 }
 0x606   : > { %v2148_v0 = vsel %vm1194_vm1, %v1594_v24, %v6046_v45  ;;  %v2147_v39 = vsel %vm1194_vm1, %v1593_v57, %v6045_v14 }
 0x607   : > { %v6049_v63 = vpop.permute.xlu1 %6048  ;;  %v2161_v62 = vpack.c.bf16 %v2148_v0, %v2147_v39 }
 0x608   : > { %v6051_v18 = vunpack.i.h.bf16 %v6049_v63  ;;  %v6050_v38 = vunpack.i.l.bf16 %v6049_v63 }
 0x609   : > { %5846 = vmatprep.mubr.msk.bf16.mxu0 %vm689_vm0, %v2161_v62 }
 0x60a   : > { %v2150_v23 = vsel %vm1194_vm1, %v1596_v16, %v6051_v18  ;;  %v2149_v48 = vsel %vm1194_vm1, %v1595_v36, %v6050_v38  ;;  %v2175_v38 = vld [vmem:[%s8947_s8] sm:$0x1] }
 0x60b   : > { %v6054_v55 = vpop.permute.xlu1 %6053  ;;  %v2162_v22 = vpack.c.bf16 %v2150_v23, %v2149_v48  ;;  %v2176_v36 = vunpack.c.l.bf16 %v2175_v38 }
 0x60c   : > { %v6056_v21 = vunpack.i.h.bf16 %v6054_v55  ;;  %v6055_v51 = vunpack.i.l.bf16 %v6054_v55 }
 0x60d   : > { %5847 = vmatmul.mubr.msk.bf16.gmra.mxu0 %vm689_vm0, %v2162_v22 }
 0x60e   : > { %v2154_v53 = vsel %vm1194_vm1, %v1600_v9, %v6056_v21  ;;  %v2153_v41 = vsel %vm1194_vm1, %v1599_v19, %v6055_v51 }
 0x60f   : > { %v2164_v3 = vpack.c.bf16 %v2154_v53, %v2153_v41 }
 0x631   : > { %v1461_v54 = vpop.xlane.xlu0 %1460 }
 0x632   : > { %6320 = vrcp.f32 %v1461_v54 }
 0x635   : > { %v6059_v7 = vpop.permute.xlu0 %6058 }
 0x636   : > { %v6061_v60 = vunpack.i.h.bf16 %v6059_v7  ;;  %v6060_v37 = vunpack.i.l.bf16 %v6059_v7 }
 0x638   : > { %v2152_v30 = vsel %vm1194_vm1, %v1598_v58, %v6061_v60  ;;  %v2151_v4 = vsel %vm1194_vm1, %v1597_v34, %v6060_v37 }
 0x639   : > { %v2163_v50 = vpack.c.bf16 %v2152_v30, %v2151_v4 }
 0x63b   : > { %5850 = vmatprep.mubr.msk.bf16.mxu0 %vm689_vm0, %v2163_v50 }
 0x63c   : > { %5851 = vmatmul.mubr.msk.bf16.gmra.mxu0 %vm689_vm0, %v2164_v3 }
 0x63f   : > { %v6321_v46 = vpop.eup %6320 }
 0x640   : > { %v1601_v47 = vmul.f32 %v6321_v46, %v7473_v35 }
 0x646   : > { %v1463_v27 = vpop.xlane.xlu1 %1462 }
 0x647   : > { %6322 = vrcp.f32 %v1463_v27 }
 0x64a   : > { %v6069_v39 = vpop.permute.xlu1 %6068 }
 0x64b   : > { %v6071_v62 = vunpack.i.h.bf16 %v6069_v39  ;;  %v6070_v6 = vunpack.i.l.bf16 %v6069_v39 }
 0x654   : > { %v6323_v59 = vpop.eup %6322 }
 0x655   : > { %v1602_v5 = vmul.f32 %v6323_v59, %v7482_v12 }
 0x666   : > { %v1465_v56 = vpop.xlane.xlu0 %1464 }
 0x667   : > { %6324 = vrcp.f32 %v1465_v56 }
 0x66a   : > { %v1467_v52 = vpop.xlane.xlu0 %1466 }
 0x66b   : > { %6326 = vrcp.f32 %v1467_v52 }
 0x66e   : > { %v6064_v43 = vpop.permute.xlu0 %6063 }
 0x66f   : > { %v6066_v24 = vunpack.i.h.bf16 %v6064_v43  ;;  %v6065_v45 = vunpack.i.l.bf16 %v6064_v43 }
 0x671   : > { %v2156_v14 = vsel %vm1194_vm1, %v1602_v5, %v6066_v24  ;;  %v2155_v57 = vsel %vm1194_vm1, %v1601_v47, %v6065_v45 }
 0x672   : > { %v2165_v49 = vpack.c.bf16 %v2156_v14, %v2155_v57 }
 0x674   : > { %v6325_v0 = vpop.eup %6324  ;;  %5854 = vmatprep.mubr.msk.bf16.mxu0 %vm689_vm0, %v2165_v49 }
 0x675   : > { %v1603_v2 = vmul.f32 %v6325_v0, %v7471_v29  ;;  %v7550_v29 = vrot.slane %v2176_v36, %v6942_v17 }
 0x677   : > { %v2157_v12 = vsel %vm1194_vm1, %v1603_v2, %v6070_v6 }
 0x678   : > { %v6327_v63 = vpop.eup %6326 }
 0x679   : > { %v1604_v35 = vmul.f32 %v6327_v63, %v7475_v44  ;;  %v7554_v44 = vrot.slane %v6740_v15, %v7043_v20 }
 0x67b   : > { %v2158_v16 = vsel %vm1194_vm1, %v1604_v35, %v6071_v62 }
 0x67c   : > { %v2166_v18 = vpack.c.bf16 %v2158_v16, %v2157_v12 }
 0x67e   : > { %5855 = vmatmul.mubr.msk.bf16.gmra.mxu0 %vm689_vm0, %v2166_v18 }
 0x6c2   : > { %v5844_v23 = vpop.f32.mrf.mxu0 }
 0x6c3   : > { %v2272_v9 = vadd.f32 %v5844_v23, %v7550_v29 }
 0x6c4   : > { %v2263_v48 = vpop.f32.mrf.mxu0 }
 0x6c5   : > { %v2264_v55 = vadd.f32 %v2263_v48, %v7550_v29  ;;  %v2332_v15 = vmul.f32 %v7554_v44, %v2272_v9 }
 0x6c6   : > { %v5845_v22 = vpop.f32.mrf.mxu0 }
 0x6c7   : > { %v2330_v21 = vmul.f32 %v7554_v44, %v2264_v55  ;;  %v2275_v51 = vadd.f32 %v5845_v22, %v7550_v29  ;;  %v7576_v34 = vadd.f32 %v6732_v10, %v2332_v15 }
 0x6c8   : > { %v2266_v19 = vpop.f32.mrf.mxu0 }
 0x6c9   : > { %v7561_v53 = vadd.f32 %v6730_v8, %v2330_v21  ;;  %v2333_v41 = vmul.f32 %v7554_v44, %v2275_v51  ;;  %v2267_v3 = vadd.f32 %v2266_v19, %v7550_v29  ;;  %v2368_v56 = vsel %vm689_vm0, %v7576_v34, 0.0  ;;  %v8981_v51 = vld [vmem:[#allocation7_spill] sm:$0xff] }
 0x6cb   : > { %v7567_v54 = vadd.f32 %v6737_v13, %v2333_v41  ;;  %v2331_v1 = vmul.f32 %v7554_v44, %v2267_v3  ;;  %v2362_v61 = vsel %vm689_vm0, %v7561_v53, 0.0 }
 0x6cc   : > { %2363 = vadd.xlane.f32.xlu1 %v2362_v61 }
 0x6cd   : > { %v7573_v7 = vadd.f32 %v6734_v11, %v2331_v1  ;;  %v5848_v8 = vpop.f32.mrf.mxu0  ;;  %v2371_v37 = vsel %vm689_vm0, %v7567_v54, 0.0  ;;  %v8982_v1 = vld [vmem:[#allocation5_spill] sm:$0xff] }
 0x6ce   : > { %v2288_v58 = vadd.f32 %v5848_v8, %v7550_v29 }
 0x6cf   : > { %v2279_v60 = vpop.f32.mrf.mxu0  ;;  %v2365_v13 = vsel %vm689_vm0, %v7573_v7, 0.0 }
 0x6d0   : > { %v2280_v30 = vadd.f32 %v2279_v60, %v7550_v29  ;;  %2366 = vadd.xlane.f32.xlu0 %v2365_v13  ;;  %2372 = vadd.xlane.f32.xlu1 %v2371_v37  ;;  %v2336_v10 = vmul.f32 %v7554_v44, %v2288_v58  ;;  %v8983_v13 = vld [vmem:[#allocation8_spill] sm:$0xff] }
 0x6d1   : > { %v5849_v4 = vpop.f32.mrf.mxu0 }
 0x6d2   : > { %v2334_v11 = vmul.f32 %v7554_v44, %v2280_v30  ;;  %v2291_v50 = vadd.f32 %v5849_v4, %v7550_v29  ;;  %v7598_v5 = vadd.f32 %v6766_v28, %v2336_v10  ;;  %v8984_v4 = vld [vmem:[#allocation6_spill] sm:$0xff] }
 0x6d3   : > { %v2282_v27 = vpop.f32.mrf.mxu0 }
 0x6d4   : > { %v7590_v52 = vadd.f32 %v6759_v25, %v2334_v11  ;;  %v2283_v46 = vadd.f32 %v2282_v27, %v7550_v29  ;;  %2369 = vadd.xlane.f32.xlu0 %v2368_v56  ;;  %v2337_v59 = vmul.f32 %v7554_v44, %v2291_v50  ;;  %v2380_v14 = vsel %vm689_vm0, %v7598_v5, 0.0 }
 0x6d6   : > { %v2335_v43 = vmul.f32 %v7554_v44, %v2283_v46  ;;  %v2374_v47 = vsel %vm689_vm0, %v7590_v52, 0.0  ;;  %v7604_v25 = vadd.f32 %v6772_v31, %v2337_v59 }
 0x6d8   : > { %v7601_v24 = vadd.f32 %v6761_v26, %v2335_v43  ;;  %2375 = vadd.xlane.f32.xlu0 %v2374_v47  ;;  %v2383_v57 = vsel %vm689_vm0, %v7604_v25, 0.0 }
 0x6da   : > { %v2377_v45 = vsel %vm689_vm0, %v7601_v24, 0.0 }
 0x6db   : > { %2378 = vadd.xlane.f32.xlu1 %v2377_v45 }
 0x6dc   : > { %2381 = vadd.xlane.f32.xlu0 %v2380_v14 }
 0x6df   : > { %2384 = vadd.xlane.f32.xlu1 %v2383_v57 }
 0x6fc   : > { %v5852_v28 = vpop.f32.mrf.mxu0 }
 0x6fd   : > { %v2304_v26 = vadd.f32 %v5852_v28, %v7550_v29 }
 0x6fe   : > { %v2295_v49 = vpop.f32.mrf.mxu0 }
 0x6ff   : > { %v2296_v0 = vadd.f32 %v2295_v49, %v7550_v29  ;;  %v2340_v39 = vmul.f32 %v7554_v44, %v2304_v26 }
 0x700   : > { %v5853_v31 = vpop.f32.mrf.mxu0 }
 0x701   : > { %v2338_v2 = vmul.f32 %v7554_v44, %v2296_v0  ;;  %v2307_v63 = vadd.f32 %v5853_v31, %v7550_v29  ;;  %v7622_v12 = vadd.f32 %v6789_v40, %v2340_v39 }
 0x702   : > { %v2298_v62 = vpop.f32.mrf.mxu0 }
 0x703   : > { %v7618_v6 = vadd.f32 %v6774_v32, %v2338_v2  ;;  %v2299_v35 = vadd.f32 %v2298_v62, %v7550_v29  ;;  %v2341_v16 = vmul.f32 %v7554_v44, %v2307_v63  ;;  %v2392_v32 = vsel %vm689_vm0, %v7622_v12, 0.0 }
 0x705   : > { %v2339_v18 = vmul.f32 %v7554_v44, %v2299_v35  ;;  %v2386_v38 = vsel %vm689_vm0, %v7618_v6, 0.0  ;;  %v7632_v23 = vadd.f32 %v6793_v42, %v2341_v16 }
 0x706   : > { %2387 = vadd.xlane.f32.xlu0 %v2386_v38 }
 0x707   : > { %v7629_v36 = vadd.f32 %v6776_v33, %v2339_v18  ;;  %v2395_v48 = vsel %vm689_vm0, %v7632_v23, 0.0 }
 0x709   : > { %v2389_v40 = vsel %vm689_vm0, %v7629_v36, 0.0 }
 0x70a   : > { %2393 = vadd.xlane.f32.xlu0 %v2392_v32  ;;  %2390 = vadd.xlane.f32.xlu1 %v2389_v40 }
 0x70e   : > { %2396 = vadd.xlane.f32.xlu1 %v2395_v48 }
 0x73e   : > { %v5856_v55 = vpop.f32.mrf.mxu0 }
 0x73f   : > { %v2320_v22 = vadd.f32 %v5856_v55, %v7550_v29 }
 0x740   : > { %v2311_v33 = vpop.f32.mrf.mxu0 }
 0x741   : > { %v2344_v9 = vmul.f32 %v7554_v44, %v2320_v22  ;;  %v2312_v42 = vadd.f32 %v2311_v33, %v7550_v29 }
 0x742   : > { %v5857_v21 = vpop.f32.mrf.mxu0 }
 0x743   : > { %v7644_v19 = vadd.f32 %v8981_v51, %v2344_v9  ;;  %v2342_v41 = vmul.f32 %v7554_v44, %v2312_v42  ;;  %v2323_v3 = vadd.f32 %v5857_v21, %v7550_v29 }
 0x744   : > { %v2314_v15 = vpop.f32.mrf.mxu0 }
 0x745   : > { %v7649_v61 = vadd.f32 %v8982_v1, %v2342_v41  ;;  %v2345_v8 = vmul.f32 %v7554_v44, %v2323_v3  ;;  %v2315_v58 = vadd.f32 %v2314_v15, %v7550_v29  ;;  %v2404_v60 = vsel %vm689_vm0, %v7644_v19, 0.0 }
 0x746   : > { %2405 = vadd.xlane.f32.xlu0 %v2404_v60 }
 0x747   : > { %v7656_v37 = vadd.f32 %v8983_v13, %v2345_v8  ;;  %v2343_v30 = vmul.f32 %v7554_v44, %v2315_v58  ;;  %v2398_v50 = vsel %vm689_vm0, %v7649_v61, 0.0  ;;  %v6128_v13 = vld [vmem:[%s8948_s9 + $0x18] sm:$0xff]  }
 0x748   : > { %5858 = vmatprep.subr.bf16.mxu0 %v6128_v13  ;;  %5990 = vmatprep.subr.bf16.mxu1 %v6128_v13 }
 0x749   : > { %v7660_v11 = vadd.f32 %v8984_v4, %v2343_v30  ;;  %v2407_v10 = vsel %vm689_vm0, %v7656_v37, 0.0  ;;  %5859 = vmatpush3.bf16.msra.mxu0 %v6128_v13  ;;  %5994 = vmatpush3.bf16.msra.mxu1 %v6128_v13  ;;  %v6129_v30 = vld [vmem:[%s8948_s9 + $0x10] sm:$0xff]   ;;  %v6130_v4 = vld [vmem:[%s8948_s9 + $0x8] sm:$0xff]  }
 0x74a   : > { %2399 = vadd.xlane.f32.xlu0 %v2398_v50  ;;  %2408 = vadd.xlane.f32.xlu1 %v2407_v10  ;;  %v6131_v50 = vld [vmem:[%s8948_s9] sm:$0xff]  }
 0x74b   : > { %v2401_v29 = vsel %vm689_vm0, %v7660_v11, 0.0  ;;  %5860 = vmatprep.subr.bf16.mxu0 %v6129_v30  ;;  %5991 = vmatprep.subr.bf16.mxu1 %v6129_v30 }
 0x74d   : > { %5861 = vmatpush3.bf16.msra.mxu0 %v6129_v30  ;;  %5995 = vmatpush3.bf16.msra.mxu1 %v6129_v30 }
 0x74e   : > { %2402 = vadd.xlane.f32.xlu1 %v2401_v29  ;;  %5862 = vmatprep.subr.bf16.mxu0 %v6130_v4 }
 0x74f   : > { %5992 = vmatprep.subr.bf16.mxu1 %v6130_v4 }
 0x751   : > { %5863 = vmatpush3.bf16.msra.mxu0 %v6130_v4  ;;  %5996 = vmatpush3.bf16.msra.mxu1 %v6130_v4 }
 0x752   : > { %5864 = vmatprep.subr.bf16.mxu0 %v6131_v50  ;;  %5993 = vmatprep.subr.bf16.mxu1 %v6131_v50 }
 0x755   : > { %v2364_v27 = vpop.xlane.xlu1 %2363  ;;  %5865 = vmatpush3.bf16.msra.mxu0 %v6131_v50  ;;  %5997 = vmatpush3.bf16.msra.mxu1 %v6131_v50 }
 0x756   : > { %v2410_v56 = vmul.f32 0.015625, %v2364_v27 }
 0x758   : > { %v7669_v46 = vsub.f32 %v7561_v53, %v2410_v56 }
 0x759   : > { %v2367_v44 = vpop.xlane.xlu0 %2366  ;;  %v2373_v59 = vpop.xlane.xlu1 %2372 }
 0x75a   : > { %v2411_v43 = vmul.f32 0.015625, %v2367_v44  ;;  %v2413_v47 = vmul.f32 0.015625, %v2373_v59  ;;  %v2442_v45 = vmul.f32 %v7669_v46, %v7669_v46 }
 0x75c   : > { %v7674_v14 = vsub.f32 %v7573_v7, %v2411_v43  ;;  %v7677_v57 = vsub.f32 %v7567_v54, %v2413_v47  ;;  %v2458_v28 = vsel %vm689_vm0, %v2442_v45, 0.0 }
 0x75d   : > { %v2370_v26 = vpop.xlane.xlu0 %2369  ;;  %2459 = vadd.xlane.f32.xlu0 %v2458_v28 }
 0x75e   : > { %v2412_v49 = vmul.f32 0.015625, %v2370_v26  ;;  %v2443_v0 = vmul.f32 %v7674_v14, %v7674_v14  ;;  %v2445_v2 = vmul.f32 %v7677_v57, %v7677_v57 }
 0x760   : > { %v7683_v31 = vsub.f32 %v7576_v34, %v2412_v49  ;;  %v2461_v39 = vsel %vm689_vm0, %v2443_v0, 0.0  ;;  %v2467_v32 = vsel %vm689_vm0, %v2445_v2, 0.0 }
 0x761   : > { %v2376_v63 = vpop.xlane.xlu0 %2375  ;;  %2462 = vadd.xlane.f32.xlu1 %v2461_v39 }
 0x762   : > { %v2414_v62 = vmul.f32 0.015625, %v2376_v63  ;;  %v2444_v35 = vmul.f32 %v7683_v31, %v7683_v31 }
 0x764   : > { %v7691_v16 = vsub.f32 %v7590_v52, %v2414_v62  ;;  %v2379_v18 = vpop.xlane.xlu1 %2378  ;;  %v2464_v38 = vsel %vm689_vm0, %v2444_v35, 0.0 }
 0x765   : > { %v2415_v40 = vmul.f32 0.015625, %v2379_v18  ;;  %v2382_v48 = vpop.xlane.xlu0 %2381  ;;  %2465 = vadd.xlane.f32.xlu0 %v2464_v38  ;;  %2468 = vadd.xlane.f32.xlu1 %v2467_v32  ;;  %v6596_v32 = vmov 0.0  }
 0x766   : > { %v2416_v55 = vmul.f32 0.015625, %v2382_v48  ;;  %v2446_v22 = vmul.f32 %v7691_v16, %v7691_v16  ;;  %5882 = vmatprep.subr.bf16.mxu0 %v6596_v32 }
 0x767   : > { %v7698_v33 = vsub.f32 %v7601_v24, %v2415_v40 }
 0x768   : > { %v7701_v9 = vsub.f32 %v7598_v5, %v2416_v55  ;;  %v2385_v42 = vpop.xlane.xlu1 %2384  ;;  %v2470_v21 = vsel %vm689_vm0, %v2446_v22, 0.0 }
 0x769   : > { %v2417_v51 = vmul.f32 0.015625, %v2385_v42  ;;  %2471 = vadd.xlane.f32.xlu0 %v2470_v21  ;;  %v2447_v41 = vmul.f32 %v7698_v33, %v7698_v33 }
 0x76a   : > { %v2448_v3 = vmul.f32 %v7701_v9, %v7701_v9 }
 0x76b   : > { %v7709_v15 = vsub.f32 %v7604_v25, %v2417_v51  ;;  %v2473_v1 = vsel %vm689_vm0, %v2447_v41, 0.0 }
 0x76c   : > { %2474 = vadd.xlane.f32.xlu1 %v2473_v1  ;;  %v2476_v8 = vsel %vm689_vm0, %v2448_v3, 0.0 }
 0x76d   : > { %2477 = vadd.xlane.f32.xlu0 %v2476_v8  ;;  %v2449_v58 = vmul.f32 %v7709_v15, %v7709_v15 }
 0x76f   : > { %v2479_v60 = vsel %vm689_vm0, %v2449_v58, 0.0 }
 0x770   : > { %2480 = vadd.xlane.f32.xlu1 %v2479_v60 }
 0x78f   : > { %v2388_v10 = vpop.xlane.xlu0 %2387 }
 0x790   : > { %v2418_v29 = vmul.f32 0.015625, %v2388_v10 }
 0x792   : > { %v7729_v27 = vsub.f32 %v7618_v6, %v2418_v29 }
 0x793   : > { %v2394_v56 = vpop.xlane.xlu0 %2393  ;;  %v2391_v44 = vpop.xlane.xlu1 %2390 }
 0x794   : > { %v2420_v59 = vmul.f32 0.015625, %v2394_v56  ;;  %v2419_v43 = vmul.f32 0.015625, %v2391_v44  ;;  %v2450_v47 = vmul.f32 %v7729_v27, %v7729_v27 }
 0x796   : > { %v7734_v45 = vsub.f32 %v7622_v12, %v2420_v59  ;;  %v7737_v28 = vsub.f32 %v7629_v36, %v2419_v43  ;;  %v2482_v26 = vsel %vm689_vm0, %v2450_v47, 0.0 }
 0x797   : > { %2483 = vadd.xlane.f32.xlu0 %v2482_v26  ;;  %v2397_v49 = vpop.xlane.xlu1 %2396 }
 0x798   : > { %v2421_v0 = vmul.f32 0.015625, %v2397_v49  ;;  %v2452_v39 = vmul.f32 %v7734_v45, %v7734_v45  ;;  %v2451_v2 = vmul.f32 %v7737_v28, %v7737_v28 }
 0x79a   : > { %v7745_v63 = vsub.f32 %v7632_v23, %v2421_v0  ;;  %v2488_v62 = vsel %vm689_vm0, %v2452_v39, 0.0  ;;  %v2485_v35 = vsel %vm689_vm0, %v2451_v2, 0.0 }
 0x79b   : > { %2489 = vadd.xlane.f32.xlu0 %v2488_v62  ;;  %2486 = vadd.xlane.f32.xlu1 %v2485_v35 }
 0x79c   : > { %v2453_v18 = vmul.f32 %v7745_v63, %v7745_v63 }
 0x79e   : > { %v2491_v38 = vsel %vm689_vm0, %v2453_v18, 0.0 }
 0x79f   : > { %2492 = vadd.xlane.f32.xlu1 %v2491_v38 }
 0x7cf   : > { %v2406_v40 = vpop.xlane.xlu0 %2405 }
 0x7d0   : > { %v2424_v48 = vmul.f32 0.015625, %v2406_v40 }
 0x7d2   : > { %v7754_v21 = vsub.f32 %v7644_v19, %v2424_v48 }
 0x7d3   : > { %v2400_v55 = vpop.xlane.xlu0 %2399  ;;  %v2409_v22 = vpop.xlane.xlu1 %2408 }
 0x7d4   : > { %v2422_v42 = vmul.f32 0.015625, %v2400_v55  ;;  %v2425_v41 = vmul.f32 0.015625, %v2409_v22  ;;  %v2456_v30 = vmul.f32 %v7754_v21, %v7754_v21 }
 0x7d6   : > { %v7757_v51 = vsub.f32 %v7649_v61, %v2422_v42  ;;  %v7762_v58 = vsub.f32 %v7656_v37, %v2425_v41  ;;  %v2500_v50 = vsel %vm689_vm0, %v2456_v30, 0.0 }
 0x7d7   : > { %v2403_v3 = vpop.xlane.xlu1 %2402 }
 0x7d8   : > { %v2423_v1 = vmul.f32 0.015625, %v2403_v3  ;;  %v2454_v8 = vmul.f32 %v7757_v51, %v7757_v51  ;;  %v2457_v29 = vmul.f32 %v7762_v58, %v7762_v58 }
 0x7da   : > { %v7765_v60 = vsub.f32 %v7660_v11, %v2423_v1  ;;  %v2494_v13 = vsel %vm689_vm0, %v2454_v8, 0.0  ;;  %v2503_v56 = vsel %vm689_vm0, %v2457_v29, 0.0 }
 0x7db   : > { %2495 = vadd.xlane.f32.xlu0 %v2494_v13 }
 0x7dc   : > { %v2455_v4 = vmul.f32 %v7765_v60, %v7765_v60 }
 0x7de   : > { %v2497_v10 = vsel %vm689_vm0, %v2455_v4, 0.0 }
 0x7df   : > { %2501 = vadd.xlane.f32.xlu0 %v2500_v50  ;;  %2498 = vadd.xlane.f32.xlu1 %v2497_v10 }
 0x7e3   : > { %2504 = vadd.xlane.f32.xlu1 %v2503_v56 }
 0x7e6   : > { %v2460_v44 = vpop.xlane.xlu0 %2459 }
 0x7e7   : > { %v2506_v59 = vmul.f32 0.015625, %v2460_v44 }
 0x7e9   : > { %v2522_v43 = vadd.f32 1e-06, %v2506_v59 }
 0x7ea   : > { %v2463_v47 = vpop.xlane.xlu1 %2462 }
 0x7eb   : > { %v2507_v26 = vmul.f32 0.015625, %v2463_v47  ;;  %6328 = vrsqrt.f32 %v2522_v43 }
 0x7ed   : > { %v2523_v49 = vadd.f32 1e-06, %v2507_v26  ;;  %v6132_v26 = vld [vmem:[%s8950_s11 + $0x18] sm:$0xff]  }
 0x7ee   : > { %v2466_v0 = vpop.xlane.xlu0 %2465  ;;  %v2469_v39 = vpop.xlane.xlu1 %2468 }
 0x7ef   : > { %6330 = vrsqrt.f32 %v2523_v49  ;;  %v2508_v2 = vmul.f32 0.015625, %v2466_v0  ;;  %v2509_v62 = vmul.f32 0.015625, %v2469_v39 }
 0x7f1   : > { %v2524_v35 = vadd.f32 1e-06, %v2508_v2  ;;  %v2525_v18 = vadd.f32 1e-06, %v2509_v62 }
 0x7f2   : > { %v2472_v38 = vpop.xlane.xlu0 %2471 }
 0x7f3   : > { %6332 = vrsqrt.f32 %v2524_v35  ;;  %v2510_v40 = vmul.f32 0.015625, %v2472_v38  ;;  %v6134_v35 = vld [vmem:[%s8950_s11 + $0x8] sm:$0xff]  }
 0x7f4   : > { %6334 = vrsqrt.f32 %v2525_v18 }
 0x7f5   : > { %v2526_v48 = vadd.f32 1e-06, %v2510_v40  ;;  %v2475_v55 = vpop.xlane.xlu1 %2474 }
 0x7f6   : > { %v2511_v22 = vmul.f32 0.015625, %v2475_v55  ;;  %v2478_v42 = vpop.xlane.xlu0 %2477 }
 0x7f7   : > { %v2512_v41 = vmul.f32 0.015625, %v2478_v42  ;;  %6336 = vrsqrt.f32 %v2526_v48 }
 0x7f8   : > { %v2527_v3 = vadd.f32 1e-06, %v2511_v22  ;;  %v6329_v13 = vpop.eup %6328 }
 0x7f9   : > { %v2528_v1 = vadd.f32 1e-06, %v2512_v41  ;;  %v2481_v8 = vpop.xlane.xlu1 %2480  ;;  %v2554_v10 = vmul.f32 %v6329_v13, %v7669_v46 }
 0x7fa   : > { %6338 = vrsqrt.f32 %v2527_v3  ;;  %v2513_v30 = vmul.f32 0.015625, %v2481_v8 }
 0x7fb   : > { %6340 = vrsqrt.f32 %v2528_v1 }
 0x7fc   : > { %v6331_v4 = vpop.eup %6330  ;;  %v2529_v50 = vadd.f32 1e-06, %v2513_v30 }
 0x7fd   : > { %v2555_v29 = vmul.f32 %v6331_v4, %v7674_v14  ;;  %v6133_v14 = vld [vmem:[%s8950_s11 + $0x10] sm:$0xff]  }
 0x7fe   : > { %6342 = vrsqrt.f32 %v2529_v50 }
 0x7ff   : > { %v2586_v56 = vpack.c.bf16 %v2555_v29, %v2554_v10 }
 0x800   : > { %v6333_v44 = vpop.eup %6332 }
 0x801   : > { %v6335_v59 = vpop.eup %6334  ;;  %v2556_v43 = vmul.f32 %v6333_v44, %v7683_v31  ;;  %5866 = vmatprep.mubr.msk.bf16.mxu0 %vm689_vm0, %v2586_v56 }
 0x802   : > { %v2557_v47 = vmul.f32 %v6335_v59, %v7677_v57 }
 0x804   : > { %v2587_v49 = vpack.c.bf16 %v2557_v47, %v2556_v43  ;;  %v6337_v0 = vpop.eup %6336 }
 0x805   : > { %v2558_v31 = vmul.f32 %v6337_v0, %v7691_v16 }
 0x806   : > { %5867 = vmatmul.mubr.msk.bf16.vlgmr.msra.gmra.mxu0 %vm689_vm0, %v2587_v49 }
 0x807   : > { %v6339_v46 = vpop.eup %6338  ;;  %5883 = vmatpush3.bf16.msra.mxu0 %v6132_v26 }
 0x808   : > { %v2559_v39 = vmul.f32 %v6339_v46, %v7698_v33  ;;  %5884 = vmatprep.subr.bf16.mxu0 %v6596_v32  ;;  %v6341_v57 = vpop.eup %6340  ;;  %v6135_v33 = vld [vmem:[%s8950_s11] sm:$0xff]  }
 0x809   : > { %v2560_v18 = vmul.f32 %v6341_v57, %v7701_v9 }
 0x80a   : > { %v2588_v2 = vpack.c.bf16 %v2559_v39, %v2558_v31 }
 0x80b   : > { %v6343_v62 = vpop.eup %6342  ;;  %5885 = vmatpush3.bf16.msra.mxu0 %v6133_v14 }
 0x80c   : > { %5870 = vmatprep.mubr.msk.bf16.mxu0 %vm689_vm0, %v2588_v2  ;;  %v2561_v38 = vmul.f32 %v6343_v62, %v7709_v15  ;;  %5886 = vmatprep.subr.bf16.mxu0 %v6596_v32 }
 0x80e   : > { %v2589_v16 = vpack.c.bf16 %v2561_v38, %v2560_v18 }
 0x80f   : > { %5887 = vmatpush3.bf16.msra.mxu0 %v6134_v35 }
 0x810   : > { %5871 = vmatmul.mubr.msk.bf16.gmra.mxu0 %vm689_vm0, %v2589_v16  ;;  %5888 = vmatprep.subr.bf16.mxu0 %v6596_v32 }
 0x813   : > { %5889 = vmatpush3.bf16.msra.mxu0 %v6135_v33 }
 0x820   : > { %v2484_v40 = vpop.xlane.xlu0 %2483 }
 0x821   : > { %v2514_v48 = vmul.f32 0.015625, %v2484_v40 }
 0x823   : > { %v2530_v55 = vadd.f32 1e-06, %v2514_v48 }
 0x824   : > { %v2490_v22 = vpop.xlane.xlu0 %2489  ;;  %v2487_v9 = vpop.xlane.xlu1 %2486 }
 0x825   : > { %v2516_v42 = vmul.f32 0.015625, %v2490_v22  ;;  %v2515_v15 = vmul.f32 0.015625, %v2487_v9  ;;  %6344 = vrsqrt.f32 %v2530_v55  ;;  %v2603_v22 = vld [vmem:[%s8949_s10] sm:$0x1] }
 0x827   : > { %v2532_v41 = vadd.f32 1e-06, %v2516_v42  ;;  %v2531_v3 = vadd.f32 1e-06, %v2515_v15  ;;  %v2604_v42 = vunpack.c.l.bf16 %v2603_v22 }
 0x828   : > { %v2493_v1 = vpop.xlane.xlu1 %2492 }
 0x829   : > { %v2517_v8 = vmul.f32 0.015625, %v2493_v1  ;;  %6346 = vrsqrt.f32 %v2531_v3 }
 0x82a   : > { %6348 = vrsqrt.f32 %v2532_v41 }
 0x82b   : > { %v2533_v13 = vadd.f32 1e-06, %v2517_v8 }
 0x82d   : > { %6350 = vrsqrt.f32 %v2533_v13 }
 0x832   : > { %v6345_v30 = vpop.eup %6344 }
 0x833   : > { %v2562_v10 = vmul.f32 %v6345_v30, %v7729_v27  ;;  %v2594_v27 = vld [vmem:[%s638_s23] sm:$0xf] }
 0x836   : > { %v6347_v4 = vpop.eup %6346 }
 0x837   : > { %v6349_v50 = vpop.eup %6348  ;;  %v2563_v29 = vmul.f32 %v6347_v4, %v7737_v28 }
 0x838   : > { %v2564_v59 = vmul.f32 %v6349_v50, %v7734_v45 }
 0x839   : > { %v2590_v44 = vpack.c.bf16 %v2563_v29, %v2562_v10 }
 0x83a   : > { %v6351_v56 = vpop.eup %6350 }
 0x83b   : > { %v2565_v43 = vmul.f32 %v6351_v56, %v7745_v63  ;;  %5874 = vmatprep.mubr.msk.bf16.mxu0 %vm689_vm0, %v2590_v44 }
 0x83d   : > { %v2591_v47 = vpack.c.bf16 %v2565_v43, %v2564_v59  ;;  %v2770_v59 = vld [vmem:[%s8951_s12] sm:$0x1] }
 0x83f   : > { %5875 = vmatmul.mubr.msk.bf16.gmra.mxu0 %vm689_vm0, %v2591_v47  ;;  %v2771_v47 = vunpack.c.l.bf16 %v2770_v59 }
 0x840   : > { %5890 = vmatprep.mubr.msk.bf16.mxu0 %vm6597_vm2, %v6596_v32 }
 0x847   : > { %5891 = vmatmul.mubr.msk.bf16.vlgmr.msra.gmra.mxu0 %vm689_vm0, %v2594_v27 }
 0x864   : > { %v2496_v28 = vpop.xlane.xlu0 %2495 }
 0x865   : > { %v2518_v45 = vmul.f32 0.015625, %v2496_v28 }
 0x867   : > { %v2534_v26 = vadd.f32 1e-06, %v2518_v45  ;;  %v2775_v45 = vrot.slane %v2771_v47, %v6942_v17 }
 0x868   : > { %v2502_v63 = vpop.xlane.xlu0 %2501  ;;  %v2499_v49 = vpop.xlane.xlu1 %2498 }
 0x869   : > { %v2520_v0 = vmul.f32 0.015625, %v2502_v63  ;;  %v2519_v46 = vmul.f32 0.015625, %v2499_v49  ;;  %6352 = vrsqrt.f32 %v2534_v26 }
 0x86b   : > { %v2536_v14 = vadd.f32 1e-06, %v2520_v0  ;;  %v2535_v31 = vadd.f32 1e-06, %v2519_v46 }
 0x86c   : > { %v2505_v39 = vpop.xlane.xlu1 %2504 }
 0x86d   : > { %v2521_v32 = vmul.f32 0.015625, %v2505_v39  ;;  %6354 = vrsqrt.f32 %v2535_v31 }
 0x86e   : > { %6356 = vrsqrt.f32 %v2536_v14 }
 0x86f   : > { %v2537_v57 = vadd.f32 1e-06, %v2521_v32 }
 0x871   : > { %6358 = vrsqrt.f32 %v2537_v57 }
 0x876   : > { %v6353_v2 = vpop.eup %6352 }
 0x877   : > { %v2566_v18 = vmul.f32 %v6353_v2, %v7757_v51 }
 0x87a   : > { %v6355_v62 = vpop.eup %6354 }
 0x87b   : > { %v6357_v35 = vpop.eup %6356  ;;  %v2567_v38 = vmul.f32 %v6355_v62, %v7765_v60  ;;  %v2608_v60 = vrot.slane %v2604_v42, %v6942_v17 }
 0x87c   : > { %v2568_v40 = vmul.f32 %v6357_v35, %v7754_v21 }
 0x87d   : > { %v2592_v33 = vpack.c.bf16 %v2567_v38, %v2566_v18 }
 0x87e   : > { %v6359_v16 = vpop.eup %6358 }
 0x87f   : > { %v2569_v48 = vmul.f32 %v6359_v16, %v7762_v58  ;;  %5878 = vmatprep.mubr.msk.bf16.mxu1 %vm689_vm0, %v2592_v33 }
 0x881   : > { %v2593_v55 = vpack.c.bf16 %v2569_v48, %v2568_v40 }
 0x883   : > { %5879 = vmatmul.mubr.msk.bf16.vlgmr.msra.gmra.mxu1 %vm689_vm0, %v2593_v55 }
 0x8c6   : > { %v5868_v9 = vpop.f32.mrf.mxu0 }
 0x8c7   : > { %v2700_v13 = vadd.f32 %v5868_v9, %v2608_v60 }
 0x8c8   : > { %v2691_v51 = vpop.f32.mrf.mxu0 }
 0x8c9   : > { %v2692_v3 = vadd.f32 %v2691_v51, %v2608_v60 }
 0x8ca   : > { %v5869_v15 = vpop.f32.mrf.mxu0 }
 0x8cb   : > { %v2703_v1 = vadd.f32 %v5869_v15, %v2608_v60 }
 0x8cc   : > { %v2694_v41 = vpop.f32.mrf.mxu0 }
 0x8cd   : > { %v2695_v21 = vadd.f32 %v2694_v41, %v2608_v60  ;;  %v2755_v4 = vpack.c.bf16 %v2703_v1, %v2700_v13 }
 0x8cf   : > { %v2754_v58 = vpack.c.bf16 %v2695_v21, %v2692_v3 }
 0x8d0   : > { %v5872_v8 = vpop.f32.mrf.mxu0 }
 0x8d1   : > { %3328 = vrot.lane.b32.xlu1 %v2754_v58, %s6595_s27  ;;  %5896 = vmatprep.mubr.msk.bf16.mxu0 %vm1194_vm1, %v2754_v58  ;;  %v2716_v2 = vadd.f32 %v5872_v8, %v2608_v60 }
 0x8d2   : > { %v2707_v30 = vpop.f32.mrf.mxu0 }
 0x8d3   : > { %v2708_v29 = vadd.f32 %v2707_v30, %v2608_v60 }
 0x8d4   : > { %v5873_v50 = vpop.f32.mrf.mxu0 }
 0x8d5   : > { %3330 = vrot.lane.b32.xlu1 %v2755_v4, %s6595_s27  ;;  %v2719_v39 = vadd.f32 %v5873_v50, %v2608_v60 }
 0x8d6   : > { %v2710_v10 = vpop.f32.mrf.mxu0 }
 0x8d7   : > { %v2711_v56 = vadd.f32 %v2710_v10, %v2608_v60  ;;  %v2757_v18 = vpack.c.bf16 %v2719_v39, %v2716_v2 }
 0x8d9   : > { %v2756_v44 = vpack.c.bf16 %v2711_v56, %v2708_v29  ;;  %v7869_v29 = vld [vmem:[%s645_s21] ss:$0 sm:$0xff] }
 0x8db   : > { %3332 = vrot.lane.b32.xlu1 %v2756_v44, %s6595_s27 }
 0x8ff   : > { %v5876_v43 = vpop.f32.mrf.mxu0 }
 0x900   : > { %v2732_v16 = vadd.f32 %v5876_v43, %v2608_v60 }
 0x901   : > { %v2723_v27 = vpop.f32.mrf.mxu0 }
 0x902   : > { %v2724_v63 = vadd.f32 %v2723_v27, %v2608_v60 }
 0x903   : > { %v5877_v28 = vpop.f32.mrf.mxu0 }
 0x904   : > { %v2735_v38 = vadd.f32 %v5877_v28, %v2608_v60 }
 0x905   : > { %v2726_v26 = vpop.f32.mrf.mxu0 }
 0x906   : > { %v2727_v49 = vadd.f32 %v2726_v26, %v2608_v60  ;;  %v2759_v33 = vpack.c.bf16 %v2735_v38, %v2732_v16 }
 0x907   : > { %v2837_v0 = vpop.f32.mrf.mxu0 }
 0x908   : > { %v2758_v46 = vpack.c.bf16 %v2727_v49, %v2724_v63  ;;  %v2838_v14 = vadd.f32 %v2837_v0, %v2775_v45 }
 0x909   : > { %v5892_v31 = vpop.f32.mrf.mxu0 }
 0x90a   : > { %v7835_v32 = vpack.c.bf16 %v2838_v14, %v2838_v14  ;;  %3336 = vrot.lane.b32.xlu1 %v2758_v46, %s6595_s27 }
 0x90b   : > { %v2840_v57 = vpop.f32.mrf.mxu0 }
 0x90c   : > { %3344 = vrot.lane.b32.xlu0 %v7835_v32, %s6595_s27  ;;  %6014 = vmatprep.subr.msk.bf16.mxu0 %vm1194_vm1, %v7835_v32  ;;  %v2870_v62 = vsel %vm1194_vm1, %v7835_v32, 0 }
 0x90d   : > { %v5893_v35 = vpop.f32.mrf.mxu0  ;;  %5895 = vmatpush3.bf16.xpose.msra.mxu0 %v2870_v62 }
 0x910   : > { %3334 = vrot.lane.b32.xlu0 %v2757_v18, %s6595_s27 }
 0x914   : > { %3338 = vrot.lane.b32.xlu0 %v2759_v33, %s6595_s27  ;;  %5897 = vmatmul.mubr.msk.bf16.vlgmr.msra.gmra.mxu0 %vm1194_vm1, %v2755_v4 }
 0x915   : > { %5900 = vmatprep.mubr.msk.bf16.mxu0 %vm1194_vm1, %v2756_v44 }
 0x91c   : > { %5901 = vmatmul.mubr.msk.bf16.gmra.mxu0 %vm1194_vm1, %v2757_v18 }
 0x91d   : > { %5904 = vmatprep.mubr.msk.bf16.mxu0 %vm1194_vm1, %v2758_v46 }
 0x924   : > { %5905 = vmatmul.mubr.msk.bf16.gmra.mxu0 %vm1194_vm1, %v2759_v33 }
 0x943   : > { %v5880_v40 = vpop.f32.mrf.mxu1  ;;  %v3329_v21 = vpop.permute.xlu1 %3328 }
 0x944   : > { %v2748_v22 = vadd.f32 %v5880_v40, %v2608_v60 }
 0x945   : > { %v2739_v48 = vpop.f32.mrf.mxu1 }
 0x946   : > { %v2740_v51 = vadd.f32 %v2739_v48, %v2608_v60 }
 0x947   : > { %v5881_v55 = vpop.f32.mrf.mxu1 }
 0x948   : > { %v2751_v9 = vadd.f32 %v5881_v55, %v2608_v60 }
 0x949   : > { %v2742_v42 = vpop.f32.mrf.mxu1 }
 0x94a   : > { %v2761_v15 = vpack.c.bf16 %v2751_v9, %v2748_v22  ;;  %v2743_v41 = vadd.f32 %v2742_v42, %v2608_v60  ;;  %v3331_v60 = vpop.permute.xlu1 %3330 }
 0x94c   : > { %v2760_v3 = vpack.c.bf16 %v2743_v41, %v2740_v51  ;;  %3342 = vrot.lane.b32.xlu0 %v2761_v15, %s6595_s27 }
 0x94e   : > { %3340 = vrot.lane.b32.xlu1 %v2760_v3, %s6595_s27  ;;  %5908 = vmatprep.mubr.msk.bf16.mxu0 %vm1194_vm1, %v2760_v3  ;;  %v3333_v8 = vpop.permute.xlu1 %3332 }
 0x94f   : > { %5909 = vmatmul.mubr.msk.bf16.gmra.mxu0 %vm1194_vm1, %v2761_v15 }
 0x950   : > { %5932 = vmatprep.mubr.msk.bf16.mxu0 %vm1194_vm1, %v3329_v21 }
 0x97c   : > { %v3337_v30 = vpop.permute.xlu1 %3336 }
 0x97e   : > { %v3345_v1 = vpop.permute.xlu0 %3344 }
 0x97f   : > { %6016 = vmatprep.subr.msk.bf16.mxu0 %vm1194_vm1, %v3345_v1  ;;  %v3371_v58 = vsel %vm1194_vm1, %v3345_v1, 0 }
 0x980   : > { %5931 = vmatpush3.bf16.xpose.msra.mxu0 %v3371_v58 }
 0x982   : > { %v3335_v13 = vpop.permute.xlu0 %3334 }
 0x986   : > { %v3339_v4 = vpop.permute.xlu0 %3338 }
 0x987   : > { %5933 = vmatmul.mubr.msk.bf16.vlgmr.msra.gmra.mxu0 %vm1194_vm1, %v3331_v60 }
 0x988   : > { %5936 = vmatprep.mubr.msk.bf16.mxu0 %vm1194_vm1, %v3333_v8 }
 0x98f   : > { %5937 = vmatmul.mubr.msk.bf16.gmra.mxu0 %vm1194_vm1, %v3335_v13 }
 0x990   : > { %5940 = vmatprep.mubr.msk.bf16.mxu0 %vm1194_vm1, %v3337_v30 }
 0x997   : > { %5941 = vmatmul.mubr.msk.bf16.gmra.mxu0 %vm1194_vm1, %v3339_v4 }
 0x9be   : > { %v3343_v10 = vpop.permute.xlu0 %3342 }
 0x9c0   : > { %v3341_v50 = vpop.permute.xlu1 %3340 }
 0x9c1   : > { %5944 = vmatprep.mubr.msk.bf16.mxu0 %vm1194_vm1, %v3341_v50 }
 0x9c2   : > { %5945 = vmatmul.mubr.msk.bf16.gmra.mxu0 %vm1194_vm1, %v3343_v10 }
 0x9d4   : > { %v5898_v56 = vpop.f32.mrf.mxu0 }
 0x9d5   : > { %v2971_v44 = vmul.f32 0.17677669, %v5898_v56 }
 0x9d6   : > { %v2906_v59 = vpop.f32.mrf.mxu0 }
 0x9d7   : > { %v7872_v43 = vadd.f32 %v7869_v29, %v2971_v44  ;;  %v2969_v47 = vmul.f32 0.17677669, %v2906_v59 }
 0x9d8   : > { %v5899_v27 = vpop.f32.mrf.mxu0 }
 0x9d9   : > { %v7875_v28 = vadd.f32 %v7869_v29, %v2969_v47  ;;  %v2972_v45 = vmul.f32 0.17677669, %v5899_v27  ;;  %v3014_v26 = vsel %vm3007_vm3, %v7872_v43, -inf }
 0x9da   : > { %v2909_v63 = vpop.f32.mrf.mxu0  ;;  %3015 = vmax.xlane.f32.xlu0 %v3014_v26 }
 0x9db   : > { %v7880_v49 = vadd.f32 %v7869_v29, %v2972_v45  ;;  %v2970_v0 = vmul.f32 0.17677669, %v2909_v63  ;;  %v3008_v46 = vsel %vm3007_vm3, %v7875_v28, -inf }
 0x9dc   : > { %v5902_v14 = vpop.f32.mrf.mxu0  ;;  %3009 = vmax.xlane.f32.xlu1 %v3008_v46 }
 0x9dd   : > { %v7885_v31 = vadd.f32 %v7869_v29, %v2970_v0  ;;  %v2975_v39 = vmul.f32 0.17677669, %v5902_v14  ;;  %v3017_v57 = vsel %vm3007_vm3, %v7880_v49, -inf }
 0x9de   : > { %v2922_v2 = vpop.f32.mrf.mxu0  ;;  %3018 = vmax.xlane.f32.xlu0 %v3017_v57 }
 0x9df   : > { %v7890_v62 = vadd.f32 %v7869_v29, %v2975_v39  ;;  %v2973_v35 = vmul.f32 0.17677669, %v2922_v2  ;;  %v3011_v33 = vsel %vm3007_vm3, %v7885_v31, -inf }
 0x9e0   : > { %v5903_v18 = vpop.f32.mrf.mxu0 }
 0x9e1   : > { %v7893_v38 = vadd.f32 %v7869_v29, %v2973_v35  ;;  %v2976_v16 = vmul.f32 0.17677669, %v5903_v18  ;;  %v3026_v40 = vsel %vm3007_vm3, %v7890_v62, -inf }
 0x9e2   : > { %v2925_v48 = vpop.f32.mrf.mxu0  ;;  %3012 = vmax.xlane.f32.xlu0 %v3011_v33  ;;  %3027 = vmax.xlane.f32.xlu1 %v3026_v40 }
 0x9e3   : > { %v7900_v55 = vadd.f32 %v7869_v29, %v2976_v16  ;;  %v2974_v22 = vmul.f32 0.17677669, %v2925_v48  ;;  %v3020_v41 = vsel %vm3007_vm3, %v7893_v38, -inf }
 0x9e4   : > { %v5906_v9 = vpop.f32.mrf.mxu0 }
 0x9e5   : > { %v7903_v42 = vadd.f32 %v7869_v29, %v2974_v22  ;;  %v2979_v51 = vmul.f32 0.17677669, %v5906_v9  ;;  %v3029_v15 = vsel %vm3007_vm3, %v7900_v55, -inf }
 0x9e6   : > { %v2938_v3 = vpop.f32.mrf.mxu0  ;;  %3030 = vmax.xlane.f32.xlu0 %v3029_v15  ;;  %3021 = vmax.xlane.f32.xlu1 %v3020_v41 }
 0x9e7   : > { %v7910_v21 = vadd.f32 %v7869_v29, %v2979_v51  ;;  %v2977_v1 = vmul.f32 0.17677669, %v2938_v3  ;;  %v3023_v13 = vsel %vm3007_vm3, %v7903_v42, -inf }
 0x9e8   : > { %v5907_v58 = vpop.f32.mrf.mxu0 }
 0x9e9   : > { %v7913_v60 = vadd.f32 %v7869_v29, %v2977_v1  ;;  %v2980_v8 = vmul.f32 0.17677669, %v5907_v58  ;;  %v3038_v30 = vsel %vm3007_vm3, %v7910_v21, -inf }
 0x9ea   : > { %v2941_v4 = vpop.f32.mrf.mxu0  ;;  %3024 = vmax.xlane.f32.xlu0 %v3023_v13  ;;  %3039 = vmax.xlane.f32.xlu1 %v3038_v30 }
 0x9eb   : > { %v7920_v50 = vadd.f32 %v7869_v29, %v2980_v8  ;;  %v2978_v10 = vmul.f32 0.17677669, %v2941_v4  ;;  %v3032_v59 = vsel %vm3007_vm3, %v7913_v60, -inf }
 0x9ed   : > { %v7923_v56 = vadd.f32 %v7869_v29, %v2978_v10  ;;  %v3041_v44 = vsel %vm3007_vm3, %v7920_v50, -inf }
 0x9ee   : > { %3042 = vmax.xlane.f32.xlu0 %v3041_v44  ;;  %3033 = vmax.xlane.f32.xlu1 %v3032_v59 }
 0x9ef   : > { %v3035_v47 = vsel %vm3007_vm3, %v7923_v56, -inf }
 0x9f2   : > { %3036 = vmax.xlane.f32.xlu0 %v3035_v47 }
 0xa0f   : > { %v5910_v27 = vpop.f32.mrf.mxu0 }
 0xa10   : > { %v2983_v45 = vmul.f32 0.17677669, %v5910_v27 }
 0xa11   : > { %v2954_v26 = vpop.f32.mrf.mxu0 }
 0xa12   : > { %v7932_v63 = vadd.f32 %v7869_v29, %v2983_v45  ;;  %v2981_v0 = vmul.f32 0.17677669, %v2954_v26 }
 0xa13   : > { %v5911_v46 = vpop.f32.mrf.mxu0 }
 0xa14   : > { %v7935_v14 = vadd.f32 %v7869_v29, %v2981_v0  ;;  %v2984_v39 = vmul.f32 0.17677669, %v5911_v46  ;;  %v3050_v57 = vsel %vm3007_vm3, %v7932_v63, -inf }
 0xa15   : > { %3051 = vmax.xlane.f32.xlu1 %v3050_v57  ;;  %v2957_v2 = vpop.f32.mrf.mxu0 }
 0xa16   : > { %v7940_v35 = vadd.f32 %v7869_v29, %v2984_v39  ;;  %v2982_v18 = vmul.f32 0.17677669, %v2957_v2  ;;  %v3044_v33 = vsel %vm3007_vm3, %v7935_v14, -inf }
 0xa18   : > { %v7943_v16 = vadd.f32 %v7869_v29, %v2982_v18  ;;  %v3053_v40 = vsel %vm3007_vm3, %v7940_v35, -inf }
 0xa19   : > { %3045 = vmax.xlane.f32.xlu1 %v3044_v33  ;;  %3054 = vmax.xlane.f32.xlu0 %v3053_v40 }
 0xa1a   : > { %v3047_v48 = vsel %vm3007_vm3, %v7943_v16, -inf }
 0xa1d   : > { %3048 = vmax.xlane.f32.xlu0 %v3047_v48 }
 0xa2a   : > { %3161 = vrot.lane.b32.xlu1 %v7835_v32, %s6593_s3 }
 0xa47   : > { %v5934_v22 = vpop.f32.mrf.mxu0 }
 0xa48   : > { %v3472_v9 = vmul.f32 0.17677669, %v5934_v22 }
 0xa49   : > { %v3407_v51 = vpop.f32.mrf.mxu0 }
 0xa4a   : > { %v7954_v15 = vadd.f32 %v7869_v29, %v3472_v9  ;;  %v3470_v41 = vmul.f32 0.17677669, %v3407_v51 }
 0xa4b   : > { %v5935_v3 = vpop.f32.mrf.mxu0 }
 0xa4c   : > { %v7957_v1 = vadd.f32 %v7869_v29, %v3470_v41  ;;  %v3473_v58 = vmul.f32 0.17677669, %v5935_v3  ;;  %v3508_v8 = vsel %vm3007_vm3, %v7954_v15, -inf }
 0xa4d   : > { %3509 = vmax.xlane.f32.xlu0 %v3508_v8  ;;  %v3410_v13 = vpop.f32.mrf.mxu0 }
 0xa4e   : > { %v7962_v4 = vadd.f32 %v7869_v29, %v3473_v58  ;;  %v3471_v10 = vmul.f32 0.17677669, %v3410_v13  ;;  %v3502_v44 = vsel %vm3007_vm3, %v7957_v1, -inf }
 0xa4f   : > { %v5938_v30 = vpop.f32.mrf.mxu0 }
 0xa50   : > { %v7967_v45 = vadd.f32 %v7869_v29, %v3471_v10  ;;  %v3476_v26 = vmul.f32 0.17677669, %v5938_v30  ;;  %v3511_v46 = vsel %vm3007_vm3, %v7962_v4, -inf }
 0xa51   : > { %3503 = vmax.xlane.f32.xlu0 %v3502_v44  ;;  %v3423_v59 = vpop.f32.mrf.mxu0 }
 0xa52   : > { %v3474_v47 = vmul.f32 0.17677669, %v3423_v59  ;;  %v7977_v18 = vadd.f32 %v7869_v29, %v3476_v26  ;;  %v3505_v40 = vsel %vm3007_vm3, %v7967_v45, -inf }
 0xa53   : > { %v5939_v27 = vpop.f32.mrf.mxu0 }
 0xa54   : > { %v7970_v0 = vadd.f32 %v7869_v29, %v3474_v47  ;;  %v3477_v33 = vmul.f32 0.17677669, %v5939_v27  ;;  %v3520_v8 = vsel %vm3007_vm3, %v7977_v18, -inf }
 0xa55   : > { %3512 = vmax.xlane.f32.xlu0 %v3511_v46  ;;  %v3426_v39 = vpop.f32.mrf.mxu0 }
 0xa56   : > { %v3514_v57 = vsel %vm3007_vm3, %v7970_v0, -inf  ;;  %v7982_v41 = vadd.f32 %v7869_v29, %v3477_v33  ;;  %v3475_v3 = vmul.f32 0.17677669, %v3426_v39 }
 0xa57   : > { %3515 = vmax.xlane.f32.xlu1 %v3514_v57  ;;  %v5942_v2 = vpop.f32.mrf.mxu0 }
 0xa58   : > { %v3480_v22 = vmul.f32 0.17677669, %v5942_v2  ;;  %v7995_v44 = vadd.f32 %v7869_v29, %v3475_v3  ;;  %v3523_v59 = vsel %vm3007_vm3, %v7982_v41, -inf }
 0xa59   : > { %3506 = vmax.xlane.f32.xlu0 %v3505_v40  ;;  %v3439_v48 = vpop.f32.mrf.mxu0 }
 0xa5a   : > { %v3478_v9 = vmul.f32 0.17677669, %v3439_v48  ;;  %v7990_v13 = vadd.f32 %v7869_v29, %v3480_v22  ;;  %v3517_v46 = vsel %vm3007_vm3, %v7995_v44, -inf }
 0xa5b   : > { %v5943_v51 = vpop.f32.mrf.mxu0 }
 0xa5c   : > { %v7985_v58 = vadd.f32 %v7869_v29, %v3478_v9  ;;  %v3481_v30 = vmul.f32 0.17677669, %v5943_v51  ;;  %v3532_v27 = vsel %vm3007_vm3, %v7990_v13, -inf }
 0xa5d   : > { %3521 = vmax.xlane.f32.xlu0 %v3520_v8 }
 0xa5e   : > { %v3526_v10 = vsel %vm3007_vm3, %v7985_v58, -inf  ;;  %v8000_v47 = vadd.f32 %v7869_v29, %v3481_v30 }
 0xa5f   : > { %3527 = vmax.xlane.f32.xlu1 %v3526_v10  ;;  %v3442_v10 = vpop.f32.mrf.mxu0 }
 0xa60   : > { %v3535_v57 = vsel %vm3007_vm3, %v8000_v47, -inf }
 0xa61   : > { %3524 = vmax.xlane.f32.xlu0 %v3523_v59 }
 0xa63   : > { %v3016_v26 = vpop.xlane.xlu0 %3015  ;;  %3533 = vmax.xlane.f32.xlu1 %v3532_v27 }
 0xa64   : > { %v3058_v30 = vsub.f32 %v7872_v43, %v3016_v26 }
 0xa65   : > { %3518 = vmax.xlane.f32.xlu0 %v3517_v46  ;;  %v3010_v39 = vpop.xlane.xlu1 %3009 }
 0xa66   : > { %v3056_v2 = vsub.f32 %v7875_v28, %v3010_v39  ;;  %v3076_v27 = vmul.f32 1.442695, %v3058_v30 }
 0xa67   : > { %v3019_v33 = vpop.xlane.xlu0 %3018  ;;  %3536 = vmax.xlane.f32.xlu1 %v3535_v57 }
 0xa68   : > { %v3072_v40 = vmul.f32 1.442695, %v3056_v2 }
 0xa6a   : > { %6360 = vpow2.f32 %v3072_v40 }
 0xa6b   : > { %v3013_v48 = vpop.xlane.xlu0 %3012  ;;  %v3028_v8 = vpop.xlane.xlu1 %3027 }
 0xa6c   : > { %v3057_v22 = vsub.f32 %v7885_v31, %v3013_v48  ;;  %v3062_v48 = vsub.f32 %v7890_v62, %v3028_v8 }
 0xa6e   : > { %v3074_v9 = vmul.f32 1.442695, %v3057_v22 }
 0xa6f   : > { %v3031_v59 = vpop.xlane.xlu0 %3030  ;;  %v3022_v39 = vpop.xlane.xlu1 %3021 }
 0xa70   : > { %6362 = vpow2.f32 %v3074_v9 }
 0xa71   : > { %6364 = vpow2.f32 %v3076_v27 }
 0xa73   : > { %v3025_v22 = vpop.xlane.xlu0 %3024 }
 0xa77   : > { %v8012_v51 = vpop.eup %6360  ;;  %v3043_v27 = vpop.xlane.xlu0 %3042 }
 0xa7b   : > { %3654 = vrot.lane.b32.xlu0 %v7835_v32, %s6594_s26  ;;  %v3059_v32 = vsub.f32 %v7880_v49, %v3019_v33  ;;  %v3084_v49 = vmul.f32 1.442695, %v3062_v48  ;;  %v3040_v33 = vpop.xlane.xlu1 %3039 }
 0xa7d   : > { %v8014_v3 = vpop.eup %6362  ;;  %v3078_v30 = vmul.f32 1.442695, %v3059_v32  ;;  %v3066_v32 = vsub.f32 %v7910_v21, %v3040_v33 }
 0xa7e   : > { %v3152_v28 = vpack.c.bf16 %v8014_v3, %v8012_v51 }
 0xa7f   : > { %6366 = vpow2.f32 %v3078_v30  ;;  %v3092_v30 = vmul.f32 1.442695, %v3066_v32 }
 0xa80   : > { %5914 = vmatprep.mubr.msk.bf16.mxu1 %vm3007_vm3, %v3152_v28  ;;  %6368 = vpow2.f32 %v3084_v49 }
 0xa82   : > { %v5946_v31 = vpop.f32.mrf.mxu0 }
 0xa83   : > { %v3484_v46 = vmul.f32 0.17677669, %v5946_v31 }
 0xa84   : > { %v3455_v57 = vpop.f32.mrf.mxu0 }
 0xa85   : > { %v8022_v2 = vadd.f32 %v7869_v29, %v3484_v46  ;;  %v3482_v40 = vmul.f32 0.17677669, %v3455_v57  ;;  %v3060_v46 = vsub.f32 %v7893_v38, %v3022_v39  ;;  %v3034_v39 = vpop.xlane.xlu1 %3033 }
 0xa86   : > { %v5947_v9 = vpop.f32.mrf.mxu0 }
 0xa87   : > { %v8026_v43 = vadd.f32 %v7869_v29, %v3482_v40  ;;  %v3544_v26 = vsel %vm3007_vm3, %v8022_v2, -inf  ;;  %v3485_v57 = vmul.f32 0.17677669, %v5947_v9  ;;  %v3063_v40 = vsub.f32 %v7900_v55, %v3031_v59  ;;  %v8047_v59 = vpop.eup %6364 }
 0xa88   : > { %3545 = vmax.xlane.f32.xlu1 %v3544_v26  ;;  %v3458_v28 = vpop.f32.mrf.mxu0  ;;  %v3080_v26 = vmul.f32 1.442695, %v3060_v46  ;;  %v3479_v9 = vmul.f32 0.17677669, %v3442_v10  ;;  %v3064_v55 = vsub.f32 %v7913_v60, %v3034_v39  ;;  %v3067_v39 = vsub.f32 %v7920_v50, %v3043_v27 }
 0xa89   : > { %v3483_v31 = vmul.f32 0.17677669, %v3458_v28  ;;  %v3538_v8 = vsel %vm3007_vm3, %v8026_v43, -inf  ;;  %v8039_v48 = vadd.f32 %v7869_v29, %v3485_v57  ;;  %v3086_v28 = vmul.f32 1.442695, %v3063_v40 }
 0xa8a   : > { %6370 = vpow2.f32 %v3080_v26  ;;  %v8050_v49 = vadd.f32 %v7869_v29, %v3479_v9  ;;  %v3107_v9 = vsel %vm3007_vm3, %v8014_v3, 0.0 }
 0xa8b   : > { %v8032_v62 = vadd.f32 %v7869_v29, %v3483_v31  ;;  %v3061_v31 = vsub.f32 %v7903_v42, %v3025_v22  ;;  %v3547_v21 = vsel %vm3007_vm3, %v8039_v48, -inf  ;;  %6372 = vpow2.f32 %v3086_v28 }
 0xa8c   : > { %3539 = vmax.xlane.f32.xlu1 %v3538_v8  ;;  %v3037_v8 = vpop.xlane.xlu0 %3036  ;;  %6374 = vpow2.f32 %v3092_v30  ;;  %v3088_v42 = vmul.f32 1.442695, %v3064_v55  ;;  %v3110_v22 = vsel %vm3007_vm3, %v8047_v59, 0.0  ;;  %v3529_v46 = vsel %vm3007_vm3, %v8050_v49, -inf  ;;  %v6367_v57 = vpop.eup %6366 }
 0xa8d   : > { %v3541_v38 = vsel %vm3007_vm3, %v8032_v62, -inf  ;;  %v3082_v33 = vmul.f32 1.442695, %v3061_v31  ;;  %v3065_v10 = vsub.f32 %v7923_v56, %v3037_v8  ;;  %v6369_v40 = vpop.eup %6368  ;;  %v3104_v29 = vsel %vm3007_vm3, %v8012_v51, 0.0 }
 0xa8e   : > { %v3113_v56 = vsel %vm3007_vm3, %v6367_v57, 0.0  ;;  %v3122_v32 = vsel %vm3007_vm3, %v6369_v40, 0.0 }
 0xa8f   : > { %6376 = vpow2.f32 %v3082_v33  ;;  %v3090_v60 = vmul.f32 1.442695, %v3065_v10 }
 0xa90   : > { %3542 = vmax.xlane.f32.xlu1 %v3541_v38  ;;  %6378 = vpow2.f32 %v3088_v42 }
 0xa91   : > { %6380 = vpow2.f32 %v3090_v60 }
 0xa94   : > { %3548 = vmax.xlane.f32.xlu1 %v3547_v21  ;;  %v3094_v21 = vmul.f32 1.442695, %v3067_v39 }
 0xa96   : > { %6382 = vpow2.f32 %v3094_v21 }
 0xa97   : > { %v6371_v38 = vpop.eup %6370 }
 0xa98   : > { %3111 = vadd.xlane.f32.xlu1 %v3110_v22  ;;  %v6373_v28 = vpop.eup %6372  ;;  %v3116_v30 = vsel %vm3007_vm3, %v6371_v38, 0.0 }
 0xa99   : > { %v6375_v55 = vpop.eup %6374  ;;  %v3125_v33 = vsel %vm3007_vm3, %v6373_v28, 0.0 }
 0xa9a   : > { %3530 = vmax.xlane.f32.xlu0 %v3529_v46  ;;  %v3153_v46 = vpack.c.bf16 %v6367_v57, %v8047_v59 }
 0xa9c   : > { %3105 = vadd.xlane.f32.xlu1 %v3104_v29  ;;  %v6377_v10 = vpop.eup %6376 }
 0xa9d   : > { %v6379_v60 = vpop.eup %6378 }
 0xa9e   : > { %3114 = vadd.xlane.f32.xlu0 %v3113_v56  ;;  %v3052_v26 = vpop.xlane.xlu1 %3051  ;;  %v6381_v39 = vpop.eup %6380 }
 0xaa0   : > { %3123 = vadd.xlane.f32.xlu1 %v3122_v32  ;;  %v3119_v32 = vsel %vm3007_vm3, %v6377_v10, 0.0 }
 0xaa2   : > { %v3055_v31 = vpop.xlane.xlu0 %3054  ;;  %3108 = vadd.xlane.f32.xlu0 %v3107_v9  ;;  %v3046_v8 = vpop.xlane.xlu1 %3045  ;;  %v3070_v9 = vsub.f32 %v7932_v63, %v3052_v26 }
 0xaa3   : > { %v3068_v51 = vsub.f32 %v7935_v14, %v3046_v8  ;;  %v3134_v14 = vsel %vm3007_vm3, %v6375_v55, 0.0  ;;  %v3071_v29 = vsub.f32 %v7940_v35, %v3055_v31  ;;  %v3128_v8 = vsel %vm3007_vm3, %v6379_v60, 0.0  ;;  %v8081_v63 = vpop.eup %6382 }
 0xaa4   : > { %3117 = vadd.xlane.f32.xlu1 %v3116_v30  ;;  %v3131_v35 = vsel %vm3007_vm3, %v6381_v39, 0.0  ;;  %v3100_v57 = vmul.f32 1.442695, %v3070_v9  ;;  %v3155_v31 = vpack.c.bf16 %v6373_v28, %v6369_v40  ;;  %v3157_v30 = vpack.c.bf16 %v8081_v63, %v6375_v55 }
 0xaa5   : > { %v3096_v42 = vmul.f32 1.442695, %v3068_v51  ;;  %v3102_v59 = vmul.f32 1.442695, %v3071_v29  ;;  %v3156_v51 = vpack.c.bf16 %v6381_v39, %v6379_v60 }
 0xaa6   : > { %v3049_v50 = vpop.xlane.xlu0 %3048  ;;  %3126 = vadd.xlane.f32.xlu0 %v3125_v33  ;;  %v3162_v27 = vpop.permute.xlu1 %3161 }
 0xaa7   : > { %v3069_v3 = vsub.f32 %v7943_v16, %v3049_v50  ;;  %v3189_v22 = vsel %vm3187_vm4, %v3162_v27, 0  ;;  %6015 = vmatprep.subr.msk.bf16.mxu1 %vm3187_vm4, %v3162_v27  ;;  %6384 = vpow2.f32 %v3096_v42  ;;  %v3154_v16 = vpack.c.bf16 %v6377_v10, %v6371_v38 }
 0xaa8   : > { %3135 = vadd.xlane.f32.xlu1 %v3134_v14  ;;  %5913 = vmatpush3.bf16.msra.mxu1 %v3189_v22 }
 0xaa9   : > { %v3098_v56 = vmul.f32 1.442695, %v3069_v3 }
 0xaaa   : > { %3120 = vadd.xlane.f32.xlu0 %v3119_v32 }
 0xaab   : > { %6386 = vpow2.f32 %v3098_v56  ;;  %5915 = vmatmul.mubr.msk.bf16.vlgmr.msra.gmra.mxu1 %vm3007_vm3, %v3153_v46 }
 0xaac   : > { %3129 = vadd.xlane.f32.xlu1 %v3128_v8  ;;  %5918 = vmatprep.mubr.msk.bf16.mxu1 %vm3007_vm3, %v3154_v16  ;;  %6388 = vpow2.f32 %v3102_v59 }
 0xaad   : > { %6390 = vpow2.f32 %v3100_v57 }
 0xaae   : > { %3132 = vadd.xlane.f32.xlu0 %v3131_v35 }
 0xab3   : > { %5919 = vmatmul.mubr.msk.bf16.gmra.mxu1 %vm3007_vm3, %v3155_v31 }
 0xab4   : > { %5922 = vmatprep.mubr.msk.bf16.mxu1 %vm3007_vm3, %v3156_v51  ;;  %v6385_v26 = vpop.eup %6384 }
 0xab8   : > { %v8083_v38 = vpop.eup %6386 }
 0xab9   : > { %v3158_v21 = vpack.c.bf16 %v8083_v38, %v6385_v26  ;;  %v8089_v40 = vpop.eup %6388 }
 0xaba   : > { %v8091_v28 = vpop.eup %6390 }
 0xabb   : > { %5923 = vmatmul.mubr.msk.bf16.gmra.mxu1 %vm3007_vm3, %v3157_v30  ;;  %v3159_v33 = vpack.c.bf16 %v8089_v40, %v8091_v28 }
 0xabc   : > { %5926 = vmatprep.mubr.msk.bf16.mxu1 %vm3007_vm3, %v3158_v21 }
 0xac3   : > { %5927 = vmatmul.mubr.msk.bf16.gmra.mxu1 %vm3007_vm3, %v3159_v33 }
 0xad6   : > { %v3510_v10 = vpop.xlane.xlu0 %3509 }
 0xad7   : > { %v3552_v42 = vsub.f32 %v7954_v15, %v3510_v10 }
 0xad9   : > { %v3570_v50 = vmul.f32 1.442695, %v3552_v42 }
 0xada   : > { %v3504_v55 = vpop.xlane.xlu0 %3503 }
 0xadb   : > { %6392 = vpow2.f32 %v3570_v50  ;;  %v3550_v27 = vsub.f32 %v7957_v1, %v3504_v55 }
 0xadd   : > { %v3566_v3 = vmul.f32 1.442695, %v3550_v27  ;;  %v3140_v27 = vsel %vm3007_vm3, %v6385_v26, 0.0 }
 0xade   : > { %v3513_v22 = vpop.xlane.xlu0 %3512 }
 0xadf   : > { %6394 = vpow2.f32 %v3566_v3  ;;  %v3553_v14 = vsub.f32 %v7962_v4, %v3513_v22 }
 0xae0   : > { %v3516_v46 = vpop.xlane.xlu1 %3515 }
 0xae1   : > { %v3572_v60 = vmul.f32 1.442695, %v3553_v14  ;;  %v3554_v32 = vsub.f32 %v7970_v0, %v3516_v46 }
 0xae2   : > { %v3507_v29 = vpop.xlane.xlu0 %3506 }
 0xae3   : > { %6396 = vpow2.f32 %v3572_v60  ;;  %v3551_v56 = vsub.f32 %v7967_v45, %v3507_v29  ;;  %v3574_v8 = vmul.f32 1.442695, %v3554_v32  ;;  %v3137_v32 = vsel %vm3007_vm3, %v8081_v63, 0.0 }
 0xae5   : > { %v3568_v39 = vmul.f32 1.442695, %v3551_v56 }
 0xae6   : > { %v3522_v15 = vpop.xlane.xlu0 %3521 }
 0xae7   : > { %6398 = vpow2.f32 %v3568_v39  ;;  %v3556_v16 = vsub.f32 %v7977_v18, %v3522_v15 }
 0xae8   : > { %v6393_v9 = vpop.eup %6392  ;;  %v3528_v1 = vpop.xlane.xlu1 %3527 }
 0xae9   : > { %v3578_v59 = vmul.f32 1.442695, %v3556_v16  ;;  %v3604_v35 = vsel %vm3007_vm3, %v6393_v9, 0.0  ;;  %v3558_v0 = vsub.f32 %v7985_v58, %v3528_v1  ;;  %v3143_v16 = vsel %vm3007_vm3, %v8083_v38, 0.0 }
 0xaea   : > { %v3525_v4 = vpop.xlane.xlu0 %3524  ;;  %3605 = vadd.xlane.f32.xlu1 %v3604_v35 }
 0xaeb   : > { %6400 = vpow2.f32 %v3578_v59  ;;  %v3557_v57 = vsub.f32 %v7982_v41, %v3525_v4  ;;  %v3582_v55 = vmul.f32 1.442695, %v3558_v0 }
 0xaec   : > { %v6395_v31 = vpop.eup %6394  ;;  %v3534_v45 = vpop.xlane.xlu1 %3533  ;;  %6402 = vpow2.f32 %v3574_v8 }
 0xaed   : > { %v3560_v51 = vsub.f32 %v7990_v13, %v3534_v45  ;;  %v3598_v18 = vsel %vm3007_vm3, %v6395_v31, 0.0  ;;  %v3580_v30 = vmul.f32 1.442695, %v3557_v57 }
 0xaee   : > { %v3519_v21 = vpop.xlane.xlu0 %3518  ;;  %3599 = vadd.xlane.f32.xlu1 %v3598_v18 }
 0xaef   : > { %v3586_v33 = vmul.f32 1.442695, %v3560_v51  ;;  %v3555_v10 = vsub.f32 %v7995_v44, %v3519_v21 }
 0xaf0   : > { %v6397_v42 = vpop.eup %6396  ;;  %v3537_v50 = vpop.xlane.xlu1 %3536 }
 0xaf1   : > { %6404 = vpow2.f32 %v3586_v33  ;;  %v3576_v41 = vmul.f32 1.442695, %v3555_v10  ;;  %v3561_v58 = vsub.f32 %v8000_v47, %v3537_v50  ;;  %v3607_v13 = vsel %vm3007_vm3, %v6397_v42, 0.0 }
 0xaf2   : > { %6406 = vpow2.f32 %v3580_v30  ;;  %v3655_v3 = vpop.permute.xlu0 %3654  ;;  %3141 = vadd.xlane.f32.xlu1 %v3140_v27  ;;  %3608 = vadd.xlane.f32.xlu0 %v3607_v13  ;;  %v3647_v26 = vpack.c.bf16 %v6397_v42, %v6393_v9 }
 0xaf3   : > { %6408 = vpow2.f32 %v3576_v41  ;;  %v3681_v22 = vsel %vm3187_vm4, %v3655_v3, 0  ;;  %6017 = vmatprep.subr.msk.bf16.mxu1 %vm3187_vm4, %v3655_v3  ;;  %v3588_v46 = vmul.f32 1.442695, %v3561_v58 }
 0xaf4   : > { %v6399_v44 = vpop.eup %6398  ;;  %5949 = vmatpush3.bf16.msra.mxu1 %v3681_v22  ;;  %6410 = vpow2.f32 %v3582_v55 }
 0xaf5   : > { %v3601_v14 = vsel %vm3007_vm3, %v6399_v44, 0.0  ;;  %v3646_v60 = vpack.c.bf16 %v6399_v44, %v6395_v31  ;;  %6412 = vpow2.f32 %v3588_v46 }
 0xaf6   : > { %3602 = vadd.xlane.f32.xlu0 %v3601_v14 }
 0xaf7   : > { %5950 = vmatprep.mubr.msk.bf16.mxu1 %vm3007_vm3, %v3646_v60 }
 0xaf8   : > { %v6401_v47 = vpop.eup %6400  ;;  %5951 = vmatmul.mubr.msk.bf16.vlgmr.msra.gmra.mxu1 %vm3007_vm3, %v3647_v26 }
 0xaf9   : > { %v3616_v29 = vsel %vm3007_vm3, %v6401_v47, 0.0  ;;  %v6403_v56 = vpop.eup %6402 }
 0xafa   : > { %3617 = vadd.xlane.f32.xlu1 %v3616_v29  ;;  %3138 = vadd.xlane.f32.xlu0 %v3137_v32  ;;  %v3610_v39 = vsel %vm3007_vm3, %v6403_v56, 0.0  ;;  %v8987_v32 = vmov 0  }
 0xafe   : > { %v6405_v15 = vpop.eup %6404  ;;  %3611 = vadd.xlane.f32.xlu1 %v3610_v39  ;;  %3144 = vadd.xlane.f32.xlu0 %v3143_v16 }
 0xaff   : > { %v6407_v9 = vpop.eup %6406  ;;  %v3628_v8 = vsel %vm3007_vm3, %v6405_v15, 0.0 }
 0xb00   : > { %v6409_v1 = vpop.eup %6408  ;;  %v3619_v4 = vsel %vm3007_vm3, %v6407_v9, 0.0  ;;  %v3649_v63 = vpack.c.bf16 %v6407_v9, %v6401_v47 }
 0xb01   : > { %v3648_v59 = vpack.c.bf16 %v6409_v1, %v6403_v56  ;;  %v6411_v35 = vpop.eup %6410  ;;  %v3613_v38 = vsel %vm3007_vm3, %v6409_v1, 0.0 }
 0xb02   : > { %3629 = vadd.xlane.f32.xlu1 %v3628_v8  ;;  %3620 = vadd.xlane.f32.xlu0 %v3619_v4  ;;  %v3622_v57 = vsel %vm3007_vm3, %v6411_v35, 0.0  ;;  %v6413_v31 = vpop.eup %6412 }
 0xb03   : > { %5954 = vmatprep.mubr.msk.bf16.mxu1 %vm3007_vm3, %v3648_v59  ;;  %v3631_v45 = vsel %vm3007_vm3, %v6413_v31, 0.0 }
 0xb04   : > { %5955 = vmatmul.mubr.msk.bf16.gmra.mxu1 %vm3007_vm3, %v3649_v63 }
 0xb06   : > { %3623 = vadd.xlane.f32.xlu1 %v3622_v57  ;;  %3614 = vadd.xlane.f32.xlu0 %v3613_v38 }
 0xb0a   : > { %3632 = vadd.xlane.f32.xlu0 %v3631_v45 }
 0xb11   : > { %v3546_v0 = vpop.xlane.xlu1 %3545 }
 0xb12   : > { %v3564_v51 = vsub.f32 %v8022_v2, %v3546_v0 }
 0xb14   : > { %v3594_v18 = vmul.f32 1.442695, %v3564_v51 }
 0xb15   : > { %v3540_v30 = vpop.xlane.xlu1 %3539 }
 0xb16   : > { %6414 = vpow2.f32 %v3594_v18  ;;  %v3562_v21 = vsub.f32 %v8026_v43, %v3540_v30 }
 0xb18   : > { %v3590_v33 = vmul.f32 1.442695, %v3562_v21 }
 0xb19   : > { %v3543_v10 = vpop.xlane.xlu1 %3542 }
 0xb1a   : > { %6416 = vpow2.f32 %v3590_v33  ;;  %v3563_v42 = vsub.f32 %v8032_v62, %v3543_v10 }
 0xb1c   : > { %v3592_v27 = vmul.f32 1.442695, %v3563_v42 }
 0xb1d   : > { %v3549_v50 = vpop.xlane.xlu1 %3548 }
 0xb1e   : > { %v3565_v55 = vsub.f32 %v8039_v48, %v3549_v50  ;;  %6418 = vpow2.f32 %v3592_v27 }
 0xb20   : > { %v3596_v13 = vmul.f32 1.442695, %v3565_v55 }
 0xb21   : > { %v3112_v39 = vpop.xlane.xlu1 %3111 }
 0xb23   : > { %v6415_v41 = vpop.eup %6414  ;;  %v3531_v58 = vpop.xlane.xlu0 %3530 }
 0xb24   : > { %v3559_v3 = vsub.f32 %v8050_v49, %v3531_v58  ;;  %v3640_v2 = vsel %vm3007_vm3, %v6415_v41, 0.0  ;;  %v3651_v49 = vpack.c.bf16 %v6413_v31, %v6405_v15 }
 0xb25   : > { %3641 = vadd.xlane.f32.xlu1 %v3640_v2  ;;  %v3106_v15 = vpop.xlane.xlu1 %3105 }
 0xb26   : > { %v3584_v22 = vmul.f32 1.442695, %v3559_v3 }
 0xb27   : > { %v6417_v44 = vpop.eup %6416  ;;  %v3115_v16 = vpop.xlane.xlu0 %3114 }
 0xb28   : > { %6420 = vpow2.f32 %v3584_v22  ;;  %v3634_v43 = vsel %vm3007_vm3, %v6417_v44, 0.0 }
 0xb29   : > { %3635 = vadd.xlane.f32.xlu1 %v3634_v43  ;;  %6422 = vpow2.f32 %v3596_v13  ;;  %v3124_v9 = vpop.xlane.xlu1 %3123 }
 0xb2a   : > { %6424 = vrcp.f32 %v3112_v39 }
 0xb2b   : > { %v6419_v62 = vpop.eup %6418  ;;  %v3109_v1 = vpop.xlane.xlu0 %3108  ;;  %6426 = vrcp.f32 %v3106_v15 }
 0xb2c   : > { %v3652_v46 = vpack.c.bf16 %v6419_v62, %v6417_v44  ;;  %v3637_v29 = vsel %vm3007_vm3, %v6419_v62, 0.0  ;;  %6428 = vrcp.f32 %v3115_v16 }
 0xb2d   : > { %v3118_v8 = vpop.xlane.xlu1 %3117  ;;  %6430 = vrcp.f32 %v3109_v1 }
 0xb2e   : > { %6432 = vrcp.f32 %v3124_v9 }
 0xb2f   : > { %v3127_v59 = vpop.xlane.xlu0 %3126  ;;  %6434 = vrcp.f32 %v3118_v8 }
 0xb30   : > { %6436 = vrcp.f32 %v3127_v59 }
 0xb33   : > { %v3121_v4 = vpop.xlane.xlu0 %3120 }
 0xb34   : > { %6438 = vrcp.f32 %v3121_v4 }
 0xb35   : > { %v6421_v14 = vpop.eup %6420 }
 0xb36   : > { %v3625_v48 = vsel %vm3007_vm3, %v6421_v14, 0.0  ;;  %v3650_v60 = vpack.c.bf16 %v6421_v14, %v6411_v35  ;;  %v6423_v26 = vpop.eup %6422  ;;  %v3136_v35 = vpop.xlane.xlu1 %3135 }
 0xb37   : > { %3626 = vadd.xlane.f32.xlu0 %v3625_v48  ;;  %v3643_v47 = vsel %vm3007_vm3, %v6423_v26, 0.0  ;;  %v3653_v56 = vpack.c.bf16 %v6423_v26, %v6415_v41  ;;  %v6425_v63 = vpop.eup %6424  ;;  %6440 = vrcp.f32 %v3136_v35  ;;  %v8156_v43 = vpop.xlane.xlu0 %3132 }
 0xb38   : > { %5958 = vmatprep.mubr.msk.bf16.mxu1 %vm3007_vm3, %v3650_v60  ;;  %v6427_v31 = vpop.eup %6426 }
 0xb39   : > { %5959 = vmatmul.mubr.msk.bf16.gmra.mxu1 %vm3007_vm3, %v3651_v49  ;;  %v6429_v18 = vpop.eup %6428 }
 0xb3a   : > { %5962 = vmatprep.mubr.msk.bf16.mxu1 %vm3007_vm3, %v3652_v46  ;;  %v3130_v45 = vpop.xlane.xlu1 %3129  ;;  %v6431_v33 = vpop.eup %6430 }
 0xb3b   : > { %3644 = vadd.xlane.f32.xlu0 %v3643_v47  ;;  %6442 = vrcp.f32 %v3130_v45  ;;  %v6433_v50 = vpop.eup %6432  ;;  %v6137_v45 = vld [vmem:[%s8952_s13 + $0x10] sm:$0xff]  }
 0xb3c   : > { %v6435_v58 = vpop.eup %6434 }
 0xb3d   : > { %v6437_v13 = vpop.eup %6436 }
 0xb3f   : > { %3638 = vadd.xlane.f32.xlu0 %v3637_v29 }
 0xb41   : > { %5963 = vmatmul.mubr.msk.bf16.gmra.mxu1 %vm3007_vm3, %v3653_v56  ;;  %v6439_v14 = vpop.eup %6438 }
 0xb42   : > { %4456 = vmatprep.mubr.bf16.mxu1 %v8987_v32 }
 0xb44   : > { %v6441_v26 = vpop.eup %6440 }
 0xb48   : > { %v6443_v56 = vpop.eup %6442 }
 0xb6b   : > { %v5916_v57 = vpop.f32.mrf.mxu1 }
 0xb6c   : > { %v8144_v38 = vmul.f32 %v6425_v63, %v5916_v57 }
 0xb6d   : > { %v3225_v0 = vpop.f32.mrf.mxu1 }
 0xb6e   : > { %v8146_v51 = vmul.f32 %v6427_v31, %v3225_v0  ;;  %v6136_v31 = vld [vmem:[%s8952_s13 + $0x18] sm:$0xff]  }
 0xb6f   : > { %v5917_v30 = vpop.f32.mrf.mxu1  ;;  %5966 = vmatprep.subr.bf16.mxu0 %v6136_v31 }
 0xb70   : > { %v8148_v21 = vmul.f32 %v6429_v18, %v5917_v30  ;;  %5967 = vmatpush3.bf16.msra.mxu0 %v6136_v31 }
 0xb71   : > { %v3228_v10 = vpop.f32.mrf.mxu1  ;;  %5968 = vmatprep.subr.bf16.mxu0 %v6137_v45 }
 0xb72   : > { %v8150_v42 = vmul.f32 %v6431_v33, %v3228_v10 }
 0xb73   : > { %v5920_v55 = vpop.f32.mrf.mxu1  ;;  %v3606_v41 = vpop.xlane.xlu1 %3605 }
 0xb74   : > { %v8152_v27 = vmul.f32 %v6433_v50, %v5920_v55  ;;  %5969 = vmatpush3.bf16.msra.mxu0 %v6137_v45 }
 0xb75   : > { %v3241_v3 = vpop.f32.mrf.mxu1 }
 0xb76   : > { %v8154_v2 = vmul.f32 %v6435_v58, %v3241_v3  ;;  %v6138_v58 = vld [vmem:[%s8952_s13 + $0x8] sm:$0xff]  }
 0xb77   : > { %v5921_v22 = vpop.f32.mrf.mxu1  ;;  %v3600_v44 = vpop.xlane.xlu1 %3599  ;;  %5970 = vmatprep.subr.bf16.mxu0 %v6138_v58 }
 0xb78   : > { %v8158_v62 = vmul.f32 %v6437_v13, %v5921_v22  ;;  %5971 = vmatpush3.bf16.msra.mxu0 %v6138_v58  ;;  %v6139_v13 = vld [vmem:[%s8952_s13] sm:$0xff]  }
 0xb79   : > { %v3244_v48 = vpop.f32.mrf.mxu1  ;;  %5972 = vmatprep.subr.bf16.mxu0 %v6139_v13 }
 0xb7a   : > { %v8160_v60 = vmul.f32 %v6439_v14, %v3244_v48 }
 0xb7b   : > { %v5924_v49 = vpop.f32.mrf.mxu1  ;;  %v3142_v46 = vpop.xlane.xlu1 %3141 }
 0xb7c   : > { %v3609_v47 = vpop.xlane.xlu0 %3608  ;;  %v8162_v29 = vmul.f32 %v6441_v26, %v5924_v49  ;;  %6444 = vrcp.f32 %v3142_v46  ;;  %5973 = vmatpush3.bf16.msra.mxu0 %v6139_v13 }
 0xb7d   : > { %v3257_v39 = vpop.f32.mrf.mxu1 }
 0xb7e   : > { %v8164_v15 = vmul.f32 %v6443_v56, %v3257_v39 }
 0xb7f   : > { %v5925_v16 = vpop.f32.mrf.mxu1 }
 0xb80   : > { %v3603_v9 = vpop.xlane.xlu0 %3602 }
 0xb81   : > { %v8166_v1 = vpop.f32.mrf.mxu1 }
 0xb83   : > { %v8168_v59 = vpop.f32.mrf.mxu1  ;;  %v3618_v55 = vpop.xlane.xlu1 %3617 }
 0xb84   : > { %v3139_v8 = vpop.xlane.xlu0 %3138 }
 0xb85   : > { %6446 = vrcp.f32 %v3139_v8  ;;  %v3273_v63 = vpop.f32.mrf.mxu1 }
 0xb87   : > { %v8178_v18 = vpop.f32.mrf.mxu1  ;;  %v3612_v14 = vpop.xlane.xlu1 %3611 }
 0xb88   : > { %v3145_v35 = vpop.xlane.xlu0 %3144 }
 0xb89   : > { %v6445_v4 = vpop.eup %6444  ;;  %6448 = vrcp.f32 %v3145_v35  ;;  %v3276_v10 = vpop.f32.mrf.mxu1 }
 0xb8a   : > { %v8170_v57 = vmul.f32 %v6445_v4, %v3273_v63  ;;  %6450 = vrcp.f32 %v3606_v41 }
 0xb8b   : > { %6452 = vrcp.f32 %v3609_v47 }
 0xb8c   : > { %6454 = vrcp.f32 %v3600_v44  ;;  %v3621_v3 = vpop.xlane.xlu0 %3620 }
 0xb8d   : > { %6456 = vrcp.f32 %v3603_v9 }
 0xb8e   : > { %6458 = vrcp.f32 %v3618_v55 }
 0xb8f   : > { %6460 = vrcp.f32 %v3621_v3 }
 0xb90   : > { %v3615_v41 = vpop.xlane.xlu0 %3614  ;;  %6462 = vrcp.f32 %v3612_v14 }
 0xb91   : > { %6464 = vrcp.f32 %v3615_v41 }
 0xb92   : > { %v6447_v0 = vpop.eup %6446 }
 0xb93   : > { %v8180_v30 = vmul.f32 %v6447_v0, %v5925_v16 }
 0xb96   : > { %v6449_v33 = vpop.eup %6448 }
 0xb97   : > { %v8182_v50 = vmul.f32 %v6449_v33, %v3276_v10  ;;  %v6451_v44 = vpop.eup %6450 }
 0xb98   : > { %v6453_v26 = vpop.eup %6452 }
 0xb99   : > { %v6455_v46 = vpop.eup %6454 }
 0xb9a   : > { %v6457_v39 = vpop.eup %6456 }
 0xb9b   : > { %v6459_v45 = vpop.eup %6458 }
 0xb9c   : > { %v6461_v0 = vpop.eup %6460 }
 0xb9d   : > { %v6463_v10 = vpop.eup %6462 }
 0xb9e   : > { %v6465_v3 = vpop.eup %6464 }
 0xbb8   : > { %v5952_v22 = vpop.f32.mrf.mxu1 }
 0xbb9   : > { %v3798_v47 = vmul.f32 %v6451_v44, %v5952_v22  ;;  %v3630_v44 = vpop.xlane.xlu1 %3629 }
 0xbba   : > { %v3717_v48 = vpop.f32.mrf.mxu1  ;;  %6466 = vrcp.f32 %v3630_v44 }
 0xbbb   : > { %v3796_v9 = vmul.f32 %v6455_v46, %v3717_v48  ;;  %v3149_v46 = vsel %vm3007_vm3, %v8089_v40, 0.0 }
 0xbbc   : > { %v5953_v49 = vpop.f32.mrf.mxu1 }
 0xbbd   : > { %v3799_v56 = vmul.f32 %v6453_v26, %v5953_v49  ;;  %v3633_v26 = vpop.xlane.xlu0 %3632 }
 0xbbe   : > { %v3720_v16 = vpop.f32.mrf.mxu1  ;;  %6468 = vrcp.f32 %v3633_v26 }
 0xbbf   : > { %v6072_v8 = vpack.i.bf16 %v3799_v56, %v3798_v47  ;;  %v3797_v35 = vmul.f32 %v6457_v39, %v3720_v16  ;;  %v3624_v47 = vpop.xlane.xlu1 %3623  ;;  %v3146_v16 = vsel %vm3007_vm3, %v8091_v28, 0.0 }
 0xbc0   : > { %6470 = vrcp.f32 %v3624_v47 }
 0xbc1   : > { %v6077_v4 = vpack.i.bf16 %v3797_v35, %v3796_v9  ;;  %6073 = vrot.lane.b32.xlu0 %v6072_v8, %s6594_s26  ;;  %v3627_v49 = vpop.xlane.xlu0 %3626 }
 0xbc2   : > { %6472 = vrcp.f32 %v3627_v49 }
 0xbc3   : > { %6078 = vrot.lane.b32.xlu1 %v6077_v4, %s6594_s26  ;;  %v3642_v56 = vpop.xlane.xlu1 %3641 }
 0xbc4   : > { %v5956_v63 = vpop.f32.mrf.mxu1 }
 0xbc5   : > { %v3802_v55 = vmul.f32 %v6459_v45, %v5956_v63  ;;  %v3645_v39 = vpop.xlane.xlu0 %3644 }
 0xbc6   : > { %v3733_v31 = vpop.f32.mrf.mxu1 }
 0xbc7   : > { %v3800_v22 = vmul.f32 %v6463_v10, %v3733_v31  ;;  %v3636_v9 = vpop.xlane.xlu1 %3635  ;;  %v6467_v63 = vpop.eup %6466 }
 0xbc8   : > { %v5957_v33 = vpop.f32.mrf.mxu1  ;;  %6474 = vrcp.f32 %v3636_v9 }
 0xbc9   : > { %v3803_v58 = vmul.f32 %v6461_v0, %v5957_v33  ;;  %v3639_v8 = vpop.xlane.xlu0 %3638 }
 0xbca   : > { %v3736_v13 = vpop.f32.mrf.mxu1  ;;  %6476 = vrcp.f32 %v3639_v8 }
 0xbcb   : > { %v6082_v14 = vpack.i.bf16 %v3803_v58, %v3802_v55  ;;  %v3801_v41 = vmul.f32 %v6465_v3, %v3736_v13  ;;  %6478 = vrcp.f32 %v3645_v39  ;;  %v6469_v40 = vpop.eup %6468 }
 0xbcc   : > { %6480 = vrcp.f32 %v3642_v56 }
 0xbcd   : > { %v6087_v48 = vpack.i.bf16 %v3801_v41, %v3800_v22  ;;  %6083 = vrot.lane.b32.xlu0 %v6082_v14, %s6594_s26  ;;  %v6471_v45 = vpop.eup %6470  ;;  %6482 = vrcp.f32 %v8156_v43 }
 0xbcf   : > { %6088 = vrot.lane.b32.xlu1 %v6087_v48, %s6594_s26  ;;  %v6473_v10 = vpop.eup %6472 }
 0xbd5   : > { %v6475_v48 = vpop.eup %6474 }
 0xbd7   : > { %v6477_v44 = vpop.eup %6476 }
 0xbd8   : > { %v6479_v47 = vpop.eup %6478 }
 0xbec   : > { %3150 = vadd.xlane.f32.xlu0 %v3149_v46 }
 0xbf3   : > { %3147 = vadd.xlane.f32.xlu1 %v3146_v16  ;;  %v6481_v16 = vpop.eup %6480 }
 0xbf9   : > { %v5960_v35 = vpop.f32.mrf.mxu1 }
 0xbfa   : > { %v3806_v0 = vmul.f32 %v6467_v63, %v5960_v35 }
 0xbfb   : > { %v3749_v4 = vpop.f32.mrf.mxu1 }
 0xbfc   : > { %v3804_v58 = vmul.f32 %v6471_v45, %v3749_v4 }
 0xbfd   : > { %v5961_v31 = vpop.f32.mrf.mxu1 }
 0xbfe   : > { %v3807_v33 = vmul.f32 %v6469_v40, %v5961_v31 }
 0xbff   : > { %v3752_v55 = vpop.f32.mrf.mxu1 }
 0xc00   : > { %v6097_v3 = vpack.i.bf16 %v3807_v33, %v3806_v0  ;;  %v3805_v28 = vmul.f32 %v6473_v10, %v3752_v55 }
 0xc01   : > { %v5964_v13 = vpop.f32.mrf.mxu1 }
 0xc02   : > { %v6092_v22 = vpack.i.bf16 %v3805_v28, %v3804_v58  ;;  %6098 = vrot.lane.b32.xlu0 %v6097_v3, %s6594_s26  ;;  %v3810_v9 = vmul.f32 %v6481_v16, %v5964_v13 }
 0xc03   : > { %v3765_v14 = vpop.f32.mrf.mxu1 }
 0xc04   : > { %6093 = vrot.lane.b32.xlu1 %v6092_v22, %s6594_s26  ;;  %v3808_v49 = vmul.f32 %v6475_v48, %v3765_v14 }
 0xc05   : > { %v5965_v41 = vpop.f32.mrf.mxu1 }
 0xc06   : > { %v3811_v56 = vmul.f32 %v6479_v47, %v5965_v41 }
 0xc07   : > { %v3768_v26 = vpop.f32.mrf.mxu1 }
 0xc08   : > { %v3809_v46 = vmul.f32 %v6477_v44, %v3768_v26  ;;  %v6107_v8 = vpack.i.bf16 %v3811_v56, %v3810_v9 }
 0xc0a   : > { %v6102_v39 = vpack.i.bf16 %v3809_v46, %v3808_v49 }
 0xc0c   : > { %6103 = vrot.lane.b32.xlu1 %v6102_v39, %s6594_s26  ;;  %v6483_v39 = vpop.eup %6482 }
 0xc0d   : > { %v3313_v9 = vmul.f32 %v6483_v39, %v8166_v1 }
 0xc10   : > { %6108 = vrot.lane.b32.xlu1 %v6107_v8, %s6594_s26 }
 0xc33   : > { %v6074_v35 = vpop.permute.xlu0 %6073 }
 0xc34   : > { %v6076_v4 = vunpack.i.h.bf16 %v6074_v35  ;;  %v6075_v63 = vunpack.i.l.bf16 %v6074_v35 }
 0xc35   : > { %v6079_v40 = vpop.permute.xlu1 %6078 }
 0xc36   : > { %v3879_v31 = vsel %vm1194_vm1, %v8148_v21, %v6076_v4  ;;  %v3878_v45 = vsel %vm1194_vm1, %v8144_v38, %v6075_v63  ;;  %v6081_v0 = vunpack.i.h.bf16 %v6079_v40  ;;  %v6080_v33 = vunpack.i.l.bf16 %v6079_v40 }
 0xc37   : > { %v3893_v10 = vpack.c.bf16 %v3879_v31, %v3878_v45 }
 0xc38   : > { %v3877_v55 = vsel %vm1194_vm1, %v8150_v42, %v6081_v0  ;;  %v3876_v58 = vsel %vm1194_vm1, %v8146_v51, %v6080_v33 }
 0xc39   : > { %v3892_v3 = vpack.c.bf16 %v3877_v55, %v3876_v58 }
 0xc3b   : > { %5974 = vmatprep.mubr.msk.bf16.mxu0 %vm689_vm0, %v3892_v3 }
 0xc3c   : > { %5975 = vmatmul.mubr.msk.bf16.vlgmr.msra.gmra.mxu0 %vm689_vm0, %v3893_v10 }
 0xc3f   : > { %v6084_v28 = vpop.permute.xlu0 %6083 }
 0xc40   : > { %v6086_v13 = vunpack.i.h.bf16 %v6084_v28  ;;  %v6085_v21 = vunpack.i.l.bf16 %v6084_v28 }
 0xc41   : > { %v6089_v22 = vpop.permute.xlu1 %6088 }
 0xc42   : > { %v3883_v38 = vsel %vm1194_vm1, %v8158_v62, %v6086_v13  ;;  %v3882_v14 = vsel %vm1194_vm1, %v8152_v27, %v6085_v21  ;;  %v6091_v41 = vunpack.i.h.bf16 %v6089_v22  ;;  %v6090_v42 = vunpack.i.l.bf16 %v6089_v22 }
 0xc43   : > { %v3895_v48 = vpack.c.bf16 %v3883_v38, %v3882_v14 }
 0xc44   : > { %v3881_v51 = vsel %vm1194_vm1, %v8160_v60, %v6091_v41  ;;  %v3880_v44 = vsel %vm1194_vm1, %v8154_v2, %v6090_v42 }
 0xc45   : > { %v3894_v26 = vpack.c.bf16 %v3881_v51, %v3880_v44 }
 0xc47   : > { %5978 = vmatprep.mubr.msk.bf16.mxu0 %vm689_vm0, %v3894_v26 }
 0xc48   : > { %5979 = vmatmul.mubr.msk.bf16.gmra.mxu0 %vm689_vm0, %v3895_v48 }
 0xc75   : > { %v3151_v62 = vpop.xlane.xlu0 %3150 }
 0xc76   : > { %6484 = vrcp.f32 %v3151_v62 }
 0xc79   : > { %v6099_v49 = vpop.permute.xlu0 %6098 }
 0xc7a   : > { %v6101_v46 = vunpack.i.h.bf16 %v6099_v49  ;;  %v6100_v27 = vunpack.i.l.bf16 %v6099_v49 }
 0xc7c   : > { %v3887_v47 = vsel %vm1194_vm1, %v8180_v30, %v6101_v46  ;;  %v3886_v60 = vsel %vm1194_vm1, %v8162_v29, %v6100_v27  ;;  %v3148_v56 = vpop.xlane.xlu1 %3147 }
 0xc7d   : > { %v3897_v2 = vpack.c.bf16 %v3887_v47, %v3886_v60  ;;  %6486 = vrcp.f32 %v3148_v56 }
 0xc80   : > { %v6094_v16 = vpop.permute.xlu1 %6093 }
 0xc81   : > { %v6096_v8 = vunpack.i.h.bf16 %v6094_v16  ;;  %v6095_v43 = vunpack.i.l.bf16 %v6094_v16 }
 0xc83   : > { %v3885_v35 = vsel %vm1194_vm1, %v3313_v9, %v6096_v8  ;;  %v3884_v4 = vsel %vm1194_vm1, %v8164_v15, %v6095_v43  ;;  %v6485_v1 = vpop.eup %6484 }
 0xc84   : > { %v3896_v63 = vpack.c.bf16 %v3885_v35, %v3884_v4  ;;  %v6104_v40 = vpop.permute.xlu1 %6103  ;;  %v3319_v58 = vmul.f32 %v6485_v1, %v8178_v18 }
 0xc85   : > { %v6106_v30 = vunpack.i.h.bf16 %v6104_v40  ;;  %v6105_v31 = vunpack.i.l.bf16 %v6104_v40 }
 0xc86   : > { %5982 = vmatprep.mubr.msk.bf16.mxu0 %vm689_vm0, %v3896_v63 }
 0xc87   : > { %v3889_v29 = vsel %vm1194_vm1, %v8182_v50, %v6106_v30  ;;  %v3888_v45 = vsel %vm1194_vm1, %v8170_v57, %v6105_v31  ;;  %5983 = vmatmul.mubr.msk.bf16.gmra.mxu0 %vm689_vm0, %v3897_v2  ;;  %v3908_v57 = vld [vmem:[%s8953_s14] sm:$0x1] }
 0xc88   : > { %v3898_v0 = vpack.c.bf16 %v3889_v29, %v3888_v45  ;;  %v6109_v33 = vpop.permute.xlu1 %6108  ;;  %v3909_v21 = vunpack.c.l.bf16 %v3908_v57 }
 0xc89   : > { %v6111_v10 = vunpack.i.h.bf16 %v6109_v33  ;;  %v6110_v3 = vunpack.i.l.bf16 %v6109_v33 }
 0xc8a   : > { %v6487_v55 = vpop.eup %6486  ;;  %5986 = vmatprep.mubr.msk.bf16.mxu0 %vm689_vm0, %v3898_v0  ;;  %v8247_v38 = vrot.slane %v3909_v21, %v6942_v17 }
 0xc8b   : > { %v3318_v15 = vmul.f32 %v6487_v55, %v8168_v59  ;;  %v3891_v28 = vsel %vm1194_vm1, %v3319_v58, %v6111_v10 }
 0xc8d   : > { %v3890_v50 = vsel %vm1194_vm1, %v3318_v15, %v6110_v3 }
 0xc8e   : > { %v3899_v13 = vpack.c.bf16 %v3891_v28, %v3890_v50 }
 0xc90   : > { %5987 = vmatmul.mubr.msk.bf16.gmra.mxu0 %vm689_vm0, %v3899_v13 }
 0xcfc   : > { %v5976_v22 = vpop.f32.mrf.mxu0 }
 0xcfd   : > { %v4005_v48 = vadd.f32 %v5976_v22, %v8247_v38 }
 0xcfe   : > { %v3996_v59 = vpop.f32.mrf.mxu0 }
 0xcff   : > { %v3997_v18 = vadd.f32 %v3996_v59, %v8247_v38  ;;  %v8262_v49 = vadd.f32 %v4005_v48, %v7576_v34 }
 0xd00   : > { %v5977_v14 = vpop.f32.mrf.mxu0 }
 0xd01   : > { %v8251_v41 = vadd.f32 %v3997_v18, %v7561_v53  ;;  %v4008_v62 = vadd.f32 %v5977_v14, %v8247_v38 }
 0xd02   : > { %v3999_v42 = vpop.f32.mrf.mxu0 }
 0xd03   : > { %v4000_v51 = vadd.f32 %v3999_v42, %v8247_v38  ;;  %v4075_v44 = vsel %vm689_vm0, %v8251_v41, 0.0  ;;  %v8267_v27 = vadd.f32 %v4008_v62, %v7567_v54 }
 0xd04   : > { %4076 = vadd.xlane.f32.xlu1 %v4075_v44 }
 0xd05   : > { %v8258_v26 = vadd.f32 %v4000_v51, %v7573_v7  ;;  %v4081_v7 = vsel %vm689_vm0, %v8262_v49, 0.0  ;;  %v4084_v16 = vsel %vm689_vm0, %v8267_v27, 0.0 }
 0xd07   : > { %v4078_v53 = vsel %vm689_vm0, %v8258_v26, 0.0 }
 0xd08   : > { %v5980_v46 = vpop.f32.mrf.mxu0  ;;  %4079 = vadd.xlane.f32.xlu0 %v4078_v53 }
 0xd09   : > { %v4021_v60 = vadd.f32 %v5980_v46, %v8247_v38 }
 0xd0a   : > { %v4012_v47 = vpop.f32.mrf.mxu0 }
 0xd0b   : > { %v4013_v56 = vadd.f32 %v4012_v47, %v8247_v38  ;;  %v8279_v54 = vadd.f32 %v4021_v60, %v7598_v5 }
 0xd0c   : > { %v5981_v2 = vpop.f32.mrf.mxu0  ;;  %4082 = vadd.xlane.f32.xlu0 %v4081_v7 }
 0xd0d   : > { %v8274_v34 = vadd.f32 %v4013_v56, %v7590_v52  ;;  %v4024_v9 = vadd.f32 %v5981_v2, %v8247_v38  ;;  %v4093_v5 = vsel %vm689_vm0, %v8279_v54, 0.0 }
 0xd0e   : > { %v4015_v39 = vpop.f32.mrf.mxu0 }
 0xd0f   : > { %v4016_v8 = vadd.f32 %v4015_v39, %v8247_v38  ;;  %v4087_v43 = vsel %vm689_vm0, %v8274_v34, 0.0  ;;  %v8289_v52 = vadd.f32 %v4024_v9, %v7604_v25 }
 0xd10   : > { %4085 = vadd.xlane.f32.xlu0 %v4084_v16  ;;  %4088 = vadd.xlane.f32.xlu1 %v4087_v43 }
 0xd11   : > { %v8286_v35 = vadd.f32 %v4016_v8, %v7601_v24  ;;  %v4096_v63 = vsel %vm689_vm0, %v8289_v52, 0.0 }
 0xd13   : > { %v4090_v4 = vsel %vm689_vm0, %v8286_v35, 0.0 }
 0xd14   : > { %4091 = vadd.xlane.f32.xlu0 %v4090_v4  ;;  %4094 = vadd.xlane.f32.xlu1 %v4093_v5 }
 0xd18   : > { %4097 = vadd.xlane.f32.xlu0 %v4096_v63 }
 0xd47   : > { %v5984_v40 = vpop.f32.mrf.mxu0 }
 0xd48   : > { %v4037_v24 = vadd.f32 %v5984_v40, %v8247_v38 }
 0xd49   : > { %v4028_v30 = vpop.f32.mrf.mxu0 }
 0xd4a   : > { %v4029_v31 = vadd.f32 %v4028_v30, %v8247_v38  ;;  %v8303_v1 = vadd.f32 %v4037_v24, %v7622_v12 }
 0xd4b   : > { %v5985_v25 = vpop.f32.mrf.mxu0 }
 0xd4c   : > { %v8300_v29 = vadd.f32 %v4029_v31, %v7618_v6  ;;  %v4040_v0 = vadd.f32 %v5985_v25, %v8247_v38  ;;  %v4105_v3 = vsel %vm689_vm0, %v8303_v1, 0.0 }
 0xd4d   : > { %v4031_v45 = vpop.f32.mrf.mxu0 }
 0xd4e   : > { %v4032_v33 = vadd.f32 %v4031_v45, %v8247_v38  ;;  %v4099_v10 = vsel %vm689_vm0, %v8300_v29, 0.0  ;;  %v8313_v58 = vadd.f32 %v4040_v0, %v7632_v23 }
 0xd4f   : > { %4100 = vadd.xlane.f32.xlu1 %v4099_v10 }
 0xd50   : > { %v8310_v55 = vadd.f32 %v4032_v33, %v7629_v36  ;;  %v5988_v15 = vpop.f32.mrf.mxu0  ;;  %v4108_v23 = vsel %vm689_vm0, %v8313_v58, 0.0 }
 0xd51   : > { %v4053_v28 = vadd.f32 %v5988_v15, %v8247_v38 }
 0xd52   : > { %v4044_v6 = vpop.f32.mrf.mxu0  ;;  %v4102_v12 = vsel %vm689_vm0, %v8310_v55, 0.0 }
 0xd53   : > { %v4045_v50 = vadd.f32 %v4044_v6, %v8247_v38  ;;  %4103 = vadd.xlane.f32.xlu0 %v4102_v12  ;;  %4106 = vadd.xlane.f32.xlu1 %v4105_v3  ;;  %v8327_v21 = vadd.f32 %v4053_v28, %v7644_v19 }
 0xd54   : > { %v5989_v13 = vpop.f32.mrf.mxu0 }
 0xd55   : > { %v8322_v36 = vadd.f32 %v4045_v50, %v7649_v61  ;;  %v4056_v22 = vadd.f32 %v5989_v13, %v8247_v38  ;;  %v4117_v19 = vsel %vm689_vm0, %v8327_v21, 0.0 }
 0xd56   : > { %v4047_v57 = vpop.f32.mrf.mxu0 }
 0xd57   : > { %v4048_v59 = vadd.f32 %v4047_v57, %v8247_v38  ;;  %4109 = vadd.xlane.f32.xlu0 %v4108_v23  ;;  %v4111_v18 = vsel %vm689_vm0, %v8322_v36, 0.0  ;;  %v8337_v61 = vadd.f32 %v4056_v22, %v7656_v37 }
 0xd58   : > { %4112 = vadd.xlane.f32.xlu1 %v4111_v18  ;;  %v6140_v18 = vld [vmem:[%s8954_s15 + $0x30] ss:$8 sps:$4 sm:$0xff]  }
 0xd59   : > { %v8334_v14 = vadd.f32 %v4048_v59, %v7660_v11  ;;  %v4120_v38 = vsel %vm689_vm0, %v8337_v61, 0.0  ;;  %v6142_v59 = vld [vmem:[%s8954_s15 + $0x34] ss:$8 sps:$4 sm:$0xff]  }
 0xd5a   : > { %4432 = vmatprep.subr.bf16.mxu1 %v6142_v59 }
 0xd5b   : > { %v4114_v42 = vsel %vm689_vm0, %v8334_v14, 0.0  ;;  %4433 = vmatpush1.bf16.msra.mxu1 %v6140_v18 }
 0xd5c   : > { %4115 = vadd.xlane.f32.xlu0 %v4114_v42  ;;  %4118 = vadd.xlane.f32.xlu1 %v4117_v19  ;;  %v6145_v42 = vld [vmem:[%s8954_s15 + $0x24] ss:$8 sps:$4 sm:$0xff]   ;;  %v6143_v19 = vld [vmem:[%s8954_s15 + $0x20] ss:$8 sps:$4 sm:$0xff]  }
 0xd5d   : > { %4434 = vmatprep.subr.bf16.mxu1 %v6145_v42 }
 0xd5f   : > { %4435 = vmatpush1.bf16.msra.mxu1 %v6143_v19 }
 0xd60   : > { %4121 = vadd.xlane.f32.xlu0 %v4120_v38  ;;  %v6148_v38 = vld [vmem:[%s8954_s15 + $0x14] ss:$8 sps:$4 sm:$0xff]  }
 0xd61   : > { %4436 = vmatprep.subr.bf16.mxu1 %v6148_v38 }
 0xd8d   : > { %v4077_v48 = vpop.xlane.xlu1 %4076 }
 0xd8e   : > { %v4123_v51 = vmul.f32 0.015625, %v4077_v48  ;;  %v6146_v48 = vld [vmem:[%s8954_s15 + $0x10] ss:$8 sps:$4 sm:$0xff]  }
 0xd8f   : > { %4437 = vmatpush1.bf16.msra.mxu1 %v6146_v48 }
 0xd90   : > { %v8346_v11 = vsub.f32 %v8251_v41, %v4123_v51  ;;  %v6151_v51 = vld [vmem:[%s8954_s15 + $0x4] ss:$8 sps:$4 sm:$0xff]  }
 0xd91   : > { %v4080_v44 = vpop.xlane.xlu0 %4079  ;;  %4438 = vmatprep.subr.bf16.mxu1 %v6151_v51 }
 0xd92   : > { %v4124_v37 = vmul.f32 0.015625, %v4080_v44  ;;  %v4155_v62 = vmul.f32 %v8346_v11, %v8346_v11  ;;  %v6149_v44 = vld [vmem:[%s8954_s15] ss:$8 sps:$4 sm:$0xff]  }
 0xd93   : > { %4439 = vmatpush1.bf16.msra.mxu1 %v6149_v44 }
 0xd94   : > { %v8351_v53 = vsub.f32 %v8258_v26, %v4124_v37  ;;  %v4171_v46 = vsel %vm689_vm0, %v4155_v62, 0.0 }
 0xd95   : > { %v4083_v47 = vpop.xlane.xlu0 %4082  ;;  %4172 = vadd.xlane.f32.xlu1 %v4171_v46 }
 0xd96   : > { %v4125_v60 = vmul.f32 0.015625, %v4083_v47  ;;  %v4156_v56 = vmul.f32 %v8351_v53, %v8351_v53 }
 0xd98   : > { %v8357_v7 = vsub.f32 %v8262_v49, %v4125_v60  ;;  %v4174_v2 = vsel %vm689_vm0, %v4156_v56, 0.0 }
 0xd99   : > { %4175 = vadd.xlane.f32.xlu0 %v4174_v2  ;;  %v4086_v39 = vpop.xlane.xlu0 %4085  ;;  %v4089_v16 = vpop.xlane.xlu1 %4088 }
 0xd9a   : > { %v4126_v9 = vmul.f32 0.015625, %v4086_v39  ;;  %v4127_v8 = vmul.f32 0.015625, %v4089_v16  ;;  %v4157_v43 = vmul.f32 %v8357_v7, %v8357_v7 }
 0xd9c   : > { %v8363_v4 = vsub.f32 %v8267_v27, %v4126_v9  ;;  %v8366_v5 = vsub.f32 %v8274_v34, %v4127_v8  ;;  %v4177_v63 = vsel %vm689_vm0, %v4157_v43, 0.0 }
 0xd9d   : > { %v4092_v40 = vpop.xlane.xlu0 %4091  ;;  %4178 = vadd.xlane.f32.xlu1 %v4177_v63  ;;  %v4095_v30 = vpop.xlane.xlu1 %4094 }
 0xd9e   : > { %v4128_v24 = vmul.f32 0.015625, %v4092_v40  ;;  %v4129_v31 = vmul.f32 0.015625, %v4095_v30  ;;  %v4158_v25 = vmul.f32 %v8363_v4, %v8363_v4  ;;  %v4159_v45 = vmul.f32 %v8366_v5, %v8366_v5 }
 0xda0   : > { %v8374_v0 = vsub.f32 %v8286_v35, %v4128_v24  ;;  %v8377_v33 = vsub.f32 %v8279_v54, %v4129_v31  ;;  %v4180_v10 = vsel %vm689_vm0, %v4158_v25, 0.0  ;;  %v4183_v15 = vsel %vm689_vm0, %v4159_v45, 0.0 }
 0xda1   : > { %4181 = vadd.xlane.f32.xlu0 %v4180_v10  ;;  %v4098_v6 = vpop.xlane.xlu0 %4097  ;;  %4184 = vadd.xlane.f32.xlu1 %v4183_v15 }
 0xda2   : > { %v4130_v12 = vmul.f32 0.015625, %v4098_v6  ;;  %v4160_v3 = vmul.f32 %v8374_v0, %v8374_v0  ;;  %v4161_v28 = vmul.f32 %v8377_v33, %v8377_v33 }
 0xda4   : > { %v8386_v50 = vsub.f32 %v8289_v52, %v4130_v12  ;;  %v4186_v13 = vsel %vm689_vm0, %v4160_v3, 0.0  ;;  %v4189_v57 = vsel %vm689_vm0, %v4161_v28, 0.0 }
 0xda5   : > { %4187 = vadd.xlane.f32.xlu0 %v4186_v13  ;;  %4190 = vadd.xlane.f32.xlu1 %v4189_v57 }
 0xda6   : > { %v4162_v23 = vmul.f32 %v8386_v50, %v8386_v50 }
 0xda8   : > { %v4192_v22 = vsel %vm689_vm0, %v4162_v23, 0.0 }
 0xda9   : > { %4193 = vadd.xlane.f32.xlu0 %v4192_v22 }
 0xdd8   : > { %v4101_v37 = vpop.xlane.xlu1 %4100 }
 0xdd9   : > { %v4131_v62 = vmul.f32 0.015625, %v4101_v37 }
 0xddb   : > { %v8418_v46 = vsub.f32 %v8300_v29, %v4131_v62 }
 0xddc   : > { %v4104_v47 = vpop.xlane.xlu0 %4103  ;;  %v4107_v60 = vpop.xlane.xlu1 %4106 }
 0xddd   : > { %v4132_v56 = vmul.f32 0.015625, %v4104_v47  ;;  %v4133_v2 = vmul.f32 0.015625, %v4107_v60  ;;  %v4163_v39 = vmul.f32 %v8418_v46, %v8418_v46 }
 0xddf   : > { %v8423_v16 = vsub.f32 %v8310_v55, %v4132_v56  ;;  %v8426_v9 = vsub.f32 %v8303_v1, %v4133_v2  ;;  %v4195_v8 = vsel %vm689_vm0, %v4163_v39, 0.0 }
 0xde0   : > { %v4110_v43 = vpop.xlane.xlu0 %4109  ;;  %4196 = vadd.xlane.f32.xlu1 %v4195_v8 }
 0xde1   : > { %v4134_v63 = vmul.f32 0.015625, %v4110_v43  ;;  %v4113_v40 = vpop.xlane.xlu1 %4112  ;;  %v4164_v30 = vmul.f32 %v8423_v16, %v8423_v16  ;;  %v4165_v24 = vmul.f32 %v8426_v9, %v8426_v9 }
 0xde2   : > { %v4135_v31 = vmul.f32 0.015625, %v4113_v40 }
 0xde3   : > { %v8434_v25 = vsub.f32 %v8313_v58, %v4134_v63  ;;  %v4198_v45 = vsel %vm689_vm0, %v4164_v30, 0.0  ;;  %v4201_v10 = vsel %vm689_vm0, %v4165_v24, 0.0 }
 0xde4   : > { %v8439_v15 = vsub.f32 %v8322_v36, %v4135_v31  ;;  %4199 = vadd.xlane.f32.xlu0 %v4198_v45  ;;  %4202 = vadd.xlane.f32.xlu1 %v4201_v10 }
 0xde5   : > { %v4116_v6 = vpop.xlane.xlu0 %4115  ;;  %v4119_v12 = vpop.xlane.xlu1 %4118  ;;  %v4166_v3 = vmul.f32 %v8434_v25, %v8434_v25 }
 0xde6   : > { %v4136_v28 = vmul.f32 0.015625, %v4116_v6  ;;  %v4137_v13 = vmul.f32 0.015625, %v4119_v12  ;;  %v4167_v57 = vmul.f32 %v8439_v15, %v8439_v15 }
 0xde7   : > { %v4204_v23 = vsel %vm689_vm0, %v4166_v3, 0.0 }
 0xde8   : > { %v8447_v22 = vsub.f32 %v8334_v14, %v4136_v28  ;;  %v8450_v59 = vsub.f32 %v8327_v21, %v4137_v13  ;;  %4205 = vadd.xlane.f32.xlu0 %v4204_v23  ;;  %v4207_v18 = vsel %vm689_vm0, %v4167_v57, 0.0 }
 0xde9   : > { %v4122_v42 = vpop.xlane.xlu0 %4121  ;;  %4208 = vadd.xlane.f32.xlu1 %v4207_v18 }
 0xdea   : > { %v4138_v19 = vmul.f32 0.015625, %v4122_v42  ;;  %v4168_v38 = vmul.f32 %v8447_v22, %v8447_v22  ;;  %v4169_v48 = vmul.f32 %v8450_v59, %v8450_v59 }
 0xdec   : > { %v8458_v51 = vsub.f32 %v8337_v61, %v4138_v19  ;;  %v4210_v44 = vsel %vm689_vm0, %v4168_v38, 0.0  ;;  %v4213_v37 = vsel %vm689_vm0, %v4169_v48, 0.0 }
 0xded   : > { %4211 = vadd.xlane.f32.xlu0 %v4210_v44  ;;  %4214 = vadd.xlane.f32.xlu1 %v4213_v37  ;;  %v8988_v44 = vld [vmem:[#allocation4_spill] sm:$0xff] }
 0xdee   : > { %v4170_v62 = vmul.f32 %v8458_v51, %v8458_v51 }
 0xdf0   : > { %v4216_v47 = vsel %vm689_vm0, %v4170_v62, 0.0 }
 0xdf1   : > { %4217 = vadd.xlane.f32.xlu0 %v4216_v47 }
 0xe1e   : > { %v4173_v60 = vpop.xlane.xlu1 %4172 }
 0xe1f   : > { %v4219_v56 = vmul.f32 0.015625, %v4173_v60 }
 0xe21   : > { %v4235_v2 = vadd.f32 1e-06, %v4219_v56 }
 0xe22   : > { %v4176_v39 = vpop.xlane.xlu0 %4175 }
 0xe23   : > { %6488 = vrsqrt.f32 %v4235_v2  ;;  %v4220_v8 = vmul.f32 0.015625, %v4176_v39  ;;  %v8989_v39 = vld [vmem:[#allocation2_spill] sm:$0xff] }
 0xe25   : > { %v4236_v43 = vadd.f32 1e-06, %v4220_v8 }
 0xe26   : > { %v4179_v63 = vpop.xlane.xlu1 %4178 }
 0xe27   : > { %6490 = vrsqrt.f32 %v4236_v43  ;;  %v4221_v40 = vmul.f32 0.015625, %v4179_v63 }
 0xe29   : > { %v4237_v30 = vadd.f32 1e-06, %v4221_v40 }
 0xe2a   : > { %v4182_v24 = vpop.xlane.xlu0 %4181  ;;  %v4185_v31 = vpop.xlane.xlu1 %4184 }
 0xe2b   : > { %6492 = vrsqrt.f32 %v4237_v30  ;;  %v4222_v45 = vmul.f32 0.015625, %v4182_v24  ;;  %v4223_v10 = vmul.f32 0.015625, %v4185_v31 }
 0xe2d   : > { %v4238_v6 = vadd.f32 1e-06, %v4222_v45  ;;  %v4239_v12 = vadd.f32 1e-06, %v4223_v10 }
 0xe2e   : > { %v4188_v3 = vpop.xlane.xlu0 %4187  ;;  %v4191_v28 = vpop.xlane.xlu1 %4190 }
 0xe2f   : > { %6494 = vrsqrt.f32 %v4238_v6  ;;  %v4224_v13 = vmul.f32 0.015625, %v4188_v3  ;;  %v4225_v42 = vmul.f32 0.015625, %v4191_v28 }
 0xe30   : > { %v6489_v57 = vpop.eup %6488  ;;  %6496 = vrsqrt.f32 %v4239_v12 }
 0xe31   : > { %v4267_v23 = vmul.f32 %v6489_v57, %v8346_v11  ;;  %v4240_v18 = vadd.f32 1e-06, %v4224_v13  ;;  %v4241_v47 = vadd.f32 1e-06, %v4225_v42 }
 0xe32   : > { %v4194_v19 = vpop.xlane.xlu0 %4193 }
 0xe33   : > { %6498 = vrsqrt.f32 %v4240_v18  ;;  %v4226_v38 = vmul.f32 0.015625, %v4194_v19  ;;  %v4287_v37 = vmul.f32 %v8988_v44, %v4267_v23 }
 0xe34   : > { %v6491_v48 = vpop.eup %6490 }
 0xe35   : > { %v4268_v62 = vmul.f32 %v6491_v48, %v8351_v53  ;;  %v4242_v60 = vadd.f32 1e-06, %v4226_v38  ;;  %v4307_v11 = vadd.f32 %v8989_v39, %v4287_v37 }
 0xe37   : > { %v4288_v56 = vmul.f32 %v8988_v44, %v4268_v62  ;;  %6500 = vrsqrt.f32 %v4242_v60 }
 0xe38   : > { %v6493_v2 = vpop.eup %6492  ;;  %6502 = vrsqrt.f32 %v4241_v47 }
 0xe39   : > { %v4308_v8 = vadd.f32 %v8989_v39, %v4288_v56  ;;  %v4269_v43 = vmul.f32 %v6493_v2, %v8357_v7 }
 0xe3b   : > { %v4323_v63 = vpack.c.bf16 %v4308_v8, %v4307_v11  ;;  %v4289_v53 = vmul.f32 %v8988_v44, %v4269_v43 }
 0xe3c   : > { %v6495_v40 = vpop.eup %6494 }
 0xe3d   : > { %5402 = vmatmul.mubr.msk.bf16.vlgmr.msra.gmra.mxu1 %vm689_vm0, %v4323_v63  ;;  %v4270_v30 = vmul.f32 %v6495_v40, %v8363_v4  ;;  %v6497_v24 = vpop.eup %6496  ;;  %v4309_v10 = vadd.f32 %v8989_v39, %v4289_v53 }
 0xe3e   : > { %4466 = vmatprep.mubr.bf16.mxu1 %v8987_v32  ;;  %v4271_v7 = vmul.f32 %v6497_v24, %v8366_v5 }
 0xe3f   : > { %v4290_v31 = vmul.f32 %v8988_v44, %v4270_v30 }
 0xe40   : > { %v6499_v45 = vpop.eup %6498  ;;  %v4291_v13 = vmul.f32 %v8988_v44, %v4271_v7 }
 0xe41   : > { %v4310_v6 = vadd.f32 %v8989_v39, %v4290_v31  ;;  %v4272_v12 = vmul.f32 %v6499_v45, %v8374_v0 }
 0xe42   : > { %v4311_v5 = vadd.f32 %v8989_v39, %v4291_v13 }
 0xe43   : > { %v4324_v3 = vpack.c.bf16 %v4310_v6, %v4309_v10  ;;  %v4292_v28 = vmul.f32 %v8988_v44, %v4272_v12 }
 0xe44   : > { %v6501_v4 = vpop.eup %6500 }
 0xe45   : > { %5403 = vmatmul.mubr.msk.bf16.gmra.mxu1 %vm689_vm0, %v4324_v3  ;;  %v6503_v57 = vpop.eup %6502  ;;  %v4274_v23 = vmul.f32 %v6501_v4, %v8386_v50  ;;  %v4312_v18 = vadd.f32 %v8989_v39, %v4292_v28 }
 0xe46   : > { %4476 = vmatprep.mubr.bf16.mxu1 %v8987_v32  ;;  %v4273_v42 = vmul.f32 %v6503_v57, %v8377_v33 }
 0xe47   : > { %v4325_v0 = vpack.c.bf16 %v4312_v18, %v4311_v5  ;;  %v4294_v19 = vmul.f32 %v8988_v44, %v4274_v23 }
 0xe48   : > { %v4293_v38 = vmul.f32 %v8988_v44, %v4273_v42 }
 0xe49   : > { %v4314_v48 = vadd.f32 %v8989_v39, %v4294_v19 }
 0xe4a   : > { %v4313_v37 = vadd.f32 %v8989_v39, %v4293_v38 }
 0xe4c   : > { %v4326_v50 = vpack.c.bf16 %v4314_v48, %v4313_v37 }
 0xe4d   : > { %5404 = vmatmul.mubr.msk.bf16.gmra.mxu1 %vm689_vm0, %v4325_v0 }
 0xe4e   : > { %4486 = vmatprep.mubr.bf16.mxu1 %v8987_v32 }
 0xe55   : > { %5405 = vmatmul.mubr.msk.bf16.gmra.mxu1 %vm689_vm0, %v4326_v50 }
 0xe56   : > { %4496 = vmatprep.mubr.bf16.mxu1 %v8987_v32 }
 0xe69   : > { %v4197_v33 = vpop.xlane.xlu1 %4196 }
 0xe6a   : > { %v4227_v62 = vmul.f32 0.015625, %v4197_v33 }
 0xe6c   : > { %v4243_v47 = vadd.f32 1e-06, %v4227_v62 }
 0xe6d   : > { %v4200_v60 = vpop.xlane.xlu0 %4199  ;;  %v4203_v56 = vpop.xlane.xlu1 %4202 }
 0xe6e   : > { %6504 = vrsqrt.f32 %v4243_v47  ;;  %v4228_v2 = vmul.f32 0.015625, %v4200_v60  ;;  %v4229_v11 = vmul.f32 0.015625, %v4203_v56  ;;  %v6153_v47 = vld [vmem:[%s8956_s17 + $0x38] sm:$0xff]  }
 0xe70   : > { %v4244_v8 = vadd.f32 1e-06, %v4228_v2  ;;  %v4245_v43 = vadd.f32 1e-06, %v4229_v11  ;;  %v6154_v11 = vld [vmem:[%s8956_s17 + $0x70] sm:$0xff]  }
 0xe71   : > { %v4206_v63 = vpop.xlane.xlu0 %4205 }
 0xe72   : > { %6506 = vrsqrt.f32 %v4244_v8  ;;  %v4230_v40 = vmul.f32 0.015625, %v4206_v63  ;;  %v4209_v30 = vpop.xlane.xlu1 %4208  ;;  %v6155_v8 = vld [vmem:[%s8956_s17 + $0x30] sm:$0xff]  }
 0xe73   : > { %6508 = vrsqrt.f32 %v4245_v43  ;;  %v4231_v24 = vmul.f32 0.015625, %v4209_v30 }
 0xe74   : > { %v4246_v53 = vadd.f32 1e-06, %v4230_v40 }
 0xe75   : > { %v4247_v10 = vadd.f32 1e-06, %v4231_v24  ;;  %v6157_v24 = vld [vmem:[%s8956_s17 + $0x28] sm:$0xff]  }
 0xe76   : > { %6510 = vrsqrt.f32 %v4246_v53  ;;  %v4212_v31 = vpop.xlane.xlu0 %4211  ;;  %v4215_v6 = vpop.xlane.xlu1 %4214 }
 0xe77   : > { %v4232_v45 = vmul.f32 0.015625, %v4212_v31  ;;  %v4233_v28 = vmul.f32 0.015625, %v4215_v6  ;;  %v6158_v6 = vld [vmem:[%s8956_s17 + $0x60] sm:$0xff]  }
 0xe79   : > { %v4248_v7 = vadd.f32 1e-06, %v4232_v45  ;;  %v4249_v18 = vadd.f32 1e-06, %v4233_v28 }
 0xe7a   : > { %v4218_v12 = vpop.xlane.xlu0 %4217 }
 0xe7b   : > { %v6505_v3 = vpop.eup %6504  ;;  %6512 = vrsqrt.f32 %v4248_v7  ;;  %v4234_v4 = vmul.f32 0.015625, %v4218_v12  ;;  %v6159_v7 = vld [vmem:[%s8956_s17 + $0x20] sm:$0xff]  }
 0xe7c   : > { %v4275_v13 = vmul.f32 %v6505_v3, %v8418_v46  ;;  %6514 = vrsqrt.f32 %v4247_v10 }
 0xe7d   : > { %v4250_v57 = vadd.f32 1e-06, %v4234_v4 }
 0xe7e   : > { %v4295_v5 = vmul.f32 %v8988_v44, %v4275_v13  ;;  %v6161_v13 = vld [vmem:[%s8956_s17 + $0x18] sm:$0xff]  }
 0xe7f   : > { %v6507_v23 = vpop.eup %6506  ;;  %6516 = vrsqrt.f32 %v4250_v57 }
 0xe80   : > { %v4276_v42 = vmul.f32 %v6507_v23, %v8423_v16  ;;  %v6509_v0 = vpop.eup %6508  ;;  %6518 = vrsqrt.f32 %v4249_v18  ;;  %v4315_v46 = vadd.f32 %v8989_v39, %v4295_v5  ;;  %v6152_v16 = vld [vmem:[%s8956_s17 + $0x78] sm:$0xff]   ;;  %v6162_v23 = vld [vmem:[%s8956_s17 + $0x50] sm:$0xff]  }
 0xe81   : > { %v4277_v48 = vmul.f32 %v6509_v0, %v8426_v9  ;;  %5642 = vmatprep.subr.bf16.mxu0 %v6152_v16  ;;  %v6167_v0 = vld [vmem:[%s8956_s17] sm:$0xff]  }
 0xe82   : > { %v4296_v19 = vmul.f32 %v8988_v44, %v4276_v42  ;;  %5643 = vmatpush3.bf16.msra.mxu0 %v6153_v47  ;;  %v6163_v42 = vld [vmem:[%s8956_s17 + $0x10] sm:$0xff]  }
 0xe83   : > { %v6511_v38 = vpop.eup %6510  ;;  %v4297_v9 = vmul.f32 %v8988_v44, %v4277_v48  ;;  %5644 = vmatprep.subr.bf16.mxu0 %v6154_v11 }
 0xe84   : > { %v4278_v37 = vmul.f32 %v6511_v38, %v8434_v25  ;;  %v4316_v50 = vadd.f32 %v8989_v39, %v4296_v19  ;;  %v4339_v19 = vld [vmem:[%s8955_s16] sm:$0x3] }
 0xe85   : > { %v4317_v63 = vadd.f32 %v8989_v39, %v4297_v9  ;;  %v4340_v38 = vunpack.c.l.bf16 %v4339_v19 }
 0xe86   : > { %v4327_v33 = vpack.c.bf16 %v4316_v50, %v4315_v46  ;;  %v4298_v62 = vmul.f32 %v8988_v44, %v4278_v37  ;;  %5645 = vmatpush3.bf16.msra.mxu0 %v6155_v8 }
 0xe87   : > { %v4345_v48 = vrot.slane %v4340_v38, %v6942_v17  ;;  %v4349_v37 = vrot.slane %v4340_v38, %v7043_v20 }
 0xe88   : > { %v6513_v60 = vpop.eup %6512  ;;  %5406 = vmatmul.mubr.msk.bf16.gmra.mxu1 %vm689_vm0, %v4327_v33  ;;  %v4318_v2 = vadd.f32 %v8989_v39, %v4298_v62 }
 0xe89   : > { %v6515_v25 = vpop.eup %6514  ;;  %4506 = vmatprep.mubr.bf16.mxu1 %v8987_v32  ;;  %v4280_v56 = vmul.f32 %v6513_v60, %v8447_v22  ;;  %v6156_v22 = vld [vmem:[%s8956_s17 + $0x68] sm:$0xff]   ;;  %v8582_v46 = vrot.slane %v4345_v48, %v6942_v17  ;;  %v8585_v50 = vrot.slane %v4349_v37, %v6942_v17 }
 0xe8a   : > { %v4279_v43 = vmul.f32 %v6515_v25, %v8439_v15  ;;  %v4328_v40 = vpack.c.bf16 %v4318_v2, %v4317_v63  ;;  %5646 = vmatprep.subr.bf16.mxu0 %v6156_v22 }
 0xe8b   : > { %v4300_v30 = vmul.f32 %v8988_v44, %v4280_v56  ;;  %5647 = vmatpush3.bf16.msra.mxu0 %v6157_v24 }
 0xe8c   : > { %v6517_v53 = vpop.eup %6516  ;;  %v4299_v15 = vmul.f32 %v8988_v44, %v4279_v43  ;;  %5648 = vmatprep.subr.bf16.mxu0 %v6158_v6 }
 0xe8d   : > { %v6519_v31 = vpop.eup %6518  ;;  %v4282_v45 = vmul.f32 %v6517_v53, %v8458_v51  ;;  %v4320_v10 = vadd.f32 %v8989_v39, %v4300_v30  ;;  %v6160_v51 = vld [vmem:[%s8956_s17 + $0x58] sm:$0xff]  }
 0xe8e   : > { %v4281_v12 = vmul.f32 %v6519_v31, %v8450_v59  ;;  %v4319_v3 = vadd.f32 %v8989_v39, %v4299_v15 }
 0xe8f   : > { %5649 = vmatpush3.bf16.msra.mxu0 %v6159_v7  ;;  %v4302_v4 = vmul.f32 %v8988_v44, %v4282_v45 }
 0xe90   : > { %5407 = vmatmul.mubr.msk.bf16.gmra.mxu1 %vm689_vm0, %v4328_v40  ;;  %v4329_v28 = vpack.c.bf16 %v4320_v10, %v4319_v3  ;;  %v4301_v57 = vmul.f32 %v8988_v44, %v4281_v12  ;;  %5650 = vmatprep.subr.bf16.mxu0 %v6160_v51  ;;  %v6165_v44 = vld [vmem:[%s8956_s17 + $0x8] sm:$0xff]  }
 0xe91   : > { %4516 = vmatprep.mubr.bf16.mxu1 %v8987_v32  ;;  %v4322_v59 = vadd.f32 %v8989_v39, %v4302_v4 }
 0xe92   : > { %v4321_v18 = vadd.f32 %v8989_v39, %v4301_v57  ;;  %v6166_v39 = vld [vmem:[%s8956_s17 + $0x40] sm:$0xff]  }
 0xe93   : > { %5651 = vmatpush3.bf16.msra.mxu0 %v6161_v13 }
 0xe94   : > { %5652 = vmatprep.subr.bf16.mxu0 %v6162_v23  ;;  %v4330_v5 = vpack.c.bf16 %v4322_v59, %v4321_v18 }
 0xe97   : > { %5653 = vmatpush3.bf16.msra.mxu0 %v6163_v42 }
 0xe98   : > { %5408 = vmatmul.mubr.msk.bf16.gmra.mxu1 %vm689_vm0, %v4329_v28 }
 0xe99   : > { %4526 = vmatprep.mubr.bf16.mxu1 %v8987_v32  ;;  %v6164_v32 = vld [vmem:[%s8956_s17 + $0x48] sm:$0xff]  }
 0xe9a   : > { %5654 = vmatprep.subr.bf16.mxu0 %v6164_v32 }
 0xe9b   : > { %5655 = vmatpush3.bf16.msra.mxu0 %v6165_v44 }
 0xe9c   : > { %5656 = vmatprep.subr.bf16.mxu0 %v6166_v39 }
 0xe9f   : > { %5657 = vmatpush3.bf16.msra.mxu0 %v6167_v0 }
 0xea0   : > { %5409 = vmatmul.mubr.msk.bf16.gmra.mxu1 %vm689_vm0, %v4330_v5 }
 0xefd   : > { %v4458_v33 = vpop.f32.mrf.mxu1 }
 0xefe   : > { %v8588_v62 = vadd.f32 %v4458_v33, %v8582_v46 }
 0xeff   : > { %v4460_v16 = vpop.f32.mrf.mxu1 }
 0xf00   : > { %v4537_v47 = vmul.f32 %v8588_v62, %v8588_v62  ;;  %v8593_v60 = vadd.f32 %v4460_v16, %v8585_v50 }
 0xf01   : > { %v4462_v9 = vpop.f32.mrf.mxu1 }
 0xf02   : > { %v4569_v20 = vmul.f32 %v4537_v47, %v8588_v62  ;;  %v4538_v25 = vmul.f32 %v8593_v60, %v8593_v60  ;;  %v8599_v56 = vadd.f32 %v4462_v9, %v8582_v46 }
 0xf03   : > { %v4464_v2 = vpop.f32.mrf.mxu1 }
 0xf04   : > { %v4601_v11 = vmul.f32 0.044715, %v4569_v20  ;;  %v4570_v8 = vmul.f32 %v4538_v25, %v8593_v60  ;;  %v4539_v43 = vmul.f32 %v8599_v56, %v8599_v56  ;;  %v8605_v63 = vadd.f32 %v4464_v2, %v8585_v50 }
 0xf05   : > { %v4468_v40 = vpop.f32.mrf.mxu1 }
 0xf06   : > { %v4633_v30 = vadd.f32 %v4601_v11, %v8588_v62  ;;  %v4602_v22 = vmul.f32 0.044715, %v4570_v8  ;;  %v4571_v53 = vmul.f32 %v4539_v43, %v8599_v56  ;;  %v4540_v24 = vmul.f32 %v8605_v63, %v8605_v63 }
 0xf07   : > { %v8612_v31 = vadd.f32 %v4468_v40, %v8582_v46  ;;  %v4470_v15 = vpop.f32.mrf.mxu1 }
 0xf08   : > { %v4665_v45 = vmul.f32 0.7978846, %v4633_v30  ;;  %v4634_v10 = vadd.f32 %v4602_v22, %v8593_v60  ;;  %v4603_v6 = vmul.f32 0.044715, %v4571_v53  ;;  %v4572_v7 = vmul.f32 %v4540_v24, %v8605_v63 }
 0xf09   : > { %v4541_v12 = vmul.f32 %v8612_v31, %v8612_v31  ;;  %v8619_v3 = vadd.f32 %v4470_v15, %v8585_v50  ;;  %v4472_v28 = vpop.f32.mrf.mxu1 }
 0xf0a   : > { %6520 = vtanh.f32 %v4665_v45  ;;  %v4666_v4 = vmul.f32 0.7978846, %v4634_v10  ;;  %v4635_v51 = vadd.f32 %v4603_v6, %v8599_v56  ;;  %v4604_v13 = vmul.f32 0.044715, %v4572_v7 }
 0xf0b   : > { %v4573_v57 = vmul.f32 %v4541_v12, %v8612_v31  ;;  %v4542_v59 = vmul.f32 %v8619_v3, %v8619_v3  ;;  %v8626_v23 = vadd.f32 %v4472_v28, %v8582_v46  ;;  %v4474_v18 = vpop.f32.mrf.mxu1 }
 0xf0c   : > { %v4667_v42 = vmul.f32 0.7978846, %v4635_v51  ;;  %v4636_v5 = vadd.f32 %v4604_v13, %v8605_v63  ;;  %v8630_v32 = vadd.f32 %v4474_v18, %v8585_v50  ;;  %6522 = vtanh.f32 %v4666_v4 }
 0xf0d   : > { %v4605_v44 = vmul.f32 0.044715, %v4573_v57  ;;  %v4574_v39 = vmul.f32 %v4542_v59, %v8619_v3  ;;  %v4543_v0 = vmul.f32 %v8626_v23, %v8626_v23  ;;  %v4478_v19 = vpop.f32.mrf.mxu1 }
 0xf0e   : > { %6524 = vtanh.f32 %v4667_v42  ;;  %v4668_v38 = vmul.f32 0.7978846, %v4636_v5  ;;  %v4544_v48 = vmul.f32 %v8630_v32, %v8630_v32  ;;  %v8638_v37 = vadd.f32 %v4478_v19, %v8582_v46 }
 0xf0f   : > { %v4637_v33 = vadd.f32 %v4605_v44, %v8612_v31  ;;  %v4606_v16 = vmul.f32 0.044715, %v4574_v39  ;;  %v4575_v47 = vmul.f32 %v4543_v0, %v8626_v23  ;;  %v4480_v9 = vpop.f32.mrf.mxu1 }
 0xf10   : > { %6526 = vtanh.f32 %v4668_v38  ;;  %v4576_v20 = vmul.f32 %v4544_v48, %v8630_v32  ;;  %v4545_v25 = vmul.f32 %v8638_v37, %v8638_v37  ;;  %v8646_v2 = vadd.f32 %v4480_v9, %v8585_v50 }
 0xf11   : > { %v4669_v11 = vmul.f32 0.7978846, %v4637_v33  ;;  %v4638_v8 = vadd.f32 %v4606_v16, %v8619_v3  ;;  %v4607_v43 = vmul.f32 0.044715, %v4575_v47  ;;  %v4482_v40 = vpop.f32.mrf.mxu1 }
 0xf12   : > { %v4608_v30 = vmul.f32 0.044715, %v4576_v20  ;;  %v4577_v22 = vmul.f32 %v4545_v25, %v8638_v37  ;;  %v4546_v53 = vmul.f32 %v8646_v2, %v8646_v2  ;;  %v8653_v24 = vadd.f32 %v4482_v40, %v8582_v46 }
 0xf13   : > { %6528 = vtanh.f32 %v4669_v11  ;;  %v4670_v15 = vmul.f32 0.7978846, %v4638_v8  ;;  %v4639_v45 = vadd.f32 %v4607_v43, %v8626_v23  ;;  %v4484_v10 = vpop.f32.mrf.mxu1 }
 0xf14   : > { %v4640_v6 = vadd.f32 %v4608_v30, %v8630_v32  ;;  %v4609_v7 = vmul.f32 0.044715, %v4577_v22  ;;  %v4578_v12 = vmul.f32 %v4546_v53, %v8646_v2  ;;  %v4547_v28 = vmul.f32 %v8653_v24, %v8653_v24 }
 0xf15   : > { %6530 = vtanh.f32 %v4670_v15  ;;  %v4671_v4 = vmul.f32 0.7978846, %v4639_v45  ;;  %v8661_v51 = vadd.f32 %v4484_v10, %v8585_v50  ;;  %v4488_v13 = vpop.f32.mrf.mxu1 }
 0xf16   : > { %v4672_v57 = vmul.f32 0.7978846, %v4640_v6  ;;  %v4641_v59 = vadd.f32 %v4609_v7, %v8638_v37  ;;  %v4610_v18 = vmul.f32 0.044715, %v4578_v12  ;;  %v4579_v42 = vmul.f32 %v4547_v28, %v8653_v24 }
 0xf17   : > { %v6521_v5 = vpop.eup %6520  ;;  %6532 = vtanh.f32 %v4671_v4  ;;  %v4548_v44 = vmul.f32 %v8661_v51, %v8661_v51  ;;  %v8668_v39 = vadd.f32 %v4488_v13, %v8582_v46  ;;  %v4490_v0 = vpop.f32.mrf.mxu1 }
 0xf18   : > { %v4729_v19 = vadd.f32 1.0, %v6521_v5  ;;  %6534 = vtanh.f32 %v4672_v57  ;;  %v4673_v38 = vmul.f32 0.7978846, %v4641_v59  ;;  %v4642_v48 = vadd.f32 %v4610_v18, %v8646_v2 }
 0xf19   : > { %v4611_v33 = vmul.f32 0.044715, %v4579_v42  ;;  %v4580_v16 = vmul.f32 %v4548_v44, %v8661_v51  ;;  %v4549_v47 = vmul.f32 %v8668_v39, %v8668_v39  ;;  %v8675_v9 = vadd.f32 %v4490_v0, %v8585_v50  ;;  %v4492_v20 = vpop.f32.mrf.mxu1  ;;  %v6523_v25 = vpop.eup %6522 }
 0xf1a   : > { %6536 = vtanh.f32 %v4673_v38  ;;  %v4674_v11 = vmul.f32 0.7978846, %v4642_v48  ;;  %v8678_v8 = vadd.f32 %v4492_v20, %v8582_v46  ;;  %v4761_v45 = vmul.f32 0.5, %v4729_v19 }
 0xf1b   : > { %v6525_v43 = vpop.eup %6524  ;;  %v4643_v40 = vadd.f32 %v4611_v33, %v8653_v24  ;;  %v4612_v30 = vmul.f32 0.044715, %v4580_v16  ;;  %v4581_v22 = vmul.f32 %v4549_v47, %v8668_v39  ;;  %v4550_v53 = vmul.f32 %v8675_v9, %v8675_v9  ;;  %v4494_v15 = vpop.f32.mrf.mxu1 }
 0xf1c   : > { %v4731_v10 = vadd.f32 1.0, %v6525_v43  ;;  %6538 = vtanh.f32 %v4674_v11  ;;  %v4551_v6 = vmul.f32 %v8678_v8, %v8678_v8  ;;  %v8690_v18 = vadd.f32 %v4494_v15, %v8585_v50 }
 0xf1d   : > { %v6527_v7 = vpop.eup %6526  ;;  %v4675_v12 = vmul.f32 0.7978846, %v4643_v40  ;;  %v4644_v28 = vadd.f32 %v4612_v30, %v8661_v51  ;;  %v4613_v4 = vmul.f32 0.044715, %v4581_v22  ;;  %v4582_v13 = vmul.f32 %v4550_v53, %v8675_v9 }
 0xf1e   : > { %v4763_v57 = vmul.f32 0.5, %v4731_v10  ;;  %v4583_v59 = vmul.f32 %v4551_v6, %v8678_v8  ;;  %v4730_v42 = vadd.f32 1.0, %v6523_v25  ;;  %v4552_v48 = vmul.f32 %v8690_v18, %v8690_v18 }
 0xf1f   : > { %6540 = vtanh.f32 %v4675_v12  ;;  %v4676_v5 = vmul.f32 0.7978846, %v4644_v28  ;;  %v4645_v44 = vadd.f32 %v4613_v4, %v8668_v39  ;;  %v4614_v0 = vmul.f32 0.044715, %v4582_v13 }
 0xf20   : > { %v6529_v19 = vpop.eup %6528  ;;  %v4615_v38 = vmul.f32 0.044715, %v4583_v59  ;;  %v4732_v33 = vadd.f32 1.0, %v6527_v7  ;;  %v4793_v11 = vmul.f32 %v4761_v45, %v8588_v62  ;;  %v4584_v43 = vmul.f32 %v4552_v48, %v8690_v18 }
 0xf21   : > { %6542 = vtanh.f32 %v4676_v5  ;;  %v4677_v16 = vmul.f32 0.7978846, %v4645_v44  ;;  %v4646_v47 = vadd.f32 %v4614_v0, %v8675_v9  ;;  %v4762_v40 = vmul.f32 0.5, %v4730_v42 }
 0xf22   : > { %v6531_v20 = vpop.eup %6530  ;;  %v4647_v25 = vadd.f32 %v4615_v38, %v8678_v8  ;;  %v4795_v30 = vmul.f32 %v4763_v57, %v8599_v56  ;;  %v4733_v22 = vadd.f32 1.0, %v6529_v19  ;;  %v4764_v15 = vmul.f32 0.5, %v4732_v33 }
 0xf23   : > { %v4678_v53 = vmul.f32 0.7978846, %v4646_v47  ;;  %6544 = vtanh.f32 %v4677_v16  ;;  %v4616_v7 = vmul.f32 0.044715, %v4584_v43  ;;  %v4734_v12 = vadd.f32 1.0, %v6531_v20 }
 0xf24   : > { %v6533_v10 = vpop.eup %6532  ;;  %v4679_v6 = vmul.f32 0.7978846, %v4647_v25  ;;  %v4794_v62 = vmul.f32 %v4762_v40, %v8593_v60  ;;  %v4796_v45 = vmul.f32 %v4764_v15, %v8605_v63  ;;  %v4825_v5 = vpack.c.bf16 %v4795_v30, %v4793_v11 }
 0xf25   : > { %v6535_v28 = vpop.eup %6534  ;;  %v4735_v4 = vadd.f32 1.0, %v6533_v10  ;;  %6546 = vtanh.f32 %v4678_v53  ;;  %v4648_v13 = vadd.f32 %v4616_v7, %v8690_v18  ;;  %v4766_v56 = vmul.f32 0.5, %v4734_v12 }
 0xf26   : > { %6548 = vtanh.f32 %v4679_v6  ;;  %v4736_v59 = vadd.f32 1.0, %v6535_v28  ;;  %v4826_v42 = vpack.c.bf16 %v4796_v45, %v4794_v62  ;;  %v4765_v48 = vmul.f32 0.5, %v4733_v22 }
 0xf27   : > { %v6537_v57 = vpop.eup %6536  ;;  %v4767_v44 = vmul.f32 0.5, %v4735_v4  ;;  %v4680_v0 = vmul.f32 0.7978846, %v4648_v13  ;;  %v4798_v60 = vmul.f32 %v4766_v56, %v8619_v3 }
 0xf28   : > { %v4768_v19 = vmul.f32 0.5, %v4736_v59  ;;  %5007 = vmatprep.mubr.bf16.mxu0 %v4826_v42  ;;  %v4797_v11 = vmul.f32 %v4765_v48, %v8612_v31  ;;  %v4737_v40 = vadd.f32 1.0, %v6537_v57 }
 0xf29   : > { %v6539_v38 = vpop.eup %6538  ;;  %6550 = vtanh.f32 %v4680_v0  ;;  %5008 = vmatmul.mubr.bf16.vlgmr.msra.gmra.mxu0 %v4825_v5  ;;  %v4799_v47 = vmul.f32 %v4767_v44, %v8626_v23 }
 0xf2a   : > { %v4800_v63 = vmul.f32 %v4768_v19, %v8630_v32  ;;  %v4738_v33 = vadd.f32 1.0, %v6539_v38  ;;  %v4769_v7 = vmul.f32 0.5, %v4737_v40 }
 0xf2b   : > { %v4827_v15 = vpack.c.bf16 %v4799_v47, %v4797_v11 }
 0xf2c   : > { %v6541_v16 = vpop.eup %6540  ;;  %v4828_v20 = vpack.c.bf16 %v4800_v63, %v4798_v60  ;;  %v4770_v53 = vmul.f32 0.5, %v4738_v33  ;;  %v4801_v45 = vmul.f32 %v4769_v7, %v8638_v37 }
 0xf2d   : > { %v4739_v25 = vadd.f32 1.0, %v6541_v16 }
 0xf2e   : > { %v6543_v43 = vpop.eup %6542  ;;  %5015 = vmatprep.mubr.bf16.mxu0 %v4828_v20  ;;  %v4802_v12 = vmul.f32 %v4770_v53, %v8646_v2 }
 0xf2f   : > { %v4740_v30 = vadd.f32 1.0, %v6543_v43  ;;  %v4771_v22 = vmul.f32 0.5, %v4739_v25 }
 0xf30   : > { %v6545_v10 = vpop.eup %6544 }
 0xf31   : > { %v4772_v6 = vmul.f32 0.5, %v4740_v30  ;;  %5016 = vmatmul.mubr.bf16.gmra.mxu0 %v4827_v15  ;;  %v4803_v28 = vmul.f32 %v4771_v22, %v8653_v24  ;;  %v4741_v13 = vadd.f32 1.0, %v6545_v10 }
 0xf32   : > { %v6547_v3 = vpop.eup %6546 }
 0xf33   : > { %v6549_v32 = vpop.eup %6548  ;;  %v4804_v23 = vmul.f32 %v4772_v6, %v8661_v51  ;;  %v4742_v31 = vadd.f32 1.0, %v6547_v3  ;;  %v4829_v57 = vpack.c.bf16 %v4803_v28, %v4801_v45  ;;  %v4773_v44 = vmul.f32 0.5, %v4741_v13 }
 0xf34   : > { %v4743_v4 = vadd.f32 1.0, %v6549_v32 }
 0xf35   : > { %v4830_v62 = vpack.c.bf16 %v4804_v23, %v4802_v12  ;;  %v4774_v5 = vmul.f32 0.5, %v4742_v31  ;;  %v4805_v19 = vmul.f32 %v4773_v44, %v8668_v39 }
 0xf36   : > { %v6551_v59 = vpop.eup %6550  ;;  %v4775_v56 = vmul.f32 0.5, %v4743_v4 }
 0xf37   : > { %5023 = vmatprep.mubr.bf16.mxu0 %v4830_v62  ;;  %v4744_v42 = vadd.f32 1.0, %v6551_v59  ;;  %v4806_v51 = vmul.f32 %v4774_v5, %v8675_v9 }
 0xf38   : > { %v4807_v2 = vmul.f32 %v4775_v56, %v8678_v8 }
 0xf39   : > { %5024 = vmatmul.mubr.bf16.gmra.mxu0 %v4829_v57  ;;  %v4776_v0 = vmul.f32 0.5, %v4744_v42 }
 0xf3a   : > { %v4831_v37 = vpack.c.bf16 %v4807_v2, %v4805_v19 }
 0xf3b   : > { %v4808_v24 = vmul.f32 %v4776_v0, %v8690_v18 }
 0xf3d   : > { %v4832_v38 = vpack.c.bf16 %v4808_v24, %v4806_v51 }
 0xf3f   : > { %5031 = vmatprep.mubr.bf16.mxu0 %v4832_v38 }
 0xf41   : > { %5032 = vmatmul.mubr.bf16.gmra.mxu0 %v4831_v37 }
 0xf48   : > { %v4498_v48 = vpop.f32.mrf.mxu1 }
 0xf49   : > { %v8716_v60 = vadd.f32 %v4498_v48, %v8582_v46 }
 0xf4a   : > { %v4500_v63 = vpop.f32.mrf.mxu1 }
 0xf4b   : > { %v4553_v33 = vmul.f32 %v8716_v60, %v8716_v60  ;;  %v8721_v8 = vadd.f32 %v4500_v63, %v8585_v50 }
 0xf4c   : > { %v4502_v9 = vpop.f32.mrf.mxu1 }
 0xf4d   : > { %v4585_v18 = vmul.f32 %v4553_v33, %v8716_v60  ;;  %v4554_v39 = vmul.f32 %v8721_v8, %v8721_v8  ;;  %v8727_v16 = vadd.f32 %v4502_v9, %v8582_v46 }
 0xf4e   : > { %v4504_v47 = vpop.f32.mrf.mxu1 }
 0xf4f   : > { %v4617_v20 = vmul.f32 0.044715, %v4585_v18  ;;  %v4586_v25 = vmul.f32 %v4554_v39, %v8721_v8  ;;  %v4555_v43 = vmul.f32 %v8727_v16, %v8727_v16  ;;  %v8733_v11 = vadd.f32 %v4504_v47, %v8585_v50 }
 0xf50   : > { %v4508_v40 = vpop.f32.mrf.mxu1 }
 0xf51   : > { %v4649_v30 = vadd.f32 %v4617_v20, %v8716_v60  ;;  %v4618_v53 = vmul.f32 0.044715, %v4586_v25  ;;  %v4587_v22 = vmul.f32 %v4555_v43, %v8727_v16  ;;  %v4556_v15 = vmul.f32 %v8733_v11, %v8733_v11 }
 0xf52   : > { %v8740_v10 = vadd.f32 %v4508_v40, %v8582_v46  ;;  %v4510_v6 = vpop.f32.mrf.mxu1 }
 0xf53   : > { %v4681_v3 = vmul.f32 0.7978846, %v4649_v30  ;;  %v4650_v7 = vadd.f32 %v4618_v53, %v8721_v8  ;;  %v4619_v32 = vmul.f32 0.044715, %v4587_v22  ;;  %v4588_v12 = vmul.f32 %v4556_v15, %v8733_v11 }
 0xf54   : > { %v4557_v23 = vmul.f32 %v8740_v10, %v8740_v10  ;;  %v8747_v28 = vadd.f32 %v4510_v6, %v8585_v50  ;;  %v4512_v4 = vpop.f32.mrf.mxu1 }
 0xf55   : > { %6552 = vtanh.f32 %v4681_v3  ;;  %v4682_v31 = vmul.f32 0.7978846, %v4650_v7  ;;  %v4651_v62 = vadd.f32 %v4619_v32, %v8727_v16  ;;  %v4620_v45 = vmul.f32 0.044715, %v4588_v12 }
 0xf56   : > { %v4589_v13 = vmul.f32 %v4557_v23, %v8740_v10  ;;  %v4558_v59 = vmul.f32 %v8747_v28, %v8747_v28  ;;  %v8754_v56 = vadd.f32 %v4512_v4, %v8582_v46  ;;  %v4514_v57 = vpop.f32.mrf.mxu1 }
 0xf57   : > { %v4683_v42 = vmul.f32 0.7978846, %v4651_v62  ;;  %v4652_v5 = vadd.f32 %v4620_v45, %v8733_v11  ;;  %v8758_v44 = vadd.f32 %v4514_v57, %v8585_v50  ;;  %6554 = vtanh.f32 %v4682_v31 }
 0xf58   : > { %v4621_v0 = vmul.f32 0.044715, %v4589_v13  ;;  %v4590_v2 = vmul.f32 %v4558_v59, %v8747_v28  ;;  %v4559_v51 = vmul.f32 %v8754_v56, %v8754_v56  ;;  %v4518_v24 = vpop.f32.mrf.mxu1 }
 0xf59   : > { %6556 = vtanh.f32 %v4683_v42  ;;  %v4684_v19 = vmul.f32 0.7978846, %v4652_v5  ;;  %v4560_v38 = vmul.f32 %v8758_v44, %v8758_v44  ;;  %v8766_v37 = vadd.f32 %v4518_v24, %v8582_v46 }
 0xf5a   : > { %v4653_v48 = vadd.f32 %v4621_v0, %v8740_v10  ;;  %v4622_v63 = vmul.f32 0.044715, %v4590_v2  ;;  %v4591_v33 = vmul.f32 %v4559_v51, %v8754_v56  ;;  %v4520_v9 = vpop.f32.mrf.mxu1 }
 0xf5b   : > { %6558 = vtanh.f32 %v4684_v19  ;;  %v4592_v18 = vmul.f32 %v4560_v38, %v8758_v44  ;;  %v4561_v39 = vmul.f32 %v8766_v37, %v8766_v37  ;;  %v8774_v47 = vadd.f32 %v4520_v9, %v8585_v50 }
 0xf5c   : > { %v4685_v20 = vmul.f32 0.7978846, %v4653_v48  ;;  %v4654_v25 = vadd.f32 %v4622_v63, %v8747_v28  ;;  %v4623_v43 = vmul.f32 0.044715, %v4591_v33  ;;  %v4522_v40 = vpop.f32.mrf.mxu1 }
 0xf5d   : > { %v4624_v30 = vmul.f32 0.044715, %v4592_v18  ;;  %v4593_v53 = vmul.f32 %v4561_v39, %v8766_v37  ;;  %v4562_v22 = vmul.f32 %v8774_v47, %v8774_v47  ;;  %v8781_v15 = vadd.f32 %v4522_v40, %v8582_v46 }
 0xf5e   : > { %6560 = vtanh.f32 %v4685_v20  ;;  %v4686_v6 = vmul.f32 0.7978846, %v4654_v25  ;;  %v4655_v3 = vadd.f32 %v4623_v43, %v8754_v56  ;;  %v4524_v7 = vpop.f32.mrf.mxu1 }
 0xf5f   : > { %v4656_v32 = vadd.f32 %v4624_v30, %v8758_v44  ;;  %v4625_v12 = vmul.f32 0.044715, %v4593_v53  ;;  %v4594_v23 = vmul.f32 %v4562_v22, %v8774_v47  ;;  %v4563_v4 = vmul.f32 %v8781_v15, %v8781_v15 }
 0xf60   : > { %6562 = vtanh.f32 %v4686_v6  ;;  %v4687_v31 = vmul.f32 0.7978846, %v4655_v3  ;;  %v8789_v62 = vadd.f32 %v4524_v7, %v8585_v50  ;;  %v4528_v45 = vpop.f32.mrf.mxu1 }
 0xf61   : > { %v4688_v13 = vmul.f32 0.7978846, %v4656_v32  ;;  %v4657_v59 = vadd.f32 %v4625_v12, %v8766_v37  ;;  %v4626_v57 = vmul.f32 0.044715, %v4594_v23  ;;  %v4595_v42 = vmul.f32 %v4563_v4, %v8781_v15 }
 0xf62   : > { %v6553_v5 = vpop.eup %6552  ;;  %6564 = vtanh.f32 %v4687_v31  ;;  %v4564_v0 = vmul.f32 %v8789_v62, %v8789_v62  ;;  %v8796_v2 = vadd.f32 %v4528_v45, %v8582_v46  ;;  %v4530_v51 = vpop.f32.mrf.mxu1 }
 0xf63   : > { %v4745_v24 = vadd.f32 1.0, %v6553_v5  ;;  %6566 = vtanh.f32 %v4688_v13  ;;  %v4689_v19 = vmul.f32 0.7978846, %v4657_v59  ;;  %v4658_v38 = vadd.f32 %v4626_v57, %v8774_v47 }
 0xf64   : > { %v4627_v48 = vmul.f32 0.044715, %v4595_v42  ;;  %v4596_v63 = vmul.f32 %v4564_v0, %v8789_v62  ;;  %v4565_v33 = vmul.f32 %v8796_v2, %v8796_v2  ;;  %v8803_v9 = vadd.f32 %v4530_v51, %v8585_v50  ;;  %v4532_v18 = vpop.f32.mrf.mxu1  ;;  %v6555_v39 = vpop.eup %6554 }
 0xf65   : > { %6568 = vtanh.f32 %v4689_v19  ;;  %v4690_v20 = vmul.f32 0.7978846, %v4658_v38  ;;  %v8806_v25 = vadd.f32 %v4532_v18, %v8582_v46  ;;  %v4777_v3 = vmul.f32 0.5, %v4745_v24 }
 0xf66   : > { %v6557_v43 = vpop.eup %6556  ;;  %v4659_v40 = vadd.f32 %v4627_v48, %v8781_v15  ;;  %v4628_v30 = vmul.f32 0.044715, %v4596_v63  ;;  %v4597_v53 = vmul.f32 %v4565_v33, %v8796_v2  ;;  %v4566_v22 = vmul.f32 %v8803_v9, %v8803_v9  ;;  %v4534_v6 = vpop.f32.mrf.mxu1 }
 0xf67   : > { %v4747_v7 = vadd.f32 1.0, %v6557_v43  ;;  %6570 = vtanh.f32 %v4690_v20  ;;  %v4567_v32 = vmul.f32 %v8806_v25, %v8806_v25  ;;  %v8818_v59 = vadd.f32 %v4534_v6, %v8585_v50 }
 0xf68   : > { %v6559_v12 = vpop.eup %6558  ;;  %v4691_v23 = vmul.f32 0.7978846, %v4659_v40  ;;  %v4660_v46 = vadd.f32 %v4628_v30, %v8789_v62  ;;  %v4629_v4 = vmul.f32 0.044715, %v4597_v53  ;;  %v4598_v31 = vmul.f32 %v4566_v22, %v8803_v9 }
 0xf69   : > { %v4779_v45 = vmul.f32 0.5, %v4747_v7  ;;  %v4599_v13 = vmul.f32 %v4567_v32, %v8806_v25  ;;  %v4746_v57 = vadd.f32 1.0, %v6555_v39  ;;  %v4568_v19 = vmul.f32 %v8818_v59, %v8818_v59 }
 0xf6a   : > { %6572 = vtanh.f32 %v4691_v23  ;;  %v4692_v42 = vmul.f32 0.7978846, %v4660_v46  ;;  %v4661_v5 = vadd.f32 %v4629_v4, %v8796_v2  ;;  %v4630_v0 = vmul.f32 0.044715, %v4598_v31 }
 0xf6b   : > { %v6561_v51 = vpop.eup %6560  ;;  %v4631_v24 = vmul.f32 0.044715, %v4599_v13  ;;  %v4748_v38 = vadd.f32 1.0, %v6559_v12  ;;  %v4600_v18 = vmul.f32 %v4568_v19, %v8818_v59  ;;  %v4778_v39 = vmul.f32 0.5, %v4746_v57 }
 0xf6c   : > { %6574 = vtanh.f32 %v4692_v42  ;;  %v4693_v48 = vmul.f32 0.7978846, %v4661_v5  ;;  %v4662_v63 = vadd.f32 %v4630_v0, %v8803_v9  ;;  %v4809_v43 = vmul.f32 %v4777_v3, %v8716_v60 }
 0xf6d   : > { %v6563_v33 = vpop.eup %6562  ;;  %v4663_v50 = vadd.f32 %v4631_v24, %v8806_v25  ;;  %v4780_v20 = vmul.f32 0.5, %v4748_v38  ;;  %v4811_v40 = vmul.f32 %v4779_v45, %v8727_v16  ;;  %v4632_v6 = vmul.f32 0.044715, %v4600_v18 }
 0xf6e   : > { %6576 = vtanh.f32 %v4693_v48  ;;  %v4694_v30 = vmul.f32 0.7978846, %v4662_v63  ;;  %v4810_v7 = vmul.f32 %v4778_v39, %v8721_v8  ;;  %v4749_v23 = vadd.f32 1.0, %v6561_v51 }
 0xf6f   : > { %v6565_v53 = vpop.eup %6564  ;;  %v4695_v22 = vmul.f32 0.7978846, %v4663_v50  ;;  %v4812_v32 = vmul.f32 %v4780_v20, %v8733_v11  ;;  %v4750_v4 = vadd.f32 1.0, %v6563_v33  ;;  %v4664_v31 = vadd.f32 %v4632_v6, %v8818_v59 }
 0xf70   : > { %v6567_v12 = vpop.eup %6566  ;;  %v4751_v46 = vadd.f32 1.0, %v6565_v53  ;;  %6578 = vtanh.f32 %v4694_v30  ;;  %v4833_v13 = vpack.c.bf16 %v4811_v40, %v4809_v43  ;;  %v4781_v0 = vmul.f32 0.5, %v4749_v23 }
 0xf71   : > { %6580 = vtanh.f32 %v4695_v22  ;;  %v4834_v60 = vpack.c.bf16 %v4812_v32, %v4810_v7  ;;  %v4752_v3 = vadd.f32 1.0, %v6567_v12  ;;  %v4782_v57 = vmul.f32 0.5, %v4750_v4 }
 0xf72   : > { %v6569_v16 = vpop.eup %6568  ;;  %v4783_v45 = vmul.f32 0.5, %v4751_v46  ;;  %v4696_v42 = vmul.f32 0.7978846, %v4664_v31  ;;  %v4813_v63 = vmul.f32 %v4781_v0, %v8740_v10 }
 0xf73   : > { %5039 = vmatprep.mubr.bf16.mxu0 %v4834_v60  ;;  %v4784_v5 = vmul.f32 0.5, %v4752_v3  ;;  %v4814_v11 = vmul.f32 %v4782_v57, %v8747_v28  ;;  %v4753_v33 = vadd.f32 1.0, %v6569_v16 }
 0xf74   : > { %v6571_v8 = vpop.eup %6570  ;;  %5040 = vmatmul.mubr.bf16.gmra.mxu0 %v4833_v13  ;;  %6582 = vtanh.f32 %v4696_v42  ;;  %v4815_v24 = vmul.f32 %v4783_v45, %v8754_v56 }
 0xf75   : > { %v4816_v51 = vmul.f32 %v4784_v5, %v8758_v44  ;;  %v4754_v19 = vadd.f32 1.0, %v6571_v8  ;;  %v4785_v53 = vmul.f32 0.5, %v4753_v33  ;;  %v4873_v5 = vld [vmem:[%s8957_s18] sm:$0x1] }
 0xf76   : > { %v4835_v20 = vpack.c.bf16 %v4815_v24, %v4813_v63  ;;  %v4874_v8 = vunpack.c.l.bf16 %v4873_v5  ;;  %v8990_v24 = vld [vmem:[#allocation3_spill] sm:$0xff] }
 0xf77   : > { %v6573_v38 = vpop.eup %6572  ;;  %v4836_v48 = vpack.c.bf16 %v4816_v51, %v4814_v11  ;;  %v4786_v40 = vmul.f32 0.5, %v4754_v19  ;;  %v4817_v12 = vmul.f32 %v4785_v53, %v8766_v37 }
 0xf78   : > { %v4755_v50 = vadd.f32 1.0, %v6573_v38  ;;  %v8847_v11 = vrot.slane %v4874_v8, %v6942_v17 }
 0xf79   : > { %v6575_v18 = vpop.eup %6574  ;;  %5047 = vmatprep.mubr.bf16.mxu0 %v4836_v48  ;;  %v4818_v6 = vmul.f32 %v4786_v40, %v8774_v47 }
 0xf7a   : > { %v4787_v39 = vmul.f32 0.5, %v4755_v50  ;;  %v4756_v43 = vadd.f32 1.0, %v6575_v18 }
 0xf7b   : > { %v6577_v30 = vpop.eup %6576 }
 0xf7c   : > { %5048 = vmatmul.mubr.bf16.gmra.mxu0 %v4835_v20  ;;  %v4788_v28 = vmul.f32 0.5, %v4756_v43  ;;  %v4819_v56 = vmul.f32 %v4787_v39, %v8781_v15  ;;  %v4757_v23 = vadd.f32 1.0, %v6577_v30 }
 0xf7d   : > { %v6579_v44 = vpop.eup %6578 }
 0xf7e   : > { %v6581_v22 = vpop.eup %6580  ;;  %v4820_v10 = vmul.f32 %v4788_v28, %v8789_v62  ;;  %v4758_v32 = vadd.f32 1.0, %v6579_v44  ;;  %v4837_v60 = vpack.c.bf16 %v4819_v56, %v4817_v12  ;;  %v4789_v45 = vmul.f32 0.5, %v4757_v23 }
 0xf7f   : > { %v4759_v7 = vadd.f32 1.0, %v6581_v22 }
 0xf80   : > { %v4838_v46 = vpack.c.bf16 %v4820_v10, %v4818_v6  ;;  %v4790_v16 = vmul.f32 0.5, %v4758_v32  ;;  %v4821_v57 = vmul.f32 %v4789_v45, %v8796_v2 }
 0xf81   : > { %v6583_v4 = vpop.eup %6582  ;;  %v4791_v31 = vmul.f32 0.5, %v4759_v7 }
 0xf82   : > { %5055 = vmatprep.mubr.bf16.mxu0 %v4838_v46  ;;  %v4760_v3 = vadd.f32 1.0, %v6583_v4  ;;  %v4822_v47 = vmul.f32 %v4790_v16, %v8803_v9 }
 0xf83   : > { %v4823_v15 = vmul.f32 %v4791_v31, %v8806_v25 }
 0xf84   : > { %5056 = vmatmul.mubr.bf16.gmra.mxu0 %v4837_v60  ;;  %v4792_v13 = vmul.f32 0.5, %v4760_v3 }
 0xf85   : > { %v4839_v42 = vpack.c.bf16 %v4823_v15, %v4821_v57 }
 0xf86   : > { %v4824_v62 = vmul.f32 %v4792_v13, %v8818_v59 }
 0xf88   : > { %v4840_v37 = vpack.c.bf16 %v4824_v62, %v4822_v47 }
 0xf8a   : > { %5063 = vmatprep.mubr.bf16.mxu0 %v4840_v37 }
 0xf8c   : > { %5064 = vmatmul.mubr.bf16.gmra.mxu0 %v4839_v42 }
 0xfe9   : > { %v5658_v0 = vpop.f32.mrf.mxu0 }
 0xfeb   : > { %v5659_v25 = vpop.f32.mrf.mxu0 }
 0xfec   : > { %v5660_v9 = vadd.f32 %v5659_v25, %v5658_v0 }
 0xfed   : > { %v5661_v51 = vpop.f32.mrf.mxu0 }
 0xfee   : > { %v5010_v59 = vadd.f32 %v5660_v9, %v8847_v11 }
 0xfef   : > { %v5662_v2 = vpop.f32.mrf.mxu0 }
 0xff0   : > { %v5076_v19 = vmul.f32 %v8990_v24, %v5010_v59  ;;  %v5663_v38 = vadd.f32 %v5662_v2, %v5661_v51 }
 0xff1   : > { %v5664_v48 = vpop.f32.mrf.mxu0 }
 0xff2   : > { %v5092_v63 = vadd.f32 %v5076_v19, %v8251_v41  ;;  %v5013_v33 = vadd.f32 %v5663_v38, %v8847_v11 }
 0xff3   : > { %v5665_v17 = vpop.f32.mrf.mxu0 }
 0xff4   : > { %v5446_v50 = vpack.c.bf16 %v5092_v63, %v5092_v63  ;;  %v5077_v18 = vmul.f32 %v8990_v24, %v5013_v33  ;;  %v5666_v39 = vadd.f32 %v5665_v17, %v5664_v48 }
 0xff5   : > { %v5667_v20 = vpop.f32.mrf.mxu0 }
 0xff6   : > { %5173 = vst.msk [vmem:[%s8858_s24] sm:$0xf] %vm5172_vm5, %v5446_v50  ;;  %v5093_v41 = vadd.f32 %v5077_v18, %v8258_v26  ;;  %v5018_v43 = vadd.f32 %v5666_v39, %v8847_v11 }
 0xff7   : > { %v5668_v40 = vpop.f32.mrf.mxu0 }
 0xff8   : > { %v5447_v30 = vpack.c.bf16 %v5093_v41, %v5093_v41  ;;  %v5078_v53 = vmul.f32 %v8990_v24, %v5018_v43  ;;  %v5669_v28 = vadd.f32 %v5668_v40, %v5667_v20 }
 0xff9   : > { %v5670_v44 = vpop.f32.mrf.mxu0 }
 0xffa   : > { %5174 = vst.msk [vmem:[%s8858_s24 + $0x4] sm:$0xf] %vm5172_vm5, %v5447_v30  ;;  %v5094_v22 = vadd.f32 %v5078_v53, %v8262_v49  ;;  %v5021_v56 = vadd.f32 %v5669_v28, %v8847_v11 }
 0xffb   : > { %v5671_v6 = vpop.f32.mrf.mxu0 }
 0xffc   : > { %v5448_v10 = vpack.c.bf16 %v5094_v22, %v5094_v22  ;;  %v5079_v7 = vmul.f32 %v8990_v24, %v5021_v56  ;;  %v5672_v26 = vadd.f32 %v5671_v6, %v5670_v44 }
 0xffd   : > { %v5673_v32 = vpop.f32.mrf.mxu0 }
 0xffe   : > { %5175 = vst.msk [vmem:[%s8858_s24 + $0x8] sm:$0xf] %vm5172_vm5, %v5448_v10  ;;  %v5095_v12 = vadd.f32 %v5079_v7, %v8267_v27  ;;  %v5026_v23 = vadd.f32 %v5672_v26, %v8847_v11 }
 0xfff   : > { %v5674_v46 = vpop.f32.mrf.mxu0 }
0x1000   : > { %v5449_v4 = vpack.c.bf16 %v5095_v12, %v5095_v12  ;;  %v5080_v31 = vmul.f32 %v8990_v24, %v5026_v23  ;;  %v5675_v49 = vadd.f32 %v5674_v46, %v5673_v32 }
0x1001   : > { %v5676_v60 = vpop.f32.mrf.mxu0 }
0x1002   : > { %5176 = vst.msk [vmem:[%s8858_s24 + $0xc] sm:$0xf] %vm5172_vm5, %v5449_v4  ;;  %v5096_v3 = vadd.f32 %v5080_v31, %v8274_v34  ;;  %v5029_v16 = vadd.f32 %v5675_v49, %v8847_v11 }
0x1003   : > { %v5677_v45 = vpop.f32.mrf.mxu0 }
0x1004   : > { %v5450_v13 = vpack.c.bf16 %v5096_v3, %v5096_v3  ;;  %v5081_v27 = vmul.f32 %v8990_v24, %v5029_v16  ;;  %v5678_v15 = vadd.f32 %v5677_v45, %v5676_v60 }
0x1005   : > { %v5679_v47 = vpop.f32.mrf.mxu0 }
0x1006   : > { %5177 = vst.msk [vmem:[%s8858_s24 + $0x10] sm:$0xf] %vm5172_vm5, %v5450_v13  ;;  %v5097_v62 = vadd.f32 %v5081_v27, %v8286_v35  ;;  %v5034_v57 = vadd.f32 %v5678_v15, %v8847_v11 }
0x1007   : > { %v5680_v37 = vpop.f32.mrf.mxu0 }
0x1008   : > { %v5451_v42 = vpack.c.bf16 %v5097_v62, %v5097_v62  ;;  %v5082_v34 = vmul.f32 %v8990_v24, %v5034_v57  ;;  %v5681_v5 = vadd.f32 %v5680_v37, %v5679_v47 }
0x100a   : > { %5178 = vst.msk [vmem:[%s8858_s24 + $0x14] sm:$0xf] %vm5172_vm5, %v5451_v42  ;;  %v5098_v8 = vadd.f32 %v5082_v34, %v8279_v54  ;;  %v5037_v0 = vadd.f32 %v5681_v5, %v8847_v11 }
0x100c   : > { %v5452_v25 = vpack.c.bf16 %v5098_v8, %v5098_v8  ;;  %v5083_v9 = vmul.f32 %v8990_v24, %v5037_v0 }
0x100e   : > { %5179 = vst.msk [vmem:[%s8858_s24 + $0x18] sm:$0xf] %vm5172_vm5, %v5452_v25  ;;  %v5099_v35 = vadd.f32 %v5083_v9, %v8289_v52 }
0x1010   : > { %v5453_v51 = vpack.c.bf16 %v5099_v35, %v5099_v35 }
0x1012   : > { %5180 = vst.msk [vmem:[%s8858_s24 + $0x1c] sm:$0xf] %vm5172_vm5, %v5453_v51 }
0x1034   : > { %v5682_v59 = vpop.f32.mrf.mxu0 }
0x1036   : > { %v5683_v2 = vpop.f32.mrf.mxu0 }
0x1037   : > { %v5684_v19 = vadd.f32 %v5683_v2, %v5682_v59 }
0x1038   : > { %v5685_v38 = vpop.f32.mrf.mxu0 }
0x1039   : > { %v5042_v48 = vadd.f32 %v5684_v19, %v8847_v11 }
0x103a   : > { %v5686_v54 = vpop.f32.mrf.mxu0 }
0x103b   : > { %v5084_v63 = vmul.f32 %v8990_v24, %v5042_v48  ;;  %v5687_v33 = vadd.f32 %v5686_v54, %v5685_v38 }
0x103c   : > { %v5688_v17 = vpop.f32.mrf.mxu0 }
0x103d   : > { %v5100_v50 = vadd.f32 %v5084_v63, %v8300_v29  ;;  %v5045_v52 = vadd.f32 %v5687_v33, %v8847_v11 }
0x103e   : > { %v5689_v18 = vpop.f32.mrf.mxu0 }
0x103f   : > { %v5454_v39 = vpack.c.bf16 %v5100_v50, %v5100_v50  ;;  %v5085_v20 = vmul.f32 %v8990_v24, %v5045_v52  ;;  %v5690_v41 = vadd.f32 %v5689_v18, %v5688_v17 }
0x1040   : > { %v5691_v43 = vpop.f32.mrf.mxu0 }
0x1041   : > { %5181 = vst.msk [vmem:[%s8858_s24 + $0x20] sm:$0xf] %vm5172_vm5, %v5454_v39  ;;  %v5101_v40 = vadd.f32 %v5085_v20, %v8310_v55  ;;  %v5050_v30 = vadd.f32 %v5690_v41, %v8847_v11 }
0x1042   : > { %v5692_v53 = vpop.f32.mrf.mxu0 }
0x1043   : > { %v5455_v28 = vpack.c.bf16 %v5101_v40, %v5101_v40  ;;  %v5086_v44 = vmul.f32 %v8990_v24, %v5050_v30  ;;  %v5693_v29 = vadd.f32 %v5692_v53, %v5691_v43 }
0x1044   : > { %v5694_v22 = vpop.f32.mrf.mxu0 }
0x1045   : > { %5182 = vst.msk [vmem:[%s8858_s24 + $0x24] sm:$0xf] %vm5172_vm5, %v5455_v28  ;;  %v5102_v56 = vadd.f32 %v5086_v44, %v8303_v1  ;;  %v5053_v6 = vadd.f32 %v5693_v29, %v8847_v11 }
0x1046   : > { %v5695_v10 = vpop.f32.mrf.mxu0 }
0x1047   : > { %v5456_v7 = vpack.c.bf16 %v5102_v56, %v5102_v56  ;;  %v5087_v26 = vmul.f32 %v8990_v24, %v5053_v6  ;;  %v5696_v55 = vadd.f32 %v5695_v10, %v5694_v22 }
0x1048   : > { %v5697_v32 = vpop.f32.mrf.mxu0 }
0x1049   : > { %5183 = vst.msk [vmem:[%s8858_s24 + $0x28] sm:$0xf] %vm5172_vm5, %v5456_v7  ;;  %v5103_v12 = vadd.f32 %v5087_v26, %v8313_v58  ;;  %v5058_v23 = vadd.f32 %v5696_v55, %v8847_v11 }
0x104a   : > { %v5698_v46 = vpop.f32.mrf.mxu0 }
0x104b   : > { %v5457_v4 = vpack.c.bf16 %v5103_v12, %v5103_v12  ;;  %v5088_v31 = vmul.f32 %v8990_v24, %v5058_v23  ;;  %v5699_v1 = vadd.f32 %v5698_v46, %v5697_v32 }
0x104c   : > { %v5700_v49 = vpop.f32.mrf.mxu0 }
0x104d   : > { %5184 = vst.msk [vmem:[%s8858_s24 + $0x2c] sm:$0xf] %vm5172_vm5, %v5457_v4  ;;  %v5104_v60 = vadd.f32 %v5088_v31, %v8322_v36  ;;  %v5061_v3 = vadd.f32 %v5699_v1, %v8847_v11 }
0x104e   : > { %v5701_v16 = vpop.f32.mrf.mxu0 }
0x104f   : > { %v5458_v45 = vpack.c.bf16 %v5104_v60, %v5104_v60  ;;  %v5089_v58 = vmul.f32 %v8990_v24, %v5061_v3  ;;  %v5702_v13 = vadd.f32 %v5701_v16, %v5700_v49 }
0x1050   : > { %v5703_v27 = vpop.f32.mrf.mxu0 }
0x1051   : > { %5185 = vst.msk [vmem:[%s8858_s24 + $0x30] sm:$0xf] %vm5172_vm5, %v5458_v45  ;;  %v5105_v15 = vadd.f32 %v5089_v58, %v8334_v14  ;;  %v5066_v47 = vadd.f32 %v5702_v13, %v8847_v11 }
0x1052   : > { %v5704_v62 = vpop.f32.mrf.mxu0 }
0x1053   : > { %v5459_v57 = vpack.c.bf16 %v5105_v15, %v5105_v15  ;;  %v5090_v36 = vmul.f32 %v8990_v24, %v5066_v47  ;;  %v5705_v37 = vadd.f32 %v5704_v62, %v5703_v27 }
0x1055   : > { %5186 = vst.msk [vmem:[%s8858_s24 + $0x34] sm:$0xf] %vm5172_vm5, %v5459_v57  ;;  %v5106_v42 = vadd.f32 %v5090_v36, %v8327_v21  ;;  %v5069_v34 = vadd.f32 %v5705_v37, %v8847_v11 }
0x1057   : > { %v5460_v5 = vpack.c.bf16 %v5106_v42, %v5106_v42  ;;  %v5091_v8 = vmul.f32 %v8990_v24, %v5069_v34 }
0x1059   : > { %5187 = vst.msk [vmem:[%s8858_s24 + $0x38] sm:$0xf] %vm5172_vm5, %v5460_v5  ;;  %v5107_v14 = vadd.f32 %v5091_v8, %v8337_v61 }
0x105b   : > { %v5461_v0 = vpack.c.bf16 %v5107_v14, %v5107_v14 }
0x105d   : > { %5188 = vst.msk [vmem:[%s8858_s24 + $0x3c] sm:$0xf] %vm5172_vm5, %v5461_v0 }
0x105e PF: > { %s29_s0 = sadd.s32 1, %s6590_s0  }
0x105f   : > { %p26_p4 = scmp.ge.s32.totalorder %s29_s0, 4  }
0x1061   :  { %28 = sbr.rel (!%p26_p4) target bundleno = 5 (0x5), region = 135 }

</bundles_post_ra>
